<compile_context>
chip_gen: v7x
topology: tpu7x:2x2x1
jax: 0.10.0
libtpu: 0.0.40
codegen_flags: <defaults>
</compile_context>

<pallas_src>
import jax
import jax.numpy as jnp
from jax.experimental import pallas as pl
from jax.experimental.pallas import tpu as pltpu

# ----------------------------- model sizes -----------------------------
IN_FEATURES = 6373
HIDDEN = 500
OUT_FEATURES = 2

# padded sizes for TPU tiling (K of layer 1 stays unpadded at 6373)
HID_PAD = 512          # 4 * 128
OUT_PAD = 128          # lane-dense output
TB_MAX = 512           # max batch-tile rows


def _round_up(x, m):
    return (x + m - 1) // m * m


# ------------------------------ kernel ---------------------------------
def mlp_kernel(x_ref, w1_ref, b1_ref, w2_ref, b2_ref, w3_ref, b3_ref,
               w4_ref, b4_ref, o_ref):
    """One batch tile: all four layers fused. bf16 MXU inputs, f32 math."""
    # layer 1: cast x f32->bf16 in-kernel, (tb, 6373) @ (6373, 512), f32 acc
    x = x_ref[...].astype(jnp.bfloat16)
    h = jnp.dot(x, w1_ref[...],
                preferred_element_type=jnp.float32) + b1_ref[...]
    h = jnp.tanh(h)                                      # dropout1: identity (eval)

    # layer 2
    h = jnp.dot(h.astype(jnp.bfloat16), w2_ref[...],
                preferred_element_type=jnp.float32) + b2_ref[...]
    h = jnp.tanh(h)                                      # dropout2: identity (eval)

    # layer 3
    h = jnp.dot(h.astype(jnp.bfloat16), w3_ref[...],
                preferred_element_type=jnp.float32) + b3_ref[...]
    h = jnp.tanh(h)                                      # dropout3: identity (eval)

    # layer 4 (logits)
    out = jnp.dot(h.astype(jnp.bfloat16), w4_ref[...],
                  preferred_element_type=jnp.float32) + b4_ref[...]
    o_ref[...] = out.astype(o_ref.dtype)


# ----------------------------- wrapper ----------------------------------
def prepare_params(params):
    """Pad + cast parameters ONCE (call outside the per-step forward).

    Weights are stored as [in, out]; weights go to bf16, biases stay f32.
    W1 keeps its true K=6373 (only the output dim is padded)."""
    w1, b1, w2, b2, w3, b3, w4, b4 = params
    bf = jnp.bfloat16
    w1_p = jnp.zeros((IN_FEATURES, HID_PAD), bf).at[:, :HIDDEN].set(w1.astype(bf))
    b1_p = jnp.zeros((1, HID_PAD), jnp.float32).at[0, :HIDDEN].set(b1)
    w2_p = jnp.zeros((HID_PAD, HID_PAD), bf).at[:HIDDEN, :HIDDEN].set(w2.astype(bf))
    b2_p = jnp.zeros((1, HID_PAD), jnp.float32).at[0, :HIDDEN].set(b2)
    w3_p = jnp.zeros((HID_PAD, HID_PAD), bf).at[:HIDDEN, :HIDDEN].set(w3.astype(bf))
    b3_p = jnp.zeros((1, HID_PAD), jnp.float32).at[0, :HIDDEN].set(b3)
    w4_p = jnp.zeros((HID_PAD, OUT_PAD), bf).at[:HIDDEN, :OUT_FEATURES].set(w4.astype(bf))
    b4_p = jnp.zeros((1, OUT_PAD), jnp.float32).at[0, :OUT_FEATURES].set(b4)
    return (w1_p, b1_p, w2_p, b2_p, w3_p, b3_p, w4_p, b4_p)


def _weight_spec(shape):
    """Constant-index block (fetched once): single-buffer to save VMEM."""
    return pl.BlockSpec(shape, lambda i: (0, 0), pipeline_mode=pl.Buffered(1))


@jax.jit
def classifier_forward(x, padded_params):
    """x: [B, 6373] float32 -> [B, 2] float32. padded_params from prepare_params."""
    w1_p, b1_p, w2_p, b2_p, w3_p, b3_p, w4_p, b4_p = padded_params
    B = x.shape[0]

    # Batch-tile selection:
    #   * B <= 128           : one tile (small-batch / latency regime)
    #   * 128 < B <= 2*TB_MAX: exactly two tiles so both v7x TensorCores work
    #   * larger             : TB_MAX-row tiles
    if B <= 128:
        tb = _round_up(max(B, 8), 8)
    elif B <= 2 * TB_MAX:
        tb = _round_up(-(-B // 2), 8)
    else:
        tb = TB_MAX
    n_b = -(-B // tb)          # cdiv; boundary block is read-padded/write-masked

    weight_bytes = 2 * (w1_p.size + w2_p.size + w3_p.size + w4_p.size) \
        + 4 * (b1_p.size + b2_p.size + b3_p.size + b4_p.size)
    cost = pl.CostEstimate(
        flops=2 * B * (IN_FEATURES * HID_PAD + 2 * HID_PAD * HID_PAD
                       + HID_PAD * OUT_PAD),
        transcendentals=3 * B * HID_PAD,
        bytes_accessed=B * IN_FEATURES * 4 + weight_bytes + B * OUT_PAD * 4,
    )

    out_p = pl.pallas_call(
        mlp_kernel,
        out_shape=jax.ShapeDtypeStruct((B, OUT_PAD), jnp.float32),
        grid_spec=pltpu.PrefetchScalarGridSpec(
            num_scalar_prefetch=0,
            grid=(n_b,),
            in_specs=[
                pl.BlockSpec((tb, IN_FEATURES), lambda i: (i, 0)),   # x batch tile (f32)
                _weight_spec((IN_FEATURES, HID_PAD)),                # W1 (fetched once)
                _weight_spec((1, HID_PAD)),                          # b1
                _weight_spec((HID_PAD, HID_PAD)),                    # W2
                _weight_spec((1, HID_PAD)),                          # b2
                _weight_spec((HID_PAD, HID_PAD)),                    # W3
                _weight_spec((1, HID_PAD)),                          # b3
                _weight_spec((HID_PAD, OUT_PAD)),                    # W4
                _weight_spec((1, OUT_PAD)),                          # b4
            ],
            out_specs=pl.BlockSpec((tb, OUT_PAD), lambda i: (i, 0)),
        ),
        compiler_params=pltpu.CompilerParams(
            # batch tiles are independent -> megacore-shardable on v7x
            dimension_semantics=("parallel",),
            # leave headroom under v7x's 64 MiB physical VMEM
            vmem_limit_bytes=48 << 20,
        ),
        cost_estimate=cost,
    )(x, w1_p, b1_p, w2_p, b2_p, w3_p, b3_p, w4_p, b4_p)

    return out_p[:, :OUT_FEATURES]


# ------------------------- parameter init -------------------------------
def init_params(key):
    """Deterministic PyTorch-style init: U(-1/sqrt(fan_in), 1/sqrt(fan_in)).

    Weights are stored as [in, out] (transpose of torch's [out, in])."""
    dims = [(IN_FEATURES, HIDDEN), (HIDDEN, HIDDEN), (HIDDEN, HIDDEN),
            (HIDDEN, OUT_FEATURES)]
    params = []
    for (fan_in, fan_out) in dims:
        key, kw, kb = jax.random.split(key, 3)
        bound = 1.0 / jnp.sqrt(fan_in)
        w = jax.random.uniform(kw, (fan_in, fan_out), jnp.float32, -bound, bound)
        b = jax.random.uniform(kb, (fan_out,), jnp.float32, -bound, bound)
        params.extend([w, b])
    return tuple(params)


def reference_forward(x, params):
    """Pure-JAX reference matching the kernel numerics (bf16 inputs, f32 acc)."""
    w1, b1, w2, b2, w3, b3, w4, b4 = params
    bf = jnp.bfloat16

    def lin(h, w, b):
        return jnp.dot(h.astype(bf), w.astype(bf),
                       preferred_element_type=jnp.float32) + b

    h = jnp.tanh(lin(x, w1, b1))
    h = jnp.tanh(lin(h, w2, b2))
    h = jnp.tanh(lin(h, w3, b3))
    return lin(h, w4, b4)


if __name__ == "__main__":
    key = jax.random.PRNGKey(0)
    kx, kp = jax.random.split(key)

    B = 4  # small batch
    x = jax.random.normal(kx, (B, IN_FEATURES), jnp.float32)
    params = init_params(kp)
    padded_params = prepare_params(params)   # pad + cast once, reuse every call

    out = classifier_forward(x, padded_params)
    out = jax.block_until_ready(out)

    ref = reference_forward(x, params)
    assert out.shape == (B, OUT_FEATURES), out.shape
    assert jnp.allclose(out, ref, atol=2e-3, rtol=2e-3), (
        f"max err {jnp.max(jnp.abs(out - ref))}")

    print("KERNEL_OK")
</pallas_src>

<mosaic_0001>
module attributes {stable_mosaic.version = 11 : i64} {
  func.func @mlp_kernel(%arg0: i32, %arg1: memref<8x6373xf32, #tpu.memory_space<vmem>>, %arg2: memref<6373x512xbf16, #tpu.memory_space<vmem>>, %arg3: memref<1x512xf32, #tpu.memory_space<vmem>>, %arg4: memref<512x512xbf16, #tpu.memory_space<vmem>>, %arg5: memref<1x512xf32, #tpu.memory_space<vmem>>, %arg6: memref<512x512xbf16, #tpu.memory_space<vmem>>, %arg7: memref<1x512xf32, #tpu.memory_space<vmem>>, %arg8: memref<512x128xbf16, #tpu.memory_space<vmem>>, %arg9: memref<1x128xf32, #tpu.memory_space<vmem>>, %arg10: memref<8x128xf32, #tpu.memory_space<vmem>>) attributes {dimension_semantics = [#tpu.dimension_semantics<parallel>], iteration_bounds = array<i64: 1>, scalar_prefetch = 0 : i64, scratch_operands = 0 : i64, tpu.core_type = #tpu.core_type<tc>, window_params = [{transform_indices = @transform_0, window_bounds = array<i64: 8, 6373>}, {pipeline_mode = #tpu.pipeline_mode<synchronous>, transform_indices = @transform_1, window_bounds = array<i64: 6373, 512>}, {pipeline_mode = #tpu.pipeline_mode<synchronous>, transform_indices = @transform_2, window_bounds = array<i64: 1, 512>}, {pipeline_mode = #tpu.pipeline_mode<synchronous>, transform_indices = @transform_3, window_bounds = array<i64: 512, 512>}, {pipeline_mode = #tpu.pipeline_mode<synchronous>, transform_indices = @transform_4, window_bounds = array<i64: 1, 512>}, {pipeline_mode = #tpu.pipeline_mode<synchronous>, transform_indices = @transform_5, window_bounds = array<i64: 512, 512>}, {pipeline_mode = #tpu.pipeline_mode<synchronous>, transform_indices = @transform_6, window_bounds = array<i64: 1, 512>}, {pipeline_mode = #tpu.pipeline_mode<synchronous>, transform_indices = @transform_7, window_bounds = array<i64: 512, 128>}, {pipeline_mode = #tpu.pipeline_mode<synchronous>, transform_indices = @transform_8, window_bounds = array<i64: 1, 128>}, {transform_indices = @transform_9, window_bounds = array<i64: 8, 128>}]} {
    %c0 = arith.constant 0 : index
    %c0_0 = arith.constant 0 : index
    %0 = vector.load %arg1[%c0, %c0_0] : memref<8x6373xf32, #tpu.memory_space<vmem>>, vector<8x6373xf32>
    %1 = arith.truncf %0 : vector<8x6373xf32> to vector<8x6373xbf16>
    %c0_1 = arith.constant 0 : index
    %c0_2 = arith.constant 0 : index
    %2 = vector.load %arg2[%c0_1, %c0_2] : memref<6373x512xbf16, #tpu.memory_space<vmem>>, vector<6373x512xbf16>
    %cst = arith.constant dense<0.000000e+00> : vector<8x512xf32>
    %3 = tpu.matmul %1, %2, %cst {dimension_numbers = #tpu.dot_dimension_numbers<[1], [0], [0], [1], [0, 0, 1, 1], [], []>} : vector<8x6373xbf16>, vector<6373x512xbf16>, vector<8x512xf32> -> vector<8x512xf32>
    %c0_3 = arith.constant 0 : index
    %c0_4 = arith.constant 0 : index
    %4 = vector.load %arg3[%c0_3, %c0_4] : memref<1x512xf32, #tpu.memory_space<vmem>>, vector<1x512xf32>
    %5 = vector.broadcast %4 : vector<1x512xf32> to vector<8x512xf32>
    %6 = arith.addf %3, %5 : vector<8x512xf32>
    %7 = math.tanh %6 : vector<8x512xf32>
    %8 = arith.truncf %7 : vector<8x512xf32> to vector<8x512xbf16>
    %c0_5 = arith.constant 0 : index
    %c0_6 = arith.constant 0 : index
    %9 = vector.load %arg4[%c0_5, %c0_6] : memref<512x512xbf16, #tpu.memory_space<vmem>>, vector<512x512xbf16>
    %cst_7 = arith.constant dense<0.000000e+00> : vector<8x512xf32>
    %10 = tpu.matmul %8, %9, %cst_7 {dimension_numbers = #tpu.dot_dimension_numbers<[1], [0], [0], [1], [0, 0, 1, 1], [], []>} : vector<8x512xbf16>, vector<512x512xbf16>, vector<8x512xf32> -> vector<8x512xf32>
    %c0_8 = arith.constant 0 : index
    %c0_9 = arith.constant 0 : index
    %11 = vector.load %arg5[%c0_8, %c0_9] : memref<1x512xf32, #tpu.memory_space<vmem>>, vector<1x512xf32>
    %12 = vector.broadcast %11 : vector<1x512xf32> to vector<8x512xf32>
    %13 = arith.addf %10, %12 : vector<8x512xf32>
    %14 = math.tanh %13 : vector<8x512xf32>
    %15 = arith.truncf %14 : vector<8x512xf32> to vector<8x512xbf16>
    %c0_10 = arith.constant 0 : index
    %c0_11 = arith.constant 0 : index
    %16 = vector.load %arg6[%c0_10, %c0_11] : memref<512x512xbf16, #tpu.memory_space<vmem>>, vector<512x512xbf16>
    %cst_12 = arith.constant dense<0.000000e+00> : vector<8x512xf32>
    %17 = tpu.matmul %15, %16, %cst_12 {dimension_numbers = #tpu.dot_dimension_numbers<[1], [0], [0], [1], [0, 0, 1, 1], [], []>} : vector<8x512xbf16>, vector<512x512xbf16>, vector<8x512xf32> -> vector<8x512xf32>
    %c0_13 = arith.constant 0 : index
    %c0_14 = arith.constant 0 : index
    %18 = vector.load %arg7[%c0_13, %c0_14] : memref<1x512xf32, #tpu.memory_space<vmem>>, vector<1x512xf32>
    %19 = vector.broadcast %18 : vector<1x512xf32> to vector<8x512xf32>
    %20 = arith.addf %17, %19 : vector<8x512xf32>
    %21 = math.tanh %20 : vector<8x512xf32>
    %22 = arith.truncf %21 : vector<8x512xf32> to vector<8x512xbf16>
    %c0_15 = arith.constant 0 : index
    %c0_16 = arith.constant 0 : index
    %23 = vector.load %arg8[%c0_15, %c0_16] : memref<512x128xbf16, #tpu.memory_space<vmem>>, vector<512x128xbf16>
    %cst_17 = arith.constant dense<0.000000e+00> : vector<8x128xf32>
    %24 = tpu.matmul %22, %23, %cst_17 {dimension_numbers = #tpu.dot_dimension_numbers<[1], [0], [0], [1], [0, 0, 1, 1], [], []>} : vector<8x512xbf16>, vector<512x128xbf16>, vector<8x128xf32> -> vector<8x128xf32>
    %c0_18 = arith.constant 0 : index
    %c0_19 = arith.constant 0 : index
    %25 = vector.load %arg9[%c0_18, %c0_19] : memref<1x128xf32, #tpu.memory_space<vmem>>, vector<1x128xf32>
    %26 = vector.broadcast %25 : vector<1x128xf32> to vector<8x128xf32>
    %27 = arith.addf %24, %26 : vector<8x128xf32>
    %c0_20 = arith.constant 0 : index
    %c0_21 = arith.constant 0 : index
    %28 = vector.load %arg10[%c0_20, %c0_21] : memref<8x128xf32, #tpu.memory_space<vmem>>, vector<8x128xf32>
    tpu.vector_store %arg10[%c0_20, %c0_21], %27 {strides = array<i32>} : memref<8x128xf32, #tpu.memory_space<vmem>>, vector<8x128xf32>,
    return
  }
  func.func @transform_0(%arg0: i32) -> (i32, i32) {
    %c0_i32 = arith.constant 0 : i32
    %c0_i32_0 = arith.constant 0 : i32
    return %arg0, %c0_i32 : i32, i32
  }
  func.func @transform_1(%arg0: i32) -> (i32, i32) {
    %c0_i32 = arith.constant 0 : i32
    %c0_i32_0 = arith.constant 0 : i32
    %c0_i32_1 = arith.constant 0 : i32
    return %c0_i32, %c0_i32_0 : i32, i32
  }
  func.func @transform_2(%arg0: i32) -> (i32, i32) {
    %c0_i32 = arith.constant 0 : i32
    %c0_i32_0 = arith.constant 0 : i32
    %c0_i32_1 = arith.constant 0 : i32
    return %c0_i32, %c0_i32_0 : i32, i32
  }
  func.func @transform_3(%arg0: i32) -> (i32, i32) {
    %c0_i32 = arith.constant 0 : i32
    %c0_i32_0 = arith.constant 0 : i32
    %c0_i32_1 = arith.constant 0 : i32
    return %c0_i32, %c0_i32_0 : i32, i32
  }
  func.func @transform_4(%arg0: i32) -> (i32, i32) {
    %c0_i32 = arith.constant 0 : i32
    %c0_i32_0 = arith.constant 0 : i32
    %c0_i32_1 = arith.constant 0 : i32
    return %c0_i32, %c0_i32_0 : i32, i32
  }
  func.func @transform_5(%arg0: i32) -> (i32, i32) {
    %c0_i32 = arith.constant 0 : i32
    %c0_i32_0 = arith.constant 0 : i32
    %c0_i32_1 = arith.constant 0 : i32
    return %c0_i32, %c0_i32_0 : i32, i32
  }
  func.func @transform_6(%arg0: i32) -> (i32, i32) {
    %c0_i32 = arith.constant 0 : i32
    %c0_i32_0 = arith.constant 0 : i32
    %c0_i32_1 = arith.constant 0 : i32
    return %c0_i32, %c0_i32_0 : i32, i32
  }
  func.func @transform_7(%arg0: i32) -> (i32, i32) {
    %c0_i32 = arith.constant 0 : i32
    %c0_i32_0 = arith.constant 0 : i32
    %c0_i32_1 = arith.constant 0 : i32
    return %c0_i32, %c0_i32_0 : i32, i32
  }
  func.func @transform_8(%arg0: i32) -> (i32, i32) {
    %c0_i32 = arith.constant 0 : i32
    %c0_i32_0 = arith.constant 0 : i32
    %c0_i32_1 = arith.constant 0 : i32
    return %c0_i32, %c0_i32_0 : i32, i32
  }
  func.func @transform_9(%arg0: i32) -> (i32, i32) {
    %c0_i32 = arith.constant 0 : i32
    %c0_i32_0 = arith.constant 0 : i32
    return %arg0, %c0_i32 : i32, i32
  }
}

</mosaic_0001>

<bundles_post_ra>
// kernel: classifier_forward.1
= control target key start
LH: loop header
LB: loop body
LE: loop exit
PB: predicated region body
PF: predicated region fallthrough
CT: control target
= control target key end

     0   :  { %14 = vsyncpa [#allocation3], 0  ;;  %s19885_s0 = inlined_call_operand.hbm [shape: f32[4,6373], index: 0, kind: input, shape index: {}]   ;;  %s19886_s1 = inlined_call_operand.hbm [shape: bf16[6373,512], index: 1, kind: input, shape index: {}]   ;;  %s19887_s2 = inlined_call_operand.hbm [shape: f32[1,512], index: 2, kind: input, shape index: {}]   ;;  %s19888_s3 = inlined_call_operand.hbm [shape: bf16[512,512], index: 3, kind: input, shape index: {}]   ;;  %s19889_s4 = inlined_call_operand.hbm [shape: f32[1,512], index: 4, kind: input, shape index: {}]   ;;  %s19890_s5 = inlined_call_operand.hbm [shape: bf16[512,512], index: 5, kind: input, shape index: {}]   ;;  %s19891_s6 = inlined_call_operand.hbm [shape: f32[1,512], index: 6, kind: input, shape index: {}]   ;;  %s19892_s7 = inlined_call_operand.hbm [shape: bf16[512,128], index: 7, kind: input, shape index: {}]   ;;  %s19893_s8 = inlined_call_operand.hbm [shape: f32[1,128], index: 8, kind: input, shape index: {}]   ;;  %s19894_s9 = inlined_call_operand.vmem [shape: f32[4,128], index: 9, kind: output, shape index: {}]  }
   0x1   :  { %15 = vsyncpa [#allocation5], 0 }
   0x2   :  { %16 = vsyncpa [#allocation8], 0 }
   0x3   :  { %17 = vsyncpa [#allocation11], 0 }
   0x4   :  { %18 = vsyncpa [#allocation14], 0 }
   0x5   :  { %23 = vsyncadd [#allocation3], 3200  ;;  %s19655_s30 = smov [#allocation4]   ;;  %s19447_s13 = scalar_lea.hbm %s19886_s1, 204032 }
   0x6   :  { %s36_s10 = sshll.u32 %s19655_s30, 4  ;;  %p19448_p0 = scmp.ne.s32.totalorder %s19886_s1, %s19447_s13  ;;  %s37_s10 = int_to_ptr.vmem [resolvable:$true] %s36_s10 }
   0x7   :  { %p19451_p1 = scmp.lt.u32.totalorder %s19447_s13, %s19886_s1 }
   0x9   :  { %p19453_p2 = pnand %p19451_p1, %p19448_p0 }
   0xb   :  { %19456 = shalt.err (!%p19453_p2)
}
   0xc   :  { %s19457_s18 = scalar_lea.vmem %s37_s10, 204032  ;;  %p19462_p4 = scmp.lt.s32.totalorder %s37_s10, %s37_s10 }
   0xd   :  { %p19458_p3 = scmp.ne.s32.totalorder %s37_s10, %s19457_s18  ;;  %p19463_p5 = scmp.lt.s32.totalorder %s19457_s18, %s19457_s18 }
   0xf   :  { %p19464_p6 = por %p19463_p5, %p19462_p4 }
  0x11   :  { %p19465_p7 = pnand %p19464_p6, %p19458_p3 }
  0x13   :  { %19468 = shalt.err (!%p19465_p7)
}
  0x14   :  { %s19656_s19 = smov 256   ;;  %s19657_s20 = smov 16  }
  0x15   :  { %42 = dma.hbm_to_vmem [thread:$0]  %s19886_s1, 204032, %s37_s10, [#allocation5], %s19656_s19, %s19656_s19, %s19657_s20  }
  0x16   :  { %s19658_s23 = smov [#allocation7]   ;;  %s19659_s25 = smov [#allocation10]  }
  0x17   :  { %s58_s24 = sshll.u32 %s19658_s23, 4  ;;  %s80_s26 = sshll.u32 %s19659_s25, 4  ;;  %s59_s24 = int_to_ptr.vmem [resolvable:$true] %s58_s24  ;;  %s81_s26 = int_to_ptr.vmem [resolvable:$true] %s80_s26 }
  0x18   :  { %s19469_s29 = scalar_lea.hbm %s19888_s3, 16384 }
  0x19   :  { %p19470_p8 = scmp.ne.s32.totalorder %s19888_s3, %s19469_s29  ;;  %p19473_p9 = scmp.lt.u32.totalorder %s19469_s29, %s19888_s3 }
  0x1b   :  { %p19475_p10 = pnand %p19473_p9, %p19470_p8 }
  0x1d   :  { %19478 = shalt.err (!%p19475_p10)
}
  0x1e   :  { %s19479_s1 = scalar_lea.vmem %s59_s24, 16384  ;;  %p19484_p12 = scmp.lt.s32.totalorder %s59_s24, %s59_s24 }
  0x1f   :  { %p19480_p11 = scmp.ne.s32.totalorder %s59_s24, %s19479_s1  ;;  %p19485_p13 = scmp.lt.s32.totalorder %s19479_s1, %s19479_s1 }
  0x21   :  { %p19486_p0 = por %p19485_p13, %p19484_p12 }
  0x23   :  { %p19487_p1 = pnand %p19486_p0, %p19480_p11 }
  0x25   :  { %19490 = shalt.err (!%p19487_p1)
}
  0x26   :  { %64 = dma.hbm_to_vmem [thread:$0]  %s19888_s3, 16384, %s59_s24, [#allocation8], %s19656_s19, %s19656_s19, %s19657_s20  }
  0x27   :  { %s19491_s17 = scalar_lea.hbm %s19890_s5, 16384 }
  0x28   :  { %p19492_p2 = scmp.ne.s32.totalorder %s19890_s5, %s19491_s17  ;;  %p19495_p3 = scmp.lt.u32.totalorder %s19491_s17, %s19890_s5 }
  0x2a   :  { %p19497_p4 = pnand %p19495_p3, %p19492_p2 }
  0x2c   :  { %19500 = shalt.err (!%p19497_p4)
}
  0x2d   :  { %s19501_s25 = scalar_lea.vmem %s81_s26, 16384  ;;  %p19506_p6 = scmp.lt.s32.totalorder %s81_s26, %s81_s26 }
  0x2e   :  { %p19502_p5 = scmp.ne.s32.totalorder %s81_s26, %s19501_s25  ;;  %p19507_p7 = scmp.lt.s32.totalorder %s19501_s25, %s19501_s25 }
  0x30   :  { %p19508_p8 = por %p19507_p7, %p19506_p6 }
  0x32   :  { %p19509_p9 = pnand %p19508_p8, %p19502_p5 }
  0x34   :  { %19512 = shalt.err (!%p19509_p9)
}
  0x35   :  { %86 = dma.hbm_to_vmem [thread:$0]  %s19890_s5, 16384, %s81_s26, [#allocation11], %s19656_s19, %s19656_s19, %s19657_s20  }
  0x36   :  { %s19660_s27 = smov [#allocation13]   ;;  %s19513_s11 = scalar_lea.hbm %s19892_s7, 4096 }
  0x37   :  { %s102_s28 = sshll.u32 %s19660_s27, 4  ;;  %p19514_p10 = scmp.ne.s32.totalorder %s19892_s7, %s19513_s11  ;;  %s103_s28 = int_to_ptr.vmem [resolvable:$true] %s102_s28 }
  0x38   :  { %p19517_p11 = scmp.lt.u32.totalorder %s19513_s11, %s19892_s7 }
  0x3a   :  { %p19519_p12 = pnand %p19517_p11, %p19514_p10 }
  0x3c   :  { %19522 = shalt.err (!%p19519_p12)
}
  0x3d   :  { %s19523_s14 = scalar_lea.vmem %s103_s28, 4096  ;;  %p19528_p0 = scmp.lt.s32.totalorder %s103_s28, %s103_s28 }
  0x3e   :  { %p19524_p13 = scmp.ne.s32.totalorder %s103_s28, %s19523_s14  ;;  %p19529_p1 = scmp.lt.s32.totalorder %s19523_s14, %s19523_s14 }
  0x40   :  { %p19530_p2 = por %p19529_p1, %p19528_p0 }
  0x42   :  { %p19531_p3 = pnand %p19530_p2, %p19524_p13 }
  0x44   :  { %19534 = shalt.err (!%p19531_p3)
}
  0x45   :  { %s19661_s5 = smov 64   ;;  %s19662_s19 = smov 4  }
  0x46   :  { %108 = dma.hbm_to_vmem [thread:$0]  %s19892_s7, 4096, %s103_s28, [#allocation14], %s19661_s5, %s19661_s5, %s19662_s19  }
  0x47   :  { %s19663_s15 = smov [#allocation2]   ;;  %s19535_s21 = scalar_lea.hbm %s19885_s0, 3200 }
  0x48   :  { %s24_s16 = sshll.u32 %s19663_s15, 4  ;;  %p19536_p4 = scmp.ne.s32.totalorder %s19885_s0, %s19535_s21  ;;  %s25_s16 = int_to_ptr.vmem [resolvable:$true] %s24_s16 }
  0x49   :  { %p19539_p5 = scmp.lt.u32.totalorder %s19535_s21, %s19885_s0 }
  0x4b   :  { %p19541_p6 = pnand %p19539_p5, %p19536_p4 }
  0x4d   :  { %19544 = shalt.err (!%p19541_p6)
}
  0x4e   :  { %s19545_s24 = scalar_lea.vmem %s25_s16, 3200  ;;  %s19549_s7 = scalar_lea.vmem %s25_s16, 6400 }
  0x4f   :  { %p19546_p7 = scmp.ne.s32.totalorder %s25_s16, %s19545_s24  ;;  %p19550_p8 = scmp.lt.s32.totalorder %s25_s16, %s25_s16 }
  0x50   :  { %p19551_p9 = scmp.lt.s32.totalorder %s19549_s7, %s19545_s24 }
  0x52   :  { %p19552_p10 = por %p19551_p9, %p19550_p8 }
  0x54   :  { %p19553_p11 = pnand %p19552_p10, %p19546_p7 }
  0x56   :  { %19556 = shalt.err (!%p19553_p11)
}
  0x57   :  { %s19664_s27 = smov 3200   ;;  %s19665_s28 = smov 200  }
  0x58   :  { %30 = dma.hbm_to_vmem [thread:$0]  %s19885_s0, 3200, %s25_s16, [#allocation3], %s19664_s27, %s19664_s27, %s19665_s28  }
  0x59   :  { %s19666_s11 = smov [#allocation6]   ;;  %s19667_s13 = smov [#allocation9]  }
  0x5a   :  { %s49_s12 = sshll.u32 %s19666_s11, 4  ;;  %s71_s1 = sshll.u32 %s19667_s13, 4  ;;  %s50_s12 = int_to_ptr.vmem [resolvable:$true] %s49_s12  ;;  %s72_s1 = int_to_ptr.vmem [resolvable:$true] %s71_s1 }
  0x5b   :  { %s19557_s5 = scalar_lea.hbm %s19887_s2, 64 }
  0x5c   :  { %p19558_p12 = scmp.ne.s32.totalorder %s19887_s2, %s19557_s5  ;;  %p19561_p13 = scmp.lt.u32.totalorder %s19557_s5, %s19887_s2 }
  0x5e   :  { %p19563_p0 = pnand %p19561_p13, %p19558_p12 }
  0x60   :  { %19566 = shalt.err (!%p19563_p0)
}
  0x61   :  { %s19567_s0 = scalar_lea.vmem %s50_s12, 64  ;;  %p19572_p2 = scmp.lt.s32.totalorder %s50_s12, %s50_s12 }
  0x62   :  { %p19568_p1 = scmp.ne.s32.totalorder %s50_s12, %s19567_s0  ;;  %p19573_p3 = scmp.lt.s32.totalorder %s19567_s0, %s19567_s0 }
  0x64   :  { %p19574_p4 = por %p19573_p3, %p19572_p2 }
  0x66   :  { %p19575_p5 = pnand %p19574_p4, %p19568_p1 }
  0x68   :  { %19578 = shalt.err (!%p19575_p5)
}
  0x69   :  { %52 = dma.hbm_to_vmem [thread:$0]  %s19887_s2, 64, %s50_s12, [#allocation5]  }
  0x6a   :  { %s19579_s22 = scalar_lea.hbm %s19889_s4, 64 }
  0x6b   :  { %p19580_p6 = scmp.ne.s32.totalorder %s19889_s4, %s19579_s22  ;;  %p19583_p7 = scmp.lt.u32.totalorder %s19579_s22, %s19889_s4 }
  0x6d   :  { %p19585_p8 = pnand %p19583_p7, %p19580_p6 }
  0x6f   :  { %19588 = shalt.err (!%p19585_p8)
}
  0x70   :  { %s19589_s7 = scalar_lea.vmem %s72_s1, 64  ;;  %p19594_p10 = scmp.lt.s32.totalorder %s72_s1, %s72_s1 }
  0x71   :  { %p19590_p9 = scmp.ne.s32.totalorder %s72_s1, %s19589_s7  ;;  %p19595_p11 = scmp.lt.s32.totalorder %s19589_s7, %s19589_s7 }
  0x73   :  { %p19596_p12 = por %p19595_p11, %p19594_p10 }
  0x75   :  { %p19597_p13 = pnand %p19596_p12, %p19590_p9 }
  0x77   :  { %19600 = shalt.err (!%p19597_p13)
}
  0x78   :  { %74 = dma.hbm_to_vmem [thread:$0]  %s19889_s4, 64, %s72_s1, [#allocation8]  }
  0x79   :  { %s19668_s28 = smov [#allocation12]   ;;  %s19669_s30 = smov [#allocation15]  }
  0x7a   :  { %s93_s29 = sshll.u32 %s19668_s28, 4  ;;  %s115_s11 = sshll.u32 %s19669_s30, 4  ;;  %s94_s29 = int_to_ptr.vmem [resolvable:$true] %s93_s29  ;;  %s116_s11 = int_to_ptr.vmem [resolvable:$true] %s115_s11 }
  0x7b   :  { %s19601_s10 = scalar_lea.hbm %s19891_s6, 64 }
  0x7c   :  { %p19602_p0 = scmp.ne.s32.totalorder %s19891_s6, %s19601_s10  ;;  %p19605_p1 = scmp.lt.u32.totalorder %s19601_s10, %s19891_s6 }
  0x7e   :  { %p19607_p2 = pnand %p19605_p1, %p19602_p0 }
  0x80   :  { %19610 = shalt.err (!%p19607_p2)
}
  0x81   :  { %s19611_s4 = scalar_lea.vmem %s94_s29, 64  ;;  %p19616_p4 = scmp.lt.s32.totalorder %s94_s29, %s94_s29 }
  0x82   :  { %p19612_p3 = scmp.ne.s32.totalorder %s94_s29, %s19611_s4  ;;  %p19617_p5 = scmp.lt.s32.totalorder %s19611_s4, %s19611_s4 }
  0x84   :  { %p19618_p6 = por %p19617_p5, %p19616_p4 }
  0x86   :  { %p19619_p7 = pnand %p19618_p6, %p19612_p3 }
  0x88   :  { %19622 = shalt.err (!%p19619_p7)
}
  0x89   :  { %96 = dma.hbm_to_vmem [thread:$0]  %s19891_s6, 64, %s94_s29, [#allocation11]  }
  0x8a   :  { %s19623_s16 = scalar_lea.hbm %s19893_s8, 16 }
  0x8b   :  { %p19624_p8 = scmp.ne.s32.totalorder %s19893_s8, %s19623_s16  ;;  %p19627_p9 = scmp.lt.u32.totalorder %s19623_s16, %s19893_s8 }
  0x8d   :  { %p19629_p10 = pnand %p19627_p9, %p19624_p8 }
  0x8f   :  { %19632 = shalt.err (!%p19629_p10)
}
  0x90   :  { %s19633_s23 = scalar_lea.vmem %s116_s11, 16  ;;  %s19637_s25 = scalar_lea.vmem %s116_s11, 32 }
  0x91   :  { %p19634_p11 = scmp.ne.s32.totalorder %s116_s11, %s19633_s23  ;;  %p19638_p12 = scmp.lt.s32.totalorder %s116_s11, %s116_s11 }
  0x92   :  { %p19639_p13 = scmp.lt.s32.totalorder %s19637_s25, %s19633_s23 }
  0x94   :  { %p19640_p0 = por %p19639_p13, %p19638_p12 }
  0x96   :  { %p19641_p1 = pnand %p19640_p0, %p19634_p11 }
  0x98   :  { %19644 = shalt.err (!%p19641_p1)
}
  0x99   :  { %118 = dma.hbm_to_vmem [thread:$0]  %s19893_s8, 16, %s116_s11, [#allocation14]  }
  0x9a   :  { %19645 = dma.done.wait [#allocation3], 6400  }
  0x9b   :  { %19646 = vsyncadd [#allocation3], 4294960896 }
  0x9c   :  { %19647 = dma.done.wait [#allocation5], 204096  }
  0x9d   :  { %19648 = vsyncadd [#allocation5], 4294763200 }
  0x9e   :  { %19649 = dma.done.wait [#allocation8], 16448  }
  0x9f   :  { %19650 = vsyncadd [#allocation8], 4294950848 }
  0xa0   :  { %19651 = dma.done.wait [#allocation11], 16448  }
  0xa1   :  { %19652 = vsyncadd [#allocation11], 4294950848 }
  0xa2   :  { %19653 = dma.done.wait [#allocation14], 4112  }
  0xa3   :  { %19654 = vsyncadd [#allocation14], 4294963184  ;;  %v16540_v0 = vld [vmem:[#allocation4 + $0x4] ss:$16 sps:$4 sm:$0xff]   ;;  %v16542_v1 = vld [vmem:[#allocation4 + $0xc] ss:$16 sps:$4 sm:$0xff]  }
  0xa4   :  { %10003 = vmatprep.subr.bf16.mxu0 %v16540_v0  ;;  %v16544_v2 = vld [vmem:[#allocation4] ss:$16 sps:$4 sm:$0xff]   ;;  %v16545_v3 = vld [vmem:[#allocation4 + $0x8] ss:$16 sps:$4 sm:$0xff]   ;;  %11028 = vmatprep.subr.bf16.mxu1 %v16542_v1  ;;  %v16546_v4 = vld [vmem:[#allocation4 + $0x24] ss:$16 sps:$4 sm:$0xff]  }
  0xa5   :  { %10004 = vmatpush1.bf16.msra.mxu0 %v16544_v2  ;;  %11029 = vmatpush1.bf16.msra.mxu1 %v16545_v3  ;;  %v16548_v5 = vld [vmem:[#allocation4 + $0x2c] ss:$16 sps:$4 sm:$0xff]   ;;  %v16550_v6 = vld [vmem:[#allocation4 + $0x20] ss:$16 sps:$4 sm:$0xff]   ;;  %v16551_v7 = vld [vmem:[#allocation4 + $0x28] ss:$16 sps:$4 sm:$0xff]  }
  0xa6   :  { %10005 = vmatprep.subr.bf16.mxu0 %v16546_v4  ;;  %11030 = vmatprep.subr.bf16.mxu1 %v16548_v5  ;;  %v16552_v8 = vld [vmem:[#allocation4 + $0x44] ss:$16 sps:$4 sm:$0xff]   ;;  %v16554_v9 = vld [vmem:[#allocation4 + $0x4c] ss:$16 sps:$4 sm:$0xff]   ;;  %v16556_v10 = vld [vmem:[#allocation4 + $0x40] ss:$16 sps:$4 sm:$0xff]  }
  0xa7   :  { %v16557_v11 = vld [vmem:[#allocation4 + $0x48] ss:$16 sps:$4 sm:$0xff]   ;;  %v16558_v12 = vld [vmem:[#allocation4 + $0x64] ss:$16 sps:$4 sm:$0xff]   ;;  %v16560_v13 = vld [vmem:[#allocation4 + $0x6c] ss:$16 sps:$4 sm:$0xff]  }
  0xa8   :  { %v16562_v14 = vld [vmem:[#allocation4 + $0x60] ss:$16 sps:$4 sm:$0xff]   ;;  %v16563_v15 = vld [vmem:[#allocation4 + $0x68] ss:$16 sps:$4 sm:$0xff]   ;;  %v16564_v16 = vld [vmem:[#allocation4 + $0x84] ss:$16 sps:$4 sm:$0xff]  }
  0xa9   :  { %10006 = vmatpush1.bf16.msra.mxu0 %v16550_v6  ;;  %11031 = vmatpush1.bf16.msra.mxu1 %v16551_v7  ;;  %v16566_v17 = vld [vmem:[#allocation4 + $0x8c] ss:$16 sps:$4 sm:$0xff]   ;;  %v16568_v18 = vld [vmem:[#allocation4 + $0x80] ss:$16 sps:$4 sm:$0xff]   ;;  %v16569_v19 = vld [vmem:[#allocation4 + $0x88] ss:$16 sps:$4 sm:$0xff]  }
  0xaa   :  { %10007 = vmatprep.subr.bf16.mxu0 %v16552_v8  ;;  %11032 = vmatprep.subr.bf16.mxu1 %v16554_v9  ;;  %v16570_v20 = vld [vmem:[#allocation4 + $0xa4] ss:$16 sps:$4 sm:$0xff]   ;;  %v16572_v21 = vld [vmem:[#allocation4 + $0xac] ss:$16 sps:$4 sm:$0xff]   ;;  %v16574_v22 = vld [vmem:[#allocation4 + $0xa0] ss:$16 sps:$4 sm:$0xff]  }
  0xab   :  { %v16575_v23 = vld [vmem:[#allocation4 + $0xa8] ss:$16 sps:$4 sm:$0xff]   ;;  %v16576_v24 = vld [vmem:[#allocation4 + $0xc4] ss:$16 sps:$4 sm:$0xff]   ;;  %v16578_v25 = vld [vmem:[#allocation4 + $0xcc] ss:$16 sps:$4 sm:$0xff]  }
  0xac   :  { %v16580_v26 = vld [vmem:[#allocation4 + $0xc0] ss:$16 sps:$4 sm:$0xff]   ;;  %v16581_v27 = vld [vmem:[#allocation4 + $0xc8] ss:$16 sps:$4 sm:$0xff]   ;;  %v16582_v28 = vld [vmem:[#allocation4 + $0xe4] ss:$16 sps:$4 sm:$0xff]  }
  0xad   :  { %10008 = vmatpush1.bf16.msra.mxu0 %v16556_v10  ;;  %11033 = vmatpush1.bf16.msra.mxu1 %v16557_v11  ;;  %v16584_v29 = vld [vmem:[#allocation4 + $0xec] ss:$16 sps:$4 sm:$0xff]   ;;  %v16586_v30 = vld [vmem:[#allocation4 + $0xe0] ss:$16 sps:$4 sm:$0xff]   ;;  %v16587_v31 = vld [vmem:[#allocation4 + $0xe8] ss:$16 sps:$4 sm:$0xff]  }
  0xae   :  { %10009 = vmatprep.subr.bf16.mxu0 %v16558_v12  ;;  %11034 = vmatprep.subr.bf16.mxu1 %v16560_v13  ;;  %v16588_v32 = vld [vmem:[#allocation4 + $0x104] ss:$16 sps:$4 sm:$0xff]   ;;  %v16590_v33 = vld [vmem:[#allocation4 + $0x10c] ss:$16 sps:$4 sm:$0xff]   ;;  %v16592_v34 = vld [vmem:[#allocation4 + $0x100] ss:$16 sps:$4 sm:$0xff]  }
  0xaf   :  { %v16593_v35 = vld [vmem:[#allocation4 + $0x108] ss:$16 sps:$4 sm:$0xff]   ;;  %v16594_v36 = vld [vmem:[#allocation4 + $0x124] ss:$16 sps:$4 sm:$0xff]   ;;  %v16596_v37 = vld [vmem:[#allocation4 + $0x12c] ss:$16 sps:$4 sm:$0xff]  }
  0xb0   :  { %v16598_v38 = vld [vmem:[#allocation4 + $0x120] ss:$16 sps:$4 sm:$0xff]   ;;  %v16599_v39 = vld [vmem:[#allocation4 + $0x128] ss:$16 sps:$4 sm:$0xff]   ;;  %v16600_v40 = vld [vmem:[#allocation4 + $0x144] ss:$16 sps:$4 sm:$0xff]  }
  0xb1   :  { %10010 = vmatpush1.bf16.msra.mxu0 %v16562_v14  ;;  %11035 = vmatpush1.bf16.msra.mxu1 %v16563_v15  ;;  %v16602_v41 = vld [vmem:[#allocation4 + $0x14c] ss:$16 sps:$4 sm:$0xff]   ;;  %v16604_v42 = vld [vmem:[#allocation4 + $0x140] ss:$16 sps:$4 sm:$0xff]   ;;  %v16605_v43 = vld [vmem:[#allocation4 + $0x148] ss:$16 sps:$4 sm:$0xff]  }
  0xb2   :  { %10011 = vmatprep.subr.bf16.mxu0 %v16564_v16  ;;  %11036 = vmatprep.subr.bf16.mxu1 %v16566_v17  ;;  %v16606_v44 = vld [vmem:[#allocation4 + $0x164] ss:$16 sps:$4 sm:$0xff]   ;;  %v16608_v45 = vld [vmem:[#allocation4 + $0x16c] ss:$16 sps:$4 sm:$0xff]   ;;  %v16610_v46 = vld [vmem:[#allocation4 + $0x160] ss:$16 sps:$4 sm:$0xff]  }
  0xb3   :  { %v16611_v47 = vld [vmem:[#allocation4 + $0x168] ss:$16 sps:$4 sm:$0xff]   ;;  %v16638_v48 = vld [vmem:[#allocation2 + $0x4] ss:$200 sps:$4 sm:$0xff]   ;;  %v16616_v52 = vld [vmem:[#allocation4 + $0x180] ss:$16 sps:$4 sm:$0xff]  }
  0xb4   :  { %v16612_v49 = vld [vmem:[#allocation4 + $0x184] ss:$16 sps:$4 sm:$0xff]   ;;  %v16614_v50 = vld [vmem:[#allocation4 + $0x18c] ss:$16 sps:$4 sm:$0xff]   ;;  %v348_v51 = vpack.c.bf16 %v16638_v48, %v16638_v48  ;;  %v16617_v53 = vld [vmem:[#allocation4 + $0x188] ss:$16 sps:$4 sm:$0xff]  }
  0xb5   :  { %10012 = vmatpush1.bf16.msra.mxu0 %v16568_v18  ;;  %11037 = vmatpush1.bf16.msra.mxu1 %v16569_v19  ;;  %v16618_v54 = vld [vmem:[#allocation4 + $0x1a4] ss:$16 sps:$4 sm:$0xff]   ;;  %v16620_v55 = vld [vmem:[#allocation4 + $0x1ac] ss:$16 sps:$4 sm:$0xff]   ;;  %v16622_v56 = vld [vmem:[#allocation4 + $0x1a0] ss:$16 sps:$4 sm:$0xff]  }
  0xb6   :  { %10013 = vmatprep.subr.bf16.mxu0 %v16570_v20  ;;  %11038 = vmatprep.subr.bf16.mxu1 %v16572_v21  ;;  %v16623_v57 = vld [vmem:[#allocation4 + $0x1a8] ss:$16 sps:$4 sm:$0xff]   ;;  %v16624_v58 = vld [vmem:[#allocation4 + $0x1c4] ss:$16 sps:$4 sm:$0xff]   ;;  %v16626_v59 = vld [vmem:[#allocation4 + $0x1cc] ss:$16 sps:$4 sm:$0xff]  }
  0xb7   :  { %10035 = vmatprep.mubr.bf16.mxu0 %v348_v51  ;;  %11060 = vmatprep.mubr.bf16.mxu1 %v348_v51  ;;  %v16628_v60 = vld [vmem:[#allocation4 + $0x1c0] ss:$16 sps:$4 sm:$0xff]   ;;  %v16629_v61 = vld [vmem:[#allocation4 + $0x1c8] ss:$16 sps:$4 sm:$0xff]   ;;  %v16630_v62 = vld [vmem:[#allocation4 + $0x1e4] ss:$16 sps:$4 sm:$0xff]  }
  0xb8   :  { %v16632_v63 = vld [vmem:[#allocation4 + $0x1ec] ss:$16 sps:$4 sm:$0xff]   ;;  %v16634_v0 = vld [vmem:[#allocation4 + $0x1e0] ss:$16 sps:$4 sm:$0xff]   ;;  %v16635_v1 = vld [vmem:[#allocation4 + $0x1e8] ss:$16 sps:$4 sm:$0xff]  }
  0xb9   :  { %10014 = vmatpush1.bf16.msra.mxu0 %v16574_v22  ;;  %11039 = vmatpush1.bf16.msra.mxu1 %v16575_v23  ;;  %v16636_v2 = vld [vmem:[#allocation2] ss:$200 sps:$4 sm:$0xff]   ;;  %v16641_v3 = vld [vmem:[#allocation4 + $0x204] ss:$16 sps:$4 sm:$0xff]   ;;  %v16644_v4 = vld [vmem:[#allocation4 + $0x20c] ss:$16 sps:$4 sm:$0xff]  }
  0xba   :  { %10015 = vmatprep.subr.bf16.mxu0 %v16576_v24  ;;  %11040 = vmatprep.subr.bf16.mxu1 %v16578_v25  ;;  %v16639_v5 = vld [vmem:[#allocation4 + $0x200] ss:$16 sps:$4 sm:$0xff]   ;;  %v16642_v6 = vld [vmem:[#allocation4 + $0x208] ss:$16 sps:$4 sm:$0xff]   ;;  %v347_v7 = vpack.c.bf16 %v16636_v2, %v16636_v2  ;;  %v16647_v8 = vld [vmem:[#allocation4 + $0x224] ss:$16 sps:$4 sm:$0xff]  }
  0xbb   :  { %v16650_v9 = vld [vmem:[#allocation4 + $0x22c] ss:$16 sps:$4 sm:$0xff]   ;;  %v16645_v10 = vld [vmem:[#allocation4 + $0x220] ss:$16 sps:$4 sm:$0xff]   ;;  %v16648_v11 = vld [vmem:[#allocation4 + $0x228] ss:$16 sps:$4 sm:$0xff]  }
  0xbc   :  { %v16653_v12 = vld [vmem:[#allocation4 + $0x244] ss:$16 sps:$4 sm:$0xff]   ;;  %v16656_v13 = vld [vmem:[#allocation4 + $0x24c] ss:$16 sps:$4 sm:$0xff]   ;;  %v16651_v14 = vld [vmem:[#allocation4 + $0x240] ss:$16 sps:$4 sm:$0xff]  }
  0xbd   :  { %10016 = vmatpush1.bf16.msra.mxu0 %v16580_v26  ;;  %11041 = vmatpush1.bf16.msra.mxu1 %v16581_v27  ;;  %v16654_v15 = vld [vmem:[#allocation4 + $0x248] ss:$16 sps:$4 sm:$0xff]   ;;  %v16659_v16 = vld [vmem:[#allocation4 + $0x264] ss:$16 sps:$4 sm:$0xff]   ;;  %v16662_v17 = vld [vmem:[#allocation4 + $0x26c] ss:$16 sps:$4 sm:$0xff]  }
  0xbe   :  { %10017 = vmatprep.subr.bf16.mxu0 %v16582_v28  ;;  %11042 = vmatprep.subr.bf16.mxu1 %v16584_v29  ;;  %v16657_v18 = vld [vmem:[#allocation4 + $0x260] ss:$16 sps:$4 sm:$0xff]   ;;  %v16660_v19 = vld [vmem:[#allocation4 + $0x268] ss:$16 sps:$4 sm:$0xff]   ;;  %v16665_v20 = vld [vmem:[#allocation4 + $0x284] ss:$16 sps:$4 sm:$0xff]  }
  0xbf   :  { %v16668_v21 = vld [vmem:[#allocation4 + $0x28c] ss:$16 sps:$4 sm:$0xff]   ;;  %v16663_v22 = vld [vmem:[#allocation4 + $0x280] ss:$16 sps:$4 sm:$0xff]   ;;  %v16666_v23 = vld [vmem:[#allocation4 + $0x288] ss:$16 sps:$4 sm:$0xff]  }
  0xc0   :  { %v16671_v24 = vld [vmem:[#allocation4 + $0x2a4] ss:$16 sps:$4 sm:$0xff]   ;;  %v16674_v25 = vld [vmem:[#allocation4 + $0x2ac] ss:$16 sps:$4 sm:$0xff]   ;;  %v16669_v26 = vld [vmem:[#allocation4 + $0x2a0] ss:$16 sps:$4 sm:$0xff]  }
  0xc1   :  { %10018 = vmatpush1.bf16.msra.mxu0 %v16586_v30  ;;  %11043 = vmatpush1.bf16.msra.mxu1 %v16587_v31  ;;  %v16672_v27 = vld [vmem:[#allocation4 + $0x2a8] ss:$16 sps:$4 sm:$0xff]   ;;  %v16677_v28 = vld [vmem:[#allocation4 + $0x2c4] ss:$16 sps:$4 sm:$0xff]   ;;  %v16680_v29 = vld [vmem:[#allocation4 + $0x2cc] ss:$16 sps:$4 sm:$0xff]  }
  0xc2   :  { %10019 = vmatprep.subr.bf16.mxu0 %v16588_v32  ;;  %11044 = vmatprep.subr.bf16.mxu1 %v16590_v33  ;;  %v16675_v30 = vld [vmem:[#allocation4 + $0x2c0] ss:$16 sps:$4 sm:$0xff]   ;;  %v16678_v31 = vld [vmem:[#allocation4 + $0x2c8] ss:$16 sps:$4 sm:$0xff]   ;;  %v16737_v32 = vld [vmem:[#allocation2 + $0xc] ss:$200 sps:$4 sm:$0xff]  }
  0xc3   :  { %v16683_v33 = vld [vmem:[#allocation4 + $0x2e4] ss:$16 sps:$4 sm:$0xff]   ;;  %v16699_v48 = vld [vmem:[#allocation4 + $0x340] ss:$16 sps:$4 sm:$0xff]   ;;  %v16710_v51 = vld [vmem:[#allocation4 + $0x36c] ss:$16 sps:$4 sm:$0xff]  }
  0xc4   :  { %v16731_v2 = vld [vmem:[#allocation4 + $0x3e4] ss:$16 sps:$4 sm:$0xff]   ;;  %vm9983_vm0 = vcmask 826368   ;;  %vm9987_vm1 = vcmask 1041408   ;;  %vm9988_vm2 = vcmask 1042432  }
  0xc5   :  { %10020 = vmatpush1.bf16.msra.mxu0 %v16592_v34  ;;  %11045 = vmatpush1.bf16.msra.mxu1 %v16593_v35  ;;  %v16686_v34 = vld [vmem:[#allocation4 + $0x2ec] ss:$16 sps:$4 sm:$0xff]   ;;  %v350_v35 = vpack.c.bf16 %v16737_v32, %v16737_v32  ;;  %v16768_v32 = vld [vmem:[#allocation4 + $0x4a0] ss:$16 sps:$4 sm:$0xff]  }
  0xc6   :  { %10021 = vmatprep.subr.bf16.mxu0 %v16594_v36  ;;  %11046 = vmatprep.subr.bf16.mxu1 %v16596_v37  ;;  %v16681_v36 = vld [vmem:[#allocation4 + $0x2e0] ss:$16 sps:$4 sm:$0xff]   ;;  %v16684_v37 = vld [vmem:[#allocation4 + $0x2e8] ss:$16 sps:$4 sm:$0xff]  }
  0xc9   :  { %10022 = vmatpush1.bf16.msra.mxu0 %v16598_v38  ;;  %11047 = vmatpush1.bf16.msra.mxu1 %v16599_v39  ;;  %v16689_v38 = vld [vmem:[#allocation4 + $0x304] ss:$16 sps:$4 sm:$0xff]   ;;  %v16692_v39 = vld [vmem:[#allocation4 + $0x30c] ss:$16 sps:$4 sm:$0xff]  }
  0xca   :  { %10023 = vmatprep.subr.bf16.mxu0 %v16600_v40  ;;  %11048 = vmatprep.subr.bf16.mxu1 %v16602_v41  ;;  %v16687_v40 = vld [vmem:[#allocation4 + $0x300] ss:$16 sps:$4 sm:$0xff]   ;;  %v16690_v41 = vld [vmem:[#allocation4 + $0x308] ss:$16 sps:$4 sm:$0xff]  }
  0xcd   :  { %10024 = vmatpush1.bf16.msra.mxu0 %v16604_v42  ;;  %11049 = vmatpush1.bf16.msra.mxu1 %v16605_v43  ;;  %v16695_v42 = vld [vmem:[#allocation4 + $0x324] ss:$16 sps:$4 sm:$0xff]   ;;  %v16698_v43 = vld [vmem:[#allocation4 + $0x32c] ss:$16 sps:$4 sm:$0xff]  }
  0xce   :  { %10025 = vmatprep.subr.bf16.mxu0 %v16606_v44  ;;  %11050 = vmatprep.subr.bf16.mxu1 %v16608_v45  ;;  %v16693_v44 = vld [vmem:[#allocation4 + $0x320] ss:$16 sps:$4 sm:$0xff]   ;;  %v16696_v45 = vld [vmem:[#allocation4 + $0x328] ss:$16 sps:$4 sm:$0xff]  }
  0xd1   :  { %10026 = vmatpush1.bf16.msra.mxu0 %v16610_v46  ;;  %11051 = vmatpush1.bf16.msra.mxu1 %v16611_v47  ;;  %v16701_v46 = vld [vmem:[#allocation4 + $0x344] ss:$16 sps:$4 sm:$0xff]   ;;  %v16704_v47 = vld [vmem:[#allocation4 + $0x34c] ss:$16 sps:$4 sm:$0xff]  }
  0xd2   :  { %10027 = vmatprep.subr.bf16.mxu0 %v16612_v49  ;;  %11052 = vmatprep.subr.bf16.mxu1 %v16614_v50  ;;  %v16702_v49 = vld [vmem:[#allocation4 + $0x348] ss:$16 sps:$4 sm:$0xff]   ;;  %v16707_v50 = vld [vmem:[#allocation4 + $0x364] ss:$16 sps:$4 sm:$0xff]  }
  0xd5   :  { %10028 = vmatpush1.bf16.msra.mxu0 %v16616_v52  ;;  %11053 = vmatpush1.bf16.msra.mxu1 %v16617_v53  ;;  %v16705_v52 = vld [vmem:[#allocation4 + $0x360] ss:$16 sps:$4 sm:$0xff]   ;;  %v16708_v53 = vld [vmem:[#allocation4 + $0x368] ss:$16 sps:$4 sm:$0xff]  }
  0xd6   :  { %10029 = vmatprep.subr.bf16.mxu0 %v16618_v54  ;;  %11054 = vmatprep.subr.bf16.mxu1 %v16620_v55  ;;  %v16713_v54 = vld [vmem:[#allocation4 + $0x384] ss:$16 sps:$4 sm:$0xff]   ;;  %v16716_v55 = vld [vmem:[#allocation4 + $0x38c] ss:$16 sps:$4 sm:$0xff]  }
  0xd9   :  { %10030 = vmatpush1.bf16.msra.mxu0 %v16622_v56  ;;  %11055 = vmatpush1.bf16.msra.mxu1 %v16623_v57  ;;  %v16711_v56 = vld [vmem:[#allocation4 + $0x380] ss:$16 sps:$4 sm:$0xff]   ;;  %v16714_v57 = vld [vmem:[#allocation4 + $0x388] ss:$16 sps:$4 sm:$0xff]  }
  0xda   :  { %10031 = vmatprep.subr.bf16.mxu0 %v16624_v58  ;;  %11056 = vmatprep.subr.bf16.mxu1 %v16626_v59  ;;  %v16719_v58 = vld [vmem:[#allocation4 + $0x3a4] ss:$16 sps:$4 sm:$0xff]   ;;  %v16722_v59 = vld [vmem:[#allocation4 + $0x3ac] ss:$16 sps:$4 sm:$0xff]  }
  0xdd   :  { %10032 = vmatpush1.bf16.msra.mxu0 %v16628_v60  ;;  %11057 = vmatpush1.bf16.msra.mxu1 %v16629_v61  ;;  %v16717_v60 = vld [vmem:[#allocation4 + $0x3a0] ss:$16 sps:$4 sm:$0xff]   ;;  %v16720_v61 = vld [vmem:[#allocation4 + $0x3a8] ss:$16 sps:$4 sm:$0xff]  }
  0xde   :  { %10033 = vmatprep.subr.bf16.mxu0 %v16630_v62  ;;  %11058 = vmatprep.subr.bf16.mxu1 %v16632_v63  ;;  %v16725_v62 = vld [vmem:[#allocation4 + $0x3c4] ss:$16 sps:$4 sm:$0xff]   ;;  %v16728_v63 = vld [vmem:[#allocation4 + $0x3cc] ss:$16 sps:$4 sm:$0xff]  }
  0xe1   :  { %10034 = vmatpush1.bf16.msra.mxu0 %v16634_v0  ;;  %11059 = vmatpush1.bf16.msra.mxu1 %v16635_v1  ;;  %v16723_v0 = vld [vmem:[#allocation4 + $0x3c0] ss:$16 sps:$4 sm:$0xff]   ;;  %v16726_v1 = vld [vmem:[#allocation4 + $0x3c8] ss:$16 sps:$4 sm:$0xff]  }
  0xe2   :  { %10044 = vmatprep.subr.bf16.mxu0 %v16641_v3  ;;  %11069 = vmatprep.subr.bf16.mxu1 %v16644_v4  ;;  %v16734_v3 = vld [vmem:[#allocation4 + $0x3ec] ss:$16 sps:$4 sm:$0xff]   ;;  %v16729_v4 = vld [vmem:[#allocation4 + $0x3e0] ss:$16 sps:$4 sm:$0xff]  }
  0xe4   :  { %10036 = vmatmul.mubr.bf16.vlgmr.msra.gmra.mrb[0].mxu0 %v347_v7  ;;  %11061 = vmatmul.mubr.bf16.vlgmr.msra.gmra.mrb[0].mxu1 %v347_v7  ;;  %v16740_v7 = vld [vmem:[#allocation4 + $0x404] ss:$16 sps:$4 sm:$0xff]  }
  0xe5   :  { %10045 = vmatpush1.bf16.msra.mxu0 %v16639_v5  ;;  %11070 = vmatpush1.bf16.msra.mxu1 %v16642_v6  ;;  %v16732_v5 = vld [vmem:[#allocation4 + $0x3e8] ss:$16 sps:$4 sm:$0xff]  }
  0xe6   :  { %10046 = vmatprep.subr.bf16.mxu0 %v16647_v8  ;;  %11071 = vmatprep.subr.bf16.mxu1 %v16650_v9  ;;  %v16735_v6 = vld [vmem:[#allocation2 + $0x8] ss:$200 sps:$4 sm:$0xff]   ;;  %v16743_v8 = vld [vmem:[#allocation4 + $0x40c] ss:$16 sps:$4 sm:$0xff]  }
  0xe7   :  { %10076 = vmatprep.mubr.bf16.mxu0 %v350_v35  ;;  %11101 = vmatprep.mubr.bf16.mxu1 %v350_v35  ;;  %v349_v9 = vpack.c.bf16 %v16735_v6, %v16735_v6  ;;  %v16779_v35 = vld [vmem:[#allocation4 + $0x4cc] ss:$16 sps:$4 sm:$0xff]   ;;  %v16830_v6 = vld [vmem:[#allocation4 + $0x5e4] ss:$16 sps:$4 sm:$0xff]  }
  0xe9   :  { %10047 = vmatpush1.bf16.msra.mxu0 %v16645_v10  ;;  %11072 = vmatpush1.bf16.msra.mxu1 %v16648_v11  ;;  %v16738_v10 = vld [vmem:[#allocation4 + $0x400] ss:$16 sps:$4 sm:$0xff]   ;;  %v16741_v11 = vld [vmem:[#allocation4 + $0x408] ss:$16 sps:$4 sm:$0xff]  }
  0xea   :  { %10048 = vmatprep.subr.bf16.mxu0 %v16653_v12  ;;  %11073 = vmatprep.subr.bf16.mxu1 %v16656_v13  ;;  %v16746_v12 = vld [vmem:[#allocation4 + $0x424] ss:$16 sps:$4 sm:$0xff]   ;;  %v16749_v13 = vld [vmem:[#allocation4 + $0x42c] ss:$16 sps:$4 sm:$0xff]  }
  0xed   :  { %10049 = vmatpush1.bf16.msra.mxu0 %v16651_v14  ;;  %11074 = vmatpush1.bf16.msra.mxu1 %v16654_v15  ;;  %v16744_v14 = vld [vmem:[#allocation4 + $0x420] ss:$16 sps:$4 sm:$0xff]   ;;  %v16747_v15 = vld [vmem:[#allocation4 + $0x428] ss:$16 sps:$4 sm:$0xff]  }
  0xee   :  { %10050 = vmatprep.subr.bf16.mxu0 %v16659_v16  ;;  %11075 = vmatprep.subr.bf16.mxu1 %v16662_v17  ;;  %v16836_v16 = vld [vmem:[#allocation2 + $0x14] ss:$200 sps:$4 sm:$0xff]  }
  0xef   :  { %v16752_v17 = vld [vmem:[#allocation4 + $0x444] ss:$16 sps:$4 sm:$0xff]  }
  0xf1   :  { %10051 = vmatpush1.bf16.msra.mxu0 %v16657_v18  ;;  %11076 = vmatpush1.bf16.msra.mxu1 %v16660_v19  ;;  %v16755_v18 = vld [vmem:[#allocation4 + $0x44c] ss:$16 sps:$4 sm:$0xff]   ;;  %v352_v19 = vpack.c.bf16 %v16836_v16, %v16836_v16  ;;  %v16840_v16 = vld [vmem:[#allocation4 + $0x608] ss:$16 sps:$4 sm:$0xff]  }
  0xf2   :  { %10052 = vmatprep.subr.bf16.mxu0 %v16665_v20  ;;  %11077 = vmatprep.subr.bf16.mxu1 %v16668_v21  ;;  %v16750_v20 = vld [vmem:[#allocation4 + $0x440] ss:$16 sps:$4 sm:$0xff]   ;;  %v16753_v21 = vld [vmem:[#allocation4 + $0x448] ss:$16 sps:$4 sm:$0xff]  }
  0xf5   :  { %10053 = vmatpush1.bf16.msra.mxu0 %v16663_v22  ;;  %11078 = vmatpush1.bf16.msra.mxu1 %v16666_v23  ;;  %v16758_v22 = vld [vmem:[#allocation4 + $0x464] ss:$16 sps:$4 sm:$0xff]   ;;  %v16761_v23 = vld [vmem:[#allocation4 + $0x46c] ss:$16 sps:$4 sm:$0xff]  }
  0xf6   :  { %10054 = vmatprep.subr.bf16.mxu0 %v16671_v24  ;;  %11079 = vmatprep.subr.bf16.mxu1 %v16674_v25  ;;  %v16756_v24 = vld [vmem:[#allocation4 + $0x460] ss:$16 sps:$4 sm:$0xff]   ;;  %v16759_v25 = vld [vmem:[#allocation4 + $0x468] ss:$16 sps:$4 sm:$0xff]  }
  0xf9   :  { %10055 = vmatpush1.bf16.msra.mxu0 %v16669_v26  ;;  %11080 = vmatpush1.bf16.msra.mxu1 %v16672_v27  ;;  %v16764_v26 = vld [vmem:[#allocation4 + $0x484] ss:$16 sps:$4 sm:$0xff]   ;;  %v16767_v27 = vld [vmem:[#allocation4 + $0x48c] ss:$16 sps:$4 sm:$0xff]  }
  0xfa   :  { %10056 = vmatprep.subr.bf16.mxu0 %v16677_v28  ;;  %11081 = vmatprep.subr.bf16.mxu1 %v16680_v29  ;;  %v16762_v28 = vld [vmem:[#allocation4 + $0x480] ss:$16 sps:$4 sm:$0xff]   ;;  %v16765_v29 = vld [vmem:[#allocation4 + $0x488] ss:$16 sps:$4 sm:$0xff]  }
  0xfd   :  { %10057 = vmatpush1.bf16.msra.mxu0 %v16675_v30  ;;  %11082 = vmatpush1.bf16.msra.mxu1 %v16678_v31  ;;  %v16770_v30 = vld [vmem:[#allocation4 + $0x4a4] ss:$16 sps:$4 sm:$0xff]   ;;  %v16773_v31 = vld [vmem:[#allocation4 + $0x4ac] ss:$16 sps:$4 sm:$0xff]  }
  0xfe   :  { %10058 = vmatprep.subr.bf16.mxu0 %v16683_v33  ;;  %11083 = vmatprep.subr.bf16.mxu1 %v16686_v34  ;;  %v16771_v33 = vld [vmem:[#allocation4 + $0x4a8] ss:$16 sps:$4 sm:$0xff]   ;;  %v16776_v34 = vld [vmem:[#allocation4 + $0x4c4] ss:$16 sps:$4 sm:$0xff]  }
 0x101   :  { %10059 = vmatpush1.bf16.msra.mxu0 %v16681_v36  ;;  %11084 = vmatpush1.bf16.msra.mxu1 %v16684_v37  ;;  %v16774_v36 = vld [vmem:[#allocation4 + $0x4c0] ss:$16 sps:$4 sm:$0xff]   ;;  %v16777_v37 = vld [vmem:[#allocation4 + $0x4c8] ss:$16 sps:$4 sm:$0xff]  }
 0x102   :  { %10060 = vmatprep.subr.bf16.mxu0 %v16689_v38  ;;  %11085 = vmatprep.subr.bf16.mxu1 %v16692_v39  ;;  %v16782_v38 = vld [vmem:[#allocation4 + $0x4e4] ss:$16 sps:$4 sm:$0xff]   ;;  %v16785_v39 = vld [vmem:[#allocation4 + $0x4ec] ss:$16 sps:$4 sm:$0xff]  }
 0x105   :  { %10061 = vmatpush1.bf16.msra.mxu0 %v16687_v40  ;;  %11086 = vmatpush1.bf16.msra.mxu1 %v16690_v41  ;;  %v16780_v40 = vld [vmem:[#allocation4 + $0x4e0] ss:$16 sps:$4 sm:$0xff]   ;;  %v16783_v41 = vld [vmem:[#allocation4 + $0x4e8] ss:$16 sps:$4 sm:$0xff]  }
 0x106   :  { %10062 = vmatprep.subr.bf16.mxu0 %v16695_v42  ;;  %11087 = vmatprep.subr.bf16.mxu1 %v16698_v43  ;;  %v16788_v42 = vld [vmem:[#allocation4 + $0x504] ss:$16 sps:$4 sm:$0xff]   ;;  %v16791_v43 = vld [vmem:[#allocation4 + $0x50c] ss:$16 sps:$4 sm:$0xff]  }
 0x109   :  { %10063 = vmatpush1.bf16.msra.mxu0 %v16693_v44  ;;  %11088 = vmatpush1.bf16.msra.mxu1 %v16696_v45  ;;  %v16786_v44 = vld [vmem:[#allocation4 + $0x500] ss:$16 sps:$4 sm:$0xff]   ;;  %v16789_v45 = vld [vmem:[#allocation4 + $0x508] ss:$16 sps:$4 sm:$0xff]  }
 0x10a   :  { %10064 = vmatprep.subr.bf16.mxu0 %v16701_v46  ;;  %11089 = vmatprep.subr.bf16.mxu1 %v16704_v47  ;;  %v16794_v46 = vld [vmem:[#allocation4 + $0x524] ss:$16 sps:$4 sm:$0xff]   ;;  %v16797_v47 = vld [vmem:[#allocation4 + $0x52c] ss:$16 sps:$4 sm:$0xff]  }
 0x10d   :  { %10065 = vmatpush1.bf16.msra.mxu0 %v16699_v48  ;;  %11090 = vmatpush1.bf16.msra.mxu1 %v16702_v49  ;;  %v16792_v48 = vld [vmem:[#allocation4 + $0x520] ss:$16 sps:$4 sm:$0xff]   ;;  %v16795_v49 = vld [vmem:[#allocation4 + $0x528] ss:$16 sps:$4 sm:$0xff]  }
 0x10e   :  { %10066 = vmatprep.subr.bf16.mxu0 %v16707_v50  ;;  %11091 = vmatprep.subr.bf16.mxu1 %v16710_v51  ;;  %v16800_v50 = vld [vmem:[#allocation4 + $0x544] ss:$16 sps:$4 sm:$0xff]   ;;  %v16803_v51 = vld [vmem:[#allocation4 + $0x54c] ss:$16 sps:$4 sm:$0xff]  }
 0x111   :  { %10067 = vmatpush1.bf16.msra.mxu0 %v16705_v52  ;;  %11092 = vmatpush1.bf16.msra.mxu1 %v16708_v53  ;;  %v16798_v52 = vld [vmem:[#allocation4 + $0x540] ss:$16 sps:$4 sm:$0xff]   ;;  %v16801_v53 = vld [vmem:[#allocation4 + $0x548] ss:$16 sps:$4 sm:$0xff]  }
 0x112   :  { %10068 = vmatprep.subr.bf16.mxu0 %v16713_v54  ;;  %11093 = vmatprep.subr.bf16.mxu1 %v16716_v55  ;;  %v16806_v54 = vld [vmem:[#allocation4 + $0x564] ss:$16 sps:$4 sm:$0xff]   ;;  %v16809_v55 = vld [vmem:[#allocation4 + $0x56c] ss:$16 sps:$4 sm:$0xff]  }
 0x115   :  { %10069 = vmatpush1.bf16.msra.mxu0 %v16711_v56  ;;  %11094 = vmatpush1.bf16.msra.mxu1 %v16714_v57  ;;  %v16804_v56 = vld [vmem:[#allocation4 + $0x560] ss:$16 sps:$4 sm:$0xff]   ;;  %v16807_v57 = vld [vmem:[#allocation4 + $0x568] ss:$16 sps:$4 sm:$0xff]  }
 0x116   :  { %10070 = vmatprep.subr.bf16.mxu0 %v16719_v58  ;;  %11095 = vmatprep.subr.bf16.mxu1 %v16722_v59  ;;  %v16812_v58 = vld [vmem:[#allocation4 + $0x584] ss:$16 sps:$4 sm:$0xff]   ;;  %v16815_v59 = vld [vmem:[#allocation4 + $0x58c] ss:$16 sps:$4 sm:$0xff]  }
 0x119   :  { %10071 = vmatpush1.bf16.msra.mxu0 %v16717_v60  ;;  %11096 = vmatpush1.bf16.msra.mxu1 %v16720_v61  ;;  %v16810_v60 = vld [vmem:[#allocation4 + $0x580] ss:$16 sps:$4 sm:$0xff]   ;;  %v16813_v61 = vld [vmem:[#allocation4 + $0x588] ss:$16 sps:$4 sm:$0xff]  }
 0x11a   :  { %10072 = vmatprep.subr.bf16.mxu0 %v16725_v62  ;;  %11097 = vmatprep.subr.bf16.mxu1 %v16728_v63  ;;  %v16818_v62 = vld [vmem:[#allocation4 + $0x5a4] ss:$16 sps:$4 sm:$0xff]   ;;  %v16821_v63 = vld [vmem:[#allocation4 + $0x5ac] ss:$16 sps:$4 sm:$0xff]  }
 0x11d   :  { %10073 = vmatpush1.bf16.msra.mxu0 %v16723_v0  ;;  %11098 = vmatpush1.bf16.msra.mxu1 %v16726_v1  ;;  %v16816_v0 = vld [vmem:[#allocation4 + $0x5a0] ss:$16 sps:$4 sm:$0xff]   ;;  %v16819_v1 = vld [vmem:[#allocation4 + $0x5a8] ss:$16 sps:$4 sm:$0xff]  }
 0x11e   :  { %10074 = vmatprep.subr.bf16.mxu0 %v16731_v2  ;;  %11099 = vmatprep.subr.bf16.mxu1 %v16734_v3  ;;  %v16824_v2 = vld [vmem:[#allocation4 + $0x5c4] ss:$16 sps:$4 sm:$0xff]   ;;  %v16827_v3 = vld [vmem:[#allocation4 + $0x5cc] ss:$16 sps:$4 sm:$0xff]  }
 0x121   :  { %10075 = vmatpush1.bf16.msra.mxu0 %v16729_v4  ;;  %11100 = vmatpush1.bf16.msra.mxu1 %v16732_v5  ;;  %v16822_v4 = vld [vmem:[#allocation4 + $0x5c0] ss:$16 sps:$4 sm:$0xff]   ;;  %v16825_v5 = vld [vmem:[#allocation4 + $0x5c8] ss:$16 sps:$4 sm:$0xff]  }
 0x122   :  { %10085 = vmatprep.subr.bf16.mxu0 %v16740_v7  ;;  %11110 = vmatprep.subr.bf16.mxu1 %v16743_v8  ;;  %v16833_v7 = vld [vmem:[#allocation4 + $0x5ec] ss:$16 sps:$4 sm:$0xff]   ;;  %v16828_v8 = vld [vmem:[#allocation4 + $0x5e0] ss:$16 sps:$4 sm:$0xff]  }
 0x124   :  { %10077 = vmatmul.mubr.bf16.vlgmr.msra.gmra.mrb[0].mxu0 %v349_v9  ;;  %11102 = vmatmul.mubr.bf16.vlgmr.msra.gmra.mrb[0].mxu1 %v349_v9  ;;  %v16831_v9 = vld [vmem:[#allocation4 + $0x5e8] ss:$16 sps:$4 sm:$0xff]  }
 0x125   :  { %10086 = vmatpush1.bf16.msra.mxu0 %v16738_v10  ;;  %11111 = vmatpush1.bf16.msra.mxu1 %v16741_v11  ;;  %v16834_v10 = vld [vmem:[#allocation2 + $0x10] ss:$200 sps:$4 sm:$0xff]   ;;  %v16839_v11 = vld [vmem:[#allocation4 + $0x604] ss:$16 sps:$4 sm:$0xff]  }
 0x126   :  { %10087 = vmatprep.subr.bf16.mxu0 %v16746_v12  ;;  %11112 = vmatprep.subr.bf16.mxu1 %v16749_v13  ;;  %v16842_v12 = vld [vmem:[#allocation4 + $0x60c] ss:$16 sps:$4 sm:$0xff]  }
 0x127   :  { %10117 = vmatprep.mubr.bf16.mxu0 %v352_v19  ;;  %11142 = vmatprep.mubr.bf16.mxu1 %v352_v19  ;;  %v16935_v13 = vld [vmem:[#allocation2 + $0x1c] ss:$200 sps:$4 sm:$0xff]  }
 0x128   :  { %v354_v19 = vpack.c.bf16 %v16935_v13, %v16935_v13  ;;  %v16930_v13 = vld [vmem:[#allocation4 + $0x7e8] ss:$16 sps:$4 sm:$0xff]  }
 0x129   :  { %10088 = vmatpush1.bf16.msra.mxu0 %v16744_v14  ;;  %11113 = vmatpush1.bf16.msra.mxu1 %v16747_v15  ;;  %v351_v14 = vpack.c.bf16 %v16834_v10, %v16834_v10  ;;  %v16837_v15 = vld [vmem:[#allocation4 + $0x600] ss:$16 sps:$4 sm:$0xff]   ;;  %v16929_v10 = vld [vmem:[#allocation4 + $0x7e4] ss:$16 sps:$4 sm:$0xff]  }
 0x12a   :  { %10089 = vmatprep.subr.bf16.mxu0 %v16752_v17  ;;  %11114 = vmatprep.subr.bf16.mxu1 %v16755_v18  ;;  %v16845_v17 = vld [vmem:[#allocation4 + $0x624] ss:$16 sps:$4 sm:$0xff]   ;;  %v16848_v18 = vld [vmem:[#allocation4 + $0x62c] ss:$16 sps:$4 sm:$0xff]  }
 0x12d   :  { %10090 = vmatpush1.bf16.msra.mxu0 %v16750_v20  ;;  %11115 = vmatpush1.bf16.msra.mxu1 %v16753_v21  ;;  %v16843_v20 = vld [vmem:[#allocation4 + $0x620] ss:$16 sps:$4 sm:$0xff]   ;;  %v16846_v21 = vld [vmem:[#allocation4 + $0x628] ss:$16 sps:$4 sm:$0xff]  }
 0x12e   :  { %10091 = vmatprep.subr.bf16.mxu0 %v16758_v22  ;;  %11116 = vmatprep.subr.bf16.mxu1 %v16761_v23  ;;  %v16851_v22 = vld [vmem:[#allocation4 + $0x644] ss:$16 sps:$4 sm:$0xff]   ;;  %v16854_v23 = vld [vmem:[#allocation4 + $0x64c] ss:$16 sps:$4 sm:$0xff]  }
 0x131   :  { %10092 = vmatpush1.bf16.msra.mxu0 %v16756_v24  ;;  %11117 = vmatpush1.bf16.msra.mxu1 %v16759_v25  ;;  %v16849_v24 = vld [vmem:[#allocation4 + $0x640] ss:$16 sps:$4 sm:$0xff]   ;;  %v16852_v25 = vld [vmem:[#allocation4 + $0x648] ss:$16 sps:$4 sm:$0xff]  }
 0x132   :  { %10093 = vmatprep.subr.bf16.mxu0 %v16764_v26  ;;  %11118 = vmatprep.subr.bf16.mxu1 %v16767_v27  ;;  %v16857_v26 = vld [vmem:[#allocation4 + $0x664] ss:$16 sps:$4 sm:$0xff]   ;;  %v16860_v27 = vld [vmem:[#allocation4 + $0x66c] ss:$16 sps:$4 sm:$0xff]  }
 0x135   :  { %10094 = vmatpush1.bf16.msra.mxu0 %v16762_v28  ;;  %11119 = vmatpush1.bf16.msra.mxu1 %v16765_v29  ;;  %v16855_v28 = vld [vmem:[#allocation4 + $0x660] ss:$16 sps:$4 sm:$0xff]   ;;  %v16858_v29 = vld [vmem:[#allocation4 + $0x668] ss:$16 sps:$4 sm:$0xff]  }
 0x136   :  { %10095 = vmatprep.subr.bf16.mxu0 %v16770_v30  ;;  %11120 = vmatprep.subr.bf16.mxu1 %v16773_v31  ;;  %v16863_v30 = vld [vmem:[#allocation4 + $0x684] ss:$16 sps:$4 sm:$0xff]   ;;  %v16866_v31 = vld [vmem:[#allocation4 + $0x68c] ss:$16 sps:$4 sm:$0xff]  }
 0x139   :  { %10096 = vmatpush1.bf16.msra.mxu0 %v16768_v32  ;;  %11121 = vmatpush1.bf16.msra.mxu1 %v16771_v33  ;;  %v16861_v32 = vld [vmem:[#allocation4 + $0x680] ss:$16 sps:$4 sm:$0xff]   ;;  %v16864_v33 = vld [vmem:[#allocation4 + $0x688] ss:$16 sps:$4 sm:$0xff]  }
 0x13a   :  { %10097 = vmatprep.subr.bf16.mxu0 %v16776_v34  ;;  %11122 = vmatprep.subr.bf16.mxu1 %v16779_v35  ;;  %v16869_v34 = vld [vmem:[#allocation4 + $0x6a4] ss:$16 sps:$4 sm:$0xff]   ;;  %v16872_v35 = vld [vmem:[#allocation4 + $0x6ac] ss:$16 sps:$4 sm:$0xff]  }
 0x13d   :  { %10098 = vmatpush1.bf16.msra.mxu0 %v16774_v36  ;;  %11123 = vmatpush1.bf16.msra.mxu1 %v16777_v37  ;;  %v16867_v36 = vld [vmem:[#allocation4 + $0x6a0] ss:$16 sps:$4 sm:$0xff]   ;;  %v16870_v37 = vld [vmem:[#allocation4 + $0x6a8] ss:$16 sps:$4 sm:$0xff]  }
 0x13e   :  { %10099 = vmatprep.subr.bf16.mxu0 %v16782_v38  ;;  %11124 = vmatprep.subr.bf16.mxu1 %v16785_v39  ;;  %v16875_v38 = vld [vmem:[#allocation4 + $0x6c4] ss:$16 sps:$4 sm:$0xff]   ;;  %v16878_v39 = vld [vmem:[#allocation4 + $0x6cc] ss:$16 sps:$4 sm:$0xff]  }
 0x141   :  { %10100 = vmatpush1.bf16.msra.mxu0 %v16780_v40  ;;  %11125 = vmatpush1.bf16.msra.mxu1 %v16783_v41  ;;  %v16873_v40 = vld [vmem:[#allocation4 + $0x6c0] ss:$16 sps:$4 sm:$0xff]   ;;  %v16876_v41 = vld [vmem:[#allocation4 + $0x6c8] ss:$16 sps:$4 sm:$0xff]  }
 0x142   :  { %10101 = vmatprep.subr.bf16.mxu0 %v16788_v42  ;;  %11126 = vmatprep.subr.bf16.mxu1 %v16791_v43  ;;  %v16881_v42 = vld [vmem:[#allocation4 + $0x6e4] ss:$16 sps:$4 sm:$0xff]   ;;  %v16884_v43 = vld [vmem:[#allocation4 + $0x6ec] ss:$16 sps:$4 sm:$0xff]  }
 0x145   :  { %10102 = vmatpush1.bf16.msra.mxu0 %v16786_v44  ;;  %11127 = vmatpush1.bf16.msra.mxu1 %v16789_v45  ;;  %v16879_v44 = vld [vmem:[#allocation4 + $0x6e0] ss:$16 sps:$4 sm:$0xff]   ;;  %v16882_v45 = vld [vmem:[#allocation4 + $0x6e8] ss:$16 sps:$4 sm:$0xff]  }
 0x146   :  { %10103 = vmatprep.subr.bf16.mxu0 %v16794_v46  ;;  %11128 = vmatprep.subr.bf16.mxu1 %v16797_v47  ;;  %v16887_v46 = vld [vmem:[#allocation4 + $0x704] ss:$16 sps:$4 sm:$0xff]   ;;  %v16890_v47 = vld [vmem:[#allocation4 + $0x70c] ss:$16 sps:$4 sm:$0xff]  }
 0x149   :  { %10104 = vmatpush1.bf16.msra.mxu0 %v16792_v48  ;;  %11129 = vmatpush1.bf16.msra.mxu1 %v16795_v49  ;;  %v16885_v48 = vld [vmem:[#allocation4 + $0x700] ss:$16 sps:$4 sm:$0xff]   ;;  %v16888_v49 = vld [vmem:[#allocation4 + $0x708] ss:$16 sps:$4 sm:$0xff]  }
 0x14a   :  { %10105 = vmatprep.subr.bf16.mxu0 %v16800_v50  ;;  %11130 = vmatprep.subr.bf16.mxu1 %v16803_v51  ;;  %v16893_v50 = vld [vmem:[#allocation4 + $0x724] ss:$16 sps:$4 sm:$0xff]   ;;  %v16896_v51 = vld [vmem:[#allocation4 + $0x72c] ss:$16 sps:$4 sm:$0xff]  }
 0x14d   :  { %10106 = vmatpush1.bf16.msra.mxu0 %v16798_v52  ;;  %11131 = vmatpush1.bf16.msra.mxu1 %v16801_v53  ;;  %v16891_v52 = vld [vmem:[#allocation4 + $0x720] ss:$16 sps:$4 sm:$0xff]   ;;  %v16894_v53 = vld [vmem:[#allocation4 + $0x728] ss:$16 sps:$4 sm:$0xff]  }
 0x14e   :  { %10107 = vmatprep.subr.bf16.mxu0 %v16806_v54  ;;  %11132 = vmatprep.subr.bf16.mxu1 %v16809_v55  ;;  %v16899_v54 = vld [vmem:[#allocation4 + $0x744] ss:$16 sps:$4 sm:$0xff]   ;;  %v16902_v55 = vld [vmem:[#allocation4 + $0x74c] ss:$16 sps:$4 sm:$0xff]  }
 0x151   :  { %10108 = vmatpush1.bf16.msra.mxu0 %v16804_v56  ;;  %11133 = vmatpush1.bf16.msra.mxu1 %v16807_v57  ;;  %v16897_v56 = vld [vmem:[#allocation4 + $0x740] ss:$16 sps:$4 sm:$0xff]   ;;  %v16900_v57 = vld [vmem:[#allocation4 + $0x748] ss:$16 sps:$4 sm:$0xff]  }
 0x152   :  { %10109 = vmatprep.subr.bf16.mxu0 %v16812_v58  ;;  %11134 = vmatprep.subr.bf16.mxu1 %v16815_v59  ;;  %v16905_v58 = vld [vmem:[#allocation4 + $0x764] ss:$16 sps:$4 sm:$0xff]   ;;  %v16908_v59 = vld [vmem:[#allocation4 + $0x76c] ss:$16 sps:$4 sm:$0xff]  }
 0x155   :  { %10110 = vmatpush1.bf16.msra.mxu0 %v16810_v60  ;;  %11135 = vmatpush1.bf16.msra.mxu1 %v16813_v61  ;;  %v16903_v60 = vld [vmem:[#allocation4 + $0x760] ss:$16 sps:$4 sm:$0xff]   ;;  %v16906_v61 = vld [vmem:[#allocation4 + $0x768] ss:$16 sps:$4 sm:$0xff]  }
 0x156   :  { %10111 = vmatprep.subr.bf16.mxu0 %v16818_v62  ;;  %11136 = vmatprep.subr.bf16.mxu1 %v16821_v63  ;;  %v16911_v62 = vld [vmem:[#allocation4 + $0x784] ss:$16 sps:$4 sm:$0xff]   ;;  %v16914_v63 = vld [vmem:[#allocation4 + $0x78c] ss:$16 sps:$4 sm:$0xff]  }
 0x159   :  { %10112 = vmatpush1.bf16.msra.mxu0 %v16816_v0  ;;  %11137 = vmatpush1.bf16.msra.mxu1 %v16819_v1  ;;  %v16909_v0 = vld [vmem:[#allocation4 + $0x780] ss:$16 sps:$4 sm:$0xff]   ;;  %v16912_v1 = vld [vmem:[#allocation4 + $0x788] ss:$16 sps:$4 sm:$0xff]  }
 0x15a   :  { %10113 = vmatprep.subr.bf16.mxu0 %v16824_v2  ;;  %11138 = vmatprep.subr.bf16.mxu1 %v16827_v3  ;;  %v16917_v2 = vld [vmem:[#allocation4 + $0x7a4] ss:$16 sps:$4 sm:$0xff]   ;;  %v16920_v3 = vld [vmem:[#allocation4 + $0x7ac] ss:$16 sps:$4 sm:$0xff]  }
 0x15d   :  { %10114 = vmatpush1.bf16.msra.mxu0 %v16822_v4  ;;  %11139 = vmatpush1.bf16.msra.mxu1 %v16825_v5  ;;  %v16915_v4 = vld [vmem:[#allocation4 + $0x7a0] ss:$16 sps:$4 sm:$0xff]   ;;  %v16918_v5 = vld [vmem:[#allocation4 + $0x7a8] ss:$16 sps:$4 sm:$0xff]  }
 0x15e   :  { %10115 = vmatprep.subr.bf16.mxu0 %v16830_v6  ;;  %11140 = vmatprep.subr.bf16.mxu1 %v16833_v7  ;;  %v16923_v6 = vld [vmem:[#allocation4 + $0x7c4] ss:$16 sps:$4 sm:$0xff]   ;;  %v16926_v7 = vld [vmem:[#allocation4 + $0x7cc] ss:$16 sps:$4 sm:$0xff]  }
 0x161   :  { %10116 = vmatpush1.bf16.msra.mxu0 %v16828_v8  ;;  %11141 = vmatpush1.bf16.msra.mxu1 %v16831_v9  ;;  %v16921_v8 = vld [vmem:[#allocation4 + $0x7c0] ss:$16 sps:$4 sm:$0xff]   ;;  %v16924_v9 = vld [vmem:[#allocation4 + $0x7c8] ss:$16 sps:$4 sm:$0xff]  }
 0x162   :  { %10126 = vmatprep.subr.bf16.mxu0 %v16839_v11  ;;  %11151 = vmatprep.subr.bf16.mxu1 %v16842_v12  ;;  %v16932_v11 = vld [vmem:[#allocation4 + $0x7ec] ss:$16 sps:$4 sm:$0xff]   ;;  %v16927_v12 = vld [vmem:[#allocation4 + $0x7e0] ss:$16 sps:$4 sm:$0xff]  }
 0x164   :  { %10118 = vmatmul.mubr.bf16.vlgmr.msra.gmra.mrb[0].mxu0 %v351_v14  ;;  %11143 = vmatmul.mubr.bf16.vlgmr.msra.gmra.mrb[0].mxu1 %v351_v14  ;;  %v16933_v14 = vld [vmem:[#allocation2 + $0x18] ss:$200 sps:$4 sm:$0xff]  }
 0x165   :  { %10127 = vmatpush1.bf16.msra.mxu0 %v16837_v15  ;;  %11152 = vmatpush1.bf16.msra.mxu1 %v16840_v16  ;;  %v16938_v15 = vld [vmem:[#allocation4 + $0x804] ss:$16 sps:$4 sm:$0xff]   ;;  %v16941_v16 = vld [vmem:[#allocation4 + $0x80c] ss:$16 sps:$4 sm:$0xff]  }
 0x166   :  { %10128 = vmatprep.subr.bf16.mxu0 %v16845_v17  ;;  %11153 = vmatprep.subr.bf16.mxu1 %v16848_v18  ;;  %v17034_v17 = vld [vmem:[#allocation2 + $0x24] ss:$200 sps:$4 sm:$0xff]   ;;  %v353_v18 = vpack.c.bf16 %v16933_v14, %v16933_v14 }
 0x167   :  { %10158 = vmatprep.mubr.bf16.mxu0 %v354_v19  ;;  %11183 = vmatprep.mubr.bf16.mxu1 %v354_v19  ;;  %v16936_v19 = vld [vmem:[#allocation4 + $0x800] ss:$16 sps:$4 sm:$0xff]   ;;  %v17028_v14 = vld [vmem:[#allocation4 + $0x9e4] ss:$16 sps:$4 sm:$0xff]  }
 0x169   :  { %10129 = vmatpush1.bf16.msra.mxu0 %v16843_v20  ;;  %11154 = vmatpush1.bf16.msra.mxu1 %v16846_v21  ;;  %v16939_v20 = vld [vmem:[#allocation4 + $0x808] ss:$16 sps:$4 sm:$0xff]   ;;  %v16944_v21 = vld [vmem:[#allocation4 + $0x824] ss:$16 sps:$4 sm:$0xff]  }
 0x16a   :  { %10130 = vmatprep.subr.bf16.mxu0 %v16851_v22  ;;  %11155 = vmatprep.subr.bf16.mxu1 %v16854_v23  ;;  %v16947_v22 = vld [vmem:[#allocation4 + $0x82c] ss:$16 sps:$4 sm:$0xff]   ;;  %v356_v23 = vpack.c.bf16 %v17034_v17, %v17034_v17  ;;  %v17026_v17 = vld [vmem:[#allocation4 + $0x9e0] ss:$16 sps:$4 sm:$0xff]  }
 0x16d   :  { %10131 = vmatpush1.bf16.msra.mxu0 %v16849_v24  ;;  %11156 = vmatpush1.bf16.msra.mxu1 %v16852_v25  ;;  %v16942_v24 = vld [vmem:[#allocation4 + $0x820] ss:$16 sps:$4 sm:$0xff]   ;;  %v16945_v25 = vld [vmem:[#allocation4 + $0x828] ss:$16 sps:$4 sm:$0xff]  }
 0x16e   :  { %10132 = vmatprep.subr.bf16.mxu0 %v16857_v26  ;;  %11157 = vmatprep.subr.bf16.mxu1 %v16860_v27  ;;  %v16950_v26 = vld [vmem:[#allocation4 + $0x844] ss:$16 sps:$4 sm:$0xff]   ;;  %v16953_v27 = vld [vmem:[#allocation4 + $0x84c] ss:$16 sps:$4 sm:$0xff]  }
 0x171   :  { %10133 = vmatpush1.bf16.msra.mxu0 %v16855_v28  ;;  %11158 = vmatpush1.bf16.msra.mxu1 %v16858_v29  ;;  %v16948_v28 = vld [vmem:[#allocation4 + $0x840] ss:$16 sps:$4 sm:$0xff]   ;;  %v16951_v29 = vld [vmem:[#allocation4 + $0x848] ss:$16 sps:$4 sm:$0xff]  }
 0x172   :  { %10134 = vmatprep.subr.bf16.mxu0 %v16863_v30  ;;  %11159 = vmatprep.subr.bf16.mxu1 %v16866_v31  ;;  %v16956_v30 = vld [vmem:[#allocation4 + $0x864] ss:$16 sps:$4 sm:$0xff]   ;;  %v16959_v31 = vld [vmem:[#allocation4 + $0x86c] ss:$16 sps:$4 sm:$0xff]  }
 0x175   :  { %10135 = vmatpush1.bf16.msra.mxu0 %v16861_v32  ;;  %11160 = vmatpush1.bf16.msra.mxu1 %v16864_v33  ;;  %v16954_v32 = vld [vmem:[#allocation4 + $0x860] ss:$16 sps:$4 sm:$0xff]   ;;  %v16957_v33 = vld [vmem:[#allocation4 + $0x868] ss:$16 sps:$4 sm:$0xff]  }
 0x176   :  { %10136 = vmatprep.subr.bf16.mxu0 %v16869_v34  ;;  %11161 = vmatprep.subr.bf16.mxu1 %v16872_v35  ;;  %v16962_v34 = vld [vmem:[#allocation4 + $0x884] ss:$16 sps:$4 sm:$0xff]   ;;  %v16965_v35 = vld [vmem:[#allocation4 + $0x88c] ss:$16 sps:$4 sm:$0xff]  }
 0x179   :  { %10137 = vmatpush1.bf16.msra.mxu0 %v16867_v36  ;;  %11162 = vmatpush1.bf16.msra.mxu1 %v16870_v37  ;;  %v16960_v36 = vld [vmem:[#allocation4 + $0x880] ss:$16 sps:$4 sm:$0xff]   ;;  %v16963_v37 = vld [vmem:[#allocation4 + $0x888] ss:$16 sps:$4 sm:$0xff]  }
 0x17a   :  { %10138 = vmatprep.subr.bf16.mxu0 %v16875_v38  ;;  %11163 = vmatprep.subr.bf16.mxu1 %v16878_v39  ;;  %v16968_v38 = vld [vmem:[#allocation4 + $0x8a4] ss:$16 sps:$4 sm:$0xff]   ;;  %v16971_v39 = vld [vmem:[#allocation4 + $0x8ac] ss:$16 sps:$4 sm:$0xff]  }
 0x17d   :  { %10139 = vmatpush1.bf16.msra.mxu0 %v16873_v40  ;;  %11164 = vmatpush1.bf16.msra.mxu1 %v16876_v41  ;;  %v16966_v40 = vld [vmem:[#allocation4 + $0x8a0] ss:$16 sps:$4 sm:$0xff]   ;;  %v16969_v41 = vld [vmem:[#allocation4 + $0x8a8] ss:$16 sps:$4 sm:$0xff]  }
 0x17e   :  { %10140 = vmatprep.subr.bf16.mxu0 %v16881_v42  ;;  %11165 = vmatprep.subr.bf16.mxu1 %v16884_v43  ;;  %v16974_v42 = vld [vmem:[#allocation4 + $0x8c4] ss:$16 sps:$4 sm:$0xff]   ;;  %v16977_v43 = vld [vmem:[#allocation4 + $0x8cc] ss:$16 sps:$4 sm:$0xff]  }
 0x181   :  { %10141 = vmatpush1.bf16.msra.mxu0 %v16879_v44  ;;  %11166 = vmatpush1.bf16.msra.mxu1 %v16882_v45  ;;  %v16972_v44 = vld [vmem:[#allocation4 + $0x8c0] ss:$16 sps:$4 sm:$0xff]   ;;  %v16975_v45 = vld [vmem:[#allocation4 + $0x8c8] ss:$16 sps:$4 sm:$0xff]  }
 0x182   :  { %10142 = vmatprep.subr.bf16.mxu0 %v16887_v46  ;;  %11167 = vmatprep.subr.bf16.mxu1 %v16890_v47  ;;  %v16980_v46 = vld [vmem:[#allocation4 + $0x8e4] ss:$16 sps:$4 sm:$0xff]   ;;  %v16983_v47 = vld [vmem:[#allocation4 + $0x8ec] ss:$16 sps:$4 sm:$0xff]  }
 0x185   :  { %10143 = vmatpush1.bf16.msra.mxu0 %v16885_v48  ;;  %11168 = vmatpush1.bf16.msra.mxu1 %v16888_v49  ;;  %v16978_v48 = vld [vmem:[#allocation4 + $0x8e0] ss:$16 sps:$4 sm:$0xff]   ;;  %v16981_v49 = vld [vmem:[#allocation4 + $0x8e8] ss:$16 sps:$4 sm:$0xff]  }
 0x186   :  { %10144 = vmatprep.subr.bf16.mxu0 %v16893_v50  ;;  %11169 = vmatprep.subr.bf16.mxu1 %v16896_v51  ;;  %v16986_v50 = vld [vmem:[#allocation4 + $0x904] ss:$16 sps:$4 sm:$0xff]   ;;  %v16989_v51 = vld [vmem:[#allocation4 + $0x90c] ss:$16 sps:$4 sm:$0xff]  }
 0x189   :  { %10145 = vmatpush1.bf16.msra.mxu0 %v16891_v52  ;;  %11170 = vmatpush1.bf16.msra.mxu1 %v16894_v53  ;;  %v16984_v52 = vld [vmem:[#allocation4 + $0x900] ss:$16 sps:$4 sm:$0xff]   ;;  %v16987_v53 = vld [vmem:[#allocation4 + $0x908] ss:$16 sps:$4 sm:$0xff]  }
 0x18a   :  { %10146 = vmatprep.subr.bf16.mxu0 %v16899_v54  ;;  %11171 = vmatprep.subr.bf16.mxu1 %v16902_v55  ;;  %v16992_v54 = vld [vmem:[#allocation4 + $0x924] ss:$16 sps:$4 sm:$0xff]   ;;  %v16995_v55 = vld [vmem:[#allocation4 + $0x92c] ss:$16 sps:$4 sm:$0xff]  }
 0x18d   :  { %10147 = vmatpush1.bf16.msra.mxu0 %v16897_v56  ;;  %11172 = vmatpush1.bf16.msra.mxu1 %v16900_v57  ;;  %v16990_v56 = vld [vmem:[#allocation4 + $0x920] ss:$16 sps:$4 sm:$0xff]   ;;  %v16993_v57 = vld [vmem:[#allocation4 + $0x928] ss:$16 sps:$4 sm:$0xff]  }
 0x18e   :  { %10148 = vmatprep.subr.bf16.mxu0 %v16905_v58  ;;  %11173 = vmatprep.subr.bf16.mxu1 %v16908_v59  ;;  %v16998_v58 = vld [vmem:[#allocation4 + $0x944] ss:$16 sps:$4 sm:$0xff]   ;;  %v17001_v59 = vld [vmem:[#allocation4 + $0x94c] ss:$16 sps:$4 sm:$0xff]  }
 0x191   :  { %10149 = vmatpush1.bf16.msra.mxu0 %v16903_v60  ;;  %11174 = vmatpush1.bf16.msra.mxu1 %v16906_v61  ;;  %v16996_v60 = vld [vmem:[#allocation4 + $0x940] ss:$16 sps:$4 sm:$0xff]   ;;  %v16999_v61 = vld [vmem:[#allocation4 + $0x948] ss:$16 sps:$4 sm:$0xff]  }
 0x192   :  { %10150 = vmatprep.subr.bf16.mxu0 %v16911_v62  ;;  %11175 = vmatprep.subr.bf16.mxu1 %v16914_v63  ;;  %v17004_v62 = vld [vmem:[#allocation4 + $0x964] ss:$16 sps:$4 sm:$0xff]   ;;  %v17007_v63 = vld [vmem:[#allocation4 + $0x96c] ss:$16 sps:$4 sm:$0xff]  }
 0x195   :  { %10151 = vmatpush1.bf16.msra.mxu0 %v16909_v0  ;;  %11176 = vmatpush1.bf16.msra.mxu1 %v16912_v1  ;;  %v17002_v0 = vld [vmem:[#allocation4 + $0x960] ss:$16 sps:$4 sm:$0xff]   ;;  %v17005_v1 = vld [vmem:[#allocation4 + $0x968] ss:$16 sps:$4 sm:$0xff]  }
 0x196   :  { %10152 = vmatprep.subr.bf16.mxu0 %v16917_v2  ;;  %11177 = vmatprep.subr.bf16.mxu1 %v16920_v3  ;;  %v17010_v2 = vld [vmem:[#allocation4 + $0x984] ss:$16 sps:$4 sm:$0xff]   ;;  %v17013_v3 = vld [vmem:[#allocation4 + $0x98c] ss:$16 sps:$4 sm:$0xff]  }
 0x199   :  { %10153 = vmatpush1.bf16.msra.mxu0 %v16915_v4  ;;  %11178 = vmatpush1.bf16.msra.mxu1 %v16918_v5  ;;  %v17008_v4 = vld [vmem:[#allocation4 + $0x980] ss:$16 sps:$4 sm:$0xff]   ;;  %v17011_v5 = vld [vmem:[#allocation4 + $0x988] ss:$16 sps:$4 sm:$0xff]  }
 0x19a   :  { %10154 = vmatprep.subr.bf16.mxu0 %v16923_v6  ;;  %11179 = vmatprep.subr.bf16.mxu1 %v16926_v7  ;;  %v17016_v6 = vld [vmem:[#allocation4 + $0x9a4] ss:$16 sps:$4 sm:$0xff]   ;;  %v17019_v7 = vld [vmem:[#allocation4 + $0x9ac] ss:$16 sps:$4 sm:$0xff]  }
 0x19d   :  { %10155 = vmatpush1.bf16.msra.mxu0 %v16921_v8  ;;  %11180 = vmatpush1.bf16.msra.mxu1 %v16924_v9  ;;  %v17014_v8 = vld [vmem:[#allocation4 + $0x9a0] ss:$16 sps:$4 sm:$0xff]   ;;  %v17017_v9 = vld [vmem:[#allocation4 + $0x9a8] ss:$16 sps:$4 sm:$0xff]  }
 0x19e   :  { %10156 = vmatprep.subr.bf16.mxu0 %v16929_v10  ;;  %11181 = vmatprep.subr.bf16.mxu1 %v16932_v11  ;;  %v17022_v10 = vld [vmem:[#allocation4 + $0x9c4] ss:$16 sps:$4 sm:$0xff]   ;;  %v17025_v11 = vld [vmem:[#allocation4 + $0x9cc] ss:$16 sps:$4 sm:$0xff]  }
 0x1a1   :  { %10157 = vmatpush1.bf16.msra.mxu0 %v16927_v12  ;;  %11182 = vmatpush1.bf16.msra.mxu1 %v16930_v13  ;;  %v17020_v12 = vld [vmem:[#allocation4 + $0x9c0] ss:$16 sps:$4 sm:$0xff]   ;;  %v17023_v13 = vld [vmem:[#allocation4 + $0x9c8] ss:$16 sps:$4 sm:$0xff]  }
 0x1a2   :  { %10167 = vmatprep.subr.bf16.mxu0 %v16938_v15  ;;  %11192 = vmatprep.subr.bf16.mxu1 %v16941_v16  ;;  %v17031_v15 = vld [vmem:[#allocation4 + $0x9ec] ss:$16 sps:$4 sm:$0xff]   ;;  %v17032_v16 = vld [vmem:[#allocation2 + $0x20] ss:$200 sps:$4 sm:$0xff]  }
 0x1a4   :  { %10159 = vmatmul.mubr.bf16.vlgmr.msra.gmra.mrb[0].mxu0 %v353_v18  ;;  %11184 = vmatmul.mubr.bf16.vlgmr.msra.gmra.mrb[0].mxu1 %v353_v18  ;;  %v17029_v18 = vld [vmem:[#allocation4 + $0x9e8] ss:$16 sps:$4 sm:$0xff]  }
 0x1a5   :  { %10168 = vmatpush1.bf16.msra.mxu0 %v16936_v19  ;;  %11193 = vmatpush1.bf16.msra.mxu1 %v16939_v20  ;;  %v17037_v19 = vld [vmem:[#allocation4 + $0xa04] ss:$16 sps:$4 sm:$0xff]   ;;  %v17040_v20 = vld [vmem:[#allocation4 + $0xa0c] ss:$16 sps:$4 sm:$0xff]  }
 0x1a6   :  { %10169 = vmatprep.subr.bf16.mxu0 %v16944_v21  ;;  %11194 = vmatprep.subr.bf16.mxu1 %v16947_v22  ;;  %v17133_v21 = vld [vmem:[#allocation2 + $0x2c] ss:$200 sps:$4 sm:$0xff]   ;;  %v355_v22 = vpack.c.bf16 %v17032_v16, %v17032_v16  ;;  %v17119_v16 = vld [vmem:[#allocation4 + $0xbc0] ss:$16 sps:$4 sm:$0xff]  }
 0x1a7   :  { %10199 = vmatprep.mubr.bf16.mxu0 %v356_v23  ;;  %11224 = vmatprep.mubr.bf16.mxu1 %v356_v23  ;;  %v17035_v23 = vld [vmem:[#allocation4 + $0xa00] ss:$16 sps:$4 sm:$0xff]  }
 0x1a9   :  { %10170 = vmatpush1.bf16.msra.mxu0 %v16942_v24  ;;  %11195 = vmatpush1.bf16.msra.mxu1 %v16945_v25  ;;  %v17038_v24 = vld [vmem:[#allocation4 + $0xa08] ss:$16 sps:$4 sm:$0xff]   ;;  %v17043_v25 = vld [vmem:[#allocation4 + $0xa24] ss:$16 sps:$4 sm:$0xff]  }
 0x1aa   :  { %10171 = vmatprep.subr.bf16.mxu0 %v16950_v26  ;;  %11196 = vmatprep.subr.bf16.mxu1 %v16953_v27  ;;  %v17046_v26 = vld [vmem:[#allocation4 + $0xa2c] ss:$16 sps:$4 sm:$0xff]   ;;  %v358_v27 = vpack.c.bf16 %v17133_v21, %v17133_v21  ;;  %v17125_v21 = vld [vmem:[#allocation4 + $0xbe0] ss:$16 sps:$4 sm:$0xff]  }
 0x1ad   :  { %10172 = vmatpush1.bf16.msra.mxu0 %v16948_v28  ;;  %11197 = vmatpush1.bf16.msra.mxu1 %v16951_v29  ;;  %v17041_v28 = vld [vmem:[#allocation4 + $0xa20] ss:$16 sps:$4 sm:$0xff]   ;;  %v17044_v29 = vld [vmem:[#allocation4 + $0xa28] ss:$16 sps:$4 sm:$0xff]  }
 0x1ae   :  { %10173 = vmatprep.subr.bf16.mxu0 %v16956_v30  ;;  %11198 = vmatprep.subr.bf16.mxu1 %v16959_v31  ;;  %v17049_v30 = vld [vmem:[#allocation4 + $0xa44] ss:$16 sps:$4 sm:$0xff]   ;;  %v17052_v31 = vld [vmem:[#allocation4 + $0xa4c] ss:$16 sps:$4 sm:$0xff]  }
 0x1b1   :  { %10174 = vmatpush1.bf16.msra.mxu0 %v16954_v32  ;;  %11199 = vmatpush1.bf16.msra.mxu1 %v16957_v33  ;;  %v17047_v32 = vld [vmem:[#allocation4 + $0xa40] ss:$16 sps:$4 sm:$0xff]   ;;  %v17050_v33 = vld [vmem:[#allocation4 + $0xa48] ss:$16 sps:$4 sm:$0xff]  }
 0x1b2   :  { %10175 = vmatprep.subr.bf16.mxu0 %v16962_v34  ;;  %11200 = vmatprep.subr.bf16.mxu1 %v16965_v35  ;;  %v17055_v34 = vld [vmem:[#allocation4 + $0xa64] ss:$16 sps:$4 sm:$0xff]   ;;  %v17058_v35 = vld [vmem:[#allocation4 + $0xa6c] ss:$16 sps:$4 sm:$0xff]  }
 0x1b5   :  { %10176 = vmatpush1.bf16.msra.mxu0 %v16960_v36  ;;  %11201 = vmatpush1.bf16.msra.mxu1 %v16963_v37  ;;  %v17053_v36 = vld [vmem:[#allocation4 + $0xa60] ss:$16 sps:$4 sm:$0xff]   ;;  %v17056_v37 = vld [vmem:[#allocation4 + $0xa68] ss:$16 sps:$4 sm:$0xff]  }
 0x1b6   :  { %10177 = vmatprep.subr.bf16.mxu0 %v16968_v38  ;;  %11202 = vmatprep.subr.bf16.mxu1 %v16971_v39  ;;  %v17061_v38 = vld [vmem:[#allocation4 + $0xa84] ss:$16 sps:$4 sm:$0xff]   ;;  %v17064_v39 = vld [vmem:[#allocation4 + $0xa8c] ss:$16 sps:$4 sm:$0xff]  }
 0x1b9   :  { %10178 = vmatpush1.bf16.msra.mxu0 %v16966_v40  ;;  %11203 = vmatpush1.bf16.msra.mxu1 %v16969_v41  ;;  %v17059_v40 = vld [vmem:[#allocation4 + $0xa80] ss:$16 sps:$4 sm:$0xff]   ;;  %v17062_v41 = vld [vmem:[#allocation4 + $0xa88] ss:$16 sps:$4 sm:$0xff]  }
 0x1ba   :  { %10179 = vmatprep.subr.bf16.mxu0 %v16974_v42  ;;  %11204 = vmatprep.subr.bf16.mxu1 %v16977_v43  ;;  %v17067_v42 = vld [vmem:[#allocation4 + $0xaa4] ss:$16 sps:$4 sm:$0xff]   ;;  %v17070_v43 = vld [vmem:[#allocation4 + $0xaac] ss:$16 sps:$4 sm:$0xff]  }
 0x1bd   :  { %10180 = vmatpush1.bf16.msra.mxu0 %v16972_v44  ;;  %11205 = vmatpush1.bf16.msra.mxu1 %v16975_v45  ;;  %v17065_v44 = vld [vmem:[#allocation4 + $0xaa0] ss:$16 sps:$4 sm:$0xff]   ;;  %v17068_v45 = vld [vmem:[#allocation4 + $0xaa8] ss:$16 sps:$4 sm:$0xff]  }
 0x1be   :  { %10181 = vmatprep.subr.bf16.mxu0 %v16980_v46  ;;  %11206 = vmatprep.subr.bf16.mxu1 %v16983_v47  ;;  %v17073_v46 = vld [vmem:[#allocation4 + $0xac4] ss:$16 sps:$4 sm:$0xff]   ;;  %v17076_v47 = vld [vmem:[#allocation4 + $0xacc] ss:$16 sps:$4 sm:$0xff]  }
 0x1c1   :  { %10182 = vmatpush1.bf16.msra.mxu0 %v16978_v48  ;;  %11207 = vmatpush1.bf16.msra.mxu1 %v16981_v49  ;;  %v17071_v48 = vld [vmem:[#allocation4 + $0xac0] ss:$16 sps:$4 sm:$0xff]   ;;  %v17074_v49 = vld [vmem:[#allocation4 + $0xac8] ss:$16 sps:$4 sm:$0xff]  }
 0x1c2   :  { %10183 = vmatprep.subr.bf16.mxu0 %v16986_v50  ;;  %11208 = vmatprep.subr.bf16.mxu1 %v16989_v51  ;;  %v17079_v50 = vld [vmem:[#allocation4 + $0xae4] ss:$16 sps:$4 sm:$0xff]   ;;  %v17082_v51 = vld [vmem:[#allocation4 + $0xaec] ss:$16 sps:$4 sm:$0xff]  }
 0x1c5   :  { %10184 = vmatpush1.bf16.msra.mxu0 %v16984_v52  ;;  %11209 = vmatpush1.bf16.msra.mxu1 %v16987_v53  ;;  %v17077_v52 = vld [vmem:[#allocation4 + $0xae0] ss:$16 sps:$4 sm:$0xff]   ;;  %v17080_v53 = vld [vmem:[#allocation4 + $0xae8] ss:$16 sps:$4 sm:$0xff]  }
 0x1c6   :  { %10185 = vmatprep.subr.bf16.mxu0 %v16992_v54  ;;  %11210 = vmatprep.subr.bf16.mxu1 %v16995_v55  ;;  %v17085_v54 = vld [vmem:[#allocation4 + $0xb04] ss:$16 sps:$4 sm:$0xff]   ;;  %v17088_v55 = vld [vmem:[#allocation4 + $0xb0c] ss:$16 sps:$4 sm:$0xff]  }
 0x1c9   :  { %10186 = vmatpush1.bf16.msra.mxu0 %v16990_v56  ;;  %11211 = vmatpush1.bf16.msra.mxu1 %v16993_v57  ;;  %v17083_v56 = vld [vmem:[#allocation4 + $0xb00] ss:$16 sps:$4 sm:$0xff]   ;;  %v17086_v57 = vld [vmem:[#allocation4 + $0xb08] ss:$16 sps:$4 sm:$0xff]  }
 0x1ca   :  { %10187 = vmatprep.subr.bf16.mxu0 %v16998_v58  ;;  %11212 = vmatprep.subr.bf16.mxu1 %v17001_v59  ;;  %v17091_v58 = vld [vmem:[#allocation4 + $0xb24] ss:$16 sps:$4 sm:$0xff]   ;;  %v17094_v59 = vld [vmem:[#allocation4 + $0xb2c] ss:$16 sps:$4 sm:$0xff]  }
 0x1cd   :  { %10188 = vmatpush1.bf16.msra.mxu0 %v16996_v60  ;;  %11213 = vmatpush1.bf16.msra.mxu1 %v16999_v61  ;;  %v17089_v60 = vld [vmem:[#allocation4 + $0xb20] ss:$16 sps:$4 sm:$0xff]   ;;  %v17092_v61 = vld [vmem:[#allocation4 + $0xb28] ss:$16 sps:$4 sm:$0xff]  }
 0x1ce   :  { %10189 = vmatprep.subr.bf16.mxu0 %v17004_v62  ;;  %11214 = vmatprep.subr.bf16.mxu1 %v17007_v63  ;;  %v17097_v62 = vld [vmem:[#allocation4 + $0xb44] ss:$16 sps:$4 sm:$0xff]   ;;  %v17100_v63 = vld [vmem:[#allocation4 + $0xb4c] ss:$16 sps:$4 sm:$0xff]  }
 0x1d1   :  { %10190 = vmatpush1.bf16.msra.mxu0 %v17002_v0  ;;  %11215 = vmatpush1.bf16.msra.mxu1 %v17005_v1  ;;  %v17095_v0 = vld [vmem:[#allocation4 + $0xb40] ss:$16 sps:$4 sm:$0xff]   ;;  %v17098_v1 = vld [vmem:[#allocation4 + $0xb48] ss:$16 sps:$4 sm:$0xff]  }
 0x1d2   :  { %10191 = vmatprep.subr.bf16.mxu0 %v17010_v2  ;;  %11216 = vmatprep.subr.bf16.mxu1 %v17013_v3  ;;  %v17103_v2 = vld [vmem:[#allocation4 + $0xb64] ss:$16 sps:$4 sm:$0xff]   ;;  %v17106_v3 = vld [vmem:[#allocation4 + $0xb6c] ss:$16 sps:$4 sm:$0xff]  }
 0x1d5   :  { %10192 = vmatpush1.bf16.msra.mxu0 %v17008_v4  ;;  %11217 = vmatpush1.bf16.msra.mxu1 %v17011_v5  ;;  %v17101_v4 = vld [vmem:[#allocation4 + $0xb60] ss:$16 sps:$4 sm:$0xff]   ;;  %v17104_v5 = vld [vmem:[#allocation4 + $0xb68] ss:$16 sps:$4 sm:$0xff]  }
 0x1d6   :  { %10193 = vmatprep.subr.bf16.mxu0 %v17016_v6  ;;  %11218 = vmatprep.subr.bf16.mxu1 %v17019_v7  ;;  %v17109_v6 = vld [vmem:[#allocation4 + $0xb84] ss:$16 sps:$4 sm:$0xff]   ;;  %v17112_v7 = vld [vmem:[#allocation4 + $0xb8c] ss:$16 sps:$4 sm:$0xff]  }
 0x1d9   :  { %10194 = vmatpush1.bf16.msra.mxu0 %v17014_v8  ;;  %11219 = vmatpush1.bf16.msra.mxu1 %v17017_v9  ;;  %v17107_v8 = vld [vmem:[#allocation4 + $0xb80] ss:$16 sps:$4 sm:$0xff]   ;;  %v17110_v9 = vld [vmem:[#allocation4 + $0xb88] ss:$16 sps:$4 sm:$0xff]  }
 0x1da   :  { %10195 = vmatprep.subr.bf16.mxu0 %v17022_v10  ;;  %11220 = vmatprep.subr.bf16.mxu1 %v17025_v11  ;;  %v17115_v10 = vld [vmem:[#allocation4 + $0xba4] ss:$16 sps:$4 sm:$0xff]   ;;  %v17118_v11 = vld [vmem:[#allocation4 + $0xbac] ss:$16 sps:$4 sm:$0xff]  }
 0x1dd   :  { %10196 = vmatpush1.bf16.msra.mxu0 %v17020_v12  ;;  %11221 = vmatpush1.bf16.msra.mxu1 %v17023_v13  ;;  %v17113_v12 = vld [vmem:[#allocation4 + $0xba0] ss:$16 sps:$4 sm:$0xff]   ;;  %v17116_v13 = vld [vmem:[#allocation4 + $0xba8] ss:$16 sps:$4 sm:$0xff]  }
 0x1de   :  { %10197 = vmatprep.subr.bf16.mxu0 %v17028_v14  ;;  %11222 = vmatprep.subr.bf16.mxu1 %v17031_v15  ;;  %v17121_v14 = vld [vmem:[#allocation4 + $0xbc4] ss:$16 sps:$4 sm:$0xff]   ;;  %v17124_v15 = vld [vmem:[#allocation4 + $0xbcc] ss:$16 sps:$4 sm:$0xff]  }
 0x1e1   :  { %10198 = vmatpush1.bf16.msra.mxu0 %v17026_v17  ;;  %11223 = vmatpush1.bf16.msra.mxu1 %v17029_v18  ;;  %v17122_v17 = vld [vmem:[#allocation4 + $0xbc8] ss:$16 sps:$4 sm:$0xff]   ;;  %v17127_v18 = vld [vmem:[#allocation4 + $0xbe4] ss:$16 sps:$4 sm:$0xff]  }
 0x1e2   :  { %10208 = vmatprep.subr.bf16.mxu0 %v17037_v19  ;;  %11233 = vmatprep.subr.bf16.mxu1 %v17040_v20  ;;  %v17130_v19 = vld [vmem:[#allocation4 + $0xbec] ss:$16 sps:$4 sm:$0xff]   ;;  %v17131_v20 = vld [vmem:[#allocation2 + $0x28] ss:$200 sps:$4 sm:$0xff]  }
 0x1e4   :  { %10200 = vmatmul.mubr.bf16.vlgmr.msra.gmra.mrb[0].mxu0 %v355_v22  ;;  %11225 = vmatmul.mubr.bf16.vlgmr.msra.gmra.mrb[0].mxu1 %v355_v22  ;;  %v17128_v22 = vld [vmem:[#allocation4 + $0xbe8] ss:$16 sps:$4 sm:$0xff]  }
 0x1e5   :  { %10209 = vmatpush1.bf16.msra.mxu0 %v17035_v23  ;;  %11234 = vmatpush1.bf16.msra.mxu1 %v17038_v24  ;;  %v17136_v23 = vld [vmem:[#allocation4 + $0xc04] ss:$16 sps:$4 sm:$0xff]   ;;  %v17139_v24 = vld [vmem:[#allocation4 + $0xc0c] ss:$16 sps:$4 sm:$0xff]  }
 0x1e6   :  { %10210 = vmatprep.subr.bf16.mxu0 %v17043_v25  ;;  %11235 = vmatprep.subr.bf16.mxu1 %v17046_v26  ;;  %v17232_v25 = vld [vmem:[#allocation2 + $0x34] ss:$200 sps:$4 sm:$0xff]   ;;  %v357_v26 = vpack.c.bf16 %v17131_v20, %v17131_v20  ;;  %v17218_v20 = vld [vmem:[#allocation4 + $0xdc0] ss:$16 sps:$4 sm:$0xff]  }
 0x1e7   :  { %10240 = vmatprep.mubr.bf16.mxu0 %v358_v27  ;;  %11265 = vmatprep.mubr.bf16.mxu1 %v358_v27  ;;  %v17134_v27 = vld [vmem:[#allocation4 + $0xc00] ss:$16 sps:$4 sm:$0xff]  }
 0x1e9   :  { %10211 = vmatpush1.bf16.msra.mxu0 %v17041_v28  ;;  %11236 = vmatpush1.bf16.msra.mxu1 %v17044_v29  ;;  %v17137_v28 = vld [vmem:[#allocation4 + $0xc08] ss:$16 sps:$4 sm:$0xff]   ;;  %v17142_v29 = vld [vmem:[#allocation4 + $0xc24] ss:$16 sps:$4 sm:$0xff]  }
 0x1ea   :  { %10212 = vmatprep.subr.bf16.mxu0 %v17049_v30  ;;  %11237 = vmatprep.subr.bf16.mxu1 %v17052_v31  ;;  %v17145_v30 = vld [vmem:[#allocation4 + $0xc2c] ss:$16 sps:$4 sm:$0xff]   ;;  %v360_v31 = vpack.c.bf16 %v17232_v25, %v17232_v25  ;;  %v17224_v25 = vld [vmem:[#allocation4 + $0xde0] ss:$16 sps:$4 sm:$0xff]  }
 0x1ed   :  { %10213 = vmatpush1.bf16.msra.mxu0 %v17047_v32  ;;  %11238 = vmatpush1.bf16.msra.mxu1 %v17050_v33  ;;  %v17140_v32 = vld [vmem:[#allocation4 + $0xc20] ss:$16 sps:$4 sm:$0xff]   ;;  %v17143_v33 = vld [vmem:[#allocation4 + $0xc28] ss:$16 sps:$4 sm:$0xff]  }
 0x1ee   :  { %10214 = vmatprep.subr.bf16.mxu0 %v17055_v34  ;;  %11239 = vmatprep.subr.bf16.mxu1 %v17058_v35  ;;  %v17148_v34 = vld [vmem:[#allocation4 + $0xc44] ss:$16 sps:$4 sm:$0xff]   ;;  %v17151_v35 = vld [vmem:[#allocation4 + $0xc4c] ss:$16 sps:$4 sm:$0xff]  }
 0x1f1   :  { %10215 = vmatpush1.bf16.msra.mxu0 %v17053_v36  ;;  %11240 = vmatpush1.bf16.msra.mxu1 %v17056_v37  ;;  %v17146_v36 = vld [vmem:[#allocation4 + $0xc40] ss:$16 sps:$4 sm:$0xff]   ;;  %v17149_v37 = vld [vmem:[#allocation4 + $0xc48] ss:$16 sps:$4 sm:$0xff]  }
 0x1f2   :  { %10216 = vmatprep.subr.bf16.mxu0 %v17061_v38  ;;  %11241 = vmatprep.subr.bf16.mxu1 %v17064_v39  ;;  %v17154_v38 = vld [vmem:[#allocation4 + $0xc64] ss:$16 sps:$4 sm:$0xff]   ;;  %v17157_v39 = vld [vmem:[#allocation4 + $0xc6c] ss:$16 sps:$4 sm:$0xff]  }
 0x1f5   :  { %10217 = vmatpush1.bf16.msra.mxu0 %v17059_v40  ;;  %11242 = vmatpush1.bf16.msra.mxu1 %v17062_v41  ;;  %v17152_v40 = vld [vmem:[#allocation4 + $0xc60] ss:$16 sps:$4 sm:$0xff]   ;;  %v17155_v41 = vld [vmem:[#allocation4 + $0xc68] ss:$16 sps:$4 sm:$0xff]  }
 0x1f6   :  { %10218 = vmatprep.subr.bf16.mxu0 %v17067_v42  ;;  %11243 = vmatprep.subr.bf16.mxu1 %v17070_v43  ;;  %v17160_v42 = vld [vmem:[#allocation4 + $0xc84] ss:$16 sps:$4 sm:$0xff]   ;;  %v17163_v43 = vld [vmem:[#allocation4 + $0xc8c] ss:$16 sps:$4 sm:$0xff]  }
 0x1f9   :  { %10219 = vmatpush1.bf16.msra.mxu0 %v17065_v44  ;;  %11244 = vmatpush1.bf16.msra.mxu1 %v17068_v45  ;;  %v17158_v44 = vld [vmem:[#allocation4 + $0xc80] ss:$16 sps:$4 sm:$0xff]   ;;  %v17161_v45 = vld [vmem:[#allocation4 + $0xc88] ss:$16 sps:$4 sm:$0xff]  }
 0x1fa   :  { %10220 = vmatprep.subr.bf16.mxu0 %v17073_v46  ;;  %11245 = vmatprep.subr.bf16.mxu1 %v17076_v47  ;;  %v17166_v46 = vld [vmem:[#allocation4 + $0xca4] ss:$16 sps:$4 sm:$0xff]   ;;  %v17169_v47 = vld [vmem:[#allocation4 + $0xcac] ss:$16 sps:$4 sm:$0xff]  }
 0x1fd   :  { %10221 = vmatpush1.bf16.msra.mxu0 %v17071_v48  ;;  %11246 = vmatpush1.bf16.msra.mxu1 %v17074_v49  ;;  %v17164_v48 = vld [vmem:[#allocation4 + $0xca0] ss:$16 sps:$4 sm:$0xff]   ;;  %v17167_v49 = vld [vmem:[#allocation4 + $0xca8] ss:$16 sps:$4 sm:$0xff]  }
 0x1fe   :  { %10222 = vmatprep.subr.bf16.mxu0 %v17079_v50  ;;  %11247 = vmatprep.subr.bf16.mxu1 %v17082_v51  ;;  %v17172_v50 = vld [vmem:[#allocation4 + $0xcc4] ss:$16 sps:$4 sm:$0xff]   ;;  %v17175_v51 = vld [vmem:[#allocation4 + $0xccc] ss:$16 sps:$4 sm:$0xff]  }
 0x201   :  { %10223 = vmatpush1.bf16.msra.mxu0 %v17077_v52  ;;  %11248 = vmatpush1.bf16.msra.mxu1 %v17080_v53  ;;  %v17170_v52 = vld [vmem:[#allocation4 + $0xcc0] ss:$16 sps:$4 sm:$0xff]   ;;  %v17173_v53 = vld [vmem:[#allocation4 + $0xcc8] ss:$16 sps:$4 sm:$0xff]  }
 0x202   :  { %10224 = vmatprep.subr.bf16.mxu0 %v17085_v54  ;;  %11249 = vmatprep.subr.bf16.mxu1 %v17088_v55  ;;  %v17178_v54 = vld [vmem:[#allocation4 + $0xce4] ss:$16 sps:$4 sm:$0xff]   ;;  %v17181_v55 = vld [vmem:[#allocation4 + $0xcec] ss:$16 sps:$4 sm:$0xff]  }
 0x205   :  { %10225 = vmatpush1.bf16.msra.mxu0 %v17083_v56  ;;  %11250 = vmatpush1.bf16.msra.mxu1 %v17086_v57  ;;  %v17176_v56 = vld [vmem:[#allocation4 + $0xce0] ss:$16 sps:$4 sm:$0xff]   ;;  %v17179_v57 = vld [vmem:[#allocation4 + $0xce8] ss:$16 sps:$4 sm:$0xff]  }
 0x206   :  { %10226 = vmatprep.subr.bf16.mxu0 %v17091_v58  ;;  %11251 = vmatprep.subr.bf16.mxu1 %v17094_v59  ;;  %v17184_v58 = vld [vmem:[#allocation4 + $0xd04] ss:$16 sps:$4 sm:$0xff]   ;;  %v17187_v59 = vld [vmem:[#allocation4 + $0xd0c] ss:$16 sps:$4 sm:$0xff]  }
 0x209   :  { %10227 = vmatpush1.bf16.msra.mxu0 %v17089_v60  ;;  %11252 = vmatpush1.bf16.msra.mxu1 %v17092_v61  ;;  %v17182_v60 = vld [vmem:[#allocation4 + $0xd00] ss:$16 sps:$4 sm:$0xff]   ;;  %v17185_v61 = vld [vmem:[#allocation4 + $0xd08] ss:$16 sps:$4 sm:$0xff]  }
 0x20a   :  { %10228 = vmatprep.subr.bf16.mxu0 %v17097_v62  ;;  %11253 = vmatprep.subr.bf16.mxu1 %v17100_v63  ;;  %v17190_v62 = vld [vmem:[#allocation4 + $0xd24] ss:$16 sps:$4 sm:$0xff]   ;;  %v17193_v63 = vld [vmem:[#allocation4 + $0xd2c] ss:$16 sps:$4 sm:$0xff]  }
 0x20d   :  { %10229 = vmatpush1.bf16.msra.mxu0 %v17095_v0  ;;  %11254 = vmatpush1.bf16.msra.mxu1 %v17098_v1  ;;  %v17188_v0 = vld [vmem:[#allocation4 + $0xd20] ss:$16 sps:$4 sm:$0xff]   ;;  %v17191_v1 = vld [vmem:[#allocation4 + $0xd28] ss:$16 sps:$4 sm:$0xff]  }
 0x20e   :  { %10230 = vmatprep.subr.bf16.mxu0 %v17103_v2  ;;  %11255 = vmatprep.subr.bf16.mxu1 %v17106_v3  ;;  %v17196_v2 = vld [vmem:[#allocation4 + $0xd44] ss:$16 sps:$4 sm:$0xff]   ;;  %v17199_v3 = vld [vmem:[#allocation4 + $0xd4c] ss:$16 sps:$4 sm:$0xff]  }
 0x211   :  { %10231 = vmatpush1.bf16.msra.mxu0 %v17101_v4  ;;  %11256 = vmatpush1.bf16.msra.mxu1 %v17104_v5  ;;  %v17194_v4 = vld [vmem:[#allocation4 + $0xd40] ss:$16 sps:$4 sm:$0xff]   ;;  %v17197_v5 = vld [vmem:[#allocation4 + $0xd48] ss:$16 sps:$4 sm:$0xff]  }
 0x212   :  { %10232 = vmatprep.subr.bf16.mxu0 %v17109_v6  ;;  %11257 = vmatprep.subr.bf16.mxu1 %v17112_v7  ;;  %v17202_v6 = vld [vmem:[#allocation4 + $0xd64] ss:$16 sps:$4 sm:$0xff]   ;;  %v17205_v7 = vld [vmem:[#allocation4 + $0xd6c] ss:$16 sps:$4 sm:$0xff]  }
 0x215   :  { %10233 = vmatpush1.bf16.msra.mxu0 %v17107_v8  ;;  %11258 = vmatpush1.bf16.msra.mxu1 %v17110_v9  ;;  %v17200_v8 = vld [vmem:[#allocation4 + $0xd60] ss:$16 sps:$4 sm:$0xff]   ;;  %v17203_v9 = vld [vmem:[#allocation4 + $0xd68] ss:$16 sps:$4 sm:$0xff]  }
 0x216   :  { %10234 = vmatprep.subr.bf16.mxu0 %v17115_v10  ;;  %11259 = vmatprep.subr.bf16.mxu1 %v17118_v11  ;;  %v17208_v10 = vld [vmem:[#allocation4 + $0xd84] ss:$16 sps:$4 sm:$0xff]   ;;  %v17211_v11 = vld [vmem:[#allocation4 + $0xd8c] ss:$16 sps:$4 sm:$0xff]  }
 0x219   :  { %10235 = vmatpush1.bf16.msra.mxu0 %v17113_v12  ;;  %11260 = vmatpush1.bf16.msra.mxu1 %v17116_v13  ;;  %v17206_v12 = vld [vmem:[#allocation4 + $0xd80] ss:$16 sps:$4 sm:$0xff]   ;;  %v17209_v13 = vld [vmem:[#allocation4 + $0xd88] ss:$16 sps:$4 sm:$0xff]  }
 0x21a   :  { %10236 = vmatprep.subr.bf16.mxu0 %v17121_v14  ;;  %11261 = vmatprep.subr.bf16.mxu1 %v17124_v15  ;;  %v17214_v14 = vld [vmem:[#allocation4 + $0xda4] ss:$16 sps:$4 sm:$0xff]   ;;  %v17217_v15 = vld [vmem:[#allocation4 + $0xdac] ss:$16 sps:$4 sm:$0xff]  }
 0x21d   :  { %10237 = vmatpush1.bf16.msra.mxu0 %v17119_v16  ;;  %11262 = vmatpush1.bf16.msra.mxu1 %v17122_v17  ;;  %v17212_v16 = vld [vmem:[#allocation4 + $0xda0] ss:$16 sps:$4 sm:$0xff]   ;;  %v17215_v17 = vld [vmem:[#allocation4 + $0xda8] ss:$16 sps:$4 sm:$0xff]  }
 0x21e   :  { %10238 = vmatprep.subr.bf16.mxu0 %v17127_v18  ;;  %11263 = vmatprep.subr.bf16.mxu1 %v17130_v19  ;;  %v17220_v18 = vld [vmem:[#allocation4 + $0xdc4] ss:$16 sps:$4 sm:$0xff]   ;;  %v17223_v19 = vld [vmem:[#allocation4 + $0xdcc] ss:$16 sps:$4 sm:$0xff]  }
 0x221   :  { %10239 = vmatpush1.bf16.msra.mxu0 %v17125_v21  ;;  %11264 = vmatpush1.bf16.msra.mxu1 %v17128_v22  ;;  %v17221_v21 = vld [vmem:[#allocation4 + $0xdc8] ss:$16 sps:$4 sm:$0xff]   ;;  %v17226_v22 = vld [vmem:[#allocation4 + $0xde4] ss:$16 sps:$4 sm:$0xff]  }
 0x222   :  { %10249 = vmatprep.subr.bf16.mxu0 %v17136_v23  ;;  %11274 = vmatprep.subr.bf16.mxu1 %v17139_v24  ;;  %v17229_v23 = vld [vmem:[#allocation4 + $0xdec] ss:$16 sps:$4 sm:$0xff]   ;;  %v17230_v24 = vld [vmem:[#allocation2 + $0x30] ss:$200 sps:$4 sm:$0xff]  }
 0x224   :  { %10241 = vmatmul.mubr.bf16.vlgmr.msra.gmra.mrb[0].mxu0 %v357_v26  ;;  %11266 = vmatmul.mubr.bf16.vlgmr.msra.gmra.mrb[0].mxu1 %v357_v26  ;;  %v17227_v26 = vld [vmem:[#allocation4 + $0xde8] ss:$16 sps:$4 sm:$0xff]  }
 0x225   :  { %10250 = vmatpush1.bf16.msra.mxu0 %v17134_v27  ;;  %11275 = vmatpush1.bf16.msra.mxu1 %v17137_v28  ;;  %v17235_v27 = vld [vmem:[#allocation4 + $0xe04] ss:$16 sps:$4 sm:$0xff]   ;;  %v17238_v28 = vld [vmem:[#allocation4 + $0xe0c] ss:$16 sps:$4 sm:$0xff]  }
 0x226   :  { %10251 = vmatprep.subr.bf16.mxu0 %v17142_v29  ;;  %11276 = vmatprep.subr.bf16.mxu1 %v17145_v30  ;;  %v17331_v29 = vld [vmem:[#allocation2 + $0x3c] ss:$200 sps:$4 sm:$0xff]   ;;  %v359_v30 = vpack.c.bf16 %v17230_v24, %v17230_v24  ;;  %v17317_v24 = vld [vmem:[#allocation4 + $0xfc0] ss:$16 sps:$4 sm:$0xff]  }
 0x227   :  { %10281 = vmatprep.mubr.bf16.mxu0 %v360_v31  ;;  %11306 = vmatprep.mubr.bf16.mxu1 %v360_v31  ;;  %v17233_v31 = vld [vmem:[#allocation4 + $0xe00] ss:$16 sps:$4 sm:$0xff]  }
 0x229   :  { %10252 = vmatpush1.bf16.msra.mxu0 %v17140_v32  ;;  %11277 = vmatpush1.bf16.msra.mxu1 %v17143_v33  ;;  %v17236_v32 = vld [vmem:[#allocation4 + $0xe08] ss:$16 sps:$4 sm:$0xff]   ;;  %v17241_v33 = vld [vmem:[#allocation4 + $0xe24] ss:$16 sps:$4 sm:$0xff]  }
 0x22a   :  { %10253 = vmatprep.subr.bf16.mxu0 %v17148_v34  ;;  %11278 = vmatprep.subr.bf16.mxu1 %v17151_v35  ;;  %v17244_v34 = vld [vmem:[#allocation4 + $0xe2c] ss:$16 sps:$4 sm:$0xff]   ;;  %v362_v35 = vpack.c.bf16 %v17331_v29, %v17331_v29  ;;  %v17323_v29 = vld [vmem:[#allocation4 + $0xfe0] ss:$16 sps:$4 sm:$0xff]  }
 0x22d   :  { %10254 = vmatpush1.bf16.msra.mxu0 %v17146_v36  ;;  %11279 = vmatpush1.bf16.msra.mxu1 %v17149_v37  ;;  %v17239_v36 = vld [vmem:[#allocation4 + $0xe20] ss:$16 sps:$4 sm:$0xff]   ;;  %v17242_v37 = vld [vmem:[#allocation4 + $0xe28] ss:$16 sps:$4 sm:$0xff]  }
 0x22e   :  { %10255 = vmatprep.subr.bf16.mxu0 %v17154_v38  ;;  %11280 = vmatprep.subr.bf16.mxu1 %v17157_v39  ;;  %v17247_v38 = vld [vmem:[#allocation4 + $0xe44] ss:$16 sps:$4 sm:$0xff]   ;;  %v17250_v39 = vld [vmem:[#allocation4 + $0xe4c] ss:$16 sps:$4 sm:$0xff]  }
 0x231   :  { %10256 = vmatpush1.bf16.msra.mxu0 %v17152_v40  ;;  %11281 = vmatpush1.bf16.msra.mxu1 %v17155_v41  ;;  %v17245_v40 = vld [vmem:[#allocation4 + $0xe40] ss:$16 sps:$4 sm:$0xff]   ;;  %v17248_v41 = vld [vmem:[#allocation4 + $0xe48] ss:$16 sps:$4 sm:$0xff]  }
 0x232   :  { %10257 = vmatprep.subr.bf16.mxu0 %v17160_v42  ;;  %11282 = vmatprep.subr.bf16.mxu1 %v17163_v43  ;;  %v17253_v42 = vld [vmem:[#allocation4 + $0xe64] ss:$16 sps:$4 sm:$0xff]   ;;  %v17256_v43 = vld [vmem:[#allocation4 + $0xe6c] ss:$16 sps:$4 sm:$0xff]  }
 0x235   :  { %10258 = vmatpush1.bf16.msra.mxu0 %v17158_v44  ;;  %11283 = vmatpush1.bf16.msra.mxu1 %v17161_v45  ;;  %v17251_v44 = vld [vmem:[#allocation4 + $0xe60] ss:$16 sps:$4 sm:$0xff]   ;;  %v17254_v45 = vld [vmem:[#allocation4 + $0xe68] ss:$16 sps:$4 sm:$0xff]  }
 0x236   :  { %10259 = vmatprep.subr.bf16.mxu0 %v17166_v46  ;;  %11284 = vmatprep.subr.bf16.mxu1 %v17169_v47  ;;  %v17259_v46 = vld [vmem:[#allocation4 + $0xe84] ss:$16 sps:$4 sm:$0xff]   ;;  %v17262_v47 = vld [vmem:[#allocation4 + $0xe8c] ss:$16 sps:$4 sm:$0xff]  }
 0x239   :  { %10260 = vmatpush1.bf16.msra.mxu0 %v17164_v48  ;;  %11285 = vmatpush1.bf16.msra.mxu1 %v17167_v49  ;;  %v17257_v48 = vld [vmem:[#allocation4 + $0xe80] ss:$16 sps:$4 sm:$0xff]   ;;  %v17260_v49 = vld [vmem:[#allocation4 + $0xe88] ss:$16 sps:$4 sm:$0xff]  }
 0x23a   :  { %10261 = vmatprep.subr.bf16.mxu0 %v17172_v50  ;;  %11286 = vmatprep.subr.bf16.mxu1 %v17175_v51  ;;  %v17265_v50 = vld [vmem:[#allocation4 + $0xea4] ss:$16 sps:$4 sm:$0xff]   ;;  %v17268_v51 = vld [vmem:[#allocation4 + $0xeac] ss:$16 sps:$4 sm:$0xff]  }
 0x23d   :  { %10262 = vmatpush1.bf16.msra.mxu0 %v17170_v52  ;;  %11287 = vmatpush1.bf16.msra.mxu1 %v17173_v53  ;;  %v17263_v52 = vld [vmem:[#allocation4 + $0xea0] ss:$16 sps:$4 sm:$0xff]   ;;  %v17266_v53 = vld [vmem:[#allocation4 + $0xea8] ss:$16 sps:$4 sm:$0xff]  }
 0x23e   :  { %10263 = vmatprep.subr.bf16.mxu0 %v17178_v54  ;;  %11288 = vmatprep.subr.bf16.mxu1 %v17181_v55  ;;  %v17271_v54 = vld [vmem:[#allocation4 + $0xec4] ss:$16 sps:$4 sm:$0xff]   ;;  %v17274_v55 = vld [vmem:[#allocation4 + $0xecc] ss:$16 sps:$4 sm:$0xff]  }
 0x241   :  { %10264 = vmatpush1.bf16.msra.mxu0 %v17176_v56  ;;  %11289 = vmatpush1.bf16.msra.mxu1 %v17179_v57  ;;  %v17269_v56 = vld [vmem:[#allocation4 + $0xec0] ss:$16 sps:$4 sm:$0xff]   ;;  %v17272_v57 = vld [vmem:[#allocation4 + $0xec8] ss:$16 sps:$4 sm:$0xff]  }
 0x242   :  { %10265 = vmatprep.subr.bf16.mxu0 %v17184_v58  ;;  %11290 = vmatprep.subr.bf16.mxu1 %v17187_v59  ;;  %v17277_v58 = vld [vmem:[#allocation4 + $0xee4] ss:$16 sps:$4 sm:$0xff]   ;;  %v17280_v59 = vld [vmem:[#allocation4 + $0xeec] ss:$16 sps:$4 sm:$0xff]  }
 0x245   :  { %10266 = vmatpush1.bf16.msra.mxu0 %v17182_v60  ;;  %11291 = vmatpush1.bf16.msra.mxu1 %v17185_v61  ;;  %v17275_v60 = vld [vmem:[#allocation4 + $0xee0] ss:$16 sps:$4 sm:$0xff]   ;;  %v17278_v61 = vld [vmem:[#allocation4 + $0xee8] ss:$16 sps:$4 sm:$0xff]  }
 0x246   :  { %10267 = vmatprep.subr.bf16.mxu0 %v17190_v62  ;;  %11292 = vmatprep.subr.bf16.mxu1 %v17193_v63  ;;  %v17283_v62 = vld [vmem:[#allocation4 + $0xf04] ss:$16 sps:$4 sm:$0xff]   ;;  %v17286_v63 = vld [vmem:[#allocation4 + $0xf0c] ss:$16 sps:$4 sm:$0xff]  }
 0x249   :  { %10268 = vmatpush1.bf16.msra.mxu0 %v17188_v0  ;;  %11293 = vmatpush1.bf16.msra.mxu1 %v17191_v1  ;;  %v17281_v0 = vld [vmem:[#allocation4 + $0xf00] ss:$16 sps:$4 sm:$0xff]   ;;  %v17284_v1 = vld [vmem:[#allocation4 + $0xf08] ss:$16 sps:$4 sm:$0xff]  }
 0x24a   :  { %10269 = vmatprep.subr.bf16.mxu0 %v17196_v2  ;;  %11294 = vmatprep.subr.bf16.mxu1 %v17199_v3  ;;  %v17289_v2 = vld [vmem:[#allocation4 + $0xf24] ss:$16 sps:$4 sm:$0xff]   ;;  %v17292_v3 = vld [vmem:[#allocation4 + $0xf2c] ss:$16 sps:$4 sm:$0xff]  }
 0x24d   :  { %10270 = vmatpush1.bf16.msra.mxu0 %v17194_v4  ;;  %11295 = vmatpush1.bf16.msra.mxu1 %v17197_v5  ;;  %v17287_v4 = vld [vmem:[#allocation4 + $0xf20] ss:$16 sps:$4 sm:$0xff]   ;;  %v17290_v5 = vld [vmem:[#allocation4 + $0xf28] ss:$16 sps:$4 sm:$0xff]  }
 0x24e   :  { %10271 = vmatprep.subr.bf16.mxu0 %v17202_v6  ;;  %11296 = vmatprep.subr.bf16.mxu1 %v17205_v7  ;;  %v17295_v6 = vld [vmem:[#allocation4 + $0xf44] ss:$16 sps:$4 sm:$0xff]   ;;  %v17298_v7 = vld [vmem:[#allocation4 + $0xf4c] ss:$16 sps:$4 sm:$0xff]  }
 0x251   :  { %10272 = vmatpush1.bf16.msra.mxu0 %v17200_v8  ;;  %11297 = vmatpush1.bf16.msra.mxu1 %v17203_v9  ;;  %v17293_v8 = vld [vmem:[#allocation4 + $0xf40] ss:$16 sps:$4 sm:$0xff]   ;;  %v17296_v9 = vld [vmem:[#allocation4 + $0xf48] ss:$16 sps:$4 sm:$0xff]  }
 0x252   :  { %10273 = vmatprep.subr.bf16.mxu0 %v17208_v10  ;;  %11298 = vmatprep.subr.bf16.mxu1 %v17211_v11  ;;  %v17301_v10 = vld [vmem:[#allocation4 + $0xf64] ss:$16 sps:$4 sm:$0xff]   ;;  %v17304_v11 = vld [vmem:[#allocation4 + $0xf6c] ss:$16 sps:$4 sm:$0xff]  }
 0x255   :  { %10274 = vmatpush1.bf16.msra.mxu0 %v17206_v12  ;;  %11299 = vmatpush1.bf16.msra.mxu1 %v17209_v13  ;;  %v17299_v12 = vld [vmem:[#allocation4 + $0xf60] ss:$16 sps:$4 sm:$0xff]   ;;  %v17302_v13 = vld [vmem:[#allocation4 + $0xf68] ss:$16 sps:$4 sm:$0xff]  }
 0x256   :  { %10275 = vmatprep.subr.bf16.mxu0 %v17214_v14  ;;  %11300 = vmatprep.subr.bf16.mxu1 %v17217_v15  ;;  %v17307_v14 = vld [vmem:[#allocation4 + $0xf84] ss:$16 sps:$4 sm:$0xff]   ;;  %v17310_v15 = vld [vmem:[#allocation4 + $0xf8c] ss:$16 sps:$4 sm:$0xff]  }
 0x259   :  { %10276 = vmatpush1.bf16.msra.mxu0 %v17212_v16  ;;  %11301 = vmatpush1.bf16.msra.mxu1 %v17215_v17  ;;  %v17305_v16 = vld [vmem:[#allocation4 + $0xf80] ss:$16 sps:$4 sm:$0xff]   ;;  %v17308_v17 = vld [vmem:[#allocation4 + $0xf88] ss:$16 sps:$4 sm:$0xff]  }
 0x25a   :  { %10277 = vmatprep.subr.bf16.mxu0 %v17220_v18  ;;  %11302 = vmatprep.subr.bf16.mxu1 %v17223_v19  ;;  %v17313_v18 = vld [vmem:[#allocation4 + $0xfa4] ss:$16 sps:$4 sm:$0xff]   ;;  %v17316_v19 = vld [vmem:[#allocation4 + $0xfac] ss:$16 sps:$4 sm:$0xff]  }
 0x25d   :  { %10278 = vmatpush1.bf16.msra.mxu0 %v17218_v20  ;;  %11303 = vmatpush1.bf16.msra.mxu1 %v17221_v21  ;;  %v17311_v20 = vld [vmem:[#allocation4 + $0xfa0] ss:$16 sps:$4 sm:$0xff]   ;;  %v17314_v21 = vld [vmem:[#allocation4 + $0xfa8] ss:$16 sps:$4 sm:$0xff]  }
 0x25e   :  { %10279 = vmatprep.subr.bf16.mxu0 %v17226_v22  ;;  %11304 = vmatprep.subr.bf16.mxu1 %v17229_v23  ;;  %v17319_v22 = vld [vmem:[#allocation4 + $0xfc4] ss:$16 sps:$4 sm:$0xff]   ;;  %v17322_v23 = vld [vmem:[#allocation4 + $0xfcc] ss:$16 sps:$4 sm:$0xff]  }
 0x261   :  { %10280 = vmatpush1.bf16.msra.mxu0 %v17224_v25  ;;  %11305 = vmatpush1.bf16.msra.mxu1 %v17227_v26  ;;  %v17320_v25 = vld [vmem:[#allocation4 + $0xfc8] ss:$16 sps:$4 sm:$0xff]   ;;  %v17325_v26 = vld [vmem:[#allocation4 + $0xfe4] ss:$16 sps:$4 sm:$0xff]  }
 0x262   :  { %10290 = vmatprep.subr.bf16.mxu0 %v17235_v27  ;;  %11315 = vmatprep.subr.bf16.mxu1 %v17238_v28  ;;  %v17328_v27 = vld [vmem:[#allocation4 + $0xfec] ss:$16 sps:$4 sm:$0xff]   ;;  %v17329_v28 = vld [vmem:[#allocation2 + $0x38] ss:$200 sps:$4 sm:$0xff]  }
 0x264   :  { %10282 = vmatmul.mubr.bf16.vlgmr.msra.gmra.mrb[0].mxu0 %v359_v30  ;;  %11307 = vmatmul.mubr.bf16.vlgmr.msra.gmra.mrb[0].mxu1 %v359_v30  ;;  %v17326_v30 = vld [vmem:[#allocation4 + $0xfe8] ss:$16 sps:$4 sm:$0xff]  }
 0x265   :  { %10291 = vmatpush1.bf16.msra.mxu0 %v17233_v31  ;;  %11316 = vmatpush1.bf16.msra.mxu1 %v17236_v32  ;;  %v17334_v31 = vld [vmem:[#allocation4 + $0x1004] ss:$16 sps:$4 sm:$0xff]   ;;  %v17337_v32 = vld [vmem:[#allocation4 + $0x100c] ss:$16 sps:$4 sm:$0xff]  }
 0x266   :  { %10292 = vmatprep.subr.bf16.mxu0 %v17241_v33  ;;  %11317 = vmatprep.subr.bf16.mxu1 %v17244_v34  ;;  %v17430_v33 = vld [vmem:[#allocation2 + $0x44] ss:$200 sps:$4 sm:$0xff]   ;;  %v361_v34 = vpack.c.bf16 %v17329_v28, %v17329_v28  ;;  %v17416_v28 = vld [vmem:[#allocation4 + $0x11c0] ss:$16 sps:$4 sm:$0xff]  }
 0x267   :  { %10322 = vmatprep.mubr.bf16.mxu0 %v362_v35  ;;  %11347 = vmatprep.mubr.bf16.mxu1 %v362_v35  ;;  %v17332_v35 = vld [vmem:[#allocation4 + $0x1000] ss:$16 sps:$4 sm:$0xff]  }
 0x269   :  { %10293 = vmatpush1.bf16.msra.mxu0 %v17239_v36  ;;  %11318 = vmatpush1.bf16.msra.mxu1 %v17242_v37  ;;  %v17335_v36 = vld [vmem:[#allocation4 + $0x1008] ss:$16 sps:$4 sm:$0xff]   ;;  %v17340_v37 = vld [vmem:[#allocation4 + $0x1024] ss:$16 sps:$4 sm:$0xff]  }
 0x26a   :  { %10294 = vmatprep.subr.bf16.mxu0 %v17247_v38  ;;  %11319 = vmatprep.subr.bf16.mxu1 %v17250_v39  ;;  %v17343_v38 = vld [vmem:[#allocation4 + $0x102c] ss:$16 sps:$4 sm:$0xff]   ;;  %v364_v39 = vpack.c.bf16 %v17430_v33, %v17430_v33  ;;  %v17422_v33 = vld [vmem:[#allocation4 + $0x11e0] ss:$16 sps:$4 sm:$0xff]  }
 0x26d   :  { %10295 = vmatpush1.bf16.msra.mxu0 %v17245_v40  ;;  %11320 = vmatpush1.bf16.msra.mxu1 %v17248_v41  ;;  %v17338_v40 = vld [vmem:[#allocation4 + $0x1020] ss:$16 sps:$4 sm:$0xff]   ;;  %v17341_v41 = vld [vmem:[#allocation4 + $0x1028] ss:$16 sps:$4 sm:$0xff]  }
 0x26e   :  { %10296 = vmatprep.subr.bf16.mxu0 %v17253_v42  ;;  %11321 = vmatprep.subr.bf16.mxu1 %v17256_v43  ;;  %v17346_v42 = vld [vmem:[#allocation4 + $0x1044] ss:$16 sps:$4 sm:$0xff]   ;;  %v17349_v43 = vld [vmem:[#allocation4 + $0x104c] ss:$16 sps:$4 sm:$0xff]  }
 0x271   :  { %10297 = vmatpush1.bf16.msra.mxu0 %v17251_v44  ;;  %11322 = vmatpush1.bf16.msra.mxu1 %v17254_v45  ;;  %v17344_v44 = vld [vmem:[#allocation4 + $0x1040] ss:$16 sps:$4 sm:$0xff]   ;;  %v17347_v45 = vld [vmem:[#allocation4 + $0x1048] ss:$16 sps:$4 sm:$0xff]  }
 0x272   :  { %10298 = vmatprep.subr.bf16.mxu0 %v17259_v46  ;;  %11323 = vmatprep.subr.bf16.mxu1 %v17262_v47  ;;  %v17352_v46 = vld [vmem:[#allocation4 + $0x1064] ss:$16 sps:$4 sm:$0xff]   ;;  %v17355_v47 = vld [vmem:[#allocation4 + $0x106c] ss:$16 sps:$4 sm:$0xff]  }
 0x275   :  { %10299 = vmatpush1.bf16.msra.mxu0 %v17257_v48  ;;  %11324 = vmatpush1.bf16.msra.mxu1 %v17260_v49  ;;  %v17350_v48 = vld [vmem:[#allocation4 + $0x1060] ss:$16 sps:$4 sm:$0xff]   ;;  %v17353_v49 = vld [vmem:[#allocation4 + $0x1068] ss:$16 sps:$4 sm:$0xff]  }
 0x276   :  { %10300 = vmatprep.subr.bf16.mxu0 %v17265_v50  ;;  %11325 = vmatprep.subr.bf16.mxu1 %v17268_v51  ;;  %v17358_v50 = vld [vmem:[#allocation4 + $0x1084] ss:$16 sps:$4 sm:$0xff]   ;;  %v17361_v51 = vld [vmem:[#allocation4 + $0x108c] ss:$16 sps:$4 sm:$0xff]  }
 0x279   :  { %10301 = vmatpush1.bf16.msra.mxu0 %v17263_v52  ;;  %11326 = vmatpush1.bf16.msra.mxu1 %v17266_v53  ;;  %v17356_v52 = vld [vmem:[#allocation4 + $0x1080] ss:$16 sps:$4 sm:$0xff]   ;;  %v17359_v53 = vld [vmem:[#allocation4 + $0x1088] ss:$16 sps:$4 sm:$0xff]  }
 0x27a   :  { %10302 = vmatprep.subr.bf16.mxu0 %v17271_v54  ;;  %11327 = vmatprep.subr.bf16.mxu1 %v17274_v55  ;;  %v17364_v54 = vld [vmem:[#allocation4 + $0x10a4] ss:$16 sps:$4 sm:$0xff]   ;;  %v17367_v55 = vld [vmem:[#allocation4 + $0x10ac] ss:$16 sps:$4 sm:$0xff]  }
 0x27d   :  { %10303 = vmatpush1.bf16.msra.mxu0 %v17269_v56  ;;  %11328 = vmatpush1.bf16.msra.mxu1 %v17272_v57  ;;  %v17362_v56 = vld [vmem:[#allocation4 + $0x10a0] ss:$16 sps:$4 sm:$0xff]   ;;  %v17365_v57 = vld [vmem:[#allocation4 + $0x10a8] ss:$16 sps:$4 sm:$0xff]  }
 0x27e   :  { %10304 = vmatprep.subr.bf16.mxu0 %v17277_v58  ;;  %11329 = vmatprep.subr.bf16.mxu1 %v17280_v59  ;;  %v17370_v58 = vld [vmem:[#allocation4 + $0x10c4] ss:$16 sps:$4 sm:$0xff]   ;;  %v17373_v59 = vld [vmem:[#allocation4 + $0x10cc] ss:$16 sps:$4 sm:$0xff]  }
 0x281   :  { %10305 = vmatpush1.bf16.msra.mxu0 %v17275_v60  ;;  %11330 = vmatpush1.bf16.msra.mxu1 %v17278_v61  ;;  %v17368_v60 = vld [vmem:[#allocation4 + $0x10c0] ss:$16 sps:$4 sm:$0xff]   ;;  %v17371_v61 = vld [vmem:[#allocation4 + $0x10c8] ss:$16 sps:$4 sm:$0xff]  }
 0x282   :  { %10306 = vmatprep.subr.bf16.mxu0 %v17283_v62  ;;  %11331 = vmatprep.subr.bf16.mxu1 %v17286_v63  ;;  %v17376_v62 = vld [vmem:[#allocation4 + $0x10e4] ss:$16 sps:$4 sm:$0xff]   ;;  %v17379_v63 = vld [vmem:[#allocation4 + $0x10ec] ss:$16 sps:$4 sm:$0xff]  }
 0x285   :  { %10307 = vmatpush1.bf16.msra.mxu0 %v17281_v0  ;;  %11332 = vmatpush1.bf16.msra.mxu1 %v17284_v1  ;;  %v17374_v0 = vld [vmem:[#allocation4 + $0x10e0] ss:$16 sps:$4 sm:$0xff]   ;;  %v17377_v1 = vld [vmem:[#allocation4 + $0x10e8] ss:$16 sps:$4 sm:$0xff]  }
 0x286   :  { %10308 = vmatprep.subr.bf16.mxu0 %v17289_v2  ;;  %11333 = vmatprep.subr.bf16.mxu1 %v17292_v3  ;;  %v17382_v2 = vld [vmem:[#allocation4 + $0x1104] ss:$16 sps:$4 sm:$0xff]   ;;  %v17385_v3 = vld [vmem:[#allocation4 + $0x110c] ss:$16 sps:$4 sm:$0xff]  }
 0x289   :  { %10309 = vmatpush1.bf16.msra.mxu0 %v17287_v4  ;;  %11334 = vmatpush1.bf16.msra.mxu1 %v17290_v5  ;;  %v17380_v4 = vld [vmem:[#allocation4 + $0x1100] ss:$16 sps:$4 sm:$0xff]   ;;  %v17383_v5 = vld [vmem:[#allocation4 + $0x1108] ss:$16 sps:$4 sm:$0xff]  }
 0x28a   :  { %10310 = vmatprep.subr.bf16.mxu0 %v17295_v6  ;;  %11335 = vmatprep.subr.bf16.mxu1 %v17298_v7  ;;  %v17388_v6 = vld [vmem:[#allocation4 + $0x1124] ss:$16 sps:$4 sm:$0xff]   ;;  %v17391_v7 = vld [vmem:[#allocation4 + $0x112c] ss:$16 sps:$4 sm:$0xff]  }
 0x28d   :  { %10311 = vmatpush1.bf16.msra.mxu0 %v17293_v8  ;;  %11336 = vmatpush1.bf16.msra.mxu1 %v17296_v9  ;;  %v17386_v8 = vld [vmem:[#allocation4 + $0x1120] ss:$16 sps:$4 sm:$0xff]   ;;  %v17389_v9 = vld [vmem:[#allocation4 + $0x1128] ss:$16 sps:$4 sm:$0xff]  }
 0x28e   :  { %10312 = vmatprep.subr.bf16.mxu0 %v17301_v10  ;;  %11337 = vmatprep.subr.bf16.mxu1 %v17304_v11  ;;  %v17394_v10 = vld [vmem:[#allocation4 + $0x1144] ss:$16 sps:$4 sm:$0xff]   ;;  %v17397_v11 = vld [vmem:[#allocation4 + $0x114c] ss:$16 sps:$4 sm:$0xff]  }
 0x291   :  { %10313 = vmatpush1.bf16.msra.mxu0 %v17299_v12  ;;  %11338 = vmatpush1.bf16.msra.mxu1 %v17302_v13  ;;  %v17392_v12 = vld [vmem:[#allocation4 + $0x1140] ss:$16 sps:$4 sm:$0xff]   ;;  %v17395_v13 = vld [vmem:[#allocation4 + $0x1148] ss:$16 sps:$4 sm:$0xff]  }
 0x292   :  { %10314 = vmatprep.subr.bf16.mxu0 %v17307_v14  ;;  %11339 = vmatprep.subr.bf16.mxu1 %v17310_v15  ;;  %v17400_v14 = vld [vmem:[#allocation4 + $0x1164] ss:$16 sps:$4 sm:$0xff]   ;;  %v17403_v15 = vld [vmem:[#allocation4 + $0x116c] ss:$16 sps:$4 sm:$0xff]  }
 0x295   :  { %10315 = vmatpush1.bf16.msra.mxu0 %v17305_v16  ;;  %11340 = vmatpush1.bf16.msra.mxu1 %v17308_v17  ;;  %v17398_v16 = vld [vmem:[#allocation4 + $0x1160] ss:$16 sps:$4 sm:$0xff]   ;;  %v17401_v17 = vld [vmem:[#allocation4 + $0x1168] ss:$16 sps:$4 sm:$0xff]  }
 0x296   :  { %10316 = vmatprep.subr.bf16.mxu0 %v17313_v18  ;;  %11341 = vmatprep.subr.bf16.mxu1 %v17316_v19  ;;  %v17406_v18 = vld [vmem:[#allocation4 + $0x1184] ss:$16 sps:$4 sm:$0xff]   ;;  %v17409_v19 = vld [vmem:[#allocation4 + $0x118c] ss:$16 sps:$4 sm:$0xff]  }
 0x299   :  { %10317 = vmatpush1.bf16.msra.mxu0 %v17311_v20  ;;  %11342 = vmatpush1.bf16.msra.mxu1 %v17314_v21  ;;  %v17404_v20 = vld [vmem:[#allocation4 + $0x1180] ss:$16 sps:$4 sm:$0xff]   ;;  %v17407_v21 = vld [vmem:[#allocation4 + $0x1188] ss:$16 sps:$4 sm:$0xff]  }
 0x29a   :  { %10318 = vmatprep.subr.bf16.mxu0 %v17319_v22  ;;  %11343 = vmatprep.subr.bf16.mxu1 %v17322_v23  ;;  %v17412_v22 = vld [vmem:[#allocation4 + $0x11a4] ss:$16 sps:$4 sm:$0xff]   ;;  %v17415_v23 = vld [vmem:[#allocation4 + $0x11ac] ss:$16 sps:$4 sm:$0xff]  }
 0x29d   :  { %10319 = vmatpush1.bf16.msra.mxu0 %v17317_v24  ;;  %11344 = vmatpush1.bf16.msra.mxu1 %v17320_v25  ;;  %v17410_v24 = vld [vmem:[#allocation4 + $0x11a0] ss:$16 sps:$4 sm:$0xff]   ;;  %v17413_v25 = vld [vmem:[#allocation4 + $0x11a8] ss:$16 sps:$4 sm:$0xff]  }
 0x29e   :  { %10320 = vmatprep.subr.bf16.mxu0 %v17325_v26  ;;  %11345 = vmatprep.subr.bf16.mxu1 %v17328_v27  ;;  %v17418_v26 = vld [vmem:[#allocation4 + $0x11c4] ss:$16 sps:$4 sm:$0xff]   ;;  %v17421_v27 = vld [vmem:[#allocation4 + $0x11cc] ss:$16 sps:$4 sm:$0xff]  }
 0x2a1   :  { %10321 = vmatpush1.bf16.msra.mxu0 %v17323_v29  ;;  %11346 = vmatpush1.bf16.msra.mxu1 %v17326_v30  ;;  %v17419_v29 = vld [vmem:[#allocation4 + $0x11c8] ss:$16 sps:$4 sm:$0xff]   ;;  %v17424_v30 = vld [vmem:[#allocation4 + $0x11e4] ss:$16 sps:$4 sm:$0xff]  }
 0x2a2   :  { %10331 = vmatprep.subr.bf16.mxu0 %v17334_v31  ;;  %11356 = vmatprep.subr.bf16.mxu1 %v17337_v32  ;;  %v17427_v31 = vld [vmem:[#allocation4 + $0x11ec] ss:$16 sps:$4 sm:$0xff]   ;;  %v17428_v32 = vld [vmem:[#allocation2 + $0x40] ss:$200 sps:$4 sm:$0xff]  }
 0x2a4   :  { %10323 = vmatmul.mubr.bf16.vlgmr.msra.gmra.mrb[0].mxu0 %v361_v34  ;;  %11348 = vmatmul.mubr.bf16.vlgmr.msra.gmra.mrb[0].mxu1 %v361_v34  ;;  %v17425_v34 = vld [vmem:[#allocation4 + $0x11e8] ss:$16 sps:$4 sm:$0xff]  }
 0x2a5   :  { %10332 = vmatpush1.bf16.msra.mxu0 %v17332_v35  ;;  %11357 = vmatpush1.bf16.msra.mxu1 %v17335_v36  ;;  %v17433_v35 = vld [vmem:[#allocation4 + $0x1204] ss:$16 sps:$4 sm:$0xff]   ;;  %v17436_v36 = vld [vmem:[#allocation4 + $0x120c] ss:$16 sps:$4 sm:$0xff]  }
 0x2a6   :  { %10333 = vmatprep.subr.bf16.mxu0 %v17340_v37  ;;  %11358 = vmatprep.subr.bf16.mxu1 %v17343_v38  ;;  %v17529_v37 = vld [vmem:[#allocation2 + $0x4c] ss:$200 sps:$4 sm:$0xff]   ;;  %v363_v38 = vpack.c.bf16 %v17428_v32, %v17428_v32  ;;  %v17515_v32 = vld [vmem:[#allocation4 + $0x13c0] ss:$16 sps:$4 sm:$0xff]  }
 0x2a7   :  { %10363 = vmatprep.mubr.bf16.mxu0 %v364_v39  ;;  %11388 = vmatprep.mubr.bf16.mxu1 %v364_v39  ;;  %v17431_v39 = vld [vmem:[#allocation4 + $0x1200] ss:$16 sps:$4 sm:$0xff]  }
 0x2a9   :  { %10334 = vmatpush1.bf16.msra.mxu0 %v17338_v40  ;;  %11359 = vmatpush1.bf16.msra.mxu1 %v17341_v41  ;;  %v17434_v40 = vld [vmem:[#allocation4 + $0x1208] ss:$16 sps:$4 sm:$0xff]   ;;  %v17439_v41 = vld [vmem:[#allocation4 + $0x1224] ss:$16 sps:$4 sm:$0xff]  }
 0x2aa   :  { %10335 = vmatprep.subr.bf16.mxu0 %v17346_v42  ;;  %11360 = vmatprep.subr.bf16.mxu1 %v17349_v43  ;;  %v17442_v42 = vld [vmem:[#allocation4 + $0x122c] ss:$16 sps:$4 sm:$0xff]   ;;  %v366_v43 = vpack.c.bf16 %v17529_v37, %v17529_v37  ;;  %v17521_v37 = vld [vmem:[#allocation4 + $0x13e0] ss:$16 sps:$4 sm:$0xff]  }
 0x2ad   :  { %10336 = vmatpush1.bf16.msra.mxu0 %v17344_v44  ;;  %11361 = vmatpush1.bf16.msra.mxu1 %v17347_v45  ;;  %v17437_v44 = vld [vmem:[#allocation4 + $0x1220] ss:$16 sps:$4 sm:$0xff]   ;;  %v17440_v45 = vld [vmem:[#allocation4 + $0x1228] ss:$16 sps:$4 sm:$0xff]  }
 0x2ae   :  { %10337 = vmatprep.subr.bf16.mxu0 %v17352_v46  ;;  %11362 = vmatprep.subr.bf16.mxu1 %v17355_v47  ;;  %v17445_v46 = vld [vmem:[#allocation4 + $0x1244] ss:$16 sps:$4 sm:$0xff]   ;;  %v17448_v47 = vld [vmem:[#allocation4 + $0x124c] ss:$16 sps:$4 sm:$0xff]  }
 0x2b1   :  { %10338 = vmatpush1.bf16.msra.mxu0 %v17350_v48  ;;  %11363 = vmatpush1.bf16.msra.mxu1 %v17353_v49  ;;  %v17443_v48 = vld [vmem:[#allocation4 + $0x1240] ss:$16 sps:$4 sm:$0xff]   ;;  %v17446_v49 = vld [vmem:[#allocation4 + $0x1248] ss:$16 sps:$4 sm:$0xff]  }
 0x2b2   :  { %10339 = vmatprep.subr.bf16.mxu0 %v17358_v50  ;;  %11364 = vmatprep.subr.bf16.mxu1 %v17361_v51  ;;  %v17451_v50 = vld [vmem:[#allocation4 + $0x1264] ss:$16 sps:$4 sm:$0xff]   ;;  %v17454_v51 = vld [vmem:[#allocation4 + $0x126c] ss:$16 sps:$4 sm:$0xff]  }
 0x2b5   :  { %10340 = vmatpush1.bf16.msra.mxu0 %v17356_v52  ;;  %11365 = vmatpush1.bf16.msra.mxu1 %v17359_v53  ;;  %v17449_v52 = vld [vmem:[#allocation4 + $0x1260] ss:$16 sps:$4 sm:$0xff]   ;;  %v17452_v53 = vld [vmem:[#allocation4 + $0x1268] ss:$16 sps:$4 sm:$0xff]  }
 0x2b6   :  { %10341 = vmatprep.subr.bf16.mxu0 %v17364_v54  ;;  %11366 = vmatprep.subr.bf16.mxu1 %v17367_v55  ;;  %v17457_v54 = vld [vmem:[#allocation4 + $0x1284] ss:$16 sps:$4 sm:$0xff]   ;;  %v17460_v55 = vld [vmem:[#allocation4 + $0x128c] ss:$16 sps:$4 sm:$0xff]  }
 0x2b9   :  { %10342 = vmatpush1.bf16.msra.mxu0 %v17362_v56  ;;  %11367 = vmatpush1.bf16.msra.mxu1 %v17365_v57  ;;  %v17455_v56 = vld [vmem:[#allocation4 + $0x1280] ss:$16 sps:$4 sm:$0xff]   ;;  %v17458_v57 = vld [vmem:[#allocation4 + $0x1288] ss:$16 sps:$4 sm:$0xff]  }
 0x2ba   :  { %10343 = vmatprep.subr.bf16.mxu0 %v17370_v58  ;;  %11368 = vmatprep.subr.bf16.mxu1 %v17373_v59  ;;  %v17463_v58 = vld [vmem:[#allocation4 + $0x12a4] ss:$16 sps:$4 sm:$0xff]   ;;  %v17466_v59 = vld [vmem:[#allocation4 + $0x12ac] ss:$16 sps:$4 sm:$0xff]  }
 0x2bd   :  { %10344 = vmatpush1.bf16.msra.mxu0 %v17368_v60  ;;  %11369 = vmatpush1.bf16.msra.mxu1 %v17371_v61  ;;  %v17461_v60 = vld [vmem:[#allocation4 + $0x12a0] ss:$16 sps:$4 sm:$0xff]   ;;  %v17464_v61 = vld [vmem:[#allocation4 + $0x12a8] ss:$16 sps:$4 sm:$0xff]  }
 0x2be   :  { %10345 = vmatprep.subr.bf16.mxu0 %v17376_v62  ;;  %11370 = vmatprep.subr.bf16.mxu1 %v17379_v63  ;;  %v17469_v62 = vld [vmem:[#allocation4 + $0x12c4] ss:$16 sps:$4 sm:$0xff]   ;;  %v17472_v63 = vld [vmem:[#allocation4 + $0x12cc] ss:$16 sps:$4 sm:$0xff]  }
 0x2c1   :  { %10346 = vmatpush1.bf16.msra.mxu0 %v17374_v0  ;;  %11371 = vmatpush1.bf16.msra.mxu1 %v17377_v1  ;;  %v17467_v0 = vld [vmem:[#allocation4 + $0x12c0] ss:$16 sps:$4 sm:$0xff]   ;;  %v17470_v1 = vld [vmem:[#allocation4 + $0x12c8] ss:$16 sps:$4 sm:$0xff]  }
 0x2c2   :  { %10347 = vmatprep.subr.bf16.mxu0 %v17382_v2  ;;  %11372 = vmatprep.subr.bf16.mxu1 %v17385_v3  ;;  %v17475_v2 = vld [vmem:[#allocation4 + $0x12e4] ss:$16 sps:$4 sm:$0xff]   ;;  %v17478_v3 = vld [vmem:[#allocation4 + $0x12ec] ss:$16 sps:$4 sm:$0xff]  }
 0x2c5   :  { %10348 = vmatpush1.bf16.msra.mxu0 %v17380_v4  ;;  %11373 = vmatpush1.bf16.msra.mxu1 %v17383_v5  ;;  %v17473_v4 = vld [vmem:[#allocation4 + $0x12e0] ss:$16 sps:$4 sm:$0xff]   ;;  %v17476_v5 = vld [vmem:[#allocation4 + $0x12e8] ss:$16 sps:$4 sm:$0xff]  }
 0x2c6   :  { %10349 = vmatprep.subr.bf16.mxu0 %v17388_v6  ;;  %11374 = vmatprep.subr.bf16.mxu1 %v17391_v7  ;;  %v17481_v6 = vld [vmem:[#allocation4 + $0x1304] ss:$16 sps:$4 sm:$0xff]   ;;  %v17484_v7 = vld [vmem:[#allocation4 + $0x130c] ss:$16 sps:$4 sm:$0xff]  }
 0x2c9   :  { %10350 = vmatpush1.bf16.msra.mxu0 %v17386_v8  ;;  %11375 = vmatpush1.bf16.msra.mxu1 %v17389_v9  ;;  %v17479_v8 = vld [vmem:[#allocation4 + $0x1300] ss:$16 sps:$4 sm:$0xff]   ;;  %v17482_v9 = vld [vmem:[#allocation4 + $0x1308] ss:$16 sps:$4 sm:$0xff]  }
 0x2ca   :  { %10351 = vmatprep.subr.bf16.mxu0 %v17394_v10  ;;  %11376 = vmatprep.subr.bf16.mxu1 %v17397_v11  ;;  %v17487_v10 = vld [vmem:[#allocation4 + $0x1324] ss:$16 sps:$4 sm:$0xff]   ;;  %v17490_v11 = vld [vmem:[#allocation4 + $0x132c] ss:$16 sps:$4 sm:$0xff]  }
 0x2cd   :  { %10352 = vmatpush1.bf16.msra.mxu0 %v17392_v12  ;;  %11377 = vmatpush1.bf16.msra.mxu1 %v17395_v13  ;;  %v17485_v12 = vld [vmem:[#allocation4 + $0x1320] ss:$16 sps:$4 sm:$0xff]   ;;  %v17488_v13 = vld [vmem:[#allocation4 + $0x1328] ss:$16 sps:$4 sm:$0xff]  }
 0x2ce   :  { %10353 = vmatprep.subr.bf16.mxu0 %v17400_v14  ;;  %11378 = vmatprep.subr.bf16.mxu1 %v17403_v15  ;;  %v17493_v14 = vld [vmem:[#allocation4 + $0x1344] ss:$16 sps:$4 sm:$0xff]   ;;  %v17496_v15 = vld [vmem:[#allocation4 + $0x134c] ss:$16 sps:$4 sm:$0xff]  }
 0x2d1   :  { %10354 = vmatpush1.bf16.msra.mxu0 %v17398_v16  ;;  %11379 = vmatpush1.bf16.msra.mxu1 %v17401_v17  ;;  %v17491_v16 = vld [vmem:[#allocation4 + $0x1340] ss:$16 sps:$4 sm:$0xff]   ;;  %v17494_v17 = vld [vmem:[#allocation4 + $0x1348] ss:$16 sps:$4 sm:$0xff]  }
 0x2d2   :  { %10355 = vmatprep.subr.bf16.mxu0 %v17406_v18  ;;  %11380 = vmatprep.subr.bf16.mxu1 %v17409_v19  ;;  %v17499_v18 = vld [vmem:[#allocation4 + $0x1364] ss:$16 sps:$4 sm:$0xff]   ;;  %v17502_v19 = vld [vmem:[#allocation4 + $0x136c] ss:$16 sps:$4 sm:$0xff]  }
 0x2d5   :  { %10356 = vmatpush1.bf16.msra.mxu0 %v17404_v20  ;;  %11381 = vmatpush1.bf16.msra.mxu1 %v17407_v21  ;;  %v17497_v20 = vld [vmem:[#allocation4 + $0x1360] ss:$16 sps:$4 sm:$0xff]   ;;  %v17500_v21 = vld [vmem:[#allocation4 + $0x1368] ss:$16 sps:$4 sm:$0xff]  }
 0x2d6   :  { %10357 = vmatprep.subr.bf16.mxu0 %v17412_v22  ;;  %11382 = vmatprep.subr.bf16.mxu1 %v17415_v23  ;;  %v17505_v22 = vld [vmem:[#allocation4 + $0x1384] ss:$16 sps:$4 sm:$0xff]   ;;  %v17508_v23 = vld [vmem:[#allocation4 + $0x138c] ss:$16 sps:$4 sm:$0xff]  }
 0x2d9   :  { %10358 = vmatpush1.bf16.msra.mxu0 %v17410_v24  ;;  %11383 = vmatpush1.bf16.msra.mxu1 %v17413_v25  ;;  %v17503_v24 = vld [vmem:[#allocation4 + $0x1380] ss:$16 sps:$4 sm:$0xff]   ;;  %v17506_v25 = vld [vmem:[#allocation4 + $0x1388] ss:$16 sps:$4 sm:$0xff]  }
 0x2da   :  { %10359 = vmatprep.subr.bf16.mxu0 %v17418_v26  ;;  %11384 = vmatprep.subr.bf16.mxu1 %v17421_v27  ;;  %v17511_v26 = vld [vmem:[#allocation4 + $0x13a4] ss:$16 sps:$4 sm:$0xff]   ;;  %v17514_v27 = vld [vmem:[#allocation4 + $0x13ac] ss:$16 sps:$4 sm:$0xff]  }
 0x2dd   :  { %10360 = vmatpush1.bf16.msra.mxu0 %v17416_v28  ;;  %11385 = vmatpush1.bf16.msra.mxu1 %v17419_v29  ;;  %v17509_v28 = vld [vmem:[#allocation4 + $0x13a0] ss:$16 sps:$4 sm:$0xff]   ;;  %v17512_v29 = vld [vmem:[#allocation4 + $0x13a8] ss:$16 sps:$4 sm:$0xff]  }
 0x2de   :  { %10361 = vmatprep.subr.bf16.mxu0 %v17424_v30  ;;  %11386 = vmatprep.subr.bf16.mxu1 %v17427_v31  ;;  %v17517_v30 = vld [vmem:[#allocation4 + $0x13c4] ss:$16 sps:$4 sm:$0xff]   ;;  %v17520_v31 = vld [vmem:[#allocation4 + $0x13cc] ss:$16 sps:$4 sm:$0xff]  }
 0x2e1   :  { %10362 = vmatpush1.bf16.msra.mxu0 %v17422_v33  ;;  %11387 = vmatpush1.bf16.msra.mxu1 %v17425_v34  ;;  %v17518_v33 = vld [vmem:[#allocation4 + $0x13c8] ss:$16 sps:$4 sm:$0xff]   ;;  %v17523_v34 = vld [vmem:[#allocation4 + $0x13e4] ss:$16 sps:$4 sm:$0xff]  }
 0x2e2   :  { %10372 = vmatprep.subr.bf16.mxu0 %v17433_v35  ;;  %11397 = vmatprep.subr.bf16.mxu1 %v17436_v36  ;;  %v17526_v35 = vld [vmem:[#allocation4 + $0x13ec] ss:$16 sps:$4 sm:$0xff]   ;;  %v17527_v36 = vld [vmem:[#allocation2 + $0x48] ss:$200 sps:$4 sm:$0xff]  }
 0x2e4   :  { %10364 = vmatmul.mubr.bf16.vlgmr.msra.gmra.mrb[0].mxu0 %v363_v38  ;;  %11389 = vmatmul.mubr.bf16.vlgmr.msra.gmra.mrb[0].mxu1 %v363_v38  ;;  %v17524_v38 = vld [vmem:[#allocation4 + $0x13e8] ss:$16 sps:$4 sm:$0xff]  }
 0x2e5   :  { %10373 = vmatpush1.bf16.msra.mxu0 %v17431_v39  ;;  %11398 = vmatpush1.bf16.msra.mxu1 %v17434_v40  ;;  %v17532_v39 = vld [vmem:[#allocation4 + $0x1404] ss:$16 sps:$4 sm:$0xff]   ;;  %v17535_v40 = vld [vmem:[#allocation4 + $0x140c] ss:$16 sps:$4 sm:$0xff]  }
 0x2e6   :  { %10374 = vmatprep.subr.bf16.mxu0 %v17439_v41  ;;  %11399 = vmatprep.subr.bf16.mxu1 %v17442_v42  ;;  %v17628_v41 = vld [vmem:[#allocation2 + $0x54] ss:$200 sps:$4 sm:$0xff]   ;;  %v365_v42 = vpack.c.bf16 %v17527_v36, %v17527_v36  ;;  %v17614_v36 = vld [vmem:[#allocation4 + $0x15c0] ss:$16 sps:$4 sm:$0xff]  }
 0x2e7   :  { %10404 = vmatprep.mubr.bf16.mxu0 %v366_v43  ;;  %11429 = vmatprep.mubr.bf16.mxu1 %v366_v43  ;;  %v17530_v43 = vld [vmem:[#allocation4 + $0x1400] ss:$16 sps:$4 sm:$0xff]  }
 0x2e9   :  { %10375 = vmatpush1.bf16.msra.mxu0 %v17437_v44  ;;  %11400 = vmatpush1.bf16.msra.mxu1 %v17440_v45  ;;  %v17533_v44 = vld [vmem:[#allocation4 + $0x1408] ss:$16 sps:$4 sm:$0xff]   ;;  %v17538_v45 = vld [vmem:[#allocation4 + $0x1424] ss:$16 sps:$4 sm:$0xff]  }
 0x2ea   :  { %10376 = vmatprep.subr.bf16.mxu0 %v17445_v46  ;;  %11401 = vmatprep.subr.bf16.mxu1 %v17448_v47  ;;  %v17541_v46 = vld [vmem:[#allocation4 + $0x142c] ss:$16 sps:$4 sm:$0xff]   ;;  %v368_v47 = vpack.c.bf16 %v17628_v41, %v17628_v41  ;;  %v17620_v41 = vld [vmem:[#allocation4 + $0x15e0] ss:$16 sps:$4 sm:$0xff]  }
 0x2ed   :  { %10377 = vmatpush1.bf16.msra.mxu0 %v17443_v48  ;;  %11402 = vmatpush1.bf16.msra.mxu1 %v17446_v49  ;;  %v17536_v48 = vld [vmem:[#allocation4 + $0x1420] ss:$16 sps:$4 sm:$0xff]   ;;  %v17539_v49 = vld [vmem:[#allocation4 + $0x1428] ss:$16 sps:$4 sm:$0xff]  }
 0x2ee   :  { %10378 = vmatprep.subr.bf16.mxu0 %v17451_v50  ;;  %11403 = vmatprep.subr.bf16.mxu1 %v17454_v51  ;;  %v17544_v50 = vld [vmem:[#allocation4 + $0x1444] ss:$16 sps:$4 sm:$0xff]   ;;  %v17547_v51 = vld [vmem:[#allocation4 + $0x144c] ss:$16 sps:$4 sm:$0xff]  }
 0x2f1   :  { %10379 = vmatpush1.bf16.msra.mxu0 %v17449_v52  ;;  %11404 = vmatpush1.bf16.msra.mxu1 %v17452_v53  ;;  %v17542_v52 = vld [vmem:[#allocation4 + $0x1440] ss:$16 sps:$4 sm:$0xff]   ;;  %v17545_v53 = vld [vmem:[#allocation4 + $0x1448] ss:$16 sps:$4 sm:$0xff]  }
 0x2f2   :  { %10380 = vmatprep.subr.bf16.mxu0 %v17457_v54  ;;  %11405 = vmatprep.subr.bf16.mxu1 %v17460_v55  ;;  %v17550_v54 = vld [vmem:[#allocation4 + $0x1464] ss:$16 sps:$4 sm:$0xff]   ;;  %v17553_v55 = vld [vmem:[#allocation4 + $0x146c] ss:$16 sps:$4 sm:$0xff]  }
 0x2f5   :  { %10381 = vmatpush1.bf16.msra.mxu0 %v17455_v56  ;;  %11406 = vmatpush1.bf16.msra.mxu1 %v17458_v57  ;;  %v17548_v56 = vld [vmem:[#allocation4 + $0x1460] ss:$16 sps:$4 sm:$0xff]   ;;  %v17551_v57 = vld [vmem:[#allocation4 + $0x1468] ss:$16 sps:$4 sm:$0xff]  }
 0x2f6   :  { %10382 = vmatprep.subr.bf16.mxu0 %v17463_v58  ;;  %11407 = vmatprep.subr.bf16.mxu1 %v17466_v59  ;;  %v17556_v58 = vld [vmem:[#allocation4 + $0x1484] ss:$16 sps:$4 sm:$0xff]   ;;  %v17559_v59 = vld [vmem:[#allocation4 + $0x148c] ss:$16 sps:$4 sm:$0xff]  }
 0x2f9   :  { %10383 = vmatpush1.bf16.msra.mxu0 %v17461_v60  ;;  %11408 = vmatpush1.bf16.msra.mxu1 %v17464_v61  ;;  %v17554_v60 = vld [vmem:[#allocation4 + $0x1480] ss:$16 sps:$4 sm:$0xff]   ;;  %v17557_v61 = vld [vmem:[#allocation4 + $0x1488] ss:$16 sps:$4 sm:$0xff]  }
 0x2fa   :  { %10384 = vmatprep.subr.bf16.mxu0 %v17469_v62  ;;  %11409 = vmatprep.subr.bf16.mxu1 %v17472_v63  ;;  %v17562_v62 = vld [vmem:[#allocation4 + $0x14a4] ss:$16 sps:$4 sm:$0xff]   ;;  %v17565_v63 = vld [vmem:[#allocation4 + $0x14ac] ss:$16 sps:$4 sm:$0xff]  }
 0x2fd   :  { %10385 = vmatpush1.bf16.msra.mxu0 %v17467_v0  ;;  %11410 = vmatpush1.bf16.msra.mxu1 %v17470_v1  ;;  %v17560_v0 = vld [vmem:[#allocation4 + $0x14a0] ss:$16 sps:$4 sm:$0xff]   ;;  %v17563_v1 = vld [vmem:[#allocation4 + $0x14a8] ss:$16 sps:$4 sm:$0xff]  }
 0x2fe   :  { %10386 = vmatprep.subr.bf16.mxu0 %v17475_v2  ;;  %11411 = vmatprep.subr.bf16.mxu1 %v17478_v3  ;;  %v17568_v2 = vld [vmem:[#allocation4 + $0x14c4] ss:$16 sps:$4 sm:$0xff]   ;;  %v17571_v3 = vld [vmem:[#allocation4 + $0x14cc] ss:$16 sps:$4 sm:$0xff]  }
 0x301   :  { %10387 = vmatpush1.bf16.msra.mxu0 %v17473_v4  ;;  %11412 = vmatpush1.bf16.msra.mxu1 %v17476_v5  ;;  %v17566_v4 = vld [vmem:[#allocation4 + $0x14c0] ss:$16 sps:$4 sm:$0xff]   ;;  %v17569_v5 = vld [vmem:[#allocation4 + $0x14c8] ss:$16 sps:$4 sm:$0xff]  }
 0x302   :  { %10388 = vmatprep.subr.bf16.mxu0 %v17481_v6  ;;  %11413 = vmatprep.subr.bf16.mxu1 %v17484_v7  ;;  %v17574_v6 = vld [vmem:[#allocation4 + $0x14e4] ss:$16 sps:$4 sm:$0xff]   ;;  %v17577_v7 = vld [vmem:[#allocation4 + $0x14ec] ss:$16 sps:$4 sm:$0xff]  }
 0x305   :  { %10389 = vmatpush1.bf16.msra.mxu0 %v17479_v8  ;;  %11414 = vmatpush1.bf16.msra.mxu1 %v17482_v9  ;;  %v17572_v8 = vld [vmem:[#allocation4 + $0x14e0] ss:$16 sps:$4 sm:$0xff]   ;;  %v17575_v9 = vld [vmem:[#allocation4 + $0x14e8] ss:$16 sps:$4 sm:$0xff]  }
 0x306   :  { %10390 = vmatprep.subr.bf16.mxu0 %v17487_v10  ;;  %11415 = vmatprep.subr.bf16.mxu1 %v17490_v11  ;;  %v17580_v10 = vld [vmem:[#allocation4 + $0x1504] ss:$16 sps:$4 sm:$0xff]   ;;  %v17583_v11 = vld [vmem:[#allocation4 + $0x150c] ss:$16 sps:$4 sm:$0xff]  }
 0x309   :  { %10391 = vmatpush1.bf16.msra.mxu0 %v17485_v12  ;;  %11416 = vmatpush1.bf16.msra.mxu1 %v17488_v13  ;;  %v17578_v12 = vld [vmem:[#allocation4 + $0x1500] ss:$16 sps:$4 sm:$0xff]   ;;  %v17581_v13 = vld [vmem:[#allocation4 + $0x1508] ss:$16 sps:$4 sm:$0xff]  }
 0x30a   :  { %10392 = vmatprep.subr.bf16.mxu0 %v17493_v14  ;;  %11417 = vmatprep.subr.bf16.mxu1 %v17496_v15  ;;  %v17586_v14 = vld [vmem:[#allocation4 + $0x1524] ss:$16 sps:$4 sm:$0xff]   ;;  %v17589_v15 = vld [vmem:[#allocation4 + $0x152c] ss:$16 sps:$4 sm:$0xff]  }
 0x30d   :  { %10393 = vmatpush1.bf16.msra.mxu0 %v17491_v16  ;;  %11418 = vmatpush1.bf16.msra.mxu1 %v17494_v17  ;;  %v17584_v16 = vld [vmem:[#allocation4 + $0x1520] ss:$16 sps:$4 sm:$0xff]   ;;  %v17587_v17 = vld [vmem:[#allocation4 + $0x1528] ss:$16 sps:$4 sm:$0xff]  }
 0x30e   :  { %10394 = vmatprep.subr.bf16.mxu0 %v17499_v18  ;;  %11419 = vmatprep.subr.bf16.mxu1 %v17502_v19  ;;  %v17592_v18 = vld [vmem:[#allocation4 + $0x1544] ss:$16 sps:$4 sm:$0xff]   ;;  %v17595_v19 = vld [vmem:[#allocation4 + $0x154c] ss:$16 sps:$4 sm:$0xff]  }
 0x311   :  { %10395 = vmatpush1.bf16.msra.mxu0 %v17497_v20  ;;  %11420 = vmatpush1.bf16.msra.mxu1 %v17500_v21  ;;  %v17590_v20 = vld [vmem:[#allocation4 + $0x1540] ss:$16 sps:$4 sm:$0xff]   ;;  %v17593_v21 = vld [vmem:[#allocation4 + $0x1548] ss:$16 sps:$4 sm:$0xff]  }
 0x312   :  { %10396 = vmatprep.subr.bf16.mxu0 %v17505_v22  ;;  %11421 = vmatprep.subr.bf16.mxu1 %v17508_v23  ;;  %v17598_v22 = vld [vmem:[#allocation4 + $0x1564] ss:$16 sps:$4 sm:$0xff]   ;;  %v17601_v23 = vld [vmem:[#allocation4 + $0x156c] ss:$16 sps:$4 sm:$0xff]  }
 0x315   :  { %10397 = vmatpush1.bf16.msra.mxu0 %v17503_v24  ;;  %11422 = vmatpush1.bf16.msra.mxu1 %v17506_v25  ;;  %v17596_v24 = vld [vmem:[#allocation4 + $0x1560] ss:$16 sps:$4 sm:$0xff]   ;;  %v17599_v25 = vld [vmem:[#allocation4 + $0x1568] ss:$16 sps:$4 sm:$0xff]  }
 0x316   :  { %10398 = vmatprep.subr.bf16.mxu0 %v17511_v26  ;;  %11423 = vmatprep.subr.bf16.mxu1 %v17514_v27  ;;  %v17604_v26 = vld [vmem:[#allocation4 + $0x1584] ss:$16 sps:$4 sm:$0xff]   ;;  %v17607_v27 = vld [vmem:[#allocation4 + $0x158c] ss:$16 sps:$4 sm:$0xff]  }
 0x319   :  { %10399 = vmatpush1.bf16.msra.mxu0 %v17509_v28  ;;  %11424 = vmatpush1.bf16.msra.mxu1 %v17512_v29  ;;  %v17602_v28 = vld [vmem:[#allocation4 + $0x1580] ss:$16 sps:$4 sm:$0xff]   ;;  %v17605_v29 = vld [vmem:[#allocation4 + $0x1588] ss:$16 sps:$4 sm:$0xff]  }
 0x31a   :  { %10400 = vmatprep.subr.bf16.mxu0 %v17517_v30  ;;  %11425 = vmatprep.subr.bf16.mxu1 %v17520_v31  ;;  %v17610_v30 = vld [vmem:[#allocation4 + $0x15a4] ss:$16 sps:$4 sm:$0xff]   ;;  %v17613_v31 = vld [vmem:[#allocation4 + $0x15ac] ss:$16 sps:$4 sm:$0xff]  }
 0x31d   :  { %10401 = vmatpush1.bf16.msra.mxu0 %v17515_v32  ;;  %11426 = vmatpush1.bf16.msra.mxu1 %v17518_v33  ;;  %v17608_v32 = vld [vmem:[#allocation4 + $0x15a0] ss:$16 sps:$4 sm:$0xff]   ;;  %v17611_v33 = vld [vmem:[#allocation4 + $0x15a8] ss:$16 sps:$4 sm:$0xff]  }
 0x31e   :  { %10402 = vmatprep.subr.bf16.mxu0 %v17523_v34  ;;  %11427 = vmatprep.subr.bf16.mxu1 %v17526_v35  ;;  %v17616_v34 = vld [vmem:[#allocation4 + $0x15c4] ss:$16 sps:$4 sm:$0xff]   ;;  %v17619_v35 = vld [vmem:[#allocation4 + $0x15cc] ss:$16 sps:$4 sm:$0xff]  }
 0x321   :  { %10403 = vmatpush1.bf16.msra.mxu0 %v17521_v37  ;;  %11428 = vmatpush1.bf16.msra.mxu1 %v17524_v38  ;;  %v17617_v37 = vld [vmem:[#allocation4 + $0x15c8] ss:$16 sps:$4 sm:$0xff]   ;;  %v17622_v38 = vld [vmem:[#allocation4 + $0x15e4] ss:$16 sps:$4 sm:$0xff]  }
 0x322   :  { %10413 = vmatprep.subr.bf16.mxu0 %v17532_v39  ;;  %11438 = vmatprep.subr.bf16.mxu1 %v17535_v40  ;;  %v17625_v39 = vld [vmem:[#allocation4 + $0x15ec] ss:$16 sps:$4 sm:$0xff]   ;;  %v17626_v40 = vld [vmem:[#allocation2 + $0x50] ss:$200 sps:$4 sm:$0xff]  }
 0x324   :  { %10405 = vmatmul.mubr.bf16.vlgmr.msra.gmra.mrb[0].mxu0 %v365_v42  ;;  %11430 = vmatmul.mubr.bf16.vlgmr.msra.gmra.mrb[0].mxu1 %v365_v42  ;;  %v17623_v42 = vld [vmem:[#allocation4 + $0x15e8] ss:$16 sps:$4 sm:$0xff]  }
 0x325   :  { %10414 = vmatpush1.bf16.msra.mxu0 %v17530_v43  ;;  %11439 = vmatpush1.bf16.msra.mxu1 %v17533_v44  ;;  %v17631_v43 = vld [vmem:[#allocation4 + $0x1604] ss:$16 sps:$4 sm:$0xff]   ;;  %v17634_v44 = vld [vmem:[#allocation4 + $0x160c] ss:$16 sps:$4 sm:$0xff]  }
 0x326   :  { %10415 = vmatprep.subr.bf16.mxu0 %v17538_v45  ;;  %11440 = vmatprep.subr.bf16.mxu1 %v17541_v46  ;;  %v17727_v45 = vld [vmem:[#allocation2 + $0x5c] ss:$200 sps:$4 sm:$0xff]   ;;  %v367_v46 = vpack.c.bf16 %v17626_v40, %v17626_v40  ;;  %v17713_v40 = vld [vmem:[#allocation4 + $0x17c0] ss:$16 sps:$4 sm:$0xff]  }
 0x327   :  { %10445 = vmatprep.mubr.bf16.mxu0 %v368_v47  ;;  %11470 = vmatprep.mubr.bf16.mxu1 %v368_v47  ;;  %v17629_v47 = vld [vmem:[#allocation4 + $0x1600] ss:$16 sps:$4 sm:$0xff]  }
 0x329   :  { %10416 = vmatpush1.bf16.msra.mxu0 %v17536_v48  ;;  %11441 = vmatpush1.bf16.msra.mxu1 %v17539_v49  ;;  %v17632_v48 = vld [vmem:[#allocation4 + $0x1608] ss:$16 sps:$4 sm:$0xff]   ;;  %v17637_v49 = vld [vmem:[#allocation4 + $0x1624] ss:$16 sps:$4 sm:$0xff]  }
 0x32a   :  { %10417 = vmatprep.subr.bf16.mxu0 %v17544_v50  ;;  %11442 = vmatprep.subr.bf16.mxu1 %v17547_v51  ;;  %v17640_v50 = vld [vmem:[#allocation4 + $0x162c] ss:$16 sps:$4 sm:$0xff]   ;;  %v370_v51 = vpack.c.bf16 %v17727_v45, %v17727_v45  ;;  %v17719_v45 = vld [vmem:[#allocation4 + $0x17e0] ss:$16 sps:$4 sm:$0xff]  }
 0x32d   :  { %10418 = vmatpush1.bf16.msra.mxu0 %v17542_v52  ;;  %11443 = vmatpush1.bf16.msra.mxu1 %v17545_v53  ;;  %v17635_v52 = vld [vmem:[#allocation4 + $0x1620] ss:$16 sps:$4 sm:$0xff]   ;;  %v17638_v53 = vld [vmem:[#allocation4 + $0x1628] ss:$16 sps:$4 sm:$0xff]  }
 0x32e   :  { %10419 = vmatprep.subr.bf16.mxu0 %v17550_v54  ;;  %11444 = vmatprep.subr.bf16.mxu1 %v17553_v55  ;;  %v17643_v54 = vld [vmem:[#allocation4 + $0x1644] ss:$16 sps:$4 sm:$0xff]   ;;  %v17646_v55 = vld [vmem:[#allocation4 + $0x164c] ss:$16 sps:$4 sm:$0xff]  }
 0x331   :  { %10420 = vmatpush1.bf16.msra.mxu0 %v17548_v56  ;;  %11445 = vmatpush1.bf16.msra.mxu1 %v17551_v57  ;;  %v17641_v56 = vld [vmem:[#allocation4 + $0x1640] ss:$16 sps:$4 sm:$0xff]   ;;  %v17644_v57 = vld [vmem:[#allocation4 + $0x1648] ss:$16 sps:$4 sm:$0xff]  }
 0x332   :  { %10421 = vmatprep.subr.bf16.mxu0 %v17556_v58  ;;  %11446 = vmatprep.subr.bf16.mxu1 %v17559_v59  ;;  %v17649_v58 = vld [vmem:[#allocation4 + $0x1664] ss:$16 sps:$4 sm:$0xff]   ;;  %v17652_v59 = vld [vmem:[#allocation4 + $0x166c] ss:$16 sps:$4 sm:$0xff]  }
 0x335   :  { %10422 = vmatpush1.bf16.msra.mxu0 %v17554_v60  ;;  %11447 = vmatpush1.bf16.msra.mxu1 %v17557_v61  ;;  %v17647_v60 = vld [vmem:[#allocation4 + $0x1660] ss:$16 sps:$4 sm:$0xff]   ;;  %v17650_v61 = vld [vmem:[#allocation4 + $0x1668] ss:$16 sps:$4 sm:$0xff]  }
 0x336   :  { %10423 = vmatprep.subr.bf16.mxu0 %v17562_v62  ;;  %11448 = vmatprep.subr.bf16.mxu1 %v17565_v63  ;;  %v17655_v62 = vld [vmem:[#allocation4 + $0x1684] ss:$16 sps:$4 sm:$0xff]   ;;  %v17658_v63 = vld [vmem:[#allocation4 + $0x168c] ss:$16 sps:$4 sm:$0xff]  }
 0x339   :  { %10424 = vmatpush1.bf16.msra.mxu0 %v17560_v0  ;;  %11449 = vmatpush1.bf16.msra.mxu1 %v17563_v1  ;;  %v17653_v0 = vld [vmem:[#allocation4 + $0x1680] ss:$16 sps:$4 sm:$0xff]   ;;  %v17656_v1 = vld [vmem:[#allocation4 + $0x1688] ss:$16 sps:$4 sm:$0xff]  }
 0x33a   :  { %10425 = vmatprep.subr.bf16.mxu0 %v17568_v2  ;;  %11450 = vmatprep.subr.bf16.mxu1 %v17571_v3  ;;  %v17661_v2 = vld [vmem:[#allocation4 + $0x16a4] ss:$16 sps:$4 sm:$0xff]   ;;  %v17664_v3 = vld [vmem:[#allocation4 + $0x16ac] ss:$16 sps:$4 sm:$0xff]  }
 0x33d   :  { %10426 = vmatpush1.bf16.msra.mxu0 %v17566_v4  ;;  %11451 = vmatpush1.bf16.msra.mxu1 %v17569_v5  ;;  %v17659_v4 = vld [vmem:[#allocation4 + $0x16a0] ss:$16 sps:$4 sm:$0xff]   ;;  %v17662_v5 = vld [vmem:[#allocation4 + $0x16a8] ss:$16 sps:$4 sm:$0xff]  }
 0x33e   :  { %10427 = vmatprep.subr.bf16.mxu0 %v17574_v6  ;;  %11452 = vmatprep.subr.bf16.mxu1 %v17577_v7  ;;  %v17667_v6 = vld [vmem:[#allocation4 + $0x16c4] ss:$16 sps:$4 sm:$0xff]   ;;  %v17670_v7 = vld [vmem:[#allocation4 + $0x16cc] ss:$16 sps:$4 sm:$0xff]  }
 0x341   :  { %10428 = vmatpush1.bf16.msra.mxu0 %v17572_v8  ;;  %11453 = vmatpush1.bf16.msra.mxu1 %v17575_v9  ;;  %v17665_v8 = vld [vmem:[#allocation4 + $0x16c0] ss:$16 sps:$4 sm:$0xff]   ;;  %v17668_v9 = vld [vmem:[#allocation4 + $0x16c8] ss:$16 sps:$4 sm:$0xff]  }
 0x342   :  { %10429 = vmatprep.subr.bf16.mxu0 %v17580_v10  ;;  %11454 = vmatprep.subr.bf16.mxu1 %v17583_v11  ;;  %v17673_v10 = vld [vmem:[#allocation4 + $0x16e4] ss:$16 sps:$4 sm:$0xff]   ;;  %v17676_v11 = vld [vmem:[#allocation4 + $0x16ec] ss:$16 sps:$4 sm:$0xff]  }
 0x345   :  { %10430 = vmatpush1.bf16.msra.mxu0 %v17578_v12  ;;  %11455 = vmatpush1.bf16.msra.mxu1 %v17581_v13  ;;  %v17671_v12 = vld [vmem:[#allocation4 + $0x16e0] ss:$16 sps:$4 sm:$0xff]   ;;  %v17674_v13 = vld [vmem:[#allocation4 + $0x16e8] ss:$16 sps:$4 sm:$0xff]  }
 0x346   :  { %10431 = vmatprep.subr.bf16.mxu0 %v17586_v14  ;;  %11456 = vmatprep.subr.bf16.mxu1 %v17589_v15  ;;  %v17679_v14 = vld [vmem:[#allocation4 + $0x1704] ss:$16 sps:$4 sm:$0xff]   ;;  %v17682_v15 = vld [vmem:[#allocation4 + $0x170c] ss:$16 sps:$4 sm:$0xff]  }
 0x349   :  { %10432 = vmatpush1.bf16.msra.mxu0 %v17584_v16  ;;  %11457 = vmatpush1.bf16.msra.mxu1 %v17587_v17  ;;  %v17677_v16 = vld [vmem:[#allocation4 + $0x1700] ss:$16 sps:$4 sm:$0xff]   ;;  %v17680_v17 = vld [vmem:[#allocation4 + $0x1708] ss:$16 sps:$4 sm:$0xff]  }
 0x34a   :  { %10433 = vmatprep.subr.bf16.mxu0 %v17592_v18  ;;  %11458 = vmatprep.subr.bf16.mxu1 %v17595_v19  ;;  %v17685_v18 = vld [vmem:[#allocation4 + $0x1724] ss:$16 sps:$4 sm:$0xff]   ;;  %v17688_v19 = vld [vmem:[#allocation4 + $0x172c] ss:$16 sps:$4 sm:$0xff]  }
 0x34d   :  { %10434 = vmatpush1.bf16.msra.mxu0 %v17590_v20  ;;  %11459 = vmatpush1.bf16.msra.mxu1 %v17593_v21  ;;  %v17683_v20 = vld [vmem:[#allocation4 + $0x1720] ss:$16 sps:$4 sm:$0xff]   ;;  %v17686_v21 = vld [vmem:[#allocation4 + $0x1728] ss:$16 sps:$4 sm:$0xff]  }
 0x34e   :  { %10435 = vmatprep.subr.bf16.mxu0 %v17598_v22  ;;  %11460 = vmatprep.subr.bf16.mxu1 %v17601_v23  ;;  %v17691_v22 = vld [vmem:[#allocation4 + $0x1744] ss:$16 sps:$4 sm:$0xff]   ;;  %v17694_v23 = vld [vmem:[#allocation4 + $0x174c] ss:$16 sps:$4 sm:$0xff]  }
 0x351   :  { %10436 = vmatpush1.bf16.msra.mxu0 %v17596_v24  ;;  %11461 = vmatpush1.bf16.msra.mxu1 %v17599_v25  ;;  %v17689_v24 = vld [vmem:[#allocation4 + $0x1740] ss:$16 sps:$4 sm:$0xff]   ;;  %v17692_v25 = vld [vmem:[#allocation4 + $0x1748] ss:$16 sps:$4 sm:$0xff]  }
 0x352   :  { %10437 = vmatprep.subr.bf16.mxu0 %v17604_v26  ;;  %11462 = vmatprep.subr.bf16.mxu1 %v17607_v27  ;;  %v17697_v26 = vld [vmem:[#allocation4 + $0x1764] ss:$16 sps:$4 sm:$0xff]   ;;  %v17700_v27 = vld [vmem:[#allocation4 + $0x176c] ss:$16 sps:$4 sm:$0xff]  }
 0x355   :  { %10438 = vmatpush1.bf16.msra.mxu0 %v17602_v28  ;;  %11463 = vmatpush1.bf16.msra.mxu1 %v17605_v29  ;;  %v17695_v28 = vld [vmem:[#allocation4 + $0x1760] ss:$16 sps:$4 sm:$0xff]   ;;  %v17698_v29 = vld [vmem:[#allocation4 + $0x1768] ss:$16 sps:$4 sm:$0xff]  }
 0x356   :  { %10439 = vmatprep.subr.bf16.mxu0 %v17610_v30  ;;  %11464 = vmatprep.subr.bf16.mxu1 %v17613_v31  ;;  %v17703_v30 = vld [vmem:[#allocation4 + $0x1784] ss:$16 sps:$4 sm:$0xff]   ;;  %v17706_v31 = vld [vmem:[#allocation4 + $0x178c] ss:$16 sps:$4 sm:$0xff]  }
 0x359   :  { %10440 = vmatpush1.bf16.msra.mxu0 %v17608_v32  ;;  %11465 = vmatpush1.bf16.msra.mxu1 %v17611_v33  ;;  %v17701_v32 = vld [vmem:[#allocation4 + $0x1780] ss:$16 sps:$4 sm:$0xff]   ;;  %v17704_v33 = vld [vmem:[#allocation4 + $0x1788] ss:$16 sps:$4 sm:$0xff]  }
 0x35a   :  { %10441 = vmatprep.subr.bf16.mxu0 %v17616_v34  ;;  %11466 = vmatprep.subr.bf16.mxu1 %v17619_v35  ;;  %v17709_v34 = vld [vmem:[#allocation4 + $0x17a4] ss:$16 sps:$4 sm:$0xff]   ;;  %v17712_v35 = vld [vmem:[#allocation4 + $0x17ac] ss:$16 sps:$4 sm:$0xff]  }
 0x35d   :  { %10442 = vmatpush1.bf16.msra.mxu0 %v17614_v36  ;;  %11467 = vmatpush1.bf16.msra.mxu1 %v17617_v37  ;;  %v17707_v36 = vld [vmem:[#allocation4 + $0x17a0] ss:$16 sps:$4 sm:$0xff]   ;;  %v17710_v37 = vld [vmem:[#allocation4 + $0x17a8] ss:$16 sps:$4 sm:$0xff]  }
 0x35e   :  { %10443 = vmatprep.subr.bf16.mxu0 %v17622_v38  ;;  %11468 = vmatprep.subr.bf16.mxu1 %v17625_v39  ;;  %v17715_v38 = vld [vmem:[#allocation4 + $0x17c4] ss:$16 sps:$4 sm:$0xff]   ;;  %v17718_v39 = vld [vmem:[#allocation4 + $0x17cc] ss:$16 sps:$4 sm:$0xff]  }
 0x361   :  { %10444 = vmatpush1.bf16.msra.mxu0 %v17620_v41  ;;  %11469 = vmatpush1.bf16.msra.mxu1 %v17623_v42  ;;  %v17716_v41 = vld [vmem:[#allocation4 + $0x17c8] ss:$16 sps:$4 sm:$0xff]   ;;  %v17721_v42 = vld [vmem:[#allocation4 + $0x17e4] ss:$16 sps:$4 sm:$0xff]  }
 0x362   :  { %10454 = vmatprep.subr.bf16.mxu0 %v17631_v43  ;;  %11479 = vmatprep.subr.bf16.mxu1 %v17634_v44  ;;  %v17724_v43 = vld [vmem:[#allocation4 + $0x17ec] ss:$16 sps:$4 sm:$0xff]   ;;  %v17725_v44 = vld [vmem:[#allocation2 + $0x58] ss:$200 sps:$4 sm:$0xff]  }
 0x364   :  { %10446 = vmatmul.mubr.bf16.vlgmr.msra.gmra.mrb[0].mxu0 %v367_v46  ;;  %11471 = vmatmul.mubr.bf16.vlgmr.msra.gmra.mrb[0].mxu1 %v367_v46  ;;  %v17722_v46 = vld [vmem:[#allocation4 + $0x17e8] ss:$16 sps:$4 sm:$0xff]  }
 0x365   :  { %10455 = vmatpush1.bf16.msra.mxu0 %v17629_v47  ;;  %11480 = vmatpush1.bf16.msra.mxu1 %v17632_v48  ;;  %v17730_v47 = vld [vmem:[#allocation4 + $0x1804] ss:$16 sps:$4 sm:$0xff]   ;;  %v17733_v48 = vld [vmem:[#allocation4 + $0x180c] ss:$16 sps:$4 sm:$0xff]  }
 0x366   :  { %10456 = vmatprep.subr.bf16.mxu0 %v17637_v49  ;;  %11481 = vmatprep.subr.bf16.mxu1 %v17640_v50  ;;  %v17826_v49 = vld [vmem:[#allocation2 + $0x64] ss:$200 sps:$4 sm:$0xff]   ;;  %v369_v50 = vpack.c.bf16 %v17725_v44, %v17725_v44  ;;  %v17812_v44 = vld [vmem:[#allocation4 + $0x19c0] ss:$16 sps:$4 sm:$0xff]  }
 0x367   :  { %10486 = vmatprep.mubr.bf16.mxu0 %v370_v51  ;;  %11511 = vmatprep.mubr.bf16.mxu1 %v370_v51  ;;  %v17728_v51 = vld [vmem:[#allocation4 + $0x1800] ss:$16 sps:$4 sm:$0xff]  }
 0x369   :  { %10457 = vmatpush1.bf16.msra.mxu0 %v17635_v52  ;;  %11482 = vmatpush1.bf16.msra.mxu1 %v17638_v53  ;;  %v17731_v52 = vld [vmem:[#allocation4 + $0x1808] ss:$16 sps:$4 sm:$0xff]   ;;  %v17736_v53 = vld [vmem:[#allocation4 + $0x1824] ss:$16 sps:$4 sm:$0xff]  }
 0x36a   :  { %10458 = vmatprep.subr.bf16.mxu0 %v17643_v54  ;;  %11483 = vmatprep.subr.bf16.mxu1 %v17646_v55  ;;  %v17739_v54 = vld [vmem:[#allocation4 + $0x182c] ss:$16 sps:$4 sm:$0xff]   ;;  %v372_v55 = vpack.c.bf16 %v17826_v49, %v17826_v49  ;;  %v17818_v49 = vld [vmem:[#allocation4 + $0x19e0] ss:$16 sps:$4 sm:$0xff]  }
 0x36d   :  { %10459 = vmatpush1.bf16.msra.mxu0 %v17641_v56  ;;  %11484 = vmatpush1.bf16.msra.mxu1 %v17644_v57  ;;  %v17734_v56 = vld [vmem:[#allocation4 + $0x1820] ss:$16 sps:$4 sm:$0xff]   ;;  %v17737_v57 = vld [vmem:[#allocation4 + $0x1828] ss:$16 sps:$4 sm:$0xff]  }
 0x36e   :  { %10460 = vmatprep.subr.bf16.mxu0 %v17649_v58  ;;  %11485 = vmatprep.subr.bf16.mxu1 %v17652_v59  ;;  %v17742_v58 = vld [vmem:[#allocation4 + $0x1844] ss:$16 sps:$4 sm:$0xff]   ;;  %v17745_v59 = vld [vmem:[#allocation4 + $0x184c] ss:$16 sps:$4 sm:$0xff]  }
 0x371   :  { %10461 = vmatpush1.bf16.msra.mxu0 %v17647_v60  ;;  %11486 = vmatpush1.bf16.msra.mxu1 %v17650_v61  ;;  %v17740_v60 = vld [vmem:[#allocation4 + $0x1840] ss:$16 sps:$4 sm:$0xff]   ;;  %v17743_v61 = vld [vmem:[#allocation4 + $0x1848] ss:$16 sps:$4 sm:$0xff]  }
 0x372   :  { %10462 = vmatprep.subr.bf16.mxu0 %v17655_v62  ;;  %11487 = vmatprep.subr.bf16.mxu1 %v17658_v63  ;;  %v17748_v62 = vld [vmem:[#allocation4 + $0x1864] ss:$16 sps:$4 sm:$0xff]   ;;  %v17751_v63 = vld [vmem:[#allocation4 + $0x186c] ss:$16 sps:$4 sm:$0xff]  }
 0x375   :  { %10463 = vmatpush1.bf16.msra.mxu0 %v17653_v0  ;;  %11488 = vmatpush1.bf16.msra.mxu1 %v17656_v1  ;;  %v17746_v0 = vld [vmem:[#allocation4 + $0x1860] ss:$16 sps:$4 sm:$0xff]   ;;  %v17749_v1 = vld [vmem:[#allocation4 + $0x1868] ss:$16 sps:$4 sm:$0xff]  }
 0x376   :  { %10464 = vmatprep.subr.bf16.mxu0 %v17661_v2  ;;  %11489 = vmatprep.subr.bf16.mxu1 %v17664_v3  ;;  %v17754_v2 = vld [vmem:[#allocation4 + $0x1884] ss:$16 sps:$4 sm:$0xff]   ;;  %v17757_v3 = vld [vmem:[#allocation4 + $0x188c] ss:$16 sps:$4 sm:$0xff]  }
 0x379   :  { %10465 = vmatpush1.bf16.msra.mxu0 %v17659_v4  ;;  %11490 = vmatpush1.bf16.msra.mxu1 %v17662_v5  ;;  %v17752_v4 = vld [vmem:[#allocation4 + $0x1880] ss:$16 sps:$4 sm:$0xff]   ;;  %v17755_v5 = vld [vmem:[#allocation4 + $0x1888] ss:$16 sps:$4 sm:$0xff]  }
 0x37a   :  { %10466 = vmatprep.subr.bf16.mxu0 %v17667_v6  ;;  %11491 = vmatprep.subr.bf16.mxu1 %v17670_v7  ;;  %v17760_v6 = vld [vmem:[#allocation4 + $0x18a4] ss:$16 sps:$4 sm:$0xff]   ;;  %v17763_v7 = vld [vmem:[#allocation4 + $0x18ac] ss:$16 sps:$4 sm:$0xff]  }
 0x37d   :  { %10467 = vmatpush1.bf16.msra.mxu0 %v17665_v8  ;;  %11492 = vmatpush1.bf16.msra.mxu1 %v17668_v9  ;;  %v17758_v8 = vld [vmem:[#allocation4 + $0x18a0] ss:$16 sps:$4 sm:$0xff]   ;;  %v17761_v9 = vld [vmem:[#allocation4 + $0x18a8] ss:$16 sps:$4 sm:$0xff]  }
 0x37e   :  { %10468 = vmatprep.subr.bf16.mxu0 %v17673_v10  ;;  %11493 = vmatprep.subr.bf16.mxu1 %v17676_v11  ;;  %v17766_v10 = vld [vmem:[#allocation4 + $0x18c4] ss:$16 sps:$4 sm:$0xff]   ;;  %v17769_v11 = vld [vmem:[#allocation4 + $0x18cc] ss:$16 sps:$4 sm:$0xff]  }
 0x381   :  { %10469 = vmatpush1.bf16.msra.mxu0 %v17671_v12  ;;  %11494 = vmatpush1.bf16.msra.mxu1 %v17674_v13  ;;  %v17764_v12 = vld [vmem:[#allocation4 + $0x18c0] ss:$16 sps:$4 sm:$0xff]   ;;  %v17767_v13 = vld [vmem:[#allocation4 + $0x18c8] ss:$16 sps:$4 sm:$0xff]  }
 0x382   :  { %10470 = vmatprep.subr.bf16.mxu0 %v17679_v14  ;;  %11495 = vmatprep.subr.bf16.mxu1 %v17682_v15  ;;  %v17772_v14 = vld [vmem:[#allocation4 + $0x18e4] ss:$16 sps:$4 sm:$0xff]   ;;  %v17775_v15 = vld [vmem:[#allocation4 + $0x18ec] ss:$16 sps:$4 sm:$0xff]  }
 0x385   :  { %10471 = vmatpush1.bf16.msra.mxu0 %v17677_v16  ;;  %11496 = vmatpush1.bf16.msra.mxu1 %v17680_v17  ;;  %v17770_v16 = vld [vmem:[#allocation4 + $0x18e0] ss:$16 sps:$4 sm:$0xff]   ;;  %v17773_v17 = vld [vmem:[#allocation4 + $0x18e8] ss:$16 sps:$4 sm:$0xff]  }
 0x386   :  { %10472 = vmatprep.subr.bf16.mxu0 %v17685_v18  ;;  %11497 = vmatprep.subr.bf16.mxu1 %v17688_v19  ;;  %v17778_v18 = vld [vmem:[#allocation4 + $0x1904] ss:$16 sps:$4 sm:$0xff]   ;;  %v17781_v19 = vld [vmem:[#allocation4 + $0x190c] ss:$16 sps:$4 sm:$0xff]  }
 0x389   :  { %10473 = vmatpush1.bf16.msra.mxu0 %v17683_v20  ;;  %11498 = vmatpush1.bf16.msra.mxu1 %v17686_v21  ;;  %v17776_v20 = vld [vmem:[#allocation4 + $0x1900] ss:$16 sps:$4 sm:$0xff]   ;;  %v17779_v21 = vld [vmem:[#allocation4 + $0x1908] ss:$16 sps:$4 sm:$0xff]  }
 0x38a   :  { %10474 = vmatprep.subr.bf16.mxu0 %v17691_v22  ;;  %11499 = vmatprep.subr.bf16.mxu1 %v17694_v23  ;;  %v17784_v22 = vld [vmem:[#allocation4 + $0x1924] ss:$16 sps:$4 sm:$0xff]   ;;  %v17787_v23 = vld [vmem:[#allocation4 + $0x192c] ss:$16 sps:$4 sm:$0xff]  }
 0x38d   :  { %10475 = vmatpush1.bf16.msra.mxu0 %v17689_v24  ;;  %11500 = vmatpush1.bf16.msra.mxu1 %v17692_v25  ;;  %v17782_v24 = vld [vmem:[#allocation4 + $0x1920] ss:$16 sps:$4 sm:$0xff]   ;;  %v17785_v25 = vld [vmem:[#allocation4 + $0x1928] ss:$16 sps:$4 sm:$0xff]  }
 0x38e   :  { %10476 = vmatprep.subr.bf16.mxu0 %v17697_v26  ;;  %11501 = vmatprep.subr.bf16.mxu1 %v17700_v27  ;;  %v17790_v26 = vld [vmem:[#allocation4 + $0x1944] ss:$16 sps:$4 sm:$0xff]   ;;  %v17793_v27 = vld [vmem:[#allocation4 + $0x194c] ss:$16 sps:$4 sm:$0xff]  }
 0x391   :  { %10477 = vmatpush1.bf16.msra.mxu0 %v17695_v28  ;;  %11502 = vmatpush1.bf16.msra.mxu1 %v17698_v29  ;;  %v17788_v28 = vld [vmem:[#allocation4 + $0x1940] ss:$16 sps:$4 sm:$0xff]   ;;  %v17791_v29 = vld [vmem:[#allocation4 + $0x1948] ss:$16 sps:$4 sm:$0xff]  }
 0x392   :  { %10478 = vmatprep.subr.bf16.mxu0 %v17703_v30  ;;  %11503 = vmatprep.subr.bf16.mxu1 %v17706_v31  ;;  %v17796_v30 = vld [vmem:[#allocation4 + $0x1964] ss:$16 sps:$4 sm:$0xff]   ;;  %v17799_v31 = vld [vmem:[#allocation4 + $0x196c] ss:$16 sps:$4 sm:$0xff]  }
 0x395   :  { %10479 = vmatpush1.bf16.msra.mxu0 %v17701_v32  ;;  %11504 = vmatpush1.bf16.msra.mxu1 %v17704_v33  ;;  %v17794_v32 = vld [vmem:[#allocation4 + $0x1960] ss:$16 sps:$4 sm:$0xff]   ;;  %v17797_v33 = vld [vmem:[#allocation4 + $0x1968] ss:$16 sps:$4 sm:$0xff]  }
 0x396   :  { %10480 = vmatprep.subr.bf16.mxu0 %v17709_v34  ;;  %11505 = vmatprep.subr.bf16.mxu1 %v17712_v35  ;;  %v17802_v34 = vld [vmem:[#allocation4 + $0x1984] ss:$16 sps:$4 sm:$0xff]   ;;  %v17805_v35 = vld [vmem:[#allocation4 + $0x198c] ss:$16 sps:$4 sm:$0xff]  }
 0x399   :  { %10481 = vmatpush1.bf16.msra.mxu0 %v17707_v36  ;;  %11506 = vmatpush1.bf16.msra.mxu1 %v17710_v37  ;;  %v17800_v36 = vld [vmem:[#allocation4 + $0x1980] ss:$16 sps:$4 sm:$0xff]   ;;  %v17803_v37 = vld [vmem:[#allocation4 + $0x1988] ss:$16 sps:$4 sm:$0xff]  }
 0x39a   :  { %10482 = vmatprep.subr.bf16.mxu0 %v17715_v38  ;;  %11507 = vmatprep.subr.bf16.mxu1 %v17718_v39  ;;  %v17808_v38 = vld [vmem:[#allocation4 + $0x19a4] ss:$16 sps:$4 sm:$0xff]   ;;  %v17811_v39 = vld [vmem:[#allocation4 + $0x19ac] ss:$16 sps:$4 sm:$0xff]  }
 0x39d   :  { %10483 = vmatpush1.bf16.msra.mxu0 %v17713_v40  ;;  %11508 = vmatpush1.bf16.msra.mxu1 %v17716_v41  ;;  %v17806_v40 = vld [vmem:[#allocation4 + $0x19a0] ss:$16 sps:$4 sm:$0xff]   ;;  %v17809_v41 = vld [vmem:[#allocation4 + $0x19a8] ss:$16 sps:$4 sm:$0xff]  }
 0x39e   :  { %10484 = vmatprep.subr.bf16.mxu0 %v17721_v42  ;;  %11509 = vmatprep.subr.bf16.mxu1 %v17724_v43  ;;  %v17814_v42 = vld [vmem:[#allocation4 + $0x19c4] ss:$16 sps:$4 sm:$0xff]   ;;  %v17817_v43 = vld [vmem:[#allocation4 + $0x19cc] ss:$16 sps:$4 sm:$0xff]  }
 0x3a1   :  { %10485 = vmatpush1.bf16.msra.mxu0 %v17719_v45  ;;  %11510 = vmatpush1.bf16.msra.mxu1 %v17722_v46  ;;  %v17815_v45 = vld [vmem:[#allocation4 + $0x19c8] ss:$16 sps:$4 sm:$0xff]   ;;  %v17820_v46 = vld [vmem:[#allocation4 + $0x19e4] ss:$16 sps:$4 sm:$0xff]  }
 0x3a2   :  { %10495 = vmatprep.subr.bf16.mxu0 %v17730_v47  ;;  %11520 = vmatprep.subr.bf16.mxu1 %v17733_v48  ;;  %v17823_v47 = vld [vmem:[#allocation4 + $0x19ec] ss:$16 sps:$4 sm:$0xff]   ;;  %v17824_v48 = vld [vmem:[#allocation2 + $0x60] ss:$200 sps:$4 sm:$0xff]  }
 0x3a4   :  { %10487 = vmatmul.mubr.bf16.vlgmr.msra.gmra.mrb[0].mxu0 %v369_v50  ;;  %11512 = vmatmul.mubr.bf16.vlgmr.msra.gmra.mrb[0].mxu1 %v369_v50  ;;  %v17821_v50 = vld [vmem:[#allocation4 + $0x19e8] ss:$16 sps:$4 sm:$0xff]  }
 0x3a5   :  { %10496 = vmatpush1.bf16.msra.mxu0 %v17728_v51  ;;  %11521 = vmatpush1.bf16.msra.mxu1 %v17731_v52  ;;  %v17829_v51 = vld [vmem:[#allocation4 + $0x1a04] ss:$16 sps:$4 sm:$0xff]   ;;  %v17832_v52 = vld [vmem:[#allocation4 + $0x1a0c] ss:$16 sps:$4 sm:$0xff]  }
 0x3a6   :  { %10497 = vmatprep.subr.bf16.mxu0 %v17736_v53  ;;  %11522 = vmatprep.subr.bf16.mxu1 %v17739_v54  ;;  %v17925_v53 = vld [vmem:[#allocation2 + $0x6c] ss:$200 sps:$4 sm:$0xff]   ;;  %v371_v54 = vpack.c.bf16 %v17824_v48, %v17824_v48  ;;  %v17911_v48 = vld [vmem:[#allocation4 + $0x1bc0] ss:$16 sps:$4 sm:$0xff]  }
 0x3a7   :  { %10527 = vmatprep.mubr.bf16.mxu0 %v372_v55  ;;  %11552 = vmatprep.mubr.bf16.mxu1 %v372_v55  ;;  %v17827_v55 = vld [vmem:[#allocation4 + $0x1a00] ss:$16 sps:$4 sm:$0xff]  }
 0x3a9   :  { %10498 = vmatpush1.bf16.msra.mxu0 %v17734_v56  ;;  %11523 = vmatpush1.bf16.msra.mxu1 %v17737_v57  ;;  %v17830_v56 = vld [vmem:[#allocation4 + $0x1a08] ss:$16 sps:$4 sm:$0xff]   ;;  %v17835_v57 = vld [vmem:[#allocation4 + $0x1a24] ss:$16 sps:$4 sm:$0xff]  }
 0x3aa   :  { %10499 = vmatprep.subr.bf16.mxu0 %v17742_v58  ;;  %11524 = vmatprep.subr.bf16.mxu1 %v17745_v59  ;;  %v17838_v58 = vld [vmem:[#allocation4 + $0x1a2c] ss:$16 sps:$4 sm:$0xff]   ;;  %v374_v59 = vpack.c.bf16 %v17925_v53, %v17925_v53  ;;  %v17917_v53 = vld [vmem:[#allocation4 + $0x1be0] ss:$16 sps:$4 sm:$0xff]  }
 0x3ad   :  { %10500 = vmatpush1.bf16.msra.mxu0 %v17740_v60  ;;  %11525 = vmatpush1.bf16.msra.mxu1 %v17743_v61  ;;  %v17833_v60 = vld [vmem:[#allocation4 + $0x1a20] ss:$16 sps:$4 sm:$0xff]   ;;  %v17836_v61 = vld [vmem:[#allocation4 + $0x1a28] ss:$16 sps:$4 sm:$0xff]  }
 0x3ae   :  { %10501 = vmatprep.subr.bf16.mxu0 %v17748_v62  ;;  %11526 = vmatprep.subr.bf16.mxu1 %v17751_v63  ;;  %v17841_v62 = vld [vmem:[#allocation4 + $0x1a44] ss:$16 sps:$4 sm:$0xff]   ;;  %v17844_v63 = vld [vmem:[#allocation4 + $0x1a4c] ss:$16 sps:$4 sm:$0xff]  }
 0x3b1   :  { %10502 = vmatpush1.bf16.msra.mxu0 %v17746_v0  ;;  %11527 = vmatpush1.bf16.msra.mxu1 %v17749_v1  ;;  %v17839_v0 = vld [vmem:[#allocation4 + $0x1a40] ss:$16 sps:$4 sm:$0xff]   ;;  %v17842_v1 = vld [vmem:[#allocation4 + $0x1a48] ss:$16 sps:$4 sm:$0xff]  }
 0x3b2   :  { %10503 = vmatprep.subr.bf16.mxu0 %v17754_v2  ;;  %11528 = vmatprep.subr.bf16.mxu1 %v17757_v3  ;;  %v17847_v2 = vld [vmem:[#allocation4 + $0x1a64] ss:$16 sps:$4 sm:$0xff]   ;;  %v17850_v3 = vld [vmem:[#allocation4 + $0x1a6c] ss:$16 sps:$4 sm:$0xff]  }
 0x3b5   :  { %10504 = vmatpush1.bf16.msra.mxu0 %v17752_v4  ;;  %11529 = vmatpush1.bf16.msra.mxu1 %v17755_v5  ;;  %v17845_v4 = vld [vmem:[#allocation4 + $0x1a60] ss:$16 sps:$4 sm:$0xff]   ;;  %v17848_v5 = vld [vmem:[#allocation4 + $0x1a68] ss:$16 sps:$4 sm:$0xff]  }
 0x3b6   :  { %10505 = vmatprep.subr.bf16.mxu0 %v17760_v6  ;;  %11530 = vmatprep.subr.bf16.mxu1 %v17763_v7  ;;  %v17853_v6 = vld [vmem:[#allocation4 + $0x1a84] ss:$16 sps:$4 sm:$0xff]   ;;  %v17856_v7 = vld [vmem:[#allocation4 + $0x1a8c] ss:$16 sps:$4 sm:$0xff]  }
 0x3b9   :  { %10506 = vmatpush1.bf16.msra.mxu0 %v17758_v8  ;;  %11531 = vmatpush1.bf16.msra.mxu1 %v17761_v9  ;;  %v17851_v8 = vld [vmem:[#allocation4 + $0x1a80] ss:$16 sps:$4 sm:$0xff]   ;;  %v17854_v9 = vld [vmem:[#allocation4 + $0x1a88] ss:$16 sps:$4 sm:$0xff]  }
 0x3ba   :  { %10507 = vmatprep.subr.bf16.mxu0 %v17766_v10  ;;  %11532 = vmatprep.subr.bf16.mxu1 %v17769_v11  ;;  %v17859_v10 = vld [vmem:[#allocation4 + $0x1aa4] ss:$16 sps:$4 sm:$0xff]   ;;  %v17862_v11 = vld [vmem:[#allocation4 + $0x1aac] ss:$16 sps:$4 sm:$0xff]  }
 0x3bd   :  { %10508 = vmatpush1.bf16.msra.mxu0 %v17764_v12  ;;  %11533 = vmatpush1.bf16.msra.mxu1 %v17767_v13  ;;  %v17857_v12 = vld [vmem:[#allocation4 + $0x1aa0] ss:$16 sps:$4 sm:$0xff]   ;;  %v17860_v13 = vld [vmem:[#allocation4 + $0x1aa8] ss:$16 sps:$4 sm:$0xff]  }
 0x3be   :  { %10509 = vmatprep.subr.bf16.mxu0 %v17772_v14  ;;  %11534 = vmatprep.subr.bf16.mxu1 %v17775_v15  ;;  %v17865_v14 = vld [vmem:[#allocation4 + $0x1ac4] ss:$16 sps:$4 sm:$0xff]   ;;  %v17868_v15 = vld [vmem:[#allocation4 + $0x1acc] ss:$16 sps:$4 sm:$0xff]  }
 0x3c1   :  { %10510 = vmatpush1.bf16.msra.mxu0 %v17770_v16  ;;  %11535 = vmatpush1.bf16.msra.mxu1 %v17773_v17  ;;  %v17863_v16 = vld [vmem:[#allocation4 + $0x1ac0] ss:$16 sps:$4 sm:$0xff]   ;;  %v17866_v17 = vld [vmem:[#allocation4 + $0x1ac8] ss:$16 sps:$4 sm:$0xff]  }
 0x3c2   :  { %10511 = vmatprep.subr.bf16.mxu0 %v17778_v18  ;;  %11536 = vmatprep.subr.bf16.mxu1 %v17781_v19  ;;  %v17871_v18 = vld [vmem:[#allocation4 + $0x1ae4] ss:$16 sps:$4 sm:$0xff]   ;;  %v17874_v19 = vld [vmem:[#allocation4 + $0x1aec] ss:$16 sps:$4 sm:$0xff]  }
 0x3c5   :  { %10512 = vmatpush1.bf16.msra.mxu0 %v17776_v20  ;;  %11537 = vmatpush1.bf16.msra.mxu1 %v17779_v21  ;;  %v17869_v20 = vld [vmem:[#allocation4 + $0x1ae0] ss:$16 sps:$4 sm:$0xff]   ;;  %v17872_v21 = vld [vmem:[#allocation4 + $0x1ae8] ss:$16 sps:$4 sm:$0xff]  }
 0x3c6   :  { %10513 = vmatprep.subr.bf16.mxu0 %v17784_v22  ;;  %11538 = vmatprep.subr.bf16.mxu1 %v17787_v23  ;;  %v17877_v22 = vld [vmem:[#allocation4 + $0x1b04] ss:$16 sps:$4 sm:$0xff]   ;;  %v17880_v23 = vld [vmem:[#allocation4 + $0x1b0c] ss:$16 sps:$4 sm:$0xff]  }
 0x3c9   :  { %10514 = vmatpush1.bf16.msra.mxu0 %v17782_v24  ;;  %11539 = vmatpush1.bf16.msra.mxu1 %v17785_v25  ;;  %v17875_v24 = vld [vmem:[#allocation4 + $0x1b00] ss:$16 sps:$4 sm:$0xff]   ;;  %v17878_v25 = vld [vmem:[#allocation4 + $0x1b08] ss:$16 sps:$4 sm:$0xff]  }
 0x3ca   :  { %10515 = vmatprep.subr.bf16.mxu0 %v17790_v26  ;;  %11540 = vmatprep.subr.bf16.mxu1 %v17793_v27  ;;  %v17883_v26 = vld [vmem:[#allocation4 + $0x1b24] ss:$16 sps:$4 sm:$0xff]   ;;  %v17886_v27 = vld [vmem:[#allocation4 + $0x1b2c] ss:$16 sps:$4 sm:$0xff]  }
 0x3cd   :  { %10516 = vmatpush1.bf16.msra.mxu0 %v17788_v28  ;;  %11541 = vmatpush1.bf16.msra.mxu1 %v17791_v29  ;;  %v17881_v28 = vld [vmem:[#allocation4 + $0x1b20] ss:$16 sps:$4 sm:$0xff]   ;;  %v17884_v29 = vld [vmem:[#allocation4 + $0x1b28] ss:$16 sps:$4 sm:$0xff]  }
 0x3ce   :  { %10517 = vmatprep.subr.bf16.mxu0 %v17796_v30  ;;  %11542 = vmatprep.subr.bf16.mxu1 %v17799_v31  ;;  %v17889_v30 = vld [vmem:[#allocation4 + $0x1b44] ss:$16 sps:$4 sm:$0xff]   ;;  %v17892_v31 = vld [vmem:[#allocation4 + $0x1b4c] ss:$16 sps:$4 sm:$0xff]  }
 0x3d1   :  { %10518 = vmatpush1.bf16.msra.mxu0 %v17794_v32  ;;  %11543 = vmatpush1.bf16.msra.mxu1 %v17797_v33  ;;  %v17887_v32 = vld [vmem:[#allocation4 + $0x1b40] ss:$16 sps:$4 sm:$0xff]   ;;  %v17890_v33 = vld [vmem:[#allocation4 + $0x1b48] ss:$16 sps:$4 sm:$0xff]  }
 0x3d2   :  { %10519 = vmatprep.subr.bf16.mxu0 %v17802_v34  ;;  %11544 = vmatprep.subr.bf16.mxu1 %v17805_v35  ;;  %v17895_v34 = vld [vmem:[#allocation4 + $0x1b64] ss:$16 sps:$4 sm:$0xff]   ;;  %v17898_v35 = vld [vmem:[#allocation4 + $0x1b6c] ss:$16 sps:$4 sm:$0xff]  }
 0x3d5   :  { %10520 = vmatpush1.bf16.msra.mxu0 %v17800_v36  ;;  %11545 = vmatpush1.bf16.msra.mxu1 %v17803_v37  ;;  %v17893_v36 = vld [vmem:[#allocation4 + $0x1b60] ss:$16 sps:$4 sm:$0xff]   ;;  %v17896_v37 = vld [vmem:[#allocation4 + $0x1b68] ss:$16 sps:$4 sm:$0xff]  }
 0x3d6   :  { %10521 = vmatprep.subr.bf16.mxu0 %v17808_v38  ;;  %11546 = vmatprep.subr.bf16.mxu1 %v17811_v39  ;;  %v17901_v38 = vld [vmem:[#allocation4 + $0x1b84] ss:$16 sps:$4 sm:$0xff]   ;;  %v17904_v39 = vld [vmem:[#allocation4 + $0x1b8c] ss:$16 sps:$4 sm:$0xff]  }
 0x3d9   :  { %10522 = vmatpush1.bf16.msra.mxu0 %v17806_v40  ;;  %11547 = vmatpush1.bf16.msra.mxu1 %v17809_v41  ;;  %v17899_v40 = vld [vmem:[#allocation4 + $0x1b80] ss:$16 sps:$4 sm:$0xff]   ;;  %v17902_v41 = vld [vmem:[#allocation4 + $0x1b88] ss:$16 sps:$4 sm:$0xff]  }
 0x3da   :  { %10523 = vmatprep.subr.bf16.mxu0 %v17814_v42  ;;  %11548 = vmatprep.subr.bf16.mxu1 %v17817_v43  ;;  %v17907_v42 = vld [vmem:[#allocation4 + $0x1ba4] ss:$16 sps:$4 sm:$0xff]   ;;  %v17910_v43 = vld [vmem:[#allocation4 + $0x1bac] ss:$16 sps:$4 sm:$0xff]  }
 0x3dd   :  { %10524 = vmatpush1.bf16.msra.mxu0 %v17812_v44  ;;  %11549 = vmatpush1.bf16.msra.mxu1 %v17815_v45  ;;  %v17905_v44 = vld [vmem:[#allocation4 + $0x1ba0] ss:$16 sps:$4 sm:$0xff]   ;;  %v17908_v45 = vld [vmem:[#allocation4 + $0x1ba8] ss:$16 sps:$4 sm:$0xff]  }
 0x3de   :  { %10525 = vmatprep.subr.bf16.mxu0 %v17820_v46  ;;  %11550 = vmatprep.subr.bf16.mxu1 %v17823_v47  ;;  %v17913_v46 = vld [vmem:[#allocation4 + $0x1bc4] ss:$16 sps:$4 sm:$0xff]   ;;  %v17916_v47 = vld [vmem:[#allocation4 + $0x1bcc] ss:$16 sps:$4 sm:$0xff]  }
 0x3e1   :  { %10526 = vmatpush1.bf16.msra.mxu0 %v17818_v49  ;;  %11551 = vmatpush1.bf16.msra.mxu1 %v17821_v50  ;;  %v17914_v49 = vld [vmem:[#allocation4 + $0x1bc8] ss:$16 sps:$4 sm:$0xff]   ;;  %v17919_v50 = vld [vmem:[#allocation4 + $0x1be4] ss:$16 sps:$4 sm:$0xff]  }
 0x3e2   :  { %10536 = vmatprep.subr.bf16.mxu0 %v17829_v51  ;;  %11561 = vmatprep.subr.bf16.mxu1 %v17832_v52  ;;  %v17922_v51 = vld [vmem:[#allocation4 + $0x1bec] ss:$16 sps:$4 sm:$0xff]   ;;  %v17923_v52 = vld [vmem:[#allocation2 + $0x68] ss:$200 sps:$4 sm:$0xff]  }
 0x3e4   :  { %10528 = vmatmul.mubr.bf16.vlgmr.msra.gmra.mrb[0].mxu0 %v371_v54  ;;  %11553 = vmatmul.mubr.bf16.vlgmr.msra.gmra.mrb[0].mxu1 %v371_v54  ;;  %v17920_v54 = vld [vmem:[#allocation4 + $0x1be8] ss:$16 sps:$4 sm:$0xff]  }
 0x3e5   :  { %10537 = vmatpush1.bf16.msra.mxu0 %v17827_v55  ;;  %11562 = vmatpush1.bf16.msra.mxu1 %v17830_v56  ;;  %v17928_v55 = vld [vmem:[#allocation4 + $0x1c04] ss:$16 sps:$4 sm:$0xff]   ;;  %v17931_v56 = vld [vmem:[#allocation4 + $0x1c0c] ss:$16 sps:$4 sm:$0xff]  }
 0x3e6   :  { %10538 = vmatprep.subr.bf16.mxu0 %v17835_v57  ;;  %11563 = vmatprep.subr.bf16.mxu1 %v17838_v58  ;;  %v18024_v57 = vld [vmem:[#allocation2 + $0x74] ss:$200 sps:$4 sm:$0xff]   ;;  %v373_v58 = vpack.c.bf16 %v17923_v52, %v17923_v52  ;;  %v18010_v52 = vld [vmem:[#allocation4 + $0x1dc0] ss:$16 sps:$4 sm:$0xff]  }
 0x3e7   :  { %10568 = vmatprep.mubr.bf16.mxu0 %v374_v59  ;;  %11593 = vmatprep.mubr.bf16.mxu1 %v374_v59  ;;  %v17926_v59 = vld [vmem:[#allocation4 + $0x1c00] ss:$16 sps:$4 sm:$0xff]  }
 0x3e9   :  { %10539 = vmatpush1.bf16.msra.mxu0 %v17833_v60  ;;  %11564 = vmatpush1.bf16.msra.mxu1 %v17836_v61  ;;  %v17929_v60 = vld [vmem:[#allocation4 + $0x1c08] ss:$16 sps:$4 sm:$0xff]   ;;  %v17934_v61 = vld [vmem:[#allocation4 + $0x1c24] ss:$16 sps:$4 sm:$0xff]  }
 0x3ea   :  { %10540 = vmatprep.subr.bf16.mxu0 %v17841_v62  ;;  %11565 = vmatprep.subr.bf16.mxu1 %v17844_v63  ;;  %v17937_v62 = vld [vmem:[#allocation4 + $0x1c2c] ss:$16 sps:$4 sm:$0xff]   ;;  %v376_v63 = vpack.c.bf16 %v18024_v57, %v18024_v57  ;;  %v18016_v57 = vld [vmem:[#allocation4 + $0x1de0] ss:$16 sps:$4 sm:$0xff]  }
 0x3ed   :  { %10541 = vmatpush1.bf16.msra.mxu0 %v17839_v0  ;;  %11566 = vmatpush1.bf16.msra.mxu1 %v17842_v1  ;;  %v17932_v0 = vld [vmem:[#allocation4 + $0x1c20] ss:$16 sps:$4 sm:$0xff]   ;;  %v17935_v1 = vld [vmem:[#allocation4 + $0x1c28] ss:$16 sps:$4 sm:$0xff]  }
 0x3ee   :  { %10542 = vmatprep.subr.bf16.mxu0 %v17847_v2  ;;  %11567 = vmatprep.subr.bf16.mxu1 %v17850_v3  ;;  %v17940_v2 = vld [vmem:[#allocation4 + $0x1c44] ss:$16 sps:$4 sm:$0xff]   ;;  %v17943_v3 = vld [vmem:[#allocation4 + $0x1c4c] ss:$16 sps:$4 sm:$0xff]  }
 0x3f1   :  { %10543 = vmatpush1.bf16.msra.mxu0 %v17845_v4  ;;  %11568 = vmatpush1.bf16.msra.mxu1 %v17848_v5  ;;  %v17938_v4 = vld [vmem:[#allocation4 + $0x1c40] ss:$16 sps:$4 sm:$0xff]   ;;  %v17941_v5 = vld [vmem:[#allocation4 + $0x1c48] ss:$16 sps:$4 sm:$0xff]  }
 0x3f2   :  { %10544 = vmatprep.subr.bf16.mxu0 %v17853_v6  ;;  %11569 = vmatprep.subr.bf16.mxu1 %v17856_v7  ;;  %v17946_v6 = vld [vmem:[#allocation4 + $0x1c64] ss:$16 sps:$4 sm:$0xff]   ;;  %v17949_v7 = vld [vmem:[#allocation4 + $0x1c6c] ss:$16 sps:$4 sm:$0xff]  }
 0x3f5   :  { %10545 = vmatpush1.bf16.msra.mxu0 %v17851_v8  ;;  %11570 = vmatpush1.bf16.msra.mxu1 %v17854_v9  ;;  %v17944_v8 = vld [vmem:[#allocation4 + $0x1c60] ss:$16 sps:$4 sm:$0xff]   ;;  %v17947_v9 = vld [vmem:[#allocation4 + $0x1c68] ss:$16 sps:$4 sm:$0xff]  }
 0x3f6   :  { %10546 = vmatprep.subr.bf16.mxu0 %v17859_v10  ;;  %11571 = vmatprep.subr.bf16.mxu1 %v17862_v11  ;;  %v17952_v10 = vld [vmem:[#allocation4 + $0x1c84] ss:$16 sps:$4 sm:$0xff]   ;;  %v17955_v11 = vld [vmem:[#allocation4 + $0x1c8c] ss:$16 sps:$4 sm:$0xff]  }
 0x3f9   :  { %10547 = vmatpush1.bf16.msra.mxu0 %v17857_v12  ;;  %11572 = vmatpush1.bf16.msra.mxu1 %v17860_v13  ;;  %v17950_v12 = vld [vmem:[#allocation4 + $0x1c80] ss:$16 sps:$4 sm:$0xff]   ;;  %v17953_v13 = vld [vmem:[#allocation4 + $0x1c88] ss:$16 sps:$4 sm:$0xff]  }
 0x3fa   :  { %10548 = vmatprep.subr.bf16.mxu0 %v17865_v14  ;;  %11573 = vmatprep.subr.bf16.mxu1 %v17868_v15  ;;  %v17958_v14 = vld [vmem:[#allocation4 + $0x1ca4] ss:$16 sps:$4 sm:$0xff]   ;;  %v17961_v15 = vld [vmem:[#allocation4 + $0x1cac] ss:$16 sps:$4 sm:$0xff]  }
 0x3fd   :  { %10549 = vmatpush1.bf16.msra.mxu0 %v17863_v16  ;;  %11574 = vmatpush1.bf16.msra.mxu1 %v17866_v17  ;;  %v17956_v16 = vld [vmem:[#allocation4 + $0x1ca0] ss:$16 sps:$4 sm:$0xff]   ;;  %v17959_v17 = vld [vmem:[#allocation4 + $0x1ca8] ss:$16 sps:$4 sm:$0xff]  }
 0x3fe   :  { %10550 = vmatprep.subr.bf16.mxu0 %v17871_v18  ;;  %11575 = vmatprep.subr.bf16.mxu1 %v17874_v19  ;;  %v17964_v18 = vld [vmem:[#allocation4 + $0x1cc4] ss:$16 sps:$4 sm:$0xff]   ;;  %v17967_v19 = vld [vmem:[#allocation4 + $0x1ccc] ss:$16 sps:$4 sm:$0xff]  }
 0x401   :  { %10551 = vmatpush1.bf16.msra.mxu0 %v17869_v20  ;;  %11576 = vmatpush1.bf16.msra.mxu1 %v17872_v21  ;;  %v17962_v20 = vld [vmem:[#allocation4 + $0x1cc0] ss:$16 sps:$4 sm:$0xff]   ;;  %v17965_v21 = vld [vmem:[#allocation4 + $0x1cc8] ss:$16 sps:$4 sm:$0xff]  }
 0x402   :  { %10552 = vmatprep.subr.bf16.mxu0 %v17877_v22  ;;  %11577 = vmatprep.subr.bf16.mxu1 %v17880_v23  ;;  %v17970_v22 = vld [vmem:[#allocation4 + $0x1ce4] ss:$16 sps:$4 sm:$0xff]   ;;  %v17973_v23 = vld [vmem:[#allocation4 + $0x1cec] ss:$16 sps:$4 sm:$0xff]  }
 0x405   :  { %10553 = vmatpush1.bf16.msra.mxu0 %v17875_v24  ;;  %11578 = vmatpush1.bf16.msra.mxu1 %v17878_v25  ;;  %v17968_v24 = vld [vmem:[#allocation4 + $0x1ce0] ss:$16 sps:$4 sm:$0xff]   ;;  %v17971_v25 = vld [vmem:[#allocation4 + $0x1ce8] ss:$16 sps:$4 sm:$0xff]  }
 0x406   :  { %10554 = vmatprep.subr.bf16.mxu0 %v17883_v26  ;;  %11579 = vmatprep.subr.bf16.mxu1 %v17886_v27  ;;  %v17976_v26 = vld [vmem:[#allocation4 + $0x1d04] ss:$16 sps:$4 sm:$0xff]   ;;  %v17979_v27 = vld [vmem:[#allocation4 + $0x1d0c] ss:$16 sps:$4 sm:$0xff]  }
 0x409   :  { %10555 = vmatpush1.bf16.msra.mxu0 %v17881_v28  ;;  %11580 = vmatpush1.bf16.msra.mxu1 %v17884_v29  ;;  %v17974_v28 = vld [vmem:[#allocation4 + $0x1d00] ss:$16 sps:$4 sm:$0xff]   ;;  %v17977_v29 = vld [vmem:[#allocation4 + $0x1d08] ss:$16 sps:$4 sm:$0xff]  }
 0x40a   :  { %10556 = vmatprep.subr.bf16.mxu0 %v17889_v30  ;;  %11581 = vmatprep.subr.bf16.mxu1 %v17892_v31  ;;  %v17982_v30 = vld [vmem:[#allocation4 + $0x1d24] ss:$16 sps:$4 sm:$0xff]   ;;  %v17985_v31 = vld [vmem:[#allocation4 + $0x1d2c] ss:$16 sps:$4 sm:$0xff]  }
 0x40d   :  { %10557 = vmatpush1.bf16.msra.mxu0 %v17887_v32  ;;  %11582 = vmatpush1.bf16.msra.mxu1 %v17890_v33  ;;  %v17980_v32 = vld [vmem:[#allocation4 + $0x1d20] ss:$16 sps:$4 sm:$0xff]   ;;  %v17983_v33 = vld [vmem:[#allocation4 + $0x1d28] ss:$16 sps:$4 sm:$0xff]  }
 0x40e   :  { %10558 = vmatprep.subr.bf16.mxu0 %v17895_v34  ;;  %11583 = vmatprep.subr.bf16.mxu1 %v17898_v35  ;;  %v17988_v34 = vld [vmem:[#allocation4 + $0x1d44] ss:$16 sps:$4 sm:$0xff]   ;;  %v17991_v35 = vld [vmem:[#allocation4 + $0x1d4c] ss:$16 sps:$4 sm:$0xff]  }
 0x411   :  { %10559 = vmatpush1.bf16.msra.mxu0 %v17893_v36  ;;  %11584 = vmatpush1.bf16.msra.mxu1 %v17896_v37  ;;  %v17986_v36 = vld [vmem:[#allocation4 + $0x1d40] ss:$16 sps:$4 sm:$0xff]   ;;  %v17989_v37 = vld [vmem:[#allocation4 + $0x1d48] ss:$16 sps:$4 sm:$0xff]  }
 0x412   :  { %10560 = vmatprep.subr.bf16.mxu0 %v17901_v38  ;;  %11585 = vmatprep.subr.bf16.mxu1 %v17904_v39  ;;  %v17994_v38 = vld [vmem:[#allocation4 + $0x1d64] ss:$16 sps:$4 sm:$0xff]   ;;  %v17997_v39 = vld [vmem:[#allocation4 + $0x1d6c] ss:$16 sps:$4 sm:$0xff]  }
 0x415   :  { %10561 = vmatpush1.bf16.msra.mxu0 %v17899_v40  ;;  %11586 = vmatpush1.bf16.msra.mxu1 %v17902_v41  ;;  %v17992_v40 = vld [vmem:[#allocation4 + $0x1d60] ss:$16 sps:$4 sm:$0xff]   ;;  %v17995_v41 = vld [vmem:[#allocation4 + $0x1d68] ss:$16 sps:$4 sm:$0xff]  }
 0x416   :  { %10562 = vmatprep.subr.bf16.mxu0 %v17907_v42  ;;  %11587 = vmatprep.subr.bf16.mxu1 %v17910_v43  ;;  %v18000_v42 = vld [vmem:[#allocation4 + $0x1d84] ss:$16 sps:$4 sm:$0xff]   ;;  %v18003_v43 = vld [vmem:[#allocation4 + $0x1d8c] ss:$16 sps:$4 sm:$0xff]  }
 0x419   :  { %10563 = vmatpush1.bf16.msra.mxu0 %v17905_v44  ;;  %11588 = vmatpush1.bf16.msra.mxu1 %v17908_v45  ;;  %v17998_v44 = vld [vmem:[#allocation4 + $0x1d80] ss:$16 sps:$4 sm:$0xff]   ;;  %v18001_v45 = vld [vmem:[#allocation4 + $0x1d88] ss:$16 sps:$4 sm:$0xff]  }
 0x41a   :  { %10564 = vmatprep.subr.bf16.mxu0 %v17913_v46  ;;  %11589 = vmatprep.subr.bf16.mxu1 %v17916_v47  ;;  %v18006_v46 = vld [vmem:[#allocation4 + $0x1da4] ss:$16 sps:$4 sm:$0xff]   ;;  %v18009_v47 = vld [vmem:[#allocation4 + $0x1dac] ss:$16 sps:$4 sm:$0xff]  }
 0x41d   :  { %10565 = vmatpush1.bf16.msra.mxu0 %v17911_v48  ;;  %11590 = vmatpush1.bf16.msra.mxu1 %v17914_v49  ;;  %v18004_v48 = vld [vmem:[#allocation4 + $0x1da0] ss:$16 sps:$4 sm:$0xff]   ;;  %v18007_v49 = vld [vmem:[#allocation4 + $0x1da8] ss:$16 sps:$4 sm:$0xff]  }
 0x41e   :  { %10566 = vmatprep.subr.bf16.mxu0 %v17919_v50  ;;  %11591 = vmatprep.subr.bf16.mxu1 %v17922_v51  ;;  %v18012_v50 = vld [vmem:[#allocation4 + $0x1dc4] ss:$16 sps:$4 sm:$0xff]   ;;  %v18015_v51 = vld [vmem:[#allocation4 + $0x1dcc] ss:$16 sps:$4 sm:$0xff]  }
 0x421   :  { %10567 = vmatpush1.bf16.msra.mxu0 %v17917_v53  ;;  %11592 = vmatpush1.bf16.msra.mxu1 %v17920_v54  ;;  %v18013_v53 = vld [vmem:[#allocation4 + $0x1dc8] ss:$16 sps:$4 sm:$0xff]   ;;  %v18018_v54 = vld [vmem:[#allocation4 + $0x1de4] ss:$16 sps:$4 sm:$0xff]  }
 0x422   :  { %10577 = vmatprep.subr.bf16.mxu0 %v17928_v55  ;;  %11602 = vmatprep.subr.bf16.mxu1 %v17931_v56  ;;  %v18021_v55 = vld [vmem:[#allocation4 + $0x1dec] ss:$16 sps:$4 sm:$0xff]   ;;  %v18022_v56 = vld [vmem:[#allocation2 + $0x70] ss:$200 sps:$4 sm:$0xff]  }
 0x424   :  { %10569 = vmatmul.mubr.bf16.vlgmr.msra.gmra.mrb[0].mxu0 %v373_v58  ;;  %11594 = vmatmul.mubr.bf16.vlgmr.msra.gmra.mrb[0].mxu1 %v373_v58  ;;  %v18019_v58 = vld [vmem:[#allocation4 + $0x1de8] ss:$16 sps:$4 sm:$0xff]  }
 0x425   :  { %10578 = vmatpush1.bf16.msra.mxu0 %v17926_v59  ;;  %11603 = vmatpush1.bf16.msra.mxu1 %v17929_v60  ;;  %v18027_v59 = vld [vmem:[#allocation4 + $0x1e04] ss:$16 sps:$4 sm:$0xff]   ;;  %v18030_v60 = vld [vmem:[#allocation4 + $0x1e0c] ss:$16 sps:$4 sm:$0xff]  }
 0x426   :  { %10579 = vmatprep.subr.bf16.mxu0 %v17934_v61  ;;  %11604 = vmatprep.subr.bf16.mxu1 %v17937_v62  ;;  %v18123_v61 = vld [vmem:[#allocation2 + $0x7c] ss:$200 sps:$4 sm:$0xff]   ;;  %v375_v62 = vpack.c.bf16 %v18022_v56, %v18022_v56  ;;  %v18109_v56 = vld [vmem:[#allocation4 + $0x1fc0] ss:$16 sps:$4 sm:$0xff]  }
 0x427   :  { %10609 = vmatprep.mubr.bf16.mxu0 %v376_v63  ;;  %11634 = vmatprep.mubr.bf16.mxu1 %v376_v63  ;;  %v18025_v63 = vld [vmem:[#allocation4 + $0x1e00] ss:$16 sps:$4 sm:$0xff]  }
 0x429   :  { %10580 = vmatpush1.bf16.msra.mxu0 %v17932_v0  ;;  %11605 = vmatpush1.bf16.msra.mxu1 %v17935_v1  ;;  %v18028_v0 = vld [vmem:[#allocation4 + $0x1e08] ss:$16 sps:$4 sm:$0xff]   ;;  %v18033_v1 = vld [vmem:[#allocation4 + $0x1e24] ss:$16 sps:$4 sm:$0xff]  }
 0x42a   :  { %10581 = vmatprep.subr.bf16.mxu0 %v17940_v2  ;;  %11606 = vmatprep.subr.bf16.mxu1 %v17943_v3  ;;  %v18036_v2 = vld [vmem:[#allocation4 + $0x1e2c] ss:$16 sps:$4 sm:$0xff]   ;;  %v378_v3 = vpack.c.bf16 %v18123_v61, %v18123_v61  ;;  %v18115_v61 = vld [vmem:[#allocation4 + $0x1fe0] ss:$16 sps:$4 sm:$0xff]  }
 0x42d   :  { %10582 = vmatpush1.bf16.msra.mxu0 %v17938_v4  ;;  %11607 = vmatpush1.bf16.msra.mxu1 %v17941_v5  ;;  %v18031_v4 = vld [vmem:[#allocation4 + $0x1e20] ss:$16 sps:$4 sm:$0xff]   ;;  %v18034_v5 = vld [vmem:[#allocation4 + $0x1e28] ss:$16 sps:$4 sm:$0xff]  }
 0x42e   :  { %10583 = vmatprep.subr.bf16.mxu0 %v17946_v6  ;;  %11608 = vmatprep.subr.bf16.mxu1 %v17949_v7  ;;  %v18039_v6 = vld [vmem:[#allocation4 + $0x1e44] ss:$16 sps:$4 sm:$0xff]   ;;  %v18042_v7 = vld [vmem:[#allocation4 + $0x1e4c] ss:$16 sps:$4 sm:$0xff]  }
 0x431   :  { %10584 = vmatpush1.bf16.msra.mxu0 %v17944_v8  ;;  %11609 = vmatpush1.bf16.msra.mxu1 %v17947_v9  ;;  %v18037_v8 = vld [vmem:[#allocation4 + $0x1e40] ss:$16 sps:$4 sm:$0xff]   ;;  %v18040_v9 = vld [vmem:[#allocation4 + $0x1e48] ss:$16 sps:$4 sm:$0xff]  }
 0x432   :  { %10585 = vmatprep.subr.bf16.mxu0 %v17952_v10  ;;  %11610 = vmatprep.subr.bf16.mxu1 %v17955_v11  ;;  %v18045_v10 = vld [vmem:[#allocation4 + $0x1e64] ss:$16 sps:$4 sm:$0xff]   ;;  %v18048_v11 = vld [vmem:[#allocation4 + $0x1e6c] ss:$16 sps:$4 sm:$0xff]  }
 0x435   :  { %10586 = vmatpush1.bf16.msra.mxu0 %v17950_v12  ;;  %11611 = vmatpush1.bf16.msra.mxu1 %v17953_v13  ;;  %v18043_v12 = vld [vmem:[#allocation4 + $0x1e60] ss:$16 sps:$4 sm:$0xff]   ;;  %v18046_v13 = vld [vmem:[#allocation4 + $0x1e68] ss:$16 sps:$4 sm:$0xff]  }
 0x436   :  { %10587 = vmatprep.subr.bf16.mxu0 %v17958_v14  ;;  %11612 = vmatprep.subr.bf16.mxu1 %v17961_v15  ;;  %v18051_v14 = vld [vmem:[#allocation4 + $0x1e84] ss:$16 sps:$4 sm:$0xff]   ;;  %v18054_v15 = vld [vmem:[#allocation4 + $0x1e8c] ss:$16 sps:$4 sm:$0xff]  }
 0x439   :  { %10588 = vmatpush1.bf16.msra.mxu0 %v17956_v16  ;;  %11613 = vmatpush1.bf16.msra.mxu1 %v17959_v17  ;;  %v18049_v16 = vld [vmem:[#allocation4 + $0x1e80] ss:$16 sps:$4 sm:$0xff]   ;;  %v18052_v17 = vld [vmem:[#allocation4 + $0x1e88] ss:$16 sps:$4 sm:$0xff]  }
 0x43a   :  { %10589 = vmatprep.subr.bf16.mxu0 %v17964_v18  ;;  %11614 = vmatprep.subr.bf16.mxu1 %v17967_v19  ;;  %v18057_v18 = vld [vmem:[#allocation4 + $0x1ea4] ss:$16 sps:$4 sm:$0xff]   ;;  %v18060_v19 = vld [vmem:[#allocation4 + $0x1eac] ss:$16 sps:$4 sm:$0xff]  }
 0x43d   :  { %10590 = vmatpush1.bf16.msra.mxu0 %v17962_v20  ;;  %11615 = vmatpush1.bf16.msra.mxu1 %v17965_v21  ;;  %v18055_v20 = vld [vmem:[#allocation4 + $0x1ea0] ss:$16 sps:$4 sm:$0xff]   ;;  %v18058_v21 = vld [vmem:[#allocation4 + $0x1ea8] ss:$16 sps:$4 sm:$0xff]  }
 0x43e   :  { %10591 = vmatprep.subr.bf16.mxu0 %v17970_v22  ;;  %11616 = vmatprep.subr.bf16.mxu1 %v17973_v23  ;;  %v18063_v22 = vld [vmem:[#allocation4 + $0x1ec4] ss:$16 sps:$4 sm:$0xff]   ;;  %v18066_v23 = vld [vmem:[#allocation4 + $0x1ecc] ss:$16 sps:$4 sm:$0xff]  }
 0x441   :  { %10592 = vmatpush1.bf16.msra.mxu0 %v17968_v24  ;;  %11617 = vmatpush1.bf16.msra.mxu1 %v17971_v25  ;;  %v18061_v24 = vld [vmem:[#allocation4 + $0x1ec0] ss:$16 sps:$4 sm:$0xff]   ;;  %v18064_v25 = vld [vmem:[#allocation4 + $0x1ec8] ss:$16 sps:$4 sm:$0xff]  }
 0x442   :  { %10593 = vmatprep.subr.bf16.mxu0 %v17976_v26  ;;  %11618 = vmatprep.subr.bf16.mxu1 %v17979_v27  ;;  %v18069_v26 = vld [vmem:[#allocation4 + $0x1ee4] ss:$16 sps:$4 sm:$0xff]   ;;  %v18072_v27 = vld [vmem:[#allocation4 + $0x1eec] ss:$16 sps:$4 sm:$0xff]  }
 0x445   :  { %10594 = vmatpush1.bf16.msra.mxu0 %v17974_v28  ;;  %11619 = vmatpush1.bf16.msra.mxu1 %v17977_v29  ;;  %v18067_v28 = vld [vmem:[#allocation4 + $0x1ee0] ss:$16 sps:$4 sm:$0xff]   ;;  %v18070_v29 = vld [vmem:[#allocation4 + $0x1ee8] ss:$16 sps:$4 sm:$0xff]  }
 0x446   :  { %10595 = vmatprep.subr.bf16.mxu0 %v17982_v30  ;;  %11620 = vmatprep.subr.bf16.mxu1 %v17985_v31  ;;  %v18075_v30 = vld [vmem:[#allocation4 + $0x1f04] ss:$16 sps:$4 sm:$0xff]   ;;  %v18078_v31 = vld [vmem:[#allocation4 + $0x1f0c] ss:$16 sps:$4 sm:$0xff]  }
 0x449   :  { %10596 = vmatpush1.bf16.msra.mxu0 %v17980_v32  ;;  %11621 = vmatpush1.bf16.msra.mxu1 %v17983_v33  ;;  %v18073_v32 = vld [vmem:[#allocation4 + $0x1f00] ss:$16 sps:$4 sm:$0xff]   ;;  %v18076_v33 = vld [vmem:[#allocation4 + $0x1f08] ss:$16 sps:$4 sm:$0xff]  }
 0x44a   :  { %10597 = vmatprep.subr.bf16.mxu0 %v17988_v34  ;;  %11622 = vmatprep.subr.bf16.mxu1 %v17991_v35  ;;  %v18081_v34 = vld [vmem:[#allocation4 + $0x1f24] ss:$16 sps:$4 sm:$0xff]   ;;  %v18084_v35 = vld [vmem:[#allocation4 + $0x1f2c] ss:$16 sps:$4 sm:$0xff]  }
 0x44d   :  { %10598 = vmatpush1.bf16.msra.mxu0 %v17986_v36  ;;  %11623 = vmatpush1.bf16.msra.mxu1 %v17989_v37  ;;  %v18079_v36 = vld [vmem:[#allocation4 + $0x1f20] ss:$16 sps:$4 sm:$0xff]   ;;  %v18082_v37 = vld [vmem:[#allocation4 + $0x1f28] ss:$16 sps:$4 sm:$0xff]  }
 0x44e   :  { %10599 = vmatprep.subr.bf16.mxu0 %v17994_v38  ;;  %11624 = vmatprep.subr.bf16.mxu1 %v17997_v39  ;;  %v18087_v38 = vld [vmem:[#allocation4 + $0x1f44] ss:$16 sps:$4 sm:$0xff]   ;;  %v18090_v39 = vld [vmem:[#allocation4 + $0x1f4c] ss:$16 sps:$4 sm:$0xff]  }
 0x451   :  { %10600 = vmatpush1.bf16.msra.mxu0 %v17992_v40  ;;  %11625 = vmatpush1.bf16.msra.mxu1 %v17995_v41  ;;  %v18085_v40 = vld [vmem:[#allocation4 + $0x1f40] ss:$16 sps:$4 sm:$0xff]   ;;  %v18088_v41 = vld [vmem:[#allocation4 + $0x1f48] ss:$16 sps:$4 sm:$0xff]  }
 0x452   :  { %10601 = vmatprep.subr.bf16.mxu0 %v18000_v42  ;;  %11626 = vmatprep.subr.bf16.mxu1 %v18003_v43  ;;  %v18093_v42 = vld [vmem:[#allocation4 + $0x1f64] ss:$16 sps:$4 sm:$0xff]   ;;  %v18096_v43 = vld [vmem:[#allocation4 + $0x1f6c] ss:$16 sps:$4 sm:$0xff]  }
 0x455   :  { %10602 = vmatpush1.bf16.msra.mxu0 %v17998_v44  ;;  %11627 = vmatpush1.bf16.msra.mxu1 %v18001_v45  ;;  %v18091_v44 = vld [vmem:[#allocation4 + $0x1f60] ss:$16 sps:$4 sm:$0xff]   ;;  %v18094_v45 = vld [vmem:[#allocation4 + $0x1f68] ss:$16 sps:$4 sm:$0xff]  }
 0x456   :  { %10603 = vmatprep.subr.bf16.mxu0 %v18006_v46  ;;  %11628 = vmatprep.subr.bf16.mxu1 %v18009_v47  ;;  %v18099_v46 = vld [vmem:[#allocation4 + $0x1f84] ss:$16 sps:$4 sm:$0xff]   ;;  %v18102_v47 = vld [vmem:[#allocation4 + $0x1f8c] ss:$16 sps:$4 sm:$0xff]  }
 0x459   :  { %10604 = vmatpush1.bf16.msra.mxu0 %v18004_v48  ;;  %11629 = vmatpush1.bf16.msra.mxu1 %v18007_v49  ;;  %v18097_v48 = vld [vmem:[#allocation4 + $0x1f80] ss:$16 sps:$4 sm:$0xff]   ;;  %v18100_v49 = vld [vmem:[#allocation4 + $0x1f88] ss:$16 sps:$4 sm:$0xff]  }
 0x45a   :  { %10605 = vmatprep.subr.bf16.mxu0 %v18012_v50  ;;  %11630 = vmatprep.subr.bf16.mxu1 %v18015_v51  ;;  %v18105_v50 = vld [vmem:[#allocation4 + $0x1fa4] ss:$16 sps:$4 sm:$0xff]   ;;  %v18108_v51 = vld [vmem:[#allocation4 + $0x1fac] ss:$16 sps:$4 sm:$0xff]  }
 0x45d   :  { %10606 = vmatpush1.bf16.msra.mxu0 %v18010_v52  ;;  %11631 = vmatpush1.bf16.msra.mxu1 %v18013_v53  ;;  %v18103_v52 = vld [vmem:[#allocation4 + $0x1fa0] ss:$16 sps:$4 sm:$0xff]   ;;  %v18106_v53 = vld [vmem:[#allocation4 + $0x1fa8] ss:$16 sps:$4 sm:$0xff]  }
 0x45e   :  { %10607 = vmatprep.subr.bf16.mxu0 %v18018_v54  ;;  %11632 = vmatprep.subr.bf16.mxu1 %v18021_v55  ;;  %v18111_v54 = vld [vmem:[#allocation4 + $0x1fc4] ss:$16 sps:$4 sm:$0xff]   ;;  %v18114_v55 = vld [vmem:[#allocation4 + $0x1fcc] ss:$16 sps:$4 sm:$0xff]  }
 0x461   :  { %10608 = vmatpush1.bf16.msra.mxu0 %v18016_v57  ;;  %11633 = vmatpush1.bf16.msra.mxu1 %v18019_v58  ;;  %v18112_v57 = vld [vmem:[#allocation4 + $0x1fc8] ss:$16 sps:$4 sm:$0xff]   ;;  %v18117_v58 = vld [vmem:[#allocation4 + $0x1fe4] ss:$16 sps:$4 sm:$0xff]  }
 0x462   :  { %10618 = vmatprep.subr.bf16.mxu0 %v18027_v59  ;;  %11643 = vmatprep.subr.bf16.mxu1 %v18030_v60  ;;  %v18120_v59 = vld [vmem:[#allocation4 + $0x1fec] ss:$16 sps:$4 sm:$0xff]   ;;  %v18121_v60 = vld [vmem:[#allocation2 + $0x78] ss:$200 sps:$4 sm:$0xff]  }
 0x464   :  { %10610 = vmatmul.mubr.bf16.vlgmr.msra.gmra.mrb[0].mxu0 %v375_v62  ;;  %11635 = vmatmul.mubr.bf16.vlgmr.msra.gmra.mrb[0].mxu1 %v375_v62  ;;  %v18118_v62 = vld [vmem:[#allocation4 + $0x1fe8] ss:$16 sps:$4 sm:$0xff]  }
 0x465   :  { %10619 = vmatpush1.bf16.msra.mxu0 %v18025_v63  ;;  %11644 = vmatpush1.bf16.msra.mxu1 %v18028_v0  ;;  %v18126_v63 = vld [vmem:[#allocation4 + $0x2004] ss:$16 sps:$4 sm:$0xff]   ;;  %v18129_v0 = vld [vmem:[#allocation4 + $0x200c] ss:$16 sps:$4 sm:$0xff]  }
 0x466   :  { %10620 = vmatprep.subr.bf16.mxu0 %v18033_v1  ;;  %11645 = vmatprep.subr.bf16.mxu1 %v18036_v2  ;;  %v18222_v1 = vld [vmem:[#allocation2 + $0x84] ss:$200 sps:$4 sm:$0xff]   ;;  %v377_v2 = vpack.c.bf16 %v18121_v60, %v18121_v60  ;;  %v18208_v60 = vld [vmem:[#allocation4 + $0x21c0] ss:$16 sps:$4 sm:$0xff]  }
 0x467   :  { %10650 = vmatprep.mubr.bf16.mxu0 %v378_v3  ;;  %11675 = vmatprep.mubr.bf16.mxu1 %v378_v3  ;;  %v18124_v3 = vld [vmem:[#allocation4 + $0x2000] ss:$16 sps:$4 sm:$0xff]  }
 0x469   :  { %10621 = vmatpush1.bf16.msra.mxu0 %v18031_v4  ;;  %11646 = vmatpush1.bf16.msra.mxu1 %v18034_v5  ;;  %v18127_v4 = vld [vmem:[#allocation4 + $0x2008] ss:$16 sps:$4 sm:$0xff]   ;;  %v18132_v5 = vld [vmem:[#allocation4 + $0x2024] ss:$16 sps:$4 sm:$0xff]  }
 0x46a   :  { %10622 = vmatprep.subr.bf16.mxu0 %v18039_v6  ;;  %11647 = vmatprep.subr.bf16.mxu1 %v18042_v7  ;;  %v18135_v6 = vld [vmem:[#allocation4 + $0x202c] ss:$16 sps:$4 sm:$0xff]   ;;  %v380_v7 = vpack.c.bf16 %v18222_v1, %v18222_v1  ;;  %v18214_v1 = vld [vmem:[#allocation4 + $0x21e0] ss:$16 sps:$4 sm:$0xff]  }
 0x46d   :  { %10623 = vmatpush1.bf16.msra.mxu0 %v18037_v8  ;;  %11648 = vmatpush1.bf16.msra.mxu1 %v18040_v9  ;;  %v18130_v8 = vld [vmem:[#allocation4 + $0x2020] ss:$16 sps:$4 sm:$0xff]   ;;  %v18133_v9 = vld [vmem:[#allocation4 + $0x2028] ss:$16 sps:$4 sm:$0xff]  }
 0x46e   :  { %10624 = vmatprep.subr.bf16.mxu0 %v18045_v10  ;;  %11649 = vmatprep.subr.bf16.mxu1 %v18048_v11  ;;  %v18138_v10 = vld [vmem:[#allocation4 + $0x2044] ss:$16 sps:$4 sm:$0xff]   ;;  %v18141_v11 = vld [vmem:[#allocation4 + $0x204c] ss:$16 sps:$4 sm:$0xff]  }
 0x471   :  { %10625 = vmatpush1.bf16.msra.mxu0 %v18043_v12  ;;  %11650 = vmatpush1.bf16.msra.mxu1 %v18046_v13  ;;  %v18136_v12 = vld [vmem:[#allocation4 + $0x2040] ss:$16 sps:$4 sm:$0xff]   ;;  %v18139_v13 = vld [vmem:[#allocation4 + $0x2048] ss:$16 sps:$4 sm:$0xff]  }
 0x472   :  { %10626 = vmatprep.subr.bf16.mxu0 %v18051_v14  ;;  %11651 = vmatprep.subr.bf16.mxu1 %v18054_v15  ;;  %v18144_v14 = vld [vmem:[#allocation4 + $0x2064] ss:$16 sps:$4 sm:$0xff]   ;;  %v18147_v15 = vld [vmem:[#allocation4 + $0x206c] ss:$16 sps:$4 sm:$0xff]  }
 0x475   :  { %10627 = vmatpush1.bf16.msra.mxu0 %v18049_v16  ;;  %11652 = vmatpush1.bf16.msra.mxu1 %v18052_v17  ;;  %v18142_v16 = vld [vmem:[#allocation4 + $0x2060] ss:$16 sps:$4 sm:$0xff]   ;;  %v18145_v17 = vld [vmem:[#allocation4 + $0x2068] ss:$16 sps:$4 sm:$0xff]  }
 0x476   :  { %10628 = vmatprep.subr.bf16.mxu0 %v18057_v18  ;;  %11653 = vmatprep.subr.bf16.mxu1 %v18060_v19  ;;  %v18150_v18 = vld [vmem:[#allocation4 + $0x2084] ss:$16 sps:$4 sm:$0xff]   ;;  %v18153_v19 = vld [vmem:[#allocation4 + $0x208c] ss:$16 sps:$4 sm:$0xff]  }
 0x479   :  { %10629 = vmatpush1.bf16.msra.mxu0 %v18055_v20  ;;  %11654 = vmatpush1.bf16.msra.mxu1 %v18058_v21  ;;  %v18148_v20 = vld [vmem:[#allocation4 + $0x2080] ss:$16 sps:$4 sm:$0xff]   ;;  %v18151_v21 = vld [vmem:[#allocation4 + $0x2088] ss:$16 sps:$4 sm:$0xff]  }
 0x47a   :  { %10630 = vmatprep.subr.bf16.mxu0 %v18063_v22  ;;  %11655 = vmatprep.subr.bf16.mxu1 %v18066_v23  ;;  %v18156_v22 = vld [vmem:[#allocation4 + $0x20a4] ss:$16 sps:$4 sm:$0xff]   ;;  %v18159_v23 = vld [vmem:[#allocation4 + $0x20ac] ss:$16 sps:$4 sm:$0xff]  }
 0x47d   :  { %10631 = vmatpush1.bf16.msra.mxu0 %v18061_v24  ;;  %11656 = vmatpush1.bf16.msra.mxu1 %v18064_v25  ;;  %v18154_v24 = vld [vmem:[#allocation4 + $0x20a0] ss:$16 sps:$4 sm:$0xff]   ;;  %v18157_v25 = vld [vmem:[#allocation4 + $0x20a8] ss:$16 sps:$4 sm:$0xff]  }
 0x47e   :  { %10632 = vmatprep.subr.bf16.mxu0 %v18069_v26  ;;  %11657 = vmatprep.subr.bf16.mxu1 %v18072_v27  ;;  %v18162_v26 = vld [vmem:[#allocation4 + $0x20c4] ss:$16 sps:$4 sm:$0xff]   ;;  %v18165_v27 = vld [vmem:[#allocation4 + $0x20cc] ss:$16 sps:$4 sm:$0xff]  }
 0x481   :  { %10633 = vmatpush1.bf16.msra.mxu0 %v18067_v28  ;;  %11658 = vmatpush1.bf16.msra.mxu1 %v18070_v29  ;;  %v18160_v28 = vld [vmem:[#allocation4 + $0x20c0] ss:$16 sps:$4 sm:$0xff]   ;;  %v18163_v29 = vld [vmem:[#allocation4 + $0x20c8] ss:$16 sps:$4 sm:$0xff]  }
 0x482   :  { %10634 = vmatprep.subr.bf16.mxu0 %v18075_v30  ;;  %11659 = vmatprep.subr.bf16.mxu1 %v18078_v31  ;;  %v18168_v30 = vld [vmem:[#allocation4 + $0x20e4] ss:$16 sps:$4 sm:$0xff]   ;;  %v18171_v31 = vld [vmem:[#allocation4 + $0x20ec] ss:$16 sps:$4 sm:$0xff]  }
 0x485   :  { %10635 = vmatpush1.bf16.msra.mxu0 %v18073_v32  ;;  %11660 = vmatpush1.bf16.msra.mxu1 %v18076_v33  ;;  %v18166_v32 = vld [vmem:[#allocation4 + $0x20e0] ss:$16 sps:$4 sm:$0xff]   ;;  %v18169_v33 = vld [vmem:[#allocation4 + $0x20e8] ss:$16 sps:$4 sm:$0xff]  }
 0x486   :  { %10636 = vmatprep.subr.bf16.mxu0 %v18081_v34  ;;  %11661 = vmatprep.subr.bf16.mxu1 %v18084_v35  ;;  %v18174_v34 = vld [vmem:[#allocation4 + $0x2104] ss:$16 sps:$4 sm:$0xff]   ;;  %v18177_v35 = vld [vmem:[#allocation4 + $0x210c] ss:$16 sps:$4 sm:$0xff]  }
 0x489   :  { %10637 = vmatpush1.bf16.msra.mxu0 %v18079_v36  ;;  %11662 = vmatpush1.bf16.msra.mxu1 %v18082_v37  ;;  %v18172_v36 = vld [vmem:[#allocation4 + $0x2100] ss:$16 sps:$4 sm:$0xff]   ;;  %v18175_v37 = vld [vmem:[#allocation4 + $0x2108] ss:$16 sps:$4 sm:$0xff]  }
 0x48a   :  { %10638 = vmatprep.subr.bf16.mxu0 %v18087_v38  ;;  %11663 = vmatprep.subr.bf16.mxu1 %v18090_v39  ;;  %v18180_v38 = vld [vmem:[#allocation4 + $0x2124] ss:$16 sps:$4 sm:$0xff]   ;;  %v18183_v39 = vld [vmem:[#allocation4 + $0x212c] ss:$16 sps:$4 sm:$0xff]  }
 0x48d   :  { %10639 = vmatpush1.bf16.msra.mxu0 %v18085_v40  ;;  %11664 = vmatpush1.bf16.msra.mxu1 %v18088_v41  ;;  %v18178_v40 = vld [vmem:[#allocation4 + $0x2120] ss:$16 sps:$4 sm:$0xff]   ;;  %v18181_v41 = vld [vmem:[#allocation4 + $0x2128] ss:$16 sps:$4 sm:$0xff]  }
 0x48e   :  { %10640 = vmatprep.subr.bf16.mxu0 %v18093_v42  ;;  %11665 = vmatprep.subr.bf16.mxu1 %v18096_v43  ;;  %v18186_v42 = vld [vmem:[#allocation4 + $0x2144] ss:$16 sps:$4 sm:$0xff]   ;;  %v18189_v43 = vld [vmem:[#allocation4 + $0x214c] ss:$16 sps:$4 sm:$0xff]  }
 0x491   :  { %10641 = vmatpush1.bf16.msra.mxu0 %v18091_v44  ;;  %11666 = vmatpush1.bf16.msra.mxu1 %v18094_v45  ;;  %v18184_v44 = vld [vmem:[#allocation4 + $0x2140] ss:$16 sps:$4 sm:$0xff]   ;;  %v18187_v45 = vld [vmem:[#allocation4 + $0x2148] ss:$16 sps:$4 sm:$0xff]  }
 0x492   :  { %10642 = vmatprep.subr.bf16.mxu0 %v18099_v46  ;;  %11667 = vmatprep.subr.bf16.mxu1 %v18102_v47  ;;  %v18192_v46 = vld [vmem:[#allocation4 + $0x2164] ss:$16 sps:$4 sm:$0xff]   ;;  %v18195_v47 = vld [vmem:[#allocation4 + $0x216c] ss:$16 sps:$4 sm:$0xff]  }
 0x495   :  { %10643 = vmatpush1.bf16.msra.mxu0 %v18097_v48  ;;  %11668 = vmatpush1.bf16.msra.mxu1 %v18100_v49  ;;  %v18190_v48 = vld [vmem:[#allocation4 + $0x2160] ss:$16 sps:$4 sm:$0xff]   ;;  %v18193_v49 = vld [vmem:[#allocation4 + $0x2168] ss:$16 sps:$4 sm:$0xff]  }
 0x496   :  { %10644 = vmatprep.subr.bf16.mxu0 %v18105_v50  ;;  %11669 = vmatprep.subr.bf16.mxu1 %v18108_v51  ;;  %v18198_v50 = vld [vmem:[#allocation4 + $0x2184] ss:$16 sps:$4 sm:$0xff]   ;;  %v18201_v51 = vld [vmem:[#allocation4 + $0x218c] ss:$16 sps:$4 sm:$0xff]  }
 0x499   :  { %10645 = vmatpush1.bf16.msra.mxu0 %v18103_v52  ;;  %11670 = vmatpush1.bf16.msra.mxu1 %v18106_v53  ;;  %v18196_v52 = vld [vmem:[#allocation4 + $0x2180] ss:$16 sps:$4 sm:$0xff]   ;;  %v18199_v53 = vld [vmem:[#allocation4 + $0x2188] ss:$16 sps:$4 sm:$0xff]  }
 0x49a   :  { %10646 = vmatprep.subr.bf16.mxu0 %v18111_v54  ;;  %11671 = vmatprep.subr.bf16.mxu1 %v18114_v55  ;;  %v18204_v54 = vld [vmem:[#allocation4 + $0x21a4] ss:$16 sps:$4 sm:$0xff]   ;;  %v18207_v55 = vld [vmem:[#allocation4 + $0x21ac] ss:$16 sps:$4 sm:$0xff]  }
 0x49d   :  { %10647 = vmatpush1.bf16.msra.mxu0 %v18109_v56  ;;  %11672 = vmatpush1.bf16.msra.mxu1 %v18112_v57  ;;  %v18202_v56 = vld [vmem:[#allocation4 + $0x21a0] ss:$16 sps:$4 sm:$0xff]   ;;  %v18205_v57 = vld [vmem:[#allocation4 + $0x21a8] ss:$16 sps:$4 sm:$0xff]  }
 0x49e   :  { %10648 = vmatprep.subr.bf16.mxu0 %v18117_v58  ;;  %11673 = vmatprep.subr.bf16.mxu1 %v18120_v59  ;;  %v18210_v58 = vld [vmem:[#allocation4 + $0x21c4] ss:$16 sps:$4 sm:$0xff]   ;;  %v18213_v59 = vld [vmem:[#allocation4 + $0x21cc] ss:$16 sps:$4 sm:$0xff]  }
 0x4a1   :  { %10649 = vmatpush1.bf16.msra.mxu0 %v18115_v61  ;;  %11674 = vmatpush1.bf16.msra.mxu1 %v18118_v62  ;;  %v18211_v61 = vld [vmem:[#allocation4 + $0x21c8] ss:$16 sps:$4 sm:$0xff]   ;;  %v18216_v62 = vld [vmem:[#allocation4 + $0x21e4] ss:$16 sps:$4 sm:$0xff]  }
 0x4a2   :  { %10659 = vmatprep.subr.bf16.mxu0 %v18126_v63  ;;  %11684 = vmatprep.subr.bf16.mxu1 %v18129_v0  ;;  %v18219_v63 = vld [vmem:[#allocation4 + $0x21ec] ss:$16 sps:$4 sm:$0xff]   ;;  %v18220_v0 = vld [vmem:[#allocation2 + $0x80] ss:$200 sps:$4 sm:$0xff]  }
 0x4a4   :  { %10651 = vmatmul.mubr.bf16.vlgmr.msra.gmra.mrb[0].mxu0 %v377_v2  ;;  %11676 = vmatmul.mubr.bf16.vlgmr.msra.gmra.mrb[0].mxu1 %v377_v2  ;;  %v18217_v2 = vld [vmem:[#allocation4 + $0x21e8] ss:$16 sps:$4 sm:$0xff]  }
 0x4a5   :  { %10660 = vmatpush1.bf16.msra.mxu0 %v18124_v3  ;;  %11685 = vmatpush1.bf16.msra.mxu1 %v18127_v4  ;;  %v18225_v3 = vld [vmem:[#allocation4 + $0x2204] ss:$16 sps:$4 sm:$0xff]   ;;  %v18228_v4 = vld [vmem:[#allocation4 + $0x220c] ss:$16 sps:$4 sm:$0xff]  }
 0x4a6   :  { %10661 = vmatprep.subr.bf16.mxu0 %v18132_v5  ;;  %11686 = vmatprep.subr.bf16.mxu1 %v18135_v6  ;;  %v18321_v5 = vld [vmem:[#allocation2 + $0x8c] ss:$200 sps:$4 sm:$0xff]   ;;  %v379_v6 = vpack.c.bf16 %v18220_v0, %v18220_v0  ;;  %v18307_v0 = vld [vmem:[#allocation4 + $0x23c0] ss:$16 sps:$4 sm:$0xff]  }
 0x4a7   :  { %10691 = vmatprep.mubr.bf16.mxu0 %v380_v7  ;;  %11716 = vmatprep.mubr.bf16.mxu1 %v380_v7  ;;  %v18223_v7 = vld [vmem:[#allocation4 + $0x2200] ss:$16 sps:$4 sm:$0xff]  }
 0x4a9   :  { %10662 = vmatpush1.bf16.msra.mxu0 %v18130_v8  ;;  %11687 = vmatpush1.bf16.msra.mxu1 %v18133_v9  ;;  %v18226_v8 = vld [vmem:[#allocation4 + $0x2208] ss:$16 sps:$4 sm:$0xff]   ;;  %v18231_v9 = vld [vmem:[#allocation4 + $0x2224] ss:$16 sps:$4 sm:$0xff]  }
 0x4aa   :  { %10663 = vmatprep.subr.bf16.mxu0 %v18138_v10  ;;  %11688 = vmatprep.subr.bf16.mxu1 %v18141_v11  ;;  %v18234_v10 = vld [vmem:[#allocation4 + $0x222c] ss:$16 sps:$4 sm:$0xff]   ;;  %v382_v11 = vpack.c.bf16 %v18321_v5, %v18321_v5  ;;  %v18313_v5 = vld [vmem:[#allocation4 + $0x23e0] ss:$16 sps:$4 sm:$0xff]  }
 0x4ad   :  { %10664 = vmatpush1.bf16.msra.mxu0 %v18136_v12  ;;  %11689 = vmatpush1.bf16.msra.mxu1 %v18139_v13  ;;  %v18229_v12 = vld [vmem:[#allocation4 + $0x2220] ss:$16 sps:$4 sm:$0xff]   ;;  %v18232_v13 = vld [vmem:[#allocation4 + $0x2228] ss:$16 sps:$4 sm:$0xff]  }
 0x4ae   :  { %10665 = vmatprep.subr.bf16.mxu0 %v18144_v14  ;;  %11690 = vmatprep.subr.bf16.mxu1 %v18147_v15  ;;  %v18237_v14 = vld [vmem:[#allocation4 + $0x2244] ss:$16 sps:$4 sm:$0xff]   ;;  %v18240_v15 = vld [vmem:[#allocation4 + $0x224c] ss:$16 sps:$4 sm:$0xff]  }
 0x4b1   :  { %10666 = vmatpush1.bf16.msra.mxu0 %v18142_v16  ;;  %11691 = vmatpush1.bf16.msra.mxu1 %v18145_v17  ;;  %v18235_v16 = vld [vmem:[#allocation4 + $0x2240] ss:$16 sps:$4 sm:$0xff]   ;;  %v18238_v17 = vld [vmem:[#allocation4 + $0x2248] ss:$16 sps:$4 sm:$0xff]  }
 0x4b2   :  { %10667 = vmatprep.subr.bf16.mxu0 %v18150_v18  ;;  %11692 = vmatprep.subr.bf16.mxu1 %v18153_v19  ;;  %v18243_v18 = vld [vmem:[#allocation4 + $0x2264] ss:$16 sps:$4 sm:$0xff]   ;;  %v18246_v19 = vld [vmem:[#allocation4 + $0x226c] ss:$16 sps:$4 sm:$0xff]  }
 0x4b5   :  { %10668 = vmatpush1.bf16.msra.mxu0 %v18148_v20  ;;  %11693 = vmatpush1.bf16.msra.mxu1 %v18151_v21  ;;  %v18241_v20 = vld [vmem:[#allocation4 + $0x2260] ss:$16 sps:$4 sm:$0xff]   ;;  %v18244_v21 = vld [vmem:[#allocation4 + $0x2268] ss:$16 sps:$4 sm:$0xff]  }
 0x4b6   :  { %10669 = vmatprep.subr.bf16.mxu0 %v18156_v22  ;;  %11694 = vmatprep.subr.bf16.mxu1 %v18159_v23  ;;  %v18249_v22 = vld [vmem:[#allocation4 + $0x2284] ss:$16 sps:$4 sm:$0xff]   ;;  %v18252_v23 = vld [vmem:[#allocation4 + $0x228c] ss:$16 sps:$4 sm:$0xff]  }
 0x4b9   :  { %10670 = vmatpush1.bf16.msra.mxu0 %v18154_v24  ;;  %11695 = vmatpush1.bf16.msra.mxu1 %v18157_v25  ;;  %v18247_v24 = vld [vmem:[#allocation4 + $0x2280] ss:$16 sps:$4 sm:$0xff]   ;;  %v18250_v25 = vld [vmem:[#allocation4 + $0x2288] ss:$16 sps:$4 sm:$0xff]  }
 0x4ba   :  { %10671 = vmatprep.subr.bf16.mxu0 %v18162_v26  ;;  %11696 = vmatprep.subr.bf16.mxu1 %v18165_v27  ;;  %v18255_v26 = vld [vmem:[#allocation4 + $0x22a4] ss:$16 sps:$4 sm:$0xff]   ;;  %v18258_v27 = vld [vmem:[#allocation4 + $0x22ac] ss:$16 sps:$4 sm:$0xff]  }
 0x4bd   :  { %10672 = vmatpush1.bf16.msra.mxu0 %v18160_v28  ;;  %11697 = vmatpush1.bf16.msra.mxu1 %v18163_v29  ;;  %v18253_v28 = vld [vmem:[#allocation4 + $0x22a0] ss:$16 sps:$4 sm:$0xff]   ;;  %v18256_v29 = vld [vmem:[#allocation4 + $0x22a8] ss:$16 sps:$4 sm:$0xff]  }
 0x4be   :  { %10673 = vmatprep.subr.bf16.mxu0 %v18168_v30  ;;  %11698 = vmatprep.subr.bf16.mxu1 %v18171_v31  ;;  %v18261_v30 = vld [vmem:[#allocation4 + $0x22c4] ss:$16 sps:$4 sm:$0xff]   ;;  %v18264_v31 = vld [vmem:[#allocation4 + $0x22cc] ss:$16 sps:$4 sm:$0xff]  }
 0x4c1   :  { %10674 = vmatpush1.bf16.msra.mxu0 %v18166_v32  ;;  %11699 = vmatpush1.bf16.msra.mxu1 %v18169_v33  ;;  %v18259_v32 = vld [vmem:[#allocation4 + $0x22c0] ss:$16 sps:$4 sm:$0xff]   ;;  %v18262_v33 = vld [vmem:[#allocation4 + $0x22c8] ss:$16 sps:$4 sm:$0xff]  }
 0x4c2   :  { %10675 = vmatprep.subr.bf16.mxu0 %v18174_v34  ;;  %11700 = vmatprep.subr.bf16.mxu1 %v18177_v35  ;;  %v18267_v34 = vld [vmem:[#allocation4 + $0x22e4] ss:$16 sps:$4 sm:$0xff]   ;;  %v18270_v35 = vld [vmem:[#allocation4 + $0x22ec] ss:$16 sps:$4 sm:$0xff]  }
 0x4c5   :  { %10676 = vmatpush1.bf16.msra.mxu0 %v18172_v36  ;;  %11701 = vmatpush1.bf16.msra.mxu1 %v18175_v37  ;;  %v18265_v36 = vld [vmem:[#allocation4 + $0x22e0] ss:$16 sps:$4 sm:$0xff]   ;;  %v18268_v37 = vld [vmem:[#allocation4 + $0x22e8] ss:$16 sps:$4 sm:$0xff]  }
 0x4c6   :  { %10677 = vmatprep.subr.bf16.mxu0 %v18180_v38  ;;  %11702 = vmatprep.subr.bf16.mxu1 %v18183_v39  ;;  %v18273_v38 = vld [vmem:[#allocation4 + $0x2304] ss:$16 sps:$4 sm:$0xff]   ;;  %v18276_v39 = vld [vmem:[#allocation4 + $0x230c] ss:$16 sps:$4 sm:$0xff]  }
 0x4c9   :  { %10678 = vmatpush1.bf16.msra.mxu0 %v18178_v40  ;;  %11703 = vmatpush1.bf16.msra.mxu1 %v18181_v41  ;;  %v18271_v40 = vld [vmem:[#allocation4 + $0x2300] ss:$16 sps:$4 sm:$0xff]   ;;  %v18274_v41 = vld [vmem:[#allocation4 + $0x2308] ss:$16 sps:$4 sm:$0xff]  }
 0x4ca   :  { %10679 = vmatprep.subr.bf16.mxu0 %v18186_v42  ;;  %11704 = vmatprep.subr.bf16.mxu1 %v18189_v43  ;;  %v18279_v42 = vld [vmem:[#allocation4 + $0x2324] ss:$16 sps:$4 sm:$0xff]   ;;  %v18282_v43 = vld [vmem:[#allocation4 + $0x232c] ss:$16 sps:$4 sm:$0xff]  }
 0x4cd   :  { %10680 = vmatpush1.bf16.msra.mxu0 %v18184_v44  ;;  %11705 = vmatpush1.bf16.msra.mxu1 %v18187_v45  ;;  %v18277_v44 = vld [vmem:[#allocation4 + $0x2320] ss:$16 sps:$4 sm:$0xff]   ;;  %v18280_v45 = vld [vmem:[#allocation4 + $0x2328] ss:$16 sps:$4 sm:$0xff]  }
 0x4ce   :  { %10681 = vmatprep.subr.bf16.mxu0 %v18192_v46  ;;  %11706 = vmatprep.subr.bf16.mxu1 %v18195_v47  ;;  %v18285_v46 = vld [vmem:[#allocation4 + $0x2344] ss:$16 sps:$4 sm:$0xff]   ;;  %v18288_v47 = vld [vmem:[#allocation4 + $0x234c] ss:$16 sps:$4 sm:$0xff]  }
 0x4d1   :  { %10682 = vmatpush1.bf16.msra.mxu0 %v18190_v48  ;;  %11707 = vmatpush1.bf16.msra.mxu1 %v18193_v49  ;;  %v18283_v48 = vld [vmem:[#allocation4 + $0x2340] ss:$16 sps:$4 sm:$0xff]   ;;  %v18286_v49 = vld [vmem:[#allocation4 + $0x2348] ss:$16 sps:$4 sm:$0xff]  }
 0x4d2   :  { %10683 = vmatprep.subr.bf16.mxu0 %v18198_v50  ;;  %11708 = vmatprep.subr.bf16.mxu1 %v18201_v51  ;;  %v18291_v50 = vld [vmem:[#allocation4 + $0x2364] ss:$16 sps:$4 sm:$0xff]   ;;  %v18294_v51 = vld [vmem:[#allocation4 + $0x236c] ss:$16 sps:$4 sm:$0xff]  }
 0x4d5   :  { %10684 = vmatpush1.bf16.msra.mxu0 %v18196_v52  ;;  %11709 = vmatpush1.bf16.msra.mxu1 %v18199_v53  ;;  %v18289_v52 = vld [vmem:[#allocation4 + $0x2360] ss:$16 sps:$4 sm:$0xff]   ;;  %v18292_v53 = vld [vmem:[#allocation4 + $0x2368] ss:$16 sps:$4 sm:$0xff]  }
 0x4d6   :  { %10685 = vmatprep.subr.bf16.mxu0 %v18204_v54  ;;  %11710 = vmatprep.subr.bf16.mxu1 %v18207_v55  ;;  %v18297_v54 = vld [vmem:[#allocation4 + $0x2384] ss:$16 sps:$4 sm:$0xff]   ;;  %v18300_v55 = vld [vmem:[#allocation4 + $0x238c] ss:$16 sps:$4 sm:$0xff]  }
 0x4d9   :  { %10686 = vmatpush1.bf16.msra.mxu0 %v18202_v56  ;;  %11711 = vmatpush1.bf16.msra.mxu1 %v18205_v57  ;;  %v18295_v56 = vld [vmem:[#allocation4 + $0x2380] ss:$16 sps:$4 sm:$0xff]   ;;  %v18298_v57 = vld [vmem:[#allocation4 + $0x2388] ss:$16 sps:$4 sm:$0xff]  }
 0x4da   :  { %10687 = vmatprep.subr.bf16.mxu0 %v18210_v58  ;;  %11712 = vmatprep.subr.bf16.mxu1 %v18213_v59  ;;  %v18303_v58 = vld [vmem:[#allocation4 + $0x23a4] ss:$16 sps:$4 sm:$0xff]   ;;  %v18306_v59 = vld [vmem:[#allocation4 + $0x23ac] ss:$16 sps:$4 sm:$0xff]  }
 0x4dd   :  { %10688 = vmatpush1.bf16.msra.mxu0 %v18208_v60  ;;  %11713 = vmatpush1.bf16.msra.mxu1 %v18211_v61  ;;  %v18301_v60 = vld [vmem:[#allocation4 + $0x23a0] ss:$16 sps:$4 sm:$0xff]   ;;  %v18304_v61 = vld [vmem:[#allocation4 + $0x23a8] ss:$16 sps:$4 sm:$0xff]  }
 0x4de   :  { %10689 = vmatprep.subr.bf16.mxu0 %v18216_v62  ;;  %11714 = vmatprep.subr.bf16.mxu1 %v18219_v63  ;;  %v18309_v62 = vld [vmem:[#allocation4 + $0x23c4] ss:$16 sps:$4 sm:$0xff]   ;;  %v18312_v63 = vld [vmem:[#allocation4 + $0x23cc] ss:$16 sps:$4 sm:$0xff]  }
 0x4e1   :  { %10690 = vmatpush1.bf16.msra.mxu0 %v18214_v1  ;;  %11715 = vmatpush1.bf16.msra.mxu1 %v18217_v2  ;;  %v18310_v1 = vld [vmem:[#allocation4 + $0x23c8] ss:$16 sps:$4 sm:$0xff]   ;;  %v18315_v2 = vld [vmem:[#allocation4 + $0x23e4] ss:$16 sps:$4 sm:$0xff]  }
 0x4e2   :  { %10700 = vmatprep.subr.bf16.mxu0 %v18225_v3  ;;  %11725 = vmatprep.subr.bf16.mxu1 %v18228_v4  ;;  %v18318_v3 = vld [vmem:[#allocation4 + $0x23ec] ss:$16 sps:$4 sm:$0xff]   ;;  %v18319_v4 = vld [vmem:[#allocation2 + $0x88] ss:$200 sps:$4 sm:$0xff]  }
 0x4e4   :  { %10692 = vmatmul.mubr.bf16.vlgmr.msra.gmra.mrb[0].mxu0 %v379_v6  ;;  %11717 = vmatmul.mubr.bf16.vlgmr.msra.gmra.mrb[0].mxu1 %v379_v6  ;;  %v18316_v6 = vld [vmem:[#allocation4 + $0x23e8] ss:$16 sps:$4 sm:$0xff]  }
 0x4e5   :  { %10701 = vmatpush1.bf16.msra.mxu0 %v18223_v7  ;;  %11726 = vmatpush1.bf16.msra.mxu1 %v18226_v8  ;;  %v18324_v7 = vld [vmem:[#allocation4 + $0x2404] ss:$16 sps:$4 sm:$0xff]   ;;  %v18327_v8 = vld [vmem:[#allocation4 + $0x240c] ss:$16 sps:$4 sm:$0xff]  }
 0x4e6   :  { %10702 = vmatprep.subr.bf16.mxu0 %v18231_v9  ;;  %11727 = vmatprep.subr.bf16.mxu1 %v18234_v10  ;;  %v18420_v9 = vld [vmem:[#allocation2 + $0x94] ss:$200 sps:$4 sm:$0xff]   ;;  %v381_v10 = vpack.c.bf16 %v18319_v4, %v18319_v4  ;;  %v18406_v4 = vld [vmem:[#allocation4 + $0x25c0] ss:$16 sps:$4 sm:$0xff]  }
 0x4e7   :  { %10732 = vmatprep.mubr.bf16.mxu0 %v382_v11  ;;  %11757 = vmatprep.mubr.bf16.mxu1 %v382_v11  ;;  %v18322_v11 = vld [vmem:[#allocation4 + $0x2400] ss:$16 sps:$4 sm:$0xff]  }
 0x4e9   :  { %10703 = vmatpush1.bf16.msra.mxu0 %v18229_v12  ;;  %11728 = vmatpush1.bf16.msra.mxu1 %v18232_v13  ;;  %v18325_v12 = vld [vmem:[#allocation4 + $0x2408] ss:$16 sps:$4 sm:$0xff]   ;;  %v18330_v13 = vld [vmem:[#allocation4 + $0x2424] ss:$16 sps:$4 sm:$0xff]  }
 0x4ea   :  { %10704 = vmatprep.subr.bf16.mxu0 %v18237_v14  ;;  %11729 = vmatprep.subr.bf16.mxu1 %v18240_v15  ;;  %v18333_v14 = vld [vmem:[#allocation4 + $0x242c] ss:$16 sps:$4 sm:$0xff]   ;;  %v384_v15 = vpack.c.bf16 %v18420_v9, %v18420_v9  ;;  %v18412_v9 = vld [vmem:[#allocation4 + $0x25e0] ss:$16 sps:$4 sm:$0xff]  }
 0x4ed   :  { %10705 = vmatpush1.bf16.msra.mxu0 %v18235_v16  ;;  %11730 = vmatpush1.bf16.msra.mxu1 %v18238_v17  ;;  %v18328_v16 = vld [vmem:[#allocation4 + $0x2420] ss:$16 sps:$4 sm:$0xff]   ;;  %v18331_v17 = vld [vmem:[#allocation4 + $0x2428] ss:$16 sps:$4 sm:$0xff]  }
 0x4ee   :  { %10706 = vmatprep.subr.bf16.mxu0 %v18243_v18  ;;  %11731 = vmatprep.subr.bf16.mxu1 %v18246_v19  ;;  %v18336_v18 = vld [vmem:[#allocation4 + $0x2444] ss:$16 sps:$4 sm:$0xff]   ;;  %v18339_v19 = vld [vmem:[#allocation4 + $0x244c] ss:$16 sps:$4 sm:$0xff]  }
 0x4f1   :  { %10707 = vmatpush1.bf16.msra.mxu0 %v18241_v20  ;;  %11732 = vmatpush1.bf16.msra.mxu1 %v18244_v21  ;;  %v18334_v20 = vld [vmem:[#allocation4 + $0x2440] ss:$16 sps:$4 sm:$0xff]   ;;  %v18337_v21 = vld [vmem:[#allocation4 + $0x2448] ss:$16 sps:$4 sm:$0xff]  }
 0x4f2   :  { %10708 = vmatprep.subr.bf16.mxu0 %v18249_v22  ;;  %11733 = vmatprep.subr.bf16.mxu1 %v18252_v23  ;;  %v18342_v22 = vld [vmem:[#allocation4 + $0x2464] ss:$16 sps:$4 sm:$0xff]   ;;  %v18345_v23 = vld [vmem:[#allocation4 + $0x246c] ss:$16 sps:$4 sm:$0xff]  }
 0x4f5   :  { %10709 = vmatpush1.bf16.msra.mxu0 %v18247_v24  ;;  %11734 = vmatpush1.bf16.msra.mxu1 %v18250_v25  ;;  %v18340_v24 = vld [vmem:[#allocation4 + $0x2460] ss:$16 sps:$4 sm:$0xff]   ;;  %v18343_v25 = vld [vmem:[#allocation4 + $0x2468] ss:$16 sps:$4 sm:$0xff]  }
 0x4f6   :  { %10710 = vmatprep.subr.bf16.mxu0 %v18255_v26  ;;  %11735 = vmatprep.subr.bf16.mxu1 %v18258_v27  ;;  %v18348_v26 = vld [vmem:[#allocation4 + $0x2484] ss:$16 sps:$4 sm:$0xff]   ;;  %v18351_v27 = vld [vmem:[#allocation4 + $0x248c] ss:$16 sps:$4 sm:$0xff]  }
 0x4f9   :  { %10711 = vmatpush1.bf16.msra.mxu0 %v18253_v28  ;;  %11736 = vmatpush1.bf16.msra.mxu1 %v18256_v29  ;;  %v18346_v28 = vld [vmem:[#allocation4 + $0x2480] ss:$16 sps:$4 sm:$0xff]   ;;  %v18349_v29 = vld [vmem:[#allocation4 + $0x2488] ss:$16 sps:$4 sm:$0xff]  }
 0x4fa   :  { %10712 = vmatprep.subr.bf16.mxu0 %v18261_v30  ;;  %11737 = vmatprep.subr.bf16.mxu1 %v18264_v31  ;;  %v18354_v30 = vld [vmem:[#allocation4 + $0x24a4] ss:$16 sps:$4 sm:$0xff]   ;;  %v18357_v31 = vld [vmem:[#allocation4 + $0x24ac] ss:$16 sps:$4 sm:$0xff]  }
 0x4fd   :  { %10713 = vmatpush1.bf16.msra.mxu0 %v18259_v32  ;;  %11738 = vmatpush1.bf16.msra.mxu1 %v18262_v33  ;;  %v18352_v32 = vld [vmem:[#allocation4 + $0x24a0] ss:$16 sps:$4 sm:$0xff]   ;;  %v18355_v33 = vld [vmem:[#allocation4 + $0x24a8] ss:$16 sps:$4 sm:$0xff]  }
 0x4fe   :  { %10714 = vmatprep.subr.bf16.mxu0 %v18267_v34  ;;  %11739 = vmatprep.subr.bf16.mxu1 %v18270_v35  ;;  %v18360_v34 = vld [vmem:[#allocation4 + $0x24c4] ss:$16 sps:$4 sm:$0xff]   ;;  %v18363_v35 = vld [vmem:[#allocation4 + $0x24cc] ss:$16 sps:$4 sm:$0xff]  }
 0x501   :  { %10715 = vmatpush1.bf16.msra.mxu0 %v18265_v36  ;;  %11740 = vmatpush1.bf16.msra.mxu1 %v18268_v37  ;;  %v18358_v36 = vld [vmem:[#allocation4 + $0x24c0] ss:$16 sps:$4 sm:$0xff]   ;;  %v18361_v37 = vld [vmem:[#allocation4 + $0x24c8] ss:$16 sps:$4 sm:$0xff]  }
 0x502   :  { %10716 = vmatprep.subr.bf16.mxu0 %v18273_v38  ;;  %11741 = vmatprep.subr.bf16.mxu1 %v18276_v39  ;;  %v18366_v38 = vld [vmem:[#allocation4 + $0x24e4] ss:$16 sps:$4 sm:$0xff]   ;;  %v18369_v39 = vld [vmem:[#allocation4 + $0x24ec] ss:$16 sps:$4 sm:$0xff]  }
 0x505   :  { %10717 = vmatpush1.bf16.msra.mxu0 %v18271_v40  ;;  %11742 = vmatpush1.bf16.msra.mxu1 %v18274_v41  ;;  %v18364_v40 = vld [vmem:[#allocation4 + $0x24e0] ss:$16 sps:$4 sm:$0xff]   ;;  %v18367_v41 = vld [vmem:[#allocation4 + $0x24e8] ss:$16 sps:$4 sm:$0xff]  }
 0x506   :  { %10718 = vmatprep.subr.bf16.mxu0 %v18279_v42  ;;  %11743 = vmatprep.subr.bf16.mxu1 %v18282_v43  ;;  %v18372_v42 = vld [vmem:[#allocation4 + $0x2504] ss:$16 sps:$4 sm:$0xff]   ;;  %v18375_v43 = vld [vmem:[#allocation4 + $0x250c] ss:$16 sps:$4 sm:$0xff]  }
 0x509   :  { %10719 = vmatpush1.bf16.msra.mxu0 %v18277_v44  ;;  %11744 = vmatpush1.bf16.msra.mxu1 %v18280_v45  ;;  %v18370_v44 = vld [vmem:[#allocation4 + $0x2500] ss:$16 sps:$4 sm:$0xff]   ;;  %v18373_v45 = vld [vmem:[#allocation4 + $0x2508] ss:$16 sps:$4 sm:$0xff]  }
 0x50a   :  { %10720 = vmatprep.subr.bf16.mxu0 %v18285_v46  ;;  %11745 = vmatprep.subr.bf16.mxu1 %v18288_v47  ;;  %v18378_v46 = vld [vmem:[#allocation4 + $0x2524] ss:$16 sps:$4 sm:$0xff]   ;;  %v18381_v47 = vld [vmem:[#allocation4 + $0x252c] ss:$16 sps:$4 sm:$0xff]  }
 0x50d   :  { %10721 = vmatpush1.bf16.msra.mxu0 %v18283_v48  ;;  %11746 = vmatpush1.bf16.msra.mxu1 %v18286_v49  ;;  %v18376_v48 = vld [vmem:[#allocation4 + $0x2520] ss:$16 sps:$4 sm:$0xff]   ;;  %v18379_v49 = vld [vmem:[#allocation4 + $0x2528] ss:$16 sps:$4 sm:$0xff]  }
 0x50e   :  { %10722 = vmatprep.subr.bf16.mxu0 %v18291_v50  ;;  %11747 = vmatprep.subr.bf16.mxu1 %v18294_v51  ;;  %v18384_v50 = vld [vmem:[#allocation4 + $0x2544] ss:$16 sps:$4 sm:$0xff]   ;;  %v18387_v51 = vld [vmem:[#allocation4 + $0x254c] ss:$16 sps:$4 sm:$0xff]  }
 0x511   :  { %10723 = vmatpush1.bf16.msra.mxu0 %v18289_v52  ;;  %11748 = vmatpush1.bf16.msra.mxu1 %v18292_v53  ;;  %v18382_v52 = vld [vmem:[#allocation4 + $0x2540] ss:$16 sps:$4 sm:$0xff]   ;;  %v18385_v53 = vld [vmem:[#allocation4 + $0x2548] ss:$16 sps:$4 sm:$0xff]  }
 0x512   :  { %10724 = vmatprep.subr.bf16.mxu0 %v18297_v54  ;;  %11749 = vmatprep.subr.bf16.mxu1 %v18300_v55  ;;  %v18390_v54 = vld [vmem:[#allocation4 + $0x2564] ss:$16 sps:$4 sm:$0xff]   ;;  %v18393_v55 = vld [vmem:[#allocation4 + $0x256c] ss:$16 sps:$4 sm:$0xff]  }
 0x515   :  { %10725 = vmatpush1.bf16.msra.mxu0 %v18295_v56  ;;  %11750 = vmatpush1.bf16.msra.mxu1 %v18298_v57  ;;  %v18388_v56 = vld [vmem:[#allocation4 + $0x2560] ss:$16 sps:$4 sm:$0xff]   ;;  %v18391_v57 = vld [vmem:[#allocation4 + $0x2568] ss:$16 sps:$4 sm:$0xff]  }
 0x516   :  { %10726 = vmatprep.subr.bf16.mxu0 %v18303_v58  ;;  %11751 = vmatprep.subr.bf16.mxu1 %v18306_v59  ;;  %v18396_v58 = vld [vmem:[#allocation4 + $0x2584] ss:$16 sps:$4 sm:$0xff]   ;;  %v18399_v59 = vld [vmem:[#allocation4 + $0x258c] ss:$16 sps:$4 sm:$0xff]  }
 0x519   :  { %10727 = vmatpush1.bf16.msra.mxu0 %v18301_v60  ;;  %11752 = vmatpush1.bf16.msra.mxu1 %v18304_v61  ;;  %v18394_v60 = vld [vmem:[#allocation4 + $0x2580] ss:$16 sps:$4 sm:$0xff]   ;;  %v18397_v61 = vld [vmem:[#allocation4 + $0x2588] ss:$16 sps:$4 sm:$0xff]  }
 0x51a   :  { %10728 = vmatprep.subr.bf16.mxu0 %v18309_v62  ;;  %11753 = vmatprep.subr.bf16.mxu1 %v18312_v63  ;;  %v18402_v62 = vld [vmem:[#allocation4 + $0x25a4] ss:$16 sps:$4 sm:$0xff]   ;;  %v18405_v63 = vld [vmem:[#allocation4 + $0x25ac] ss:$16 sps:$4 sm:$0xff]  }
 0x51d   :  { %10729 = vmatpush1.bf16.msra.mxu0 %v18307_v0  ;;  %11754 = vmatpush1.bf16.msra.mxu1 %v18310_v1  ;;  %v18400_v0 = vld [vmem:[#allocation4 + $0x25a0] ss:$16 sps:$4 sm:$0xff]   ;;  %v18403_v1 = vld [vmem:[#allocation4 + $0x25a8] ss:$16 sps:$4 sm:$0xff]  }
 0x51e   :  { %10730 = vmatprep.subr.bf16.mxu0 %v18315_v2  ;;  %11755 = vmatprep.subr.bf16.mxu1 %v18318_v3  ;;  %v18408_v2 = vld [vmem:[#allocation4 + $0x25c4] ss:$16 sps:$4 sm:$0xff]   ;;  %v18411_v3 = vld [vmem:[#allocation4 + $0x25cc] ss:$16 sps:$4 sm:$0xff]  }
 0x521   :  { %10731 = vmatpush1.bf16.msra.mxu0 %v18313_v5  ;;  %11756 = vmatpush1.bf16.msra.mxu1 %v18316_v6  ;;  %v18409_v5 = vld [vmem:[#allocation4 + $0x25c8] ss:$16 sps:$4 sm:$0xff]   ;;  %v18414_v6 = vld [vmem:[#allocation4 + $0x25e4] ss:$16 sps:$4 sm:$0xff]  }
 0x522   :  { %10741 = vmatprep.subr.bf16.mxu0 %v18324_v7  ;;  %11766 = vmatprep.subr.bf16.mxu1 %v18327_v8  ;;  %v18417_v7 = vld [vmem:[#allocation4 + $0x25ec] ss:$16 sps:$4 sm:$0xff]   ;;  %v18418_v8 = vld [vmem:[#allocation2 + $0x90] ss:$200 sps:$4 sm:$0xff]  }
 0x524   :  { %10733 = vmatmul.mubr.bf16.vlgmr.msra.gmra.mrb[0].mxu0 %v381_v10  ;;  %11758 = vmatmul.mubr.bf16.vlgmr.msra.gmra.mrb[0].mxu1 %v381_v10  ;;  %v18415_v10 = vld [vmem:[#allocation4 + $0x25e8] ss:$16 sps:$4 sm:$0xff]  }
 0x525   :  { %10742 = vmatpush1.bf16.msra.mxu0 %v18322_v11  ;;  %11767 = vmatpush1.bf16.msra.mxu1 %v18325_v12  ;;  %v18423_v11 = vld [vmem:[#allocation4 + $0x2604] ss:$16 sps:$4 sm:$0xff]   ;;  %v18426_v12 = vld [vmem:[#allocation4 + $0x260c] ss:$16 sps:$4 sm:$0xff]  }
 0x526   :  { %10743 = vmatprep.subr.bf16.mxu0 %v18330_v13  ;;  %11768 = vmatprep.subr.bf16.mxu1 %v18333_v14  ;;  %v18519_v13 = vld [vmem:[#allocation2 + $0x9c] ss:$200 sps:$4 sm:$0xff]   ;;  %v383_v14 = vpack.c.bf16 %v18418_v8, %v18418_v8  ;;  %v18505_v8 = vld [vmem:[#allocation4 + $0x27c0] ss:$16 sps:$4 sm:$0xff]  }
 0x527   :  { %10773 = vmatprep.mubr.bf16.mxu0 %v384_v15  ;;  %11798 = vmatprep.mubr.bf16.mxu1 %v384_v15  ;;  %v18421_v15 = vld [vmem:[#allocation4 + $0x2600] ss:$16 sps:$4 sm:$0xff]  }
 0x529   :  { %10744 = vmatpush1.bf16.msra.mxu0 %v18328_v16  ;;  %11769 = vmatpush1.bf16.msra.mxu1 %v18331_v17  ;;  %v18424_v16 = vld [vmem:[#allocation4 + $0x2608] ss:$16 sps:$4 sm:$0xff]   ;;  %v18429_v17 = vld [vmem:[#allocation4 + $0x2624] ss:$16 sps:$4 sm:$0xff]  }
 0x52a   :  { %10745 = vmatprep.subr.bf16.mxu0 %v18336_v18  ;;  %11770 = vmatprep.subr.bf16.mxu1 %v18339_v19  ;;  %v18432_v18 = vld [vmem:[#allocation4 + $0x262c] ss:$16 sps:$4 sm:$0xff]   ;;  %v386_v19 = vpack.c.bf16 %v18519_v13, %v18519_v13  ;;  %v18511_v13 = vld [vmem:[#allocation4 + $0x27e0] ss:$16 sps:$4 sm:$0xff]  }
 0x52d   :  { %10746 = vmatpush1.bf16.msra.mxu0 %v18334_v20  ;;  %11771 = vmatpush1.bf16.msra.mxu1 %v18337_v21  ;;  %v18427_v20 = vld [vmem:[#allocation4 + $0x2620] ss:$16 sps:$4 sm:$0xff]   ;;  %v18430_v21 = vld [vmem:[#allocation4 + $0x2628] ss:$16 sps:$4 sm:$0xff]  }
 0x52e   :  { %10747 = vmatprep.subr.bf16.mxu0 %v18342_v22  ;;  %11772 = vmatprep.subr.bf16.mxu1 %v18345_v23  ;;  %v18435_v22 = vld [vmem:[#allocation4 + $0x2644] ss:$16 sps:$4 sm:$0xff]   ;;  %v18438_v23 = vld [vmem:[#allocation4 + $0x264c] ss:$16 sps:$4 sm:$0xff]  }
 0x531   :  { %10748 = vmatpush1.bf16.msra.mxu0 %v18340_v24  ;;  %11773 = vmatpush1.bf16.msra.mxu1 %v18343_v25  ;;  %v18433_v24 = vld [vmem:[#allocation4 + $0x2640] ss:$16 sps:$4 sm:$0xff]   ;;  %v18436_v25 = vld [vmem:[#allocation4 + $0x2648] ss:$16 sps:$4 sm:$0xff]  }
 0x532   :  { %10749 = vmatprep.subr.bf16.mxu0 %v18348_v26  ;;  %11774 = vmatprep.subr.bf16.mxu1 %v18351_v27  ;;  %v18441_v26 = vld [vmem:[#allocation4 + $0x2664] ss:$16 sps:$4 sm:$0xff]   ;;  %v18444_v27 = vld [vmem:[#allocation4 + $0x266c] ss:$16 sps:$4 sm:$0xff]  }
 0x535   :  { %10750 = vmatpush1.bf16.msra.mxu0 %v18346_v28  ;;  %11775 = vmatpush1.bf16.msra.mxu1 %v18349_v29  ;;  %v18439_v28 = vld [vmem:[#allocation4 + $0x2660] ss:$16 sps:$4 sm:$0xff]   ;;  %v18442_v29 = vld [vmem:[#allocation4 + $0x2668] ss:$16 sps:$4 sm:$0xff]  }
 0x536   :  { %10751 = vmatprep.subr.bf16.mxu0 %v18354_v30  ;;  %11776 = vmatprep.subr.bf16.mxu1 %v18357_v31  ;;  %v18447_v30 = vld [vmem:[#allocation4 + $0x2684] ss:$16 sps:$4 sm:$0xff]   ;;  %v18450_v31 = vld [vmem:[#allocation4 + $0x268c] ss:$16 sps:$4 sm:$0xff]  }
 0x539   :  { %10752 = vmatpush1.bf16.msra.mxu0 %v18352_v32  ;;  %11777 = vmatpush1.bf16.msra.mxu1 %v18355_v33  ;;  %v18445_v32 = vld [vmem:[#allocation4 + $0x2680] ss:$16 sps:$4 sm:$0xff]   ;;  %v18448_v33 = vld [vmem:[#allocation4 + $0x2688] ss:$16 sps:$4 sm:$0xff]  }
 0x53a   :  { %10753 = vmatprep.subr.bf16.mxu0 %v18360_v34  ;;  %11778 = vmatprep.subr.bf16.mxu1 %v18363_v35  ;;  %v18453_v34 = vld [vmem:[#allocation4 + $0x26a4] ss:$16 sps:$4 sm:$0xff]   ;;  %v18456_v35 = vld [vmem:[#allocation4 + $0x26ac] ss:$16 sps:$4 sm:$0xff]  }
 0x53d   :  { %10754 = vmatpush1.bf16.msra.mxu0 %v18358_v36  ;;  %11779 = vmatpush1.bf16.msra.mxu1 %v18361_v37  ;;  %v18451_v36 = vld [vmem:[#allocation4 + $0x26a0] ss:$16 sps:$4 sm:$0xff]   ;;  %v18454_v37 = vld [vmem:[#allocation4 + $0x26a8] ss:$16 sps:$4 sm:$0xff]  }
 0x53e   :  { %10755 = vmatprep.subr.bf16.mxu0 %v18366_v38  ;;  %11780 = vmatprep.subr.bf16.mxu1 %v18369_v39  ;;  %v18459_v38 = vld [vmem:[#allocation4 + $0x26c4] ss:$16 sps:$4 sm:$0xff]   ;;  %v18462_v39 = vld [vmem:[#allocation4 + $0x26cc] ss:$16 sps:$4 sm:$0xff]  }
 0x541   :  { %10756 = vmatpush1.bf16.msra.mxu0 %v18364_v40  ;;  %11781 = vmatpush1.bf16.msra.mxu1 %v18367_v41  ;;  %v18457_v40 = vld [vmem:[#allocation4 + $0x26c0] ss:$16 sps:$4 sm:$0xff]   ;;  %v18460_v41 = vld [vmem:[#allocation4 + $0x26c8] ss:$16 sps:$4 sm:$0xff]  }
 0x542   :  { %10757 = vmatprep.subr.bf16.mxu0 %v18372_v42  ;;  %11782 = vmatprep.subr.bf16.mxu1 %v18375_v43  ;;  %v18465_v42 = vld [vmem:[#allocation4 + $0x26e4] ss:$16 sps:$4 sm:$0xff]   ;;  %v18468_v43 = vld [vmem:[#allocation4 + $0x26ec] ss:$16 sps:$4 sm:$0xff]  }
 0x545   :  { %10758 = vmatpush1.bf16.msra.mxu0 %v18370_v44  ;;  %11783 = vmatpush1.bf16.msra.mxu1 %v18373_v45  ;;  %v18463_v44 = vld [vmem:[#allocation4 + $0x26e0] ss:$16 sps:$4 sm:$0xff]   ;;  %v18466_v45 = vld [vmem:[#allocation4 + $0x26e8] ss:$16 sps:$4 sm:$0xff]  }
 0x546   :  { %10759 = vmatprep.subr.bf16.mxu0 %v18378_v46  ;;  %11784 = vmatprep.subr.bf16.mxu1 %v18381_v47  ;;  %v18471_v46 = vld [vmem:[#allocation4 + $0x2704] ss:$16 sps:$4 sm:$0xff]   ;;  %v18474_v47 = vld [vmem:[#allocation4 + $0x270c] ss:$16 sps:$4 sm:$0xff]  }
 0x549   :  { %10760 = vmatpush1.bf16.msra.mxu0 %v18376_v48  ;;  %11785 = vmatpush1.bf16.msra.mxu1 %v18379_v49  ;;  %v18469_v48 = vld [vmem:[#allocation4 + $0x2700] ss:$16 sps:$4 sm:$0xff]   ;;  %v18472_v49 = vld [vmem:[#allocation4 + $0x2708] ss:$16 sps:$4 sm:$0xff]  }
 0x54a   :  { %10761 = vmatprep.subr.bf16.mxu0 %v18384_v50  ;;  %11786 = vmatprep.subr.bf16.mxu1 %v18387_v51  ;;  %v18477_v50 = vld [vmem:[#allocation4 + $0x2724] ss:$16 sps:$4 sm:$0xff]   ;;  %v18480_v51 = vld [vmem:[#allocation4 + $0x272c] ss:$16 sps:$4 sm:$0xff]  }
 0x54d   :  { %10762 = vmatpush1.bf16.msra.mxu0 %v18382_v52  ;;  %11787 = vmatpush1.bf16.msra.mxu1 %v18385_v53  ;;  %v18475_v52 = vld [vmem:[#allocation4 + $0x2720] ss:$16 sps:$4 sm:$0xff]   ;;  %v18478_v53 = vld [vmem:[#allocation4 + $0x2728] ss:$16 sps:$4 sm:$0xff]  }
 0x54e   :  { %10763 = vmatprep.subr.bf16.mxu0 %v18390_v54  ;;  %11788 = vmatprep.subr.bf16.mxu1 %v18393_v55  ;;  %v18483_v54 = vld [vmem:[#allocation4 + $0x2744] ss:$16 sps:$4 sm:$0xff]   ;;  %v18486_v55 = vld [vmem:[#allocation4 + $0x274c] ss:$16 sps:$4 sm:$0xff]  }
 0x551   :  { %10764 = vmatpush1.bf16.msra.mxu0 %v18388_v56  ;;  %11789 = vmatpush1.bf16.msra.mxu1 %v18391_v57  ;;  %v18481_v56 = vld [vmem:[#allocation4 + $0x2740] ss:$16 sps:$4 sm:$0xff]   ;;  %v18484_v57 = vld [vmem:[#allocation4 + $0x2748] ss:$16 sps:$4 sm:$0xff]  }
 0x552   :  { %10765 = vmatprep.subr.bf16.mxu0 %v18396_v58  ;;  %11790 = vmatprep.subr.bf16.mxu1 %v18399_v59  ;;  %v18489_v58 = vld [vmem:[#allocation4 + $0x2764] ss:$16 sps:$4 sm:$0xff]   ;;  %v18492_v59 = vld [vmem:[#allocation4 + $0x276c] ss:$16 sps:$4 sm:$0xff]  }
 0x555   :  { %10766 = vmatpush1.bf16.msra.mxu0 %v18394_v60  ;;  %11791 = vmatpush1.bf16.msra.mxu1 %v18397_v61  ;;  %v18487_v60 = vld [vmem:[#allocation4 + $0x2760] ss:$16 sps:$4 sm:$0xff]   ;;  %v18490_v61 = vld [vmem:[#allocation4 + $0x2768] ss:$16 sps:$4 sm:$0xff]  }
 0x556   :  { %10767 = vmatprep.subr.bf16.mxu0 %v18402_v62  ;;  %11792 = vmatprep.subr.bf16.mxu1 %v18405_v63  ;;  %v18495_v62 = vld [vmem:[#allocation4 + $0x2784] ss:$16 sps:$4 sm:$0xff]   ;;  %v18498_v63 = vld [vmem:[#allocation4 + $0x278c] ss:$16 sps:$4 sm:$0xff]  }
 0x559   :  { %10768 = vmatpush1.bf16.msra.mxu0 %v18400_v0  ;;  %11793 = vmatpush1.bf16.msra.mxu1 %v18403_v1  ;;  %v18493_v0 = vld [vmem:[#allocation4 + $0x2780] ss:$16 sps:$4 sm:$0xff]   ;;  %v18496_v1 = vld [vmem:[#allocation4 + $0x2788] ss:$16 sps:$4 sm:$0xff]  }
 0x55a   :  { %10769 = vmatprep.subr.bf16.mxu0 %v18408_v2  ;;  %11794 = vmatprep.subr.bf16.mxu1 %v18411_v3  ;;  %v18501_v2 = vld [vmem:[#allocation4 + $0x27a4] ss:$16 sps:$4 sm:$0xff]   ;;  %v18504_v3 = vld [vmem:[#allocation4 + $0x27ac] ss:$16 sps:$4 sm:$0xff]  }
 0x55d   :  { %10770 = vmatpush1.bf16.msra.mxu0 %v18406_v4  ;;  %11795 = vmatpush1.bf16.msra.mxu1 %v18409_v5  ;;  %v18499_v4 = vld [vmem:[#allocation4 + $0x27a0] ss:$16 sps:$4 sm:$0xff]   ;;  %v18502_v5 = vld [vmem:[#allocation4 + $0x27a8] ss:$16 sps:$4 sm:$0xff]  }
 0x55e   :  { %10771 = vmatprep.subr.bf16.mxu0 %v18414_v6  ;;  %11796 = vmatprep.subr.bf16.mxu1 %v18417_v7  ;;  %v18507_v6 = vld [vmem:[#allocation4 + $0x27c4] ss:$16 sps:$4 sm:$0xff]   ;;  %v18510_v7 = vld [vmem:[#allocation4 + $0x27cc] ss:$16 sps:$4 sm:$0xff]  }
 0x561   :  { %10772 = vmatpush1.bf16.msra.mxu0 %v18412_v9  ;;  %11797 = vmatpush1.bf16.msra.mxu1 %v18415_v10  ;;  %v18508_v9 = vld [vmem:[#allocation4 + $0x27c8] ss:$16 sps:$4 sm:$0xff]   ;;  %v18513_v10 = vld [vmem:[#allocation4 + $0x27e4] ss:$16 sps:$4 sm:$0xff]  }
 0x562   :  { %10782 = vmatprep.subr.bf16.mxu0 %v18423_v11  ;;  %11807 = vmatprep.subr.bf16.mxu1 %v18426_v12  ;;  %v18516_v11 = vld [vmem:[#allocation4 + $0x27ec] ss:$16 sps:$4 sm:$0xff]   ;;  %v18517_v12 = vld [vmem:[#allocation2 + $0x98] ss:$200 sps:$4 sm:$0xff]  }
 0x564   :  { %10774 = vmatmul.mubr.bf16.vlgmr.msra.gmra.mrb[0].mxu0 %v383_v14  ;;  %11799 = vmatmul.mubr.bf16.vlgmr.msra.gmra.mrb[0].mxu1 %v383_v14  ;;  %v18514_v14 = vld [vmem:[#allocation4 + $0x27e8] ss:$16 sps:$4 sm:$0xff]  }
 0x565   :  { %10783 = vmatpush1.bf16.msra.mxu0 %v18421_v15  ;;  %11808 = vmatpush1.bf16.msra.mxu1 %v18424_v16  ;;  %v18522_v15 = vld [vmem:[#allocation4 + $0x2804] ss:$16 sps:$4 sm:$0xff]   ;;  %v18525_v16 = vld [vmem:[#allocation4 + $0x280c] ss:$16 sps:$4 sm:$0xff]  }
 0x566   :  { %10784 = vmatprep.subr.bf16.mxu0 %v18429_v17  ;;  %11809 = vmatprep.subr.bf16.mxu1 %v18432_v18  ;;  %v18618_v17 = vld [vmem:[#allocation2 + $0xa4] ss:$200 sps:$4 sm:$0xff]   ;;  %v385_v18 = vpack.c.bf16 %v18517_v12, %v18517_v12  ;;  %v18604_v12 = vld [vmem:[#allocation4 + $0x29c0] ss:$16 sps:$4 sm:$0xff]  }
 0x567   :  { %10814 = vmatprep.mubr.bf16.mxu0 %v386_v19  ;;  %11839 = vmatprep.mubr.bf16.mxu1 %v386_v19  ;;  %v18520_v19 = vld [vmem:[#allocation4 + $0x2800] ss:$16 sps:$4 sm:$0xff]  }
 0x569   :  { %10785 = vmatpush1.bf16.msra.mxu0 %v18427_v20  ;;  %11810 = vmatpush1.bf16.msra.mxu1 %v18430_v21  ;;  %v18523_v20 = vld [vmem:[#allocation4 + $0x2808] ss:$16 sps:$4 sm:$0xff]   ;;  %v18528_v21 = vld [vmem:[#allocation4 + $0x2824] ss:$16 sps:$4 sm:$0xff]  }
 0x56a   :  { %10786 = vmatprep.subr.bf16.mxu0 %v18435_v22  ;;  %11811 = vmatprep.subr.bf16.mxu1 %v18438_v23  ;;  %v18531_v22 = vld [vmem:[#allocation4 + $0x282c] ss:$16 sps:$4 sm:$0xff]   ;;  %v388_v23 = vpack.c.bf16 %v18618_v17, %v18618_v17  ;;  %v18610_v17 = vld [vmem:[#allocation4 + $0x29e0] ss:$16 sps:$4 sm:$0xff]  }
 0x56d   :  { %10787 = vmatpush1.bf16.msra.mxu0 %v18433_v24  ;;  %11812 = vmatpush1.bf16.msra.mxu1 %v18436_v25  ;;  %v18526_v24 = vld [vmem:[#allocation4 + $0x2820] ss:$16 sps:$4 sm:$0xff]   ;;  %v18529_v25 = vld [vmem:[#allocation4 + $0x2828] ss:$16 sps:$4 sm:$0xff]  }
 0x56e   :  { %10788 = vmatprep.subr.bf16.mxu0 %v18441_v26  ;;  %11813 = vmatprep.subr.bf16.mxu1 %v18444_v27  ;;  %v18534_v26 = vld [vmem:[#allocation4 + $0x2844] ss:$16 sps:$4 sm:$0xff]   ;;  %v18537_v27 = vld [vmem:[#allocation4 + $0x284c] ss:$16 sps:$4 sm:$0xff]  }
 0x571   :  { %10789 = vmatpush1.bf16.msra.mxu0 %v18439_v28  ;;  %11814 = vmatpush1.bf16.msra.mxu1 %v18442_v29  ;;  %v18532_v28 = vld [vmem:[#allocation4 + $0x2840] ss:$16 sps:$4 sm:$0xff]   ;;  %v18535_v29 = vld [vmem:[#allocation4 + $0x2848] ss:$16 sps:$4 sm:$0xff]  }
 0x572   :  { %10790 = vmatprep.subr.bf16.mxu0 %v18447_v30  ;;  %11815 = vmatprep.subr.bf16.mxu1 %v18450_v31  ;;  %v18540_v30 = vld [vmem:[#allocation4 + $0x2864] ss:$16 sps:$4 sm:$0xff]   ;;  %v18543_v31 = vld [vmem:[#allocation4 + $0x286c] ss:$16 sps:$4 sm:$0xff]  }
 0x575   :  { %10791 = vmatpush1.bf16.msra.mxu0 %v18445_v32  ;;  %11816 = vmatpush1.bf16.msra.mxu1 %v18448_v33  ;;  %v18538_v32 = vld [vmem:[#allocation4 + $0x2860] ss:$16 sps:$4 sm:$0xff]   ;;  %v18541_v33 = vld [vmem:[#allocation4 + $0x2868] ss:$16 sps:$4 sm:$0xff]  }
 0x576   :  { %10792 = vmatprep.subr.bf16.mxu0 %v18453_v34  ;;  %11817 = vmatprep.subr.bf16.mxu1 %v18456_v35  ;;  %v18546_v34 = vld [vmem:[#allocation4 + $0x2884] ss:$16 sps:$4 sm:$0xff]   ;;  %v18549_v35 = vld [vmem:[#allocation4 + $0x288c] ss:$16 sps:$4 sm:$0xff]  }
 0x579   :  { %10793 = vmatpush1.bf16.msra.mxu0 %v18451_v36  ;;  %11818 = vmatpush1.bf16.msra.mxu1 %v18454_v37  ;;  %v18544_v36 = vld [vmem:[#allocation4 + $0x2880] ss:$16 sps:$4 sm:$0xff]   ;;  %v18547_v37 = vld [vmem:[#allocation4 + $0x2888] ss:$16 sps:$4 sm:$0xff]  }
 0x57a   :  { %10794 = vmatprep.subr.bf16.mxu0 %v18459_v38  ;;  %11819 = vmatprep.subr.bf16.mxu1 %v18462_v39  ;;  %v18552_v38 = vld [vmem:[#allocation4 + $0x28a4] ss:$16 sps:$4 sm:$0xff]   ;;  %v18555_v39 = vld [vmem:[#allocation4 + $0x28ac] ss:$16 sps:$4 sm:$0xff]  }
 0x57d   :  { %10795 = vmatpush1.bf16.msra.mxu0 %v18457_v40  ;;  %11820 = vmatpush1.bf16.msra.mxu1 %v18460_v41  ;;  %v18550_v40 = vld [vmem:[#allocation4 + $0x28a0] ss:$16 sps:$4 sm:$0xff]   ;;  %v18553_v41 = vld [vmem:[#allocation4 + $0x28a8] ss:$16 sps:$4 sm:$0xff]  }
 0x57e   :  { %10796 = vmatprep.subr.bf16.mxu0 %v18465_v42  ;;  %11821 = vmatprep.subr.bf16.mxu1 %v18468_v43  ;;  %v18558_v42 = vld [vmem:[#allocation4 + $0x28c4] ss:$16 sps:$4 sm:$0xff]   ;;  %v18561_v43 = vld [vmem:[#allocation4 + $0x28cc] ss:$16 sps:$4 sm:$0xff]  }
 0x581   :  { %10797 = vmatpush1.bf16.msra.mxu0 %v18463_v44  ;;  %11822 = vmatpush1.bf16.msra.mxu1 %v18466_v45  ;;  %v18556_v44 = vld [vmem:[#allocation4 + $0x28c0] ss:$16 sps:$4 sm:$0xff]   ;;  %v18559_v45 = vld [vmem:[#allocation4 + $0x28c8] ss:$16 sps:$4 sm:$0xff]  }
 0x582   :  { %10798 = vmatprep.subr.bf16.mxu0 %v18471_v46  ;;  %11823 = vmatprep.subr.bf16.mxu1 %v18474_v47  ;;  %v18564_v46 = vld [vmem:[#allocation4 + $0x28e4] ss:$16 sps:$4 sm:$0xff]   ;;  %v18567_v47 = vld [vmem:[#allocation4 + $0x28ec] ss:$16 sps:$4 sm:$0xff]  }
 0x585   :  { %10799 = vmatpush1.bf16.msra.mxu0 %v18469_v48  ;;  %11824 = vmatpush1.bf16.msra.mxu1 %v18472_v49  ;;  %v18562_v48 = vld [vmem:[#allocation4 + $0x28e0] ss:$16 sps:$4 sm:$0xff]   ;;  %v18565_v49 = vld [vmem:[#allocation4 + $0x28e8] ss:$16 sps:$4 sm:$0xff]  }
 0x586   :  { %10800 = vmatprep.subr.bf16.mxu0 %v18477_v50  ;;  %11825 = vmatprep.subr.bf16.mxu1 %v18480_v51  ;;  %v18570_v50 = vld [vmem:[#allocation4 + $0x2904] ss:$16 sps:$4 sm:$0xff]   ;;  %v18573_v51 = vld [vmem:[#allocation4 + $0x290c] ss:$16 sps:$4 sm:$0xff]  }
 0x589   :  { %10801 = vmatpush1.bf16.msra.mxu0 %v18475_v52  ;;  %11826 = vmatpush1.bf16.msra.mxu1 %v18478_v53  ;;  %v18568_v52 = vld [vmem:[#allocation4 + $0x2900] ss:$16 sps:$4 sm:$0xff]   ;;  %v18571_v53 = vld [vmem:[#allocation4 + $0x2908] ss:$16 sps:$4 sm:$0xff]  }
 0x58a   :  { %10802 = vmatprep.subr.bf16.mxu0 %v18483_v54  ;;  %11827 = vmatprep.subr.bf16.mxu1 %v18486_v55  ;;  %v18576_v54 = vld [vmem:[#allocation4 + $0x2924] ss:$16 sps:$4 sm:$0xff]   ;;  %v18579_v55 = vld [vmem:[#allocation4 + $0x292c] ss:$16 sps:$4 sm:$0xff]  }
 0x58d   :  { %10803 = vmatpush1.bf16.msra.mxu0 %v18481_v56  ;;  %11828 = vmatpush1.bf16.msra.mxu1 %v18484_v57  ;;  %v18574_v56 = vld [vmem:[#allocation4 + $0x2920] ss:$16 sps:$4 sm:$0xff]   ;;  %v18577_v57 = vld [vmem:[#allocation4 + $0x2928] ss:$16 sps:$4 sm:$0xff]  }
 0x58e   :  { %10804 = vmatprep.subr.bf16.mxu0 %v18489_v58  ;;  %11829 = vmatprep.subr.bf16.mxu1 %v18492_v59  ;;  %v18582_v58 = vld [vmem:[#allocation4 + $0x2944] ss:$16 sps:$4 sm:$0xff]   ;;  %v18585_v59 = vld [vmem:[#allocation4 + $0x294c] ss:$16 sps:$4 sm:$0xff]  }
 0x591   :  { %10805 = vmatpush1.bf16.msra.mxu0 %v18487_v60  ;;  %11830 = vmatpush1.bf16.msra.mxu1 %v18490_v61  ;;  %v18580_v60 = vld [vmem:[#allocation4 + $0x2940] ss:$16 sps:$4 sm:$0xff]   ;;  %v18583_v61 = vld [vmem:[#allocation4 + $0x2948] ss:$16 sps:$4 sm:$0xff]  }
 0x592   :  { %10806 = vmatprep.subr.bf16.mxu0 %v18495_v62  ;;  %11831 = vmatprep.subr.bf16.mxu1 %v18498_v63  ;;  %v18588_v62 = vld [vmem:[#allocation4 + $0x2964] ss:$16 sps:$4 sm:$0xff]   ;;  %v18591_v63 = vld [vmem:[#allocation4 + $0x296c] ss:$16 sps:$4 sm:$0xff]  }
 0x595   :  { %10807 = vmatpush1.bf16.msra.mxu0 %v18493_v0  ;;  %11832 = vmatpush1.bf16.msra.mxu1 %v18496_v1  ;;  %v18586_v0 = vld [vmem:[#allocation4 + $0x2960] ss:$16 sps:$4 sm:$0xff]   ;;  %v18589_v1 = vld [vmem:[#allocation4 + $0x2968] ss:$16 sps:$4 sm:$0xff]  }
 0x596   :  { %10808 = vmatprep.subr.bf16.mxu0 %v18501_v2  ;;  %11833 = vmatprep.subr.bf16.mxu1 %v18504_v3  ;;  %v18594_v2 = vld [vmem:[#allocation4 + $0x2984] ss:$16 sps:$4 sm:$0xff]   ;;  %v18597_v3 = vld [vmem:[#allocation4 + $0x298c] ss:$16 sps:$4 sm:$0xff]  }
 0x599   :  { %10809 = vmatpush1.bf16.msra.mxu0 %v18499_v4  ;;  %11834 = vmatpush1.bf16.msra.mxu1 %v18502_v5  ;;  %v18592_v4 = vld [vmem:[#allocation4 + $0x2980] ss:$16 sps:$4 sm:$0xff]   ;;  %v18595_v5 = vld [vmem:[#allocation4 + $0x2988] ss:$16 sps:$4 sm:$0xff]  }
 0x59a   :  { %10810 = vmatprep.subr.bf16.mxu0 %v18507_v6  ;;  %11835 = vmatprep.subr.bf16.mxu1 %v18510_v7  ;;  %v18600_v6 = vld [vmem:[#allocation4 + $0x29a4] ss:$16 sps:$4 sm:$0xff]   ;;  %v18603_v7 = vld [vmem:[#allocation4 + $0x29ac] ss:$16 sps:$4 sm:$0xff]  }
 0x59d   :  { %10811 = vmatpush1.bf16.msra.mxu0 %v18505_v8  ;;  %11836 = vmatpush1.bf16.msra.mxu1 %v18508_v9  ;;  %v18598_v8 = vld [vmem:[#allocation4 + $0x29a0] ss:$16 sps:$4 sm:$0xff]   ;;  %v18601_v9 = vld [vmem:[#allocation4 + $0x29a8] ss:$16 sps:$4 sm:$0xff]  }
 0x59e   :  { %10812 = vmatprep.subr.bf16.mxu0 %v18513_v10  ;;  %11837 = vmatprep.subr.bf16.mxu1 %v18516_v11  ;;  %v18606_v10 = vld [vmem:[#allocation4 + $0x29c4] ss:$16 sps:$4 sm:$0xff]   ;;  %v18609_v11 = vld [vmem:[#allocation4 + $0x29cc] ss:$16 sps:$4 sm:$0xff]  }
 0x5a1   :  { %10813 = vmatpush1.bf16.msra.mxu0 %v18511_v13  ;;  %11838 = vmatpush1.bf16.msra.mxu1 %v18514_v14  ;;  %v18607_v13 = vld [vmem:[#allocation4 + $0x29c8] ss:$16 sps:$4 sm:$0xff]   ;;  %v18612_v14 = vld [vmem:[#allocation4 + $0x29e4] ss:$16 sps:$4 sm:$0xff]  }
 0x5a2   :  { %10823 = vmatprep.subr.bf16.mxu0 %v18522_v15  ;;  %11848 = vmatprep.subr.bf16.mxu1 %v18525_v16  ;;  %v18615_v15 = vld [vmem:[#allocation4 + $0x29ec] ss:$16 sps:$4 sm:$0xff]   ;;  %v18616_v16 = vld [vmem:[#allocation2 + $0xa0] ss:$200 sps:$4 sm:$0xff]  }
 0x5a4   :  { %10815 = vmatmul.mubr.bf16.vlgmr.msra.gmra.mrb[0].mxu0 %v385_v18  ;;  %11840 = vmatmul.mubr.bf16.vlgmr.msra.gmra.mrb[0].mxu1 %v385_v18  ;;  %v18613_v18 = vld [vmem:[#allocation4 + $0x29e8] ss:$16 sps:$4 sm:$0xff]  }
 0x5a5   :  { %10824 = vmatpush1.bf16.msra.mxu0 %v18520_v19  ;;  %11849 = vmatpush1.bf16.msra.mxu1 %v18523_v20  ;;  %v18621_v19 = vld [vmem:[#allocation4 + $0x2a04] ss:$16 sps:$4 sm:$0xff]   ;;  %v18624_v20 = vld [vmem:[#allocation4 + $0x2a0c] ss:$16 sps:$4 sm:$0xff]  }
 0x5a6   :  { %10825 = vmatprep.subr.bf16.mxu0 %v18528_v21  ;;  %11850 = vmatprep.subr.bf16.mxu1 %v18531_v22  ;;  %v18717_v21 = vld [vmem:[#allocation2 + $0xac] ss:$200 sps:$4 sm:$0xff]   ;;  %v387_v22 = vpack.c.bf16 %v18616_v16, %v18616_v16  ;;  %v18703_v16 = vld [vmem:[#allocation4 + $0x2bc0] ss:$16 sps:$4 sm:$0xff]  }
 0x5a7   :  { %10855 = vmatprep.mubr.bf16.mxu0 %v388_v23  ;;  %11880 = vmatprep.mubr.bf16.mxu1 %v388_v23  ;;  %v18619_v23 = vld [vmem:[#allocation4 + $0x2a00] ss:$16 sps:$4 sm:$0xff]  }
 0x5a9   :  { %10826 = vmatpush1.bf16.msra.mxu0 %v18526_v24  ;;  %11851 = vmatpush1.bf16.msra.mxu1 %v18529_v25  ;;  %v18622_v24 = vld [vmem:[#allocation4 + $0x2a08] ss:$16 sps:$4 sm:$0xff]   ;;  %v18627_v25 = vld [vmem:[#allocation4 + $0x2a24] ss:$16 sps:$4 sm:$0xff]  }
 0x5aa   :  { %10827 = vmatprep.subr.bf16.mxu0 %v18534_v26  ;;  %11852 = vmatprep.subr.bf16.mxu1 %v18537_v27  ;;  %v18630_v26 = vld [vmem:[#allocation4 + $0x2a2c] ss:$16 sps:$4 sm:$0xff]   ;;  %v390_v27 = vpack.c.bf16 %v18717_v21, %v18717_v21  ;;  %v18709_v21 = vld [vmem:[#allocation4 + $0x2be0] ss:$16 sps:$4 sm:$0xff]  }
 0x5ad   :  { %10828 = vmatpush1.bf16.msra.mxu0 %v18532_v28  ;;  %11853 = vmatpush1.bf16.msra.mxu1 %v18535_v29  ;;  %v18625_v28 = vld [vmem:[#allocation4 + $0x2a20] ss:$16 sps:$4 sm:$0xff]   ;;  %v18628_v29 = vld [vmem:[#allocation4 + $0x2a28] ss:$16 sps:$4 sm:$0xff]  }
 0x5ae   :  { %10829 = vmatprep.subr.bf16.mxu0 %v18540_v30  ;;  %11854 = vmatprep.subr.bf16.mxu1 %v18543_v31  ;;  %v18633_v30 = vld [vmem:[#allocation4 + $0x2a44] ss:$16 sps:$4 sm:$0xff]   ;;  %v18636_v31 = vld [vmem:[#allocation4 + $0x2a4c] ss:$16 sps:$4 sm:$0xff]  }
 0x5b1   :  { %10830 = vmatpush1.bf16.msra.mxu0 %v18538_v32  ;;  %11855 = vmatpush1.bf16.msra.mxu1 %v18541_v33  ;;  %v18631_v32 = vld [vmem:[#allocation4 + $0x2a40] ss:$16 sps:$4 sm:$0xff]   ;;  %v18634_v33 = vld [vmem:[#allocation4 + $0x2a48] ss:$16 sps:$4 sm:$0xff]  }
 0x5b2   :  { %10831 = vmatprep.subr.bf16.mxu0 %v18546_v34  ;;  %11856 = vmatprep.subr.bf16.mxu1 %v18549_v35  ;;  %v18639_v34 = vld [vmem:[#allocation4 + $0x2a64] ss:$16 sps:$4 sm:$0xff]   ;;  %v18642_v35 = vld [vmem:[#allocation4 + $0x2a6c] ss:$16 sps:$4 sm:$0xff]  }
 0x5b5   :  { %10832 = vmatpush1.bf16.msra.mxu0 %v18544_v36  ;;  %11857 = vmatpush1.bf16.msra.mxu1 %v18547_v37  ;;  %v18637_v36 = vld [vmem:[#allocation4 + $0x2a60] ss:$16 sps:$4 sm:$0xff]   ;;  %v18640_v37 = vld [vmem:[#allocation4 + $0x2a68] ss:$16 sps:$4 sm:$0xff]  }
 0x5b6   :  { %10833 = vmatprep.subr.bf16.mxu0 %v18552_v38  ;;  %11858 = vmatprep.subr.bf16.mxu1 %v18555_v39  ;;  %v18645_v38 = vld [vmem:[#allocation4 + $0x2a84] ss:$16 sps:$4 sm:$0xff]   ;;  %v18648_v39 = vld [vmem:[#allocation4 + $0x2a8c] ss:$16 sps:$4 sm:$0xff]  }
 0x5b9   :  { %10834 = vmatpush1.bf16.msra.mxu0 %v18550_v40  ;;  %11859 = vmatpush1.bf16.msra.mxu1 %v18553_v41  ;;  %v18643_v40 = vld [vmem:[#allocation4 + $0x2a80] ss:$16 sps:$4 sm:$0xff]   ;;  %v18646_v41 = vld [vmem:[#allocation4 + $0x2a88] ss:$16 sps:$4 sm:$0xff]  }
 0x5ba   :  { %10835 = vmatprep.subr.bf16.mxu0 %v18558_v42  ;;  %11860 = vmatprep.subr.bf16.mxu1 %v18561_v43  ;;  %v18651_v42 = vld [vmem:[#allocation4 + $0x2aa4] ss:$16 sps:$4 sm:$0xff]   ;;  %v18654_v43 = vld [vmem:[#allocation4 + $0x2aac] ss:$16 sps:$4 sm:$0xff]  }
 0x5bd   :  { %10836 = vmatpush1.bf16.msra.mxu0 %v18556_v44  ;;  %11861 = vmatpush1.bf16.msra.mxu1 %v18559_v45  ;;  %v18649_v44 = vld [vmem:[#allocation4 + $0x2aa0] ss:$16 sps:$4 sm:$0xff]   ;;  %v18652_v45 = vld [vmem:[#allocation4 + $0x2aa8] ss:$16 sps:$4 sm:$0xff]  }
 0x5be   :  { %10837 = vmatprep.subr.bf16.mxu0 %v18564_v46  ;;  %11862 = vmatprep.subr.bf16.mxu1 %v18567_v47  ;;  %v18657_v46 = vld [vmem:[#allocation4 + $0x2ac4] ss:$16 sps:$4 sm:$0xff]   ;;  %v18660_v47 = vld [vmem:[#allocation4 + $0x2acc] ss:$16 sps:$4 sm:$0xff]  }
 0x5c1   :  { %10838 = vmatpush1.bf16.msra.mxu0 %v18562_v48  ;;  %11863 = vmatpush1.bf16.msra.mxu1 %v18565_v49  ;;  %v18655_v48 = vld [vmem:[#allocation4 + $0x2ac0] ss:$16 sps:$4 sm:$0xff]   ;;  %v18658_v49 = vld [vmem:[#allocation4 + $0x2ac8] ss:$16 sps:$4 sm:$0xff]  }
 0x5c2   :  { %10839 = vmatprep.subr.bf16.mxu0 %v18570_v50  ;;  %11864 = vmatprep.subr.bf16.mxu1 %v18573_v51  ;;  %v18663_v50 = vld [vmem:[#allocation4 + $0x2ae4] ss:$16 sps:$4 sm:$0xff]   ;;  %v18666_v51 = vld [vmem:[#allocation4 + $0x2aec] ss:$16 sps:$4 sm:$0xff]  }
 0x5c5   :  { %10840 = vmatpush1.bf16.msra.mxu0 %v18568_v52  ;;  %11865 = vmatpush1.bf16.msra.mxu1 %v18571_v53  ;;  %v18661_v52 = vld [vmem:[#allocation4 + $0x2ae0] ss:$16 sps:$4 sm:$0xff]   ;;  %v18664_v53 = vld [vmem:[#allocation4 + $0x2ae8] ss:$16 sps:$4 sm:$0xff]  }
 0x5c6   :  { %10841 = vmatprep.subr.bf16.mxu0 %v18576_v54  ;;  %11866 = vmatprep.subr.bf16.mxu1 %v18579_v55  ;;  %v18669_v54 = vld [vmem:[#allocation4 + $0x2b04] ss:$16 sps:$4 sm:$0xff]   ;;  %v18672_v55 = vld [vmem:[#allocation4 + $0x2b0c] ss:$16 sps:$4 sm:$0xff]  }
 0x5c9   :  { %10842 = vmatpush1.bf16.msra.mxu0 %v18574_v56  ;;  %11867 = vmatpush1.bf16.msra.mxu1 %v18577_v57  ;;  %v18667_v56 = vld [vmem:[#allocation4 + $0x2b00] ss:$16 sps:$4 sm:$0xff]   ;;  %v18670_v57 = vld [vmem:[#allocation4 + $0x2b08] ss:$16 sps:$4 sm:$0xff]  }
 0x5ca   :  { %10843 = vmatprep.subr.bf16.mxu0 %v18582_v58  ;;  %11868 = vmatprep.subr.bf16.mxu1 %v18585_v59  ;;  %v18675_v58 = vld [vmem:[#allocation4 + $0x2b24] ss:$16 sps:$4 sm:$0xff]   ;;  %v18678_v59 = vld [vmem:[#allocation4 + $0x2b2c] ss:$16 sps:$4 sm:$0xff]  }
 0x5cd   :  { %10844 = vmatpush1.bf16.msra.mxu0 %v18580_v60  ;;  %11869 = vmatpush1.bf16.msra.mxu1 %v18583_v61  ;;  %v18673_v60 = vld [vmem:[#allocation4 + $0x2b20] ss:$16 sps:$4 sm:$0xff]   ;;  %v18676_v61 = vld [vmem:[#allocation4 + $0x2b28] ss:$16 sps:$4 sm:$0xff]  }
 0x5ce   :  { %10845 = vmatprep.subr.bf16.mxu0 %v18588_v62  ;;  %11870 = vmatprep.subr.bf16.mxu1 %v18591_v63  ;;  %v18681_v62 = vld [vmem:[#allocation4 + $0x2b44] ss:$16 sps:$4 sm:$0xff]   ;;  %v18684_v63 = vld [vmem:[#allocation4 + $0x2b4c] ss:$16 sps:$4 sm:$0xff]  }
 0x5d1   :  { %10846 = vmatpush1.bf16.msra.mxu0 %v18586_v0  ;;  %11871 = vmatpush1.bf16.msra.mxu1 %v18589_v1  ;;  %v18679_v0 = vld [vmem:[#allocation4 + $0x2b40] ss:$16 sps:$4 sm:$0xff]   ;;  %v18682_v1 = vld [vmem:[#allocation4 + $0x2b48] ss:$16 sps:$4 sm:$0xff]  }
 0x5d2   :  { %10847 = vmatprep.subr.bf16.mxu0 %v18594_v2  ;;  %11872 = vmatprep.subr.bf16.mxu1 %v18597_v3  ;;  %v18687_v2 = vld [vmem:[#allocation4 + $0x2b64] ss:$16 sps:$4 sm:$0xff]   ;;  %v18690_v3 = vld [vmem:[#allocation4 + $0x2b6c] ss:$16 sps:$4 sm:$0xff]  }
 0x5d5   :  { %10848 = vmatpush1.bf16.msra.mxu0 %v18592_v4  ;;  %11873 = vmatpush1.bf16.msra.mxu1 %v18595_v5  ;;  %v18685_v4 = vld [vmem:[#allocation4 + $0x2b60] ss:$16 sps:$4 sm:$0xff]   ;;  %v18688_v5 = vld [vmem:[#allocation4 + $0x2b68] ss:$16 sps:$4 sm:$0xff]  }
 0x5d6   :  { %10849 = vmatprep.subr.bf16.mxu0 %v18600_v6  ;;  %11874 = vmatprep.subr.bf16.mxu1 %v18603_v7  ;;  %v18693_v6 = vld [vmem:[#allocation4 + $0x2b84] ss:$16 sps:$4 sm:$0xff]   ;;  %v18696_v7 = vld [vmem:[#allocation4 + $0x2b8c] ss:$16 sps:$4 sm:$0xff]  }
 0x5d9   :  { %10850 = vmatpush1.bf16.msra.mxu0 %v18598_v8  ;;  %11875 = vmatpush1.bf16.msra.mxu1 %v18601_v9  ;;  %v18691_v8 = vld [vmem:[#allocation4 + $0x2b80] ss:$16 sps:$4 sm:$0xff]   ;;  %v18694_v9 = vld [vmem:[#allocation4 + $0x2b88] ss:$16 sps:$4 sm:$0xff]  }
 0x5da   :  { %10851 = vmatprep.subr.bf16.mxu0 %v18606_v10  ;;  %11876 = vmatprep.subr.bf16.mxu1 %v18609_v11  ;;  %v18699_v10 = vld [vmem:[#allocation4 + $0x2ba4] ss:$16 sps:$4 sm:$0xff]   ;;  %v18702_v11 = vld [vmem:[#allocation4 + $0x2bac] ss:$16 sps:$4 sm:$0xff]  }
 0x5dd   :  { %10852 = vmatpush1.bf16.msra.mxu0 %v18604_v12  ;;  %11877 = vmatpush1.bf16.msra.mxu1 %v18607_v13  ;;  %v18697_v12 = vld [vmem:[#allocation4 + $0x2ba0] ss:$16 sps:$4 sm:$0xff]   ;;  %v18700_v13 = vld [vmem:[#allocation4 + $0x2ba8] ss:$16 sps:$4 sm:$0xff]  }
 0x5de   :  { %10853 = vmatprep.subr.bf16.mxu0 %v18612_v14  ;;  %11878 = vmatprep.subr.bf16.mxu1 %v18615_v15  ;;  %v18705_v14 = vld [vmem:[#allocation4 + $0x2bc4] ss:$16 sps:$4 sm:$0xff]   ;;  %v18708_v15 = vld [vmem:[#allocation4 + $0x2bcc] ss:$16 sps:$4 sm:$0xff]  }
 0x5e1   :  { %10854 = vmatpush1.bf16.msra.mxu0 %v18610_v17  ;;  %11879 = vmatpush1.bf16.msra.mxu1 %v18613_v18  ;;  %v18706_v17 = vld [vmem:[#allocation4 + $0x2bc8] ss:$16 sps:$4 sm:$0xff]   ;;  %v18711_v18 = vld [vmem:[#allocation4 + $0x2be4] ss:$16 sps:$4 sm:$0xff]  }
 0x5e2   :  { %10864 = vmatprep.subr.bf16.mxu0 %v18621_v19  ;;  %11889 = vmatprep.subr.bf16.mxu1 %v18624_v20  ;;  %v18714_v19 = vld [vmem:[#allocation4 + $0x2bec] ss:$16 sps:$4 sm:$0xff]   ;;  %v18715_v20 = vld [vmem:[#allocation2 + $0xa8] ss:$200 sps:$4 sm:$0xff]  }
 0x5e4   :  { %10856 = vmatmul.mubr.bf16.vlgmr.msra.gmra.mrb[0].mxu0 %v387_v22  ;;  %11881 = vmatmul.mubr.bf16.vlgmr.msra.gmra.mrb[0].mxu1 %v387_v22  ;;  %v18712_v22 = vld [vmem:[#allocation4 + $0x2be8] ss:$16 sps:$4 sm:$0xff]  }
 0x5e5   :  { %10865 = vmatpush1.bf16.msra.mxu0 %v18619_v23  ;;  %11890 = vmatpush1.bf16.msra.mxu1 %v18622_v24  ;;  %v18720_v23 = vld [vmem:[#allocation4 + $0x2c04] ss:$16 sps:$4 sm:$0xff]   ;;  %v18723_v24 = vld [vmem:[#allocation4 + $0x2c0c] ss:$16 sps:$4 sm:$0xff]  }
 0x5e6   :  { %10866 = vmatprep.subr.bf16.mxu0 %v18627_v25  ;;  %11891 = vmatprep.subr.bf16.mxu1 %v18630_v26  ;;  %v18816_v25 = vld [vmem:[#allocation2 + $0xb4] ss:$200 sps:$4 sm:$0xff]   ;;  %v389_v26 = vpack.c.bf16 %v18715_v20, %v18715_v20  ;;  %v18802_v20 = vld [vmem:[#allocation4 + $0x2dc0] ss:$16 sps:$4 sm:$0xff]  }
 0x5e7   :  { %10896 = vmatprep.mubr.bf16.mxu0 %v390_v27  ;;  %11921 = vmatprep.mubr.bf16.mxu1 %v390_v27  ;;  %v18718_v27 = vld [vmem:[#allocation4 + $0x2c00] ss:$16 sps:$4 sm:$0xff]  }
 0x5e9   :  { %10867 = vmatpush1.bf16.msra.mxu0 %v18625_v28  ;;  %11892 = vmatpush1.bf16.msra.mxu1 %v18628_v29  ;;  %v18721_v28 = vld [vmem:[#allocation4 + $0x2c08] ss:$16 sps:$4 sm:$0xff]   ;;  %v18726_v29 = vld [vmem:[#allocation4 + $0x2c24] ss:$16 sps:$4 sm:$0xff]  }
 0x5ea   :  { %10868 = vmatprep.subr.bf16.mxu0 %v18633_v30  ;;  %11893 = vmatprep.subr.bf16.mxu1 %v18636_v31  ;;  %v18729_v30 = vld [vmem:[#allocation4 + $0x2c2c] ss:$16 sps:$4 sm:$0xff]   ;;  %v392_v31 = vpack.c.bf16 %v18816_v25, %v18816_v25  ;;  %v18808_v25 = vld [vmem:[#allocation4 + $0x2de0] ss:$16 sps:$4 sm:$0xff]  }
 0x5ed   :  { %10869 = vmatpush1.bf16.msra.mxu0 %v18631_v32  ;;  %11894 = vmatpush1.bf16.msra.mxu1 %v18634_v33  ;;  %v18724_v32 = vld [vmem:[#allocation4 + $0x2c20] ss:$16 sps:$4 sm:$0xff]   ;;  %v18727_v33 = vld [vmem:[#allocation4 + $0x2c28] ss:$16 sps:$4 sm:$0xff]  }
 0x5ee   :  { %10870 = vmatprep.subr.bf16.mxu0 %v18639_v34  ;;  %11895 = vmatprep.subr.bf16.mxu1 %v18642_v35  ;;  %v18732_v34 = vld [vmem:[#allocation4 + $0x2c44] ss:$16 sps:$4 sm:$0xff]   ;;  %v18735_v35 = vld [vmem:[#allocation4 + $0x2c4c] ss:$16 sps:$4 sm:$0xff]  }
 0x5f1   :  { %10871 = vmatpush1.bf16.msra.mxu0 %v18637_v36  ;;  %11896 = vmatpush1.bf16.msra.mxu1 %v18640_v37  ;;  %v18730_v36 = vld [vmem:[#allocation4 + $0x2c40] ss:$16 sps:$4 sm:$0xff]   ;;  %v18733_v37 = vld [vmem:[#allocation4 + $0x2c48] ss:$16 sps:$4 sm:$0xff]  }
 0x5f2   :  { %10872 = vmatprep.subr.bf16.mxu0 %v18645_v38  ;;  %11897 = vmatprep.subr.bf16.mxu1 %v18648_v39  ;;  %v18738_v38 = vld [vmem:[#allocation4 + $0x2c64] ss:$16 sps:$4 sm:$0xff]   ;;  %v18741_v39 = vld [vmem:[#allocation4 + $0x2c6c] ss:$16 sps:$4 sm:$0xff]  }
 0x5f5   :  { %10873 = vmatpush1.bf16.msra.mxu0 %v18643_v40  ;;  %11898 = vmatpush1.bf16.msra.mxu1 %v18646_v41  ;;  %v18736_v40 = vld [vmem:[#allocation4 + $0x2c60] ss:$16 sps:$4 sm:$0xff]   ;;  %v18739_v41 = vld [vmem:[#allocation4 + $0x2c68] ss:$16 sps:$4 sm:$0xff]  }
 0x5f6   :  { %10874 = vmatprep.subr.bf16.mxu0 %v18651_v42  ;;  %11899 = vmatprep.subr.bf16.mxu1 %v18654_v43  ;;  %v18744_v42 = vld [vmem:[#allocation4 + $0x2c84] ss:$16 sps:$4 sm:$0xff]   ;;  %v18747_v43 = vld [vmem:[#allocation4 + $0x2c8c] ss:$16 sps:$4 sm:$0xff]  }
 0x5f9   :  { %10875 = vmatpush1.bf16.msra.mxu0 %v18649_v44  ;;  %11900 = vmatpush1.bf16.msra.mxu1 %v18652_v45  ;;  %v18742_v44 = vld [vmem:[#allocation4 + $0x2c80] ss:$16 sps:$4 sm:$0xff]   ;;  %v18745_v45 = vld [vmem:[#allocation4 + $0x2c88] ss:$16 sps:$4 sm:$0xff]  }
 0x5fa   :  { %10876 = vmatprep.subr.bf16.mxu0 %v18657_v46  ;;  %11901 = vmatprep.subr.bf16.mxu1 %v18660_v47  ;;  %v18750_v46 = vld [vmem:[#allocation4 + $0x2ca4] ss:$16 sps:$4 sm:$0xff]   ;;  %v18753_v47 = vld [vmem:[#allocation4 + $0x2cac] ss:$16 sps:$4 sm:$0xff]  }
 0x5fd   :  { %10877 = vmatpush1.bf16.msra.mxu0 %v18655_v48  ;;  %11902 = vmatpush1.bf16.msra.mxu1 %v18658_v49  ;;  %v18748_v48 = vld [vmem:[#allocation4 + $0x2ca0] ss:$16 sps:$4 sm:$0xff]   ;;  %v18751_v49 = vld [vmem:[#allocation4 + $0x2ca8] ss:$16 sps:$4 sm:$0xff]  }
 0x5fe   :  { %10878 = vmatprep.subr.bf16.mxu0 %v18663_v50  ;;  %11903 = vmatprep.subr.bf16.mxu1 %v18666_v51  ;;  %v18756_v50 = vld [vmem:[#allocation4 + $0x2cc4] ss:$16 sps:$4 sm:$0xff]   ;;  %v18759_v51 = vld [vmem:[#allocation4 + $0x2ccc] ss:$16 sps:$4 sm:$0xff]  }
 0x601   :  { %10879 = vmatpush1.bf16.msra.mxu0 %v18661_v52  ;;  %11904 = vmatpush1.bf16.msra.mxu1 %v18664_v53  ;;  %v18754_v52 = vld [vmem:[#allocation4 + $0x2cc0] ss:$16 sps:$4 sm:$0xff]   ;;  %v18757_v53 = vld [vmem:[#allocation4 + $0x2cc8] ss:$16 sps:$4 sm:$0xff]  }
 0x602   :  { %10880 = vmatprep.subr.bf16.mxu0 %v18669_v54  ;;  %11905 = vmatprep.subr.bf16.mxu1 %v18672_v55  ;;  %v18762_v54 = vld [vmem:[#allocation4 + $0x2ce4] ss:$16 sps:$4 sm:$0xff]   ;;  %v18765_v55 = vld [vmem:[#allocation4 + $0x2cec] ss:$16 sps:$4 sm:$0xff]  }
 0x605   :  { %10881 = vmatpush1.bf16.msra.mxu0 %v18667_v56  ;;  %11906 = vmatpush1.bf16.msra.mxu1 %v18670_v57  ;;  %v18760_v56 = vld [vmem:[#allocation4 + $0x2ce0] ss:$16 sps:$4 sm:$0xff]   ;;  %v18763_v57 = vld [vmem:[#allocation4 + $0x2ce8] ss:$16 sps:$4 sm:$0xff]  }
 0x606   :  { %10882 = vmatprep.subr.bf16.mxu0 %v18675_v58  ;;  %11907 = vmatprep.subr.bf16.mxu1 %v18678_v59  ;;  %v18768_v58 = vld [vmem:[#allocation4 + $0x2d04] ss:$16 sps:$4 sm:$0xff]   ;;  %v18771_v59 = vld [vmem:[#allocation4 + $0x2d0c] ss:$16 sps:$4 sm:$0xff]  }
 0x609   :  { %10883 = vmatpush1.bf16.msra.mxu0 %v18673_v60  ;;  %11908 = vmatpush1.bf16.msra.mxu1 %v18676_v61  ;;  %v18766_v60 = vld [vmem:[#allocation4 + $0x2d00] ss:$16 sps:$4 sm:$0xff]   ;;  %v18769_v61 = vld [vmem:[#allocation4 + $0x2d08] ss:$16 sps:$4 sm:$0xff]  }
 0x60a   :  { %10884 = vmatprep.subr.bf16.mxu0 %v18681_v62  ;;  %11909 = vmatprep.subr.bf16.mxu1 %v18684_v63  ;;  %v18774_v62 = vld [vmem:[#allocation4 + $0x2d24] ss:$16 sps:$4 sm:$0xff]   ;;  %v18777_v63 = vld [vmem:[#allocation4 + $0x2d2c] ss:$16 sps:$4 sm:$0xff]  }
 0x60d   :  { %10885 = vmatpush1.bf16.msra.mxu0 %v18679_v0  ;;  %11910 = vmatpush1.bf16.msra.mxu1 %v18682_v1  ;;  %v18772_v0 = vld [vmem:[#allocation4 + $0x2d20] ss:$16 sps:$4 sm:$0xff]   ;;  %v18775_v1 = vld [vmem:[#allocation4 + $0x2d28] ss:$16 sps:$4 sm:$0xff]  }
 0x60e   :  { %10886 = vmatprep.subr.bf16.mxu0 %v18687_v2  ;;  %11911 = vmatprep.subr.bf16.mxu1 %v18690_v3  ;;  %v18780_v2 = vld [vmem:[#allocation4 + $0x2d44] ss:$16 sps:$4 sm:$0xff]   ;;  %v18783_v3 = vld [vmem:[#allocation4 + $0x2d4c] ss:$16 sps:$4 sm:$0xff]  }
 0x611   :  { %10887 = vmatpush1.bf16.msra.mxu0 %v18685_v4  ;;  %11912 = vmatpush1.bf16.msra.mxu1 %v18688_v5  ;;  %v18778_v4 = vld [vmem:[#allocation4 + $0x2d40] ss:$16 sps:$4 sm:$0xff]   ;;  %v18781_v5 = vld [vmem:[#allocation4 + $0x2d48] ss:$16 sps:$4 sm:$0xff]  }
 0x612   :  { %10888 = vmatprep.subr.bf16.mxu0 %v18693_v6  ;;  %11913 = vmatprep.subr.bf16.mxu1 %v18696_v7  ;;  %v18786_v6 = vld [vmem:[#allocation4 + $0x2d64] ss:$16 sps:$4 sm:$0xff]   ;;  %v18789_v7 = vld [vmem:[#allocation4 + $0x2d6c] ss:$16 sps:$4 sm:$0xff]  }
 0x615   :  { %10889 = vmatpush1.bf16.msra.mxu0 %v18691_v8  ;;  %11914 = vmatpush1.bf16.msra.mxu1 %v18694_v9  ;;  %v18784_v8 = vld [vmem:[#allocation4 + $0x2d60] ss:$16 sps:$4 sm:$0xff]   ;;  %v18787_v9 = vld [vmem:[#allocation4 + $0x2d68] ss:$16 sps:$4 sm:$0xff]  }
 0x616   :  { %10890 = vmatprep.subr.bf16.mxu0 %v18699_v10  ;;  %11915 = vmatprep.subr.bf16.mxu1 %v18702_v11  ;;  %v18792_v10 = vld [vmem:[#allocation4 + $0x2d84] ss:$16 sps:$4 sm:$0xff]   ;;  %v18795_v11 = vld [vmem:[#allocation4 + $0x2d8c] ss:$16 sps:$4 sm:$0xff]  }
 0x619   :  { %10891 = vmatpush1.bf16.msra.mxu0 %v18697_v12  ;;  %11916 = vmatpush1.bf16.msra.mxu1 %v18700_v13  ;;  %v18790_v12 = vld [vmem:[#allocation4 + $0x2d80] ss:$16 sps:$4 sm:$0xff]   ;;  %v18793_v13 = vld [vmem:[#allocation4 + $0x2d88] ss:$16 sps:$4 sm:$0xff]  }
 0x61a   :  { %10892 = vmatprep.subr.bf16.mxu0 %v18705_v14  ;;  %11917 = vmatprep.subr.bf16.mxu1 %v18708_v15  ;;  %v18798_v14 = vld [vmem:[#allocation4 + $0x2da4] ss:$16 sps:$4 sm:$0xff]   ;;  %v18801_v15 = vld [vmem:[#allocation4 + $0x2dac] ss:$16 sps:$4 sm:$0xff]  }
 0x61d   :  { %10893 = vmatpush1.bf16.msra.mxu0 %v18703_v16  ;;  %11918 = vmatpush1.bf16.msra.mxu1 %v18706_v17  ;;  %v18796_v16 = vld [vmem:[#allocation4 + $0x2da0] ss:$16 sps:$4 sm:$0xff]   ;;  %v18799_v17 = vld [vmem:[#allocation4 + $0x2da8] ss:$16 sps:$4 sm:$0xff]  }
 0x61e   :  { %10894 = vmatprep.subr.bf16.mxu0 %v18711_v18  ;;  %11919 = vmatprep.subr.bf16.mxu1 %v18714_v19  ;;  %v18804_v18 = vld [vmem:[#allocation4 + $0x2dc4] ss:$16 sps:$4 sm:$0xff]   ;;  %v18807_v19 = vld [vmem:[#allocation4 + $0x2dcc] ss:$16 sps:$4 sm:$0xff]  }
 0x621   :  { %10895 = vmatpush1.bf16.msra.mxu0 %v18709_v21  ;;  %11920 = vmatpush1.bf16.msra.mxu1 %v18712_v22  ;;  %v18805_v21 = vld [vmem:[#allocation4 + $0x2dc8] ss:$16 sps:$4 sm:$0xff]   ;;  %v18810_v22 = vld [vmem:[#allocation4 + $0x2de4] ss:$16 sps:$4 sm:$0xff]  }
 0x622   :  { %10905 = vmatprep.subr.bf16.mxu0 %v18720_v23  ;;  %11930 = vmatprep.subr.bf16.mxu1 %v18723_v24  ;;  %v18813_v23 = vld [vmem:[#allocation4 + $0x2dec] ss:$16 sps:$4 sm:$0xff]   ;;  %v18814_v24 = vld [vmem:[#allocation2 + $0xb0] ss:$200 sps:$4 sm:$0xff]  }
 0x624   :  { %10897 = vmatmul.mubr.bf16.vlgmr.msra.gmra.mrb[0].mxu0 %v389_v26  ;;  %11922 = vmatmul.mubr.bf16.vlgmr.msra.gmra.mrb[0].mxu1 %v389_v26  ;;  %v18811_v26 = vld [vmem:[#allocation4 + $0x2de8] ss:$16 sps:$4 sm:$0xff]  }
 0x625   :  { %10906 = vmatpush1.bf16.msra.mxu0 %v18718_v27  ;;  %11931 = vmatpush1.bf16.msra.mxu1 %v18721_v28  ;;  %v18819_v27 = vld [vmem:[#allocation4 + $0x2e04] ss:$16 sps:$4 sm:$0xff]   ;;  %v18822_v28 = vld [vmem:[#allocation4 + $0x2e0c] ss:$16 sps:$4 sm:$0xff]  }
 0x626   :  { %10907 = vmatprep.subr.bf16.mxu0 %v18726_v29  ;;  %11932 = vmatprep.subr.bf16.mxu1 %v18729_v30  ;;  %v18915_v29 = vld [vmem:[#allocation2 + $0xbc] ss:$200 sps:$4 sm:$0xff]   ;;  %v391_v30 = vpack.c.bf16 %v18814_v24, %v18814_v24  ;;  %v18901_v24 = vld [vmem:[#allocation4 + $0x2fc0] ss:$16 sps:$4 sm:$0xff]  }
 0x627   :  { %10937 = vmatprep.mubr.bf16.mxu0 %v392_v31  ;;  %11962 = vmatprep.mubr.bf16.mxu1 %v392_v31  ;;  %v18817_v31 = vld [vmem:[#allocation4 + $0x2e00] ss:$16 sps:$4 sm:$0xff]  }
 0x629   :  { %10908 = vmatpush1.bf16.msra.mxu0 %v18724_v32  ;;  %11933 = vmatpush1.bf16.msra.mxu1 %v18727_v33  ;;  %v18820_v32 = vld [vmem:[#allocation4 + $0x2e08] ss:$16 sps:$4 sm:$0xff]   ;;  %v18825_v33 = vld [vmem:[#allocation4 + $0x2e24] ss:$16 sps:$4 sm:$0xff]  }
 0x62a   :  { %10909 = vmatprep.subr.bf16.mxu0 %v18732_v34  ;;  %11934 = vmatprep.subr.bf16.mxu1 %v18735_v35  ;;  %v18828_v34 = vld [vmem:[#allocation4 + $0x2e2c] ss:$16 sps:$4 sm:$0xff]   ;;  %v394_v35 = vpack.c.bf16 %v18915_v29, %v18915_v29  ;;  %v18907_v29 = vld [vmem:[#allocation4 + $0x2fe0] ss:$16 sps:$4 sm:$0xff]  }
 0x62d   :  { %10910 = vmatpush1.bf16.msra.mxu0 %v18730_v36  ;;  %11935 = vmatpush1.bf16.msra.mxu1 %v18733_v37  ;;  %v18823_v36 = vld [vmem:[#allocation4 + $0x2e20] ss:$16 sps:$4 sm:$0xff]   ;;  %v18826_v37 = vld [vmem:[#allocation4 + $0x2e28] ss:$16 sps:$4 sm:$0xff]  }
 0x62e   :  { %10911 = vmatprep.subr.bf16.mxu0 %v18738_v38  ;;  %11936 = vmatprep.subr.bf16.mxu1 %v18741_v39  ;;  %v18831_v38 = vld [vmem:[#allocation4 + $0x2e44] ss:$16 sps:$4 sm:$0xff]   ;;  %v18834_v39 = vld [vmem:[#allocation4 + $0x2e4c] ss:$16 sps:$4 sm:$0xff]  }
 0x631   :  { %10912 = vmatpush1.bf16.msra.mxu0 %v18736_v40  ;;  %11937 = vmatpush1.bf16.msra.mxu1 %v18739_v41  ;;  %v18829_v40 = vld [vmem:[#allocation4 + $0x2e40] ss:$16 sps:$4 sm:$0xff]   ;;  %v18832_v41 = vld [vmem:[#allocation4 + $0x2e48] ss:$16 sps:$4 sm:$0xff]  }
 0x632   :  { %10913 = vmatprep.subr.bf16.mxu0 %v18744_v42  ;;  %11938 = vmatprep.subr.bf16.mxu1 %v18747_v43  ;;  %v18837_v42 = vld [vmem:[#allocation4 + $0x2e64] ss:$16 sps:$4 sm:$0xff]   ;;  %v18840_v43 = vld [vmem:[#allocation4 + $0x2e6c] ss:$16 sps:$4 sm:$0xff]  }
 0x635   :  { %10914 = vmatpush1.bf16.msra.mxu0 %v18742_v44  ;;  %11939 = vmatpush1.bf16.msra.mxu1 %v18745_v45  ;;  %v18835_v44 = vld [vmem:[#allocation4 + $0x2e60] ss:$16 sps:$4 sm:$0xff]   ;;  %v18838_v45 = vld [vmem:[#allocation4 + $0x2e68] ss:$16 sps:$4 sm:$0xff]  }
 0x636   :  { %10915 = vmatprep.subr.bf16.mxu0 %v18750_v46  ;;  %11940 = vmatprep.subr.bf16.mxu1 %v18753_v47  ;;  %v18843_v46 = vld [vmem:[#allocation4 + $0x2e84] ss:$16 sps:$4 sm:$0xff]   ;;  %v18846_v47 = vld [vmem:[#allocation4 + $0x2e8c] ss:$16 sps:$4 sm:$0xff]  }
 0x639   :  { %10916 = vmatpush1.bf16.msra.mxu0 %v18748_v48  ;;  %11941 = vmatpush1.bf16.msra.mxu1 %v18751_v49  ;;  %v18841_v48 = vld [vmem:[#allocation4 + $0x2e80] ss:$16 sps:$4 sm:$0xff]   ;;  %v18844_v49 = vld [vmem:[#allocation4 + $0x2e88] ss:$16 sps:$4 sm:$0xff]  }
 0x63a   :  { %10917 = vmatprep.subr.bf16.mxu0 %v18756_v50  ;;  %11942 = vmatprep.subr.bf16.mxu1 %v18759_v51  ;;  %v18849_v50 = vld [vmem:[#allocation4 + $0x2ea4] ss:$16 sps:$4 sm:$0xff]   ;;  %v18852_v51 = vld [vmem:[#allocation4 + $0x2eac] ss:$16 sps:$4 sm:$0xff]  }
 0x63d   :  { %10918 = vmatpush1.bf16.msra.mxu0 %v18754_v52  ;;  %11943 = vmatpush1.bf16.msra.mxu1 %v18757_v53  ;;  %v18847_v52 = vld [vmem:[#allocation4 + $0x2ea0] ss:$16 sps:$4 sm:$0xff]   ;;  %v18850_v53 = vld [vmem:[#allocation4 + $0x2ea8] ss:$16 sps:$4 sm:$0xff]  }
 0x63e   :  { %10919 = vmatprep.subr.bf16.mxu0 %v18762_v54  ;;  %11944 = vmatprep.subr.bf16.mxu1 %v18765_v55  ;;  %v18855_v54 = vld [vmem:[#allocation4 + $0x2ec4] ss:$16 sps:$4 sm:$0xff]   ;;  %v18858_v55 = vld [vmem:[#allocation4 + $0x2ecc] ss:$16 sps:$4 sm:$0xff]  }
 0x641   :  { %10920 = vmatpush1.bf16.msra.mxu0 %v18760_v56  ;;  %11945 = vmatpush1.bf16.msra.mxu1 %v18763_v57  ;;  %v18853_v56 = vld [vmem:[#allocation4 + $0x2ec0] ss:$16 sps:$4 sm:$0xff]   ;;  %v18856_v57 = vld [vmem:[#allocation4 + $0x2ec8] ss:$16 sps:$4 sm:$0xff]  }
 0x642   :  { %10921 = vmatprep.subr.bf16.mxu0 %v18768_v58  ;;  %11946 = vmatprep.subr.bf16.mxu1 %v18771_v59  ;;  %v18861_v58 = vld [vmem:[#allocation4 + $0x2ee4] ss:$16 sps:$4 sm:$0xff]   ;;  %v18864_v59 = vld [vmem:[#allocation4 + $0x2eec] ss:$16 sps:$4 sm:$0xff]  }
 0x645   :  { %10922 = vmatpush1.bf16.msra.mxu0 %v18766_v60  ;;  %11947 = vmatpush1.bf16.msra.mxu1 %v18769_v61  ;;  %v18859_v60 = vld [vmem:[#allocation4 + $0x2ee0] ss:$16 sps:$4 sm:$0xff]   ;;  %v18862_v61 = vld [vmem:[#allocation4 + $0x2ee8] ss:$16 sps:$4 sm:$0xff]  }
 0x646   :  { %10923 = vmatprep.subr.bf16.mxu0 %v18774_v62  ;;  %11948 = vmatprep.subr.bf16.mxu1 %v18777_v63  ;;  %v18867_v62 = vld [vmem:[#allocation4 + $0x2f04] ss:$16 sps:$4 sm:$0xff]   ;;  %v18870_v63 = vld [vmem:[#allocation4 + $0x2f0c] ss:$16 sps:$4 sm:$0xff]  }
 0x649   :  { %10924 = vmatpush1.bf16.msra.mxu0 %v18772_v0  ;;  %11949 = vmatpush1.bf16.msra.mxu1 %v18775_v1  ;;  %v18865_v0 = vld [vmem:[#allocation4 + $0x2f00] ss:$16 sps:$4 sm:$0xff]   ;;  %v18868_v1 = vld [vmem:[#allocation4 + $0x2f08] ss:$16 sps:$4 sm:$0xff]  }
 0x64a   :  { %10925 = vmatprep.subr.bf16.mxu0 %v18780_v2  ;;  %11950 = vmatprep.subr.bf16.mxu1 %v18783_v3  ;;  %v18873_v2 = vld [vmem:[#allocation4 + $0x2f24] ss:$16 sps:$4 sm:$0xff]   ;;  %v18876_v3 = vld [vmem:[#allocation4 + $0x2f2c] ss:$16 sps:$4 sm:$0xff]  }
 0x64d   :  { %10926 = vmatpush1.bf16.msra.mxu0 %v18778_v4  ;;  %11951 = vmatpush1.bf16.msra.mxu1 %v18781_v5  ;;  %v18871_v4 = vld [vmem:[#allocation4 + $0x2f20] ss:$16 sps:$4 sm:$0xff]   ;;  %v18874_v5 = vld [vmem:[#allocation4 + $0x2f28] ss:$16 sps:$4 sm:$0xff]  }
 0x64e   :  { %10927 = vmatprep.subr.bf16.mxu0 %v18786_v6  ;;  %11952 = vmatprep.subr.bf16.mxu1 %v18789_v7  ;;  %v18879_v6 = vld [vmem:[#allocation4 + $0x2f44] ss:$16 sps:$4 sm:$0xff]   ;;  %v18882_v7 = vld [vmem:[#allocation4 + $0x2f4c] ss:$16 sps:$4 sm:$0xff]  }
 0x651   :  { %10928 = vmatpush1.bf16.msra.mxu0 %v18784_v8  ;;  %11953 = vmatpush1.bf16.msra.mxu1 %v18787_v9  ;;  %v18877_v8 = vld [vmem:[#allocation4 + $0x2f40] ss:$16 sps:$4 sm:$0xff]   ;;  %v18880_v9 = vld [vmem:[#allocation4 + $0x2f48] ss:$16 sps:$4 sm:$0xff]  }
 0x652   :  { %10929 = vmatprep.subr.bf16.mxu0 %v18792_v10  ;;  %11954 = vmatprep.subr.bf16.mxu1 %v18795_v11  ;;  %v18885_v10 = vld [vmem:[#allocation4 + $0x2f64] ss:$16 sps:$4 sm:$0xff]   ;;  %v18888_v11 = vld [vmem:[#allocation4 + $0x2f6c] ss:$16 sps:$4 sm:$0xff]  }
 0x655   :  { %10930 = vmatpush1.bf16.msra.mxu0 %v18790_v12  ;;  %11955 = vmatpush1.bf16.msra.mxu1 %v18793_v13  ;;  %v18883_v12 = vld [vmem:[#allocation4 + $0x2f60] ss:$16 sps:$4 sm:$0xff]   ;;  %v18886_v13 = vld [vmem:[#allocation4 + $0x2f68] ss:$16 sps:$4 sm:$0xff]  }
 0x656   :  { %10931 = vmatprep.subr.bf16.mxu0 %v18798_v14  ;;  %11956 = vmatprep.subr.bf16.mxu1 %v18801_v15  ;;  %v18891_v14 = vld [vmem:[#allocation4 + $0x2f84] ss:$16 sps:$4 sm:$0xff]   ;;  %v18894_v15 = vld [vmem:[#allocation4 + $0x2f8c] ss:$16 sps:$4 sm:$0xff]  }
 0x659   :  { %10932 = vmatpush1.bf16.msra.mxu0 %v18796_v16  ;;  %11957 = vmatpush1.bf16.msra.mxu1 %v18799_v17  ;;  %v18889_v16 = vld [vmem:[#allocation4 + $0x2f80] ss:$16 sps:$4 sm:$0xff]   ;;  %v18892_v17 = vld [vmem:[#allocation4 + $0x2f88] ss:$16 sps:$4 sm:$0xff]  }
 0x65a   :  { %10933 = vmatprep.subr.bf16.mxu0 %v18804_v18  ;;  %11958 = vmatprep.subr.bf16.mxu1 %v18807_v19  ;;  %v18897_v18 = vld [vmem:[#allocation4 + $0x2fa4] ss:$16 sps:$4 sm:$0xff]   ;;  %v18900_v19 = vld [vmem:[#allocation4 + $0x2fac] ss:$16 sps:$4 sm:$0xff]  }
 0x65d   :  { %10934 = vmatpush1.bf16.msra.mxu0 %v18802_v20  ;;  %11959 = vmatpush1.bf16.msra.mxu1 %v18805_v21  ;;  %v18895_v20 = vld [vmem:[#allocation4 + $0x2fa0] ss:$16 sps:$4 sm:$0xff]   ;;  %v18898_v21 = vld [vmem:[#allocation4 + $0x2fa8] ss:$16 sps:$4 sm:$0xff]  }
 0x65e   :  { %10935 = vmatprep.subr.bf16.mxu0 %v18810_v22  ;;  %11960 = vmatprep.subr.bf16.mxu1 %v18813_v23  ;;  %v18903_v22 = vld [vmem:[#allocation4 + $0x2fc4] ss:$16 sps:$4 sm:$0xff]   ;;  %v18906_v23 = vld [vmem:[#allocation4 + $0x2fcc] ss:$16 sps:$4 sm:$0xff]  }
 0x661   :  { %10936 = vmatpush1.bf16.msra.mxu0 %v18808_v25  ;;  %11961 = vmatpush1.bf16.msra.mxu1 %v18811_v26  ;;  %v18904_v25 = vld [vmem:[#allocation4 + $0x2fc8] ss:$16 sps:$4 sm:$0xff]   ;;  %v18909_v26 = vld [vmem:[#allocation4 + $0x2fe4] ss:$16 sps:$4 sm:$0xff]  }
 0x662   :  { %10946 = vmatprep.subr.bf16.mxu0 %v18819_v27  ;;  %11971 = vmatprep.subr.bf16.mxu1 %v18822_v28  ;;  %v18912_v27 = vld [vmem:[#allocation4 + $0x2fec] ss:$16 sps:$4 sm:$0xff]   ;;  %v18913_v28 = vld [vmem:[#allocation2 + $0xb8] ss:$200 sps:$4 sm:$0xff]  }
 0x664   :  { %10938 = vmatmul.mubr.bf16.vlgmr.msra.gmra.mrb[0].mxu0 %v391_v30  ;;  %11963 = vmatmul.mubr.bf16.vlgmr.msra.gmra.mrb[0].mxu1 %v391_v30  ;;  %v18910_v30 = vld [vmem:[#allocation4 + $0x2fe8] ss:$16 sps:$4 sm:$0xff]  }
 0x665   :  { %10947 = vmatpush1.bf16.msra.mxu0 %v18817_v31  ;;  %11972 = vmatpush1.bf16.msra.mxu1 %v18820_v32  ;;  %v18918_v31 = vld [vmem:[#allocation4 + $0x3004] ss:$16 sps:$4 sm:$0xff]   ;;  %v18921_v32 = vld [vmem:[#allocation4 + $0x300c] ss:$16 sps:$4 sm:$0xff]  }
 0x666   :  { %10948 = vmatprep.subr.bf16.mxu0 %v18825_v33  ;;  %11973 = vmatprep.subr.bf16.mxu1 %v18828_v34  ;;  %v19004_v33 = vld [vmem:[#allocation2 + $0xc4] ss:$200 sps:$4 sm:$0xff]   ;;  %v393_v34 = vpack.c.bf16 %v18913_v28, %v18913_v28 }
 0x667   :  { %10978 = vmatprep.mubr.bf16.mxu0 %v394_v35  ;;  %12003 = vmatprep.mubr.bf16.mxu1 %v394_v35  ;;  %v18916_v35 = vld [vmem:[#allocation4 + $0x3000] ss:$16 sps:$4 sm:$0xff]  }
 0x669   :  { %10949 = vmatpush1.bf16.msra.mxu0 %v18823_v36  ;;  %11974 = vmatpush1.bf16.msra.mxu1 %v18826_v37  ;;  %v18919_v36 = vld [vmem:[#allocation4 + $0x3008] ss:$16 sps:$4 sm:$0xff]   ;;  %v18924_v37 = vld [vmem:[#allocation4 + $0x3024] ss:$16 sps:$4 sm:$0xff]  }
 0x66a   :  { %10950 = vmatprep.subr.bf16.mxu0 %v18831_v38  ;;  %11975 = vmatprep.subr.bf16.mxu1 %v18834_v39  ;;  %v18927_v38 = vld [vmem:[#allocation4 + $0x302c] ss:$16 sps:$4 sm:$0xff]   ;;  %v396_v39 = vpack.c.bf16 %v19004_v33, %v19004_v33 }
 0x66d   :  { %10951 = vmatpush1.bf16.msra.mxu0 %v18829_v40  ;;  %11976 = vmatpush1.bf16.msra.mxu1 %v18832_v41  ;;  %v18922_v40 = vld [vmem:[#allocation4 + $0x3020] ss:$16 sps:$4 sm:$0xff]   ;;  %v18925_v41 = vld [vmem:[#allocation4 + $0x3028] ss:$16 sps:$4 sm:$0xff]  }
 0x66e   :  { %10952 = vmatprep.subr.bf16.mxu0 %v18837_v42  ;;  %11977 = vmatprep.subr.bf16.mxu1 %v18840_v43  ;;  %v18930_v42 = vld [vmem:[#allocation4 + $0x3044] ss:$16 sps:$4 sm:$0xff]   ;;  %v18933_v43 = vld [vmem:[#allocation4 + $0x304c] ss:$16 sps:$4 sm:$0xff]  }
 0x671   :  { %10953 = vmatpush1.bf16.msra.mxu0 %v18835_v44  ;;  %11978 = vmatpush1.bf16.msra.mxu1 %v18838_v45  ;;  %v18928_v44 = vld [vmem:[#allocation4 + $0x3040] ss:$16 sps:$4 sm:$0xff]   ;;  %v18931_v45 = vld [vmem:[#allocation4 + $0x3048] ss:$16 sps:$4 sm:$0xff]  }
 0x672   :  { %10954 = vmatprep.subr.bf16.mxu0 %v18843_v46  ;;  %11979 = vmatprep.subr.bf16.mxu1 %v18846_v47  ;;  %v18936_v46 = vld [vmem:[#allocation4 + $0x3064] ss:$16 sps:$4 sm:$0xff]   ;;  %v18939_v47 = vld [vmem:[#allocation4 + $0x306c] ss:$16 sps:$4 sm:$0xff]  }
 0x675   :  { %10955 = vmatpush1.bf16.msra.mxu0 %v18841_v48  ;;  %11980 = vmatpush1.bf16.msra.mxu1 %v18844_v49  ;;  %v18934_v48 = vld [vmem:[#allocation4 + $0x3060] ss:$16 sps:$4 sm:$0xff]   ;;  %v18937_v49 = vld [vmem:[#allocation4 + $0x3068] ss:$16 sps:$4 sm:$0xff]  }
 0x676   :  { %10956 = vmatprep.subr.bf16.mxu0 %v18849_v50  ;;  %11981 = vmatprep.subr.bf16.mxu1 %v18852_v51  ;;  %v18942_v50 = vld [vmem:[#allocation4 + $0x3084] ss:$16 sps:$4 sm:$0xff]   ;;  %v18945_v51 = vld [vmem:[#allocation4 + $0x308c] ss:$16 sps:$4 sm:$0xff]  }
 0x679   :  { %10957 = vmatpush1.bf16.msra.mxu0 %v18847_v52  ;;  %11982 = vmatpush1.bf16.msra.mxu1 %v18850_v53  ;;  %v18940_v52 = vld [vmem:[#allocation4 + $0x3080] ss:$16 sps:$4 sm:$0xff]   ;;  %v18943_v53 = vld [vmem:[#allocation4 + $0x3088] ss:$16 sps:$4 sm:$0xff]  }
 0x67a   :  { %10958 = vmatprep.subr.bf16.mxu0 %v18855_v54  ;;  %11983 = vmatprep.subr.bf16.mxu1 %v18858_v55  ;;  %v18948_v54 = vld [vmem:[#allocation4 + $0x30a4] ss:$16 sps:$4 sm:$0xff]   ;;  %v18951_v55 = vld [vmem:[#allocation4 + $0x30ac] ss:$16 sps:$4 sm:$0xff]  }
 0x67d   :  { %10959 = vmatpush1.bf16.msra.mxu0 %v18853_v56  ;;  %11984 = vmatpush1.bf16.msra.mxu1 %v18856_v57  ;;  %v18946_v56 = vld [vmem:[#allocation4 + $0x30a0] ss:$16 sps:$4 sm:$0xff]   ;;  %v18949_v57 = vld [vmem:[#allocation4 + $0x30a8] ss:$16 sps:$4 sm:$0xff]  }
 0x67e   :  { %10960 = vmatprep.subr.bf16.mxu0 %v18861_v58  ;;  %11985 = vmatprep.subr.bf16.mxu1 %v18864_v59  ;;  %v18954_v58 = vld [vmem:[#allocation4 + $0x30c4] ss:$16 sps:$4 sm:$0xff]   ;;  %v18957_v59 = vld [vmem:[#allocation4 + $0x30cc] ss:$16 sps:$4 sm:$0xff]  }
 0x681   :  { %10961 = vmatpush1.bf16.msra.mxu0 %v18859_v60  ;;  %11986 = vmatpush1.bf16.msra.mxu1 %v18862_v61  ;;  %v18952_v60 = vld [vmem:[#allocation4 + $0x30c0] ss:$16 sps:$4 sm:$0xff]   ;;  %v18955_v61 = vld [vmem:[#allocation4 + $0x30c8] ss:$16 sps:$4 sm:$0xff]  }
 0x682   :  { %10962 = vmatprep.subr.bf16.mxu0 %v18867_v62  ;;  %11987 = vmatprep.subr.bf16.mxu1 %v18870_v63  ;;  %v18960_v62 = vld [vmem:[#allocation4 + $0x30e4] ss:$16 sps:$4 sm:$0xff]   ;;  %v18963_v63 = vld [vmem:[#allocation4 + $0x30ec] ss:$16 sps:$4 sm:$0xff]  }
 0x685   :  { %10963 = vmatpush1.bf16.msra.mxu0 %v18865_v0  ;;  %11988 = vmatpush1.bf16.msra.mxu1 %v18868_v1  ;;  %v18958_v0 = vld [vmem:[#allocation4 + $0x30e0] ss:$16 sps:$4 sm:$0xff]   ;;  %v18961_v1 = vld [vmem:[#allocation4 + $0x30e8] ss:$16 sps:$4 sm:$0xff]  }
 0x686   :  { %10964 = vmatprep.subr.bf16.mxu0 %v18873_v2  ;;  %11989 = vmatprep.subr.bf16.mxu1 %v18876_v3  ;;  %v18966_v2 = vld [vmem:[#allocation4 + $0x3104] ss:$16 sps:$4 sm:$0xff]   ;;  %v18969_v3 = vld [vmem:[#allocation4 + $0x310c] ss:$16 sps:$4 sm:$0xff]  }
 0x689   :  { %10965 = vmatpush1.bf16.msra.mxu0 %v18871_v4  ;;  %11990 = vmatpush1.bf16.msra.mxu1 %v18874_v5  ;;  %v18964_v4 = vld [vmem:[#allocation4 + $0x3100] ss:$16 sps:$4 sm:$0xff]   ;;  %v18967_v5 = vld [vmem:[#allocation4 + $0x3108] ss:$16 sps:$4 sm:$0xff]  }
 0x68a   :  { %10966 = vmatprep.subr.bf16.mxu0 %v18879_v6  ;;  %11991 = vmatprep.subr.bf16.mxu1 %v18882_v7  ;;  %v18972_v6 = vld [vmem:[#allocation4 + $0x3124] ss:$16 sps:$4 sm:$0xff]   ;;  %v18975_v7 = vld [vmem:[#allocation4 + $0x312c] ss:$16 sps:$4 sm:$0xff]  }
 0x68d   :  { %10967 = vmatpush1.bf16.msra.mxu0 %v18877_v8  ;;  %11992 = vmatpush1.bf16.msra.mxu1 %v18880_v9  ;;  %v18970_v8 = vld [vmem:[#allocation4 + $0x3120] ss:$16 sps:$4 sm:$0xff]   ;;  %v18973_v9 = vld [vmem:[#allocation4 + $0x3128] ss:$16 sps:$4 sm:$0xff]  }
 0x68e   :  { %10968 = vmatprep.subr.bf16.mxu0 %v18885_v10  ;;  %11993 = vmatprep.subr.bf16.mxu1 %v18888_v11  ;;  %v18978_v10 = vld [vmem:[#allocation4 + $0x3144] ss:$16 sps:$4 sm:$0xff]   ;;  %v18981_v11 = vld [vmem:[#allocation4 + $0x314c] ss:$16 sps:$4 sm:$0xff]  }
 0x691   :  { %10969 = vmatpush1.bf16.msra.mxu0 %v18883_v12  ;;  %11994 = vmatpush1.bf16.msra.mxu1 %v18886_v13  ;;  %v18976_v12 = vld [vmem:[#allocation4 + $0x3140] ss:$16 sps:$4 sm:$0xff]   ;;  %v18979_v13 = vld [vmem:[#allocation4 + $0x3148] ss:$16 sps:$4 sm:$0xff]  }
 0x692   :  { %10970 = vmatprep.subr.bf16.mxu0 %v18891_v14  ;;  %11995 = vmatprep.subr.bf16.mxu1 %v18894_v15  ;;  %v18984_v14 = vld [vmem:[#allocation4 + $0x3164] ss:$16 sps:$4 sm:$0xff]   ;;  %v18987_v15 = vld [vmem:[#allocation4 + $0x316c] ss:$16 sps:$4 sm:$0xff]  }
 0x695   :  { %10971 = vmatpush1.bf16.msra.mxu0 %v18889_v16  ;;  %11996 = vmatpush1.bf16.msra.mxu1 %v18892_v17  ;;  %v18982_v16 = vld [vmem:[#allocation4 + $0x3160] ss:$16 sps:$4 sm:$0xff]   ;;  %v18985_v17 = vld [vmem:[#allocation4 + $0x3168] ss:$16 sps:$4 sm:$0xff]  }
 0x696   :  { %10972 = vmatprep.subr.bf16.mxu0 %v18897_v18  ;;  %11997 = vmatprep.subr.bf16.mxu1 %v18900_v19  ;;  %v18990_v18 = vld [vmem:[#allocation4 + $0x3184] ss:$16 sps:$4 sm:$0xff]   ;;  %v18993_v19 = vld [vmem:[#allocation4 + $0x318c] ss:$16 sps:$4 sm:$0xff]  }
 0x699   :  { %10973 = vmatpush1.bf16.msra.mxu0 %v18895_v20  ;;  %11998 = vmatpush1.bf16.msra.mxu1 %v18898_v21  ;;  %v1989_v20 = vld [vmem:[#allocation4 + $0x31c0] sm:$0x77]  ;;  %v1990_v21 = vld [vmem:[#allocation4 + $0x31c8] sm:$0x77] }
 0x69a   :  { %10974 = vmatprep.subr.bf16.mxu0 %v18903_v22  ;;  %11999 = vmatprep.subr.bf16.mxu1 %v18906_v23  ;;  %v19670_v22 = vmov 65535   ;;  %v15966_v28 = vcombine.high %v1989_v20, %v1989_v20  ;;  %v15965_v33 = vcombine.low %v1989_v20, %v1989_v20  ;;  %v19070_v20 = vld [vmem:[#allocation7 + $0x148] ss:$16 sps:$4 sm:$0xff]  }
 0x69b   :  { %v9989_v23 = vsel %vm9987_vm1, 4294967295, %v19670_v22  ;;  %v19078_v22 = vld [vmem:[#allocation7 + $0x16c] ss:$16 sps:$4 sm:$0xff]  }
 0x69d   :  { %10975 = vmatpush1.bf16.msra.mxu0 %v18901_v24  ;;  %12000 = vmatpush1.bf16.msra.mxu1 %v18904_v25  ;;  %v18988_v24 = vld [vmem:[#allocation4 + $0x3180] ss:$16 sps:$4 sm:$0xff]   ;;  %v18991_v25 = vld [vmem:[#allocation4 + $0x3188] ss:$16 sps:$4 sm:$0xff]  }
 0x69e   :  { %10976 = vmatprep.subr.bf16.mxu0 %v18909_v26  ;;  %12001 = vmatprep.subr.bf16.mxu1 %v18912_v27  ;;  %v18996_v26 = vld [vmem:[#allocation4 + $0x31a4] ss:$16 sps:$4 sm:$0xff]   ;;  %v18999_v27 = vld [vmem:[#allocation4 + $0x31ac] ss:$16 sps:$4 sm:$0xff]  }
 0x6a1   :  { %10977 = vmatpush1.bf16.msra.mxu0 %v18907_v29  ;;  %12002 = vmatpush1.bf16.msra.mxu1 %v18910_v30  ;;  %v15968_v29 = vcombine.high %v1990_v21, %v1990_v21  ;;  %v9990_v30 = vsel %vm9988_vm2, %v9989_v23, 0  ;;  %v19073_v23 = vld [vmem:[#allocation7 + $0x160] ss:$16 sps:$4 sm:$0xff]  }
 0x6a2   :  { %10987 = vmatprep.subr.bf16.mxu0 %v18918_v31  ;;  %12012 = vmatprep.subr.bf16.mxu1 %v18921_v32  ;;  %v18994_v31 = vld [vmem:[#allocation4 + $0x31a0] ss:$16 sps:$4 sm:$0xff]   ;;  %v18997_v32 = vld [vmem:[#allocation4 + $0x31a8] ss:$16 sps:$4 sm:$0xff]  }
 0x6a4   :  { %10979 = vmatmul.mubr.bf16.vlgmr.msra.gmra.mrb[0].mxu0 %v393_v34  ;;  %12004 = vmatmul.mubr.bf16.vlgmr.msra.gmra.mrb[0].mxu1 %v393_v34  ;;  %v15967_v34 = vcombine.low %v1990_v21, %v1990_v21  ;;  %v19075_v21 = vld [vmem:[#allocation7 + $0x164] ss:$16 sps:$4 sm:$0xff]  }
 0x6a5   :  { %10988 = vmatpush1.bf16.msra.mxu0 %v18916_v35  ;;  %12013 = vmatpush1.bf16.msra.mxu1 %v18919_v36  ;;  %v9995_v35 = vand.u32 %v15966_v28, %v9990_v30  ;;  %v10001_v36 = vand.u32 %v15968_v29, %v9990_v30  ;;  %v19082_v28 = vld [vmem:[#allocation7 + $0x188] ss:$16 sps:$4 sm:$0xff]   ;;  %v19087_v29 = vld [vmem:[#allocation7 + $0x1a4] ss:$16 sps:$4 sm:$0xff]  }
 0x6a6   :  { %10989 = vmatprep.subr.bf16.mxu0 %v18924_v37  ;;  %12014 = vmatprep.subr.bf16.mxu1 %v18927_v38  ;;  %v19006_v37 = vld [vmem:[#allocation2 + $0xc0] ss:$200 sps:$4 sm:$0xff]   ;;  %v9992_v38 = vand.u32 %v15965_v33, %v9990_v30 }
 0x6a7   :  { %15969 = vmatprep.mubr.msk.bf16.mxu0 %vm9983_vm0, %v396_v39  ;;  %15970 = vmatprep.mubr.msk.bf16.mxu1 %vm9983_vm0, %v396_v39  ;;  %v9998_v39 = vand.u32 %v15967_v34, %v9990_v30  ;;  %v19090_v30 = vld [vmem:[#allocation7 + $0x1ac] ss:$16 sps:$4 sm:$0xff]   ;;  %v19093_v33 = vld [vmem:[#allocation7 + $0x1c4] ss:$16 sps:$4 sm:$0xff]  }
 0x6a8   :  { %v19096_v34 = vld [vmem:[#allocation7 + $0x1cc] ss:$16 sps:$4 sm:$0xff]  }
 0x6a9   :  { %10990 = vmatpush1.bf16.msra.mxu0 %v18922_v40  ;;  %12015 = vmatpush1.bf16.msra.mxu1 %v18925_v41  ;;  %v19009_v40 = vld [vmem:[#allocation7 + $0x4] ss:$16 sps:$4 sm:$0xff]   ;;  %v19012_v41 = vld [vmem:[#allocation7 + $0xc] ss:$16 sps:$4 sm:$0xff]  }
 0x6aa   :  { %10991 = vmatprep.subr.bf16.mxu0 %v18930_v42  ;;  %12016 = vmatprep.subr.bf16.mxu1 %v18933_v43  ;;  %v395_v42 = vpack.c.bf16 %v19006_v37, %v19006_v37  ;;  %v19007_v43 = vld [vmem:[#allocation7] ss:$16 sps:$4 sm:$0xff]   ;;  %v19099_v37 = vld [vmem:[#allocation7 + $0x1e4] ss:$16 sps:$4 sm:$0xff]  }
 0x6ad   :  { %10992 = vmatpush1.bf16.msra.mxu0 %v18928_v44  ;;  %12017 = vmatpush1.bf16.msra.mxu1 %v18931_v45  ;;  %v19010_v44 = vld [vmem:[#allocation7 + $0x8] ss:$16 sps:$4 sm:$0xff]   ;;  %v19015_v45 = vld [vmem:[#allocation7 + $0x24] ss:$16 sps:$4 sm:$0xff]  }
 0x6ae   :  { %10993 = vmatprep.subr.bf16.mxu0 %v18936_v46  ;;  %12018 = vmatprep.subr.bf16.mxu1 %v18939_v47  ;;  %v19018_v46 = vld [vmem:[#allocation7 + $0x2c] ss:$16 sps:$4 sm:$0xff]   ;;  %v19013_v47 = vld [vmem:[#allocation7 + $0x20] ss:$16 sps:$4 sm:$0xff]  }
 0x6b1   :  { %10994 = vmatpush1.bf16.msra.mxu0 %v18934_v48  ;;  %12019 = vmatpush1.bf16.msra.mxu1 %v18937_v49  ;;  %v19016_v48 = vld [vmem:[#allocation7 + $0x28] ss:$16 sps:$4 sm:$0xff]   ;;  %v19021_v49 = vld [vmem:[#allocation7 + $0x44] ss:$16 sps:$4 sm:$0xff]  }
 0x6b2   :  { %10995 = vmatprep.subr.bf16.mxu0 %v18942_v50  ;;  %12020 = vmatprep.subr.bf16.mxu1 %v18945_v51  ;;  %v19024_v50 = vld [vmem:[#allocation7 + $0x4c] ss:$16 sps:$4 sm:$0xff]   ;;  %v19019_v51 = vld [vmem:[#allocation7 + $0x40] ss:$16 sps:$4 sm:$0xff]  }
 0x6b5   :  { %10996 = vmatpush1.bf16.msra.mxu0 %v18940_v52  ;;  %12021 = vmatpush1.bf16.msra.mxu1 %v18943_v53  ;;  %v19022_v52 = vld [vmem:[#allocation7 + $0x48] ss:$16 sps:$4 sm:$0xff]   ;;  %v19027_v53 = vld [vmem:[#allocation7 + $0x64] ss:$16 sps:$4 sm:$0xff]  }
 0x6b6   :  { %10997 = vmatprep.subr.bf16.mxu0 %v18948_v54  ;;  %12022 = vmatprep.subr.bf16.mxu1 %v18951_v55  ;;  %v19030_v54 = vld [vmem:[#allocation7 + $0x6c] ss:$16 sps:$4 sm:$0xff]   ;;  %v19025_v55 = vld [vmem:[#allocation7 + $0x60] ss:$16 sps:$4 sm:$0xff]  }
 0x6b9   :  { %10998 = vmatpush1.bf16.msra.mxu0 %v18946_v56  ;;  %12023 = vmatpush1.bf16.msra.mxu1 %v18949_v57  ;;  %v19028_v56 = vld [vmem:[#allocation7 + $0x68] ss:$16 sps:$4 sm:$0xff]   ;;  %v19033_v57 = vld [vmem:[#allocation7 + $0x84] ss:$16 sps:$4 sm:$0xff]  }
 0x6ba   :  { %10999 = vmatprep.subr.bf16.mxu0 %v18954_v58  ;;  %12024 = vmatprep.subr.bf16.mxu1 %v18957_v59  ;;  %v19036_v58 = vld [vmem:[#allocation7 + $0x8c] ss:$16 sps:$4 sm:$0xff]   ;;  %v19031_v59 = vld [vmem:[#allocation7 + $0x80] ss:$16 sps:$4 sm:$0xff]  }
 0x6bd   :  { %11000 = vmatpush1.bf16.msra.mxu0 %v18952_v60  ;;  %12025 = vmatpush1.bf16.msra.mxu1 %v18955_v61  ;;  %v19034_v60 = vld [vmem:[#allocation7 + $0x88] ss:$16 sps:$4 sm:$0xff]   ;;  %v19039_v61 = vld [vmem:[#allocation7 + $0xa4] ss:$16 sps:$4 sm:$0xff]  }
 0x6be   :  { %11001 = vmatprep.subr.bf16.mxu0 %v18960_v62  ;;  %12026 = vmatprep.subr.bf16.mxu1 %v18963_v63  ;;  %v19042_v62 = vld [vmem:[#allocation7 + $0xac] ss:$16 sps:$4 sm:$0xff]   ;;  %v19037_v63 = vld [vmem:[#allocation7 + $0xa0] ss:$16 sps:$4 sm:$0xff]  }
 0x6c1   :  { %11002 = vmatpush1.bf16.msra.mxu0 %v18958_v0  ;;  %12027 = vmatpush1.bf16.msra.mxu1 %v18961_v1  ;;  %v19040_v0 = vld [vmem:[#allocation7 + $0xa8] ss:$16 sps:$4 sm:$0xff]   ;;  %v19045_v1 = vld [vmem:[#allocation7 + $0xc4] ss:$16 sps:$4 sm:$0xff]  }
 0x6c2   :  { %11003 = vmatprep.subr.bf16.mxu0 %v18966_v2  ;;  %12028 = vmatprep.subr.bf16.mxu1 %v18969_v3  ;;  %v19048_v2 = vld [vmem:[#allocation7 + $0xcc] ss:$16 sps:$4 sm:$0xff]   ;;  %v19043_v3 = vld [vmem:[#allocation7 + $0xc0] ss:$16 sps:$4 sm:$0xff]  }
 0x6c5   :  { %11004 = vmatpush1.bf16.msra.mxu0 %v18964_v4  ;;  %12029 = vmatpush1.bf16.msra.mxu1 %v18967_v5  ;;  %v19046_v4 = vld [vmem:[#allocation7 + $0xc8] ss:$16 sps:$4 sm:$0xff]   ;;  %v19051_v5 = vld [vmem:[#allocation7 + $0xe4] ss:$16 sps:$4 sm:$0xff]  }
 0x6c6   :  { %11005 = vmatprep.subr.bf16.mxu0 %v18972_v6  ;;  %12030 = vmatprep.subr.bf16.mxu1 %v18975_v7  ;;  %v19054_v6 = vld [vmem:[#allocation7 + $0xec] ss:$16 sps:$4 sm:$0xff]   ;;  %v19049_v7 = vld [vmem:[#allocation7 + $0xe0] ss:$16 sps:$4 sm:$0xff]  }
 0x6c9   :  { %11006 = vmatpush1.bf16.msra.mxu0 %v18970_v8  ;;  %12031 = vmatpush1.bf16.msra.mxu1 %v18973_v9  ;;  %v19052_v8 = vld [vmem:[#allocation7 + $0xe8] ss:$16 sps:$4 sm:$0xff]   ;;  %v19057_v9 = vld [vmem:[#allocation7 + $0x104] ss:$16 sps:$4 sm:$0xff]  }
 0x6ca   :  { %11007 = vmatprep.subr.bf16.mxu0 %v18978_v10  ;;  %12032 = vmatprep.subr.bf16.mxu1 %v18981_v11  ;;  %v19060_v10 = vld [vmem:[#allocation7 + $0x10c] ss:$16 sps:$4 sm:$0xff]   ;;  %v19055_v11 = vld [vmem:[#allocation7 + $0x100] ss:$16 sps:$4 sm:$0xff]  }
 0x6cd   :  { %11008 = vmatpush1.bf16.msra.mxu0 %v18976_v12  ;;  %12033 = vmatpush1.bf16.msra.mxu1 %v18979_v13  ;;  %v19058_v12 = vld [vmem:[#allocation7 + $0x108] ss:$16 sps:$4 sm:$0xff]   ;;  %v19063_v13 = vld [vmem:[#allocation7 + $0x124] ss:$16 sps:$4 sm:$0xff]  }
 0x6ce   :  { %11009 = vmatprep.subr.bf16.mxu0 %v18984_v14  ;;  %12034 = vmatprep.subr.bf16.mxu1 %v18987_v15  ;;  %v19066_v14 = vld [vmem:[#allocation7 + $0x12c] ss:$16 sps:$4 sm:$0xff]   ;;  %v19061_v15 = vld [vmem:[#allocation7 + $0x120] ss:$16 sps:$4 sm:$0xff]  }
 0x6d1   :  { %11010 = vmatpush1.bf16.msra.mxu0 %v18982_v16  ;;  %12035 = vmatpush1.bf16.msra.mxu1 %v18985_v17  ;;  %v19064_v16 = vld [vmem:[#allocation7 + $0x128] ss:$16 sps:$4 sm:$0xff]   ;;  %v19069_v17 = vld [vmem:[#allocation7 + $0x144] ss:$16 sps:$4 sm:$0xff]  }
 0x6d2   :  { %11011 = vmatprep.subr.bf16.mxu0 %v18990_v18  ;;  %12036 = vmatprep.subr.bf16.mxu1 %v18993_v19  ;;  %v19072_v18 = vld [vmem:[#allocation7 + $0x14c] ss:$16 sps:$4 sm:$0xff]   ;;  %v19067_v19 = vld [vmem:[#allocation7 + $0x140] ss:$16 sps:$4 sm:$0xff]  }
 0x6d5   :  { %11012 = vmatpush1.bf16.msra.mxu0 %v18988_v24  ;;  %12037 = vmatpush1.bf16.msra.mxu1 %v18991_v25  ;;  %v19076_v24 = vld [vmem:[#allocation7 + $0x168] ss:$16 sps:$4 sm:$0xff]   ;;  %v19081_v25 = vld [vmem:[#allocation7 + $0x184] ss:$16 sps:$4 sm:$0xff]  }
 0x6d6   :  { %11013 = vmatprep.subr.bf16.mxu0 %v18996_v26  ;;  %12038 = vmatprep.subr.bf16.mxu1 %v18999_v27  ;;  %v19084_v26 = vld [vmem:[#allocation7 + $0x18c] ss:$16 sps:$4 sm:$0xff]   ;;  %v19079_v27 = vld [vmem:[#allocation7 + $0x180] ss:$16 sps:$4 sm:$0xff]  }
 0x6d9   :  { %11014 = vmatpush1.bf16.msra.mxu0 %v18994_v31  ;;  %12039 = vmatpush1.bf16.msra.mxu1 %v18997_v32  ;;  %v19085_v31 = vld [vmem:[#allocation7 + $0x1a0] ss:$16 sps:$4 sm:$0xff]   ;;  %v19088_v32 = vld [vmem:[#allocation7 + $0x1a8] ss:$16 sps:$4 sm:$0xff]  }
 0x6da   :  { %11015 = vmatprep.subr.bf16.mxu0 %v9995_v35  ;;  %12040 = vmatprep.subr.bf16.mxu1 %v10001_v36  ;;  %v19091_v35 = vld [vmem:[#allocation7 + $0x1c0] ss:$16 sps:$4 sm:$0xff]   ;;  %v19094_v36 = vld [vmem:[#allocation7 + $0x1c8] ss:$16 sps:$4 sm:$0xff]  }
 0x6dd   :  { %11016 = vmatpush1.bf16.msra.mxu0 %v9992_v38  ;;  %12041 = vmatpush1.bf16.msra.mxu1 %v9998_v39  ;;  %v19102_v38 = vld [vmem:[#allocation7 + $0x1ec] ss:$16 sps:$4 sm:$0xff]   ;;  %v19097_v39 = vld [vmem:[#allocation7 + $0x1e0] ss:$16 sps:$4 sm:$0xff]  }
 0x6de   :  { %12851 = vmatprep.subr.bf16.mxu0 %v19009_v40  ;;  %12933 = vmatprep.subr.bf16.mxu1 %v19012_v41  ;;  %v19100_v40 = vld [vmem:[#allocation7 + $0x1e8] ss:$16 sps:$4 sm:$0xff]   ;;  %v19105_v41 = vld [vmem:[#allocation7 + $0x204] ss:$16 sps:$4 sm:$0xff]  }
 0x6e0   :  { %11020 = vmatmul.mubr.bf16.vlgmr.msra.gmra.mrb[0].mxu0 %v395_v42  ;;  %12045 = vmatmul.mubr.bf16.vlgmr.msra.gmra.mrb[0].mxu1 %v395_v42  ;;  %v19108_v42 = vld [vmem:[#allocation7 + $0x20c] ss:$16 sps:$4 sm:$0xff]  }
 0x6e1   :  { %12852 = vmatpush1.bf16.msra.mxu0 %v19007_v43  ;;  %12934 = vmatpush1.bf16.msra.mxu1 %v19010_v44  ;;  %v1993_v43 = vlaneseq }
 0x6e2   :  { %12853 = vmatprep.subr.bf16.mxu0 %v19015_v45  ;;  %12935 = vmatprep.subr.bf16.mxu1 %v19018_v46  ;;  %v19843_v46 = vld [vmem:[#allocation6] sm:$0xf] }
 0x6e3   :  { %v19838_v44 = vshrl.u32 %v1993_v43, 7  ;;  %v19165_v43 = vld [vmem:[#allocation7 + $0x344] ss:$16 sps:$4 sm:$0xff]  }
 0x6e5   :  { %12854 = vmatpush1.bf16.msra.mxu0 %v19013_v47  ;;  %12936 = vmatpush1.bf16.msra.mxu1 %v19016_v48  ;;  %v19841_v45 = vsub.s32 0, %v19838_v44  ;;  %v19846_v47 = vsub.s32 1, %v19838_v44  ;;  %v19849_v48 = vsub.s32 3, %v19838_v44 }
 0x6e6   :  { %12855 = vmatprep.subr.bf16.mxu0 %v19021_v49  ;;  %12937 = vmatprep.subr.bf16.mxu1 %v19024_v50 }
 0x6e7   :  { %v1996_v49 = vrot.slane %v19843_v46, %v19841_v45  ;;  %v2000_v50 = vrot.slane %v19843_v46, %v19846_v47 }
 0x6e9   :  { %12856 = vmatpush1.bf16.msra.mxu0 %v19019_v51  ;;  %12938 = vmatpush1.bf16.msra.mxu1 %v19022_v52  ;;  %v2008_v51 = vrot.slane %v19843_v46, %v19849_v48 }
 0x6ea   :  { %12857 = vmatprep.subr.bf16.mxu0 %v19027_v53  ;;  %12939 = vmatprep.subr.bf16.mxu1 %v19030_v54 }
 0x6ed   :  { %12858 = vmatpush1.bf16.msra.mxu0 %v19025_v55  ;;  %12940 = vmatpush1.bf16.msra.mxu1 %v19028_v56 }
 0x6ee   :  { %12859 = vmatprep.subr.bf16.mxu0 %v19033_v57  ;;  %12941 = vmatprep.subr.bf16.mxu1 %v19036_v58 }
 0x6f1   :  { %12860 = vmatpush1.bf16.msra.mxu0 %v19031_v59  ;;  %12942 = vmatpush1.bf16.msra.mxu1 %v19034_v60 }
 0x6f2   :  { %12861 = vmatprep.subr.bf16.mxu0 %v19039_v61  ;;  %12943 = vmatprep.subr.bf16.mxu1 %v19042_v62 }
 0x6f5   :  { %12862 = vmatpush1.bf16.msra.mxu0 %v19037_v63  ;;  %12944 = vmatpush1.bf16.msra.mxu1 %v19040_v0 }
 0x6f6   :  { %12863 = vmatprep.subr.bf16.mxu0 %v19045_v1  ;;  %12945 = vmatprep.subr.bf16.mxu1 %v19048_v2 }
 0x6f9   :  { %12864 = vmatpush1.bf16.msra.mxu0 %v19043_v3  ;;  %12946 = vmatpush1.bf16.msra.mxu1 %v19046_v4  ;;  %v19103_v3 = vld [vmem:[#allocation7 + $0x200] ss:$16 sps:$4 sm:$0xff]   ;;  %v19106_v4 = vld [vmem:[#allocation7 + $0x208] ss:$16 sps:$4 sm:$0xff]  }
 0x6fa   :  { %12865 = vmatprep.subr.bf16.mxu0 %v19051_v5  ;;  %12947 = vmatprep.subr.bf16.mxu1 %v19054_v6  ;;  %v19111_v6 = vld [vmem:[#allocation7 + $0x224] ss:$16 sps:$4 sm:$0xff]  }
 0x6fd   :  { %12866 = vmatpush1.bf16.msra.mxu0 %v19049_v7  ;;  %12948 = vmatpush1.bf16.msra.mxu1 %v19052_v8  ;;  %v19114_v7 = vld [vmem:[#allocation7 + $0x22c] ss:$16 sps:$4 sm:$0xff]  }
 0x6fe   :  { %12867 = vmatprep.subr.bf16.mxu0 %v19057_v9  ;;  %12949 = vmatprep.subr.bf16.mxu1 %v19060_v10  ;;  %v19109_v9 = vld [vmem:[#allocation7 + $0x220] ss:$16 sps:$4 sm:$0xff]   ;;  %v19112_v10 = vld [vmem:[#allocation7 + $0x228] ss:$16 sps:$4 sm:$0xff]  }
 0x701   :  { %12868 = vmatpush1.bf16.msra.mxu0 %v19055_v11  ;;  %12950 = vmatpush1.bf16.msra.mxu1 %v19058_v12  ;;  %v19117_v11 = vld [vmem:[#allocation7 + $0x244] ss:$16 sps:$4 sm:$0xff]   ;;  %v19120_v12 = vld [vmem:[#allocation7 + $0x24c] ss:$16 sps:$4 sm:$0xff]  }
 0x702   :  { %12869 = vmatprep.subr.bf16.mxu0 %v19063_v13  ;;  %12951 = vmatprep.subr.bf16.mxu1 %v19066_v14  ;;  %v19115_v13 = vld [vmem:[#allocation7 + $0x240] ss:$16 sps:$4 sm:$0xff]   ;;  %v19118_v14 = vld [vmem:[#allocation7 + $0x248] ss:$16 sps:$4 sm:$0xff]  }
 0x705   :  { %12870 = vmatpush1.bf16.msra.mxu0 %v19061_v15  ;;  %12952 = vmatpush1.bf16.msra.mxu1 %v19064_v16  ;;  %v19123_v15 = vld [vmem:[#allocation7 + $0x264] ss:$16 sps:$4 sm:$0xff]   ;;  %v19126_v16 = vld [vmem:[#allocation7 + $0x26c] ss:$16 sps:$4 sm:$0xff]  }
 0x706   :  { %12871 = vmatprep.subr.bf16.mxu0 %v19069_v17  ;;  %12953 = vmatprep.subr.bf16.mxu1 %v19072_v18  ;;  %v19121_v17 = vld [vmem:[#allocation7 + $0x260] ss:$16 sps:$4 sm:$0xff]   ;;  %v19124_v18 = vld [vmem:[#allocation7 + $0x268] ss:$16 sps:$4 sm:$0xff]  }
 0x709   :  { %12872 = vmatpush1.bf16.msra.mxu0 %v19067_v19  ;;  %12954 = vmatpush1.bf16.msra.mxu1 %v19070_v20  ;;  %v19129_v19 = vld [vmem:[#allocation7 + $0x284] ss:$16 sps:$4 sm:$0xff]   ;;  %v19132_v20 = vld [vmem:[#allocation7 + $0x28c] ss:$16 sps:$4 sm:$0xff]  }
 0x70a   :  { %12873 = vmatprep.subr.bf16.mxu0 %v19075_v21  ;;  %12955 = vmatprep.subr.bf16.mxu1 %v19078_v22  ;;  %v19127_v21 = vld [vmem:[#allocation7 + $0x280] ss:$16 sps:$4 sm:$0xff]   ;;  %v19130_v22 = vld [vmem:[#allocation7 + $0x288] ss:$16 sps:$4 sm:$0xff]  }
 0x70d   :  { %12874 = vmatpush1.bf16.msra.mxu0 %v19073_v23  ;;  %12956 = vmatpush1.bf16.msra.mxu1 %v19076_v24  ;;  %v19135_v23 = vld [vmem:[#allocation7 + $0x2a4] ss:$16 sps:$4 sm:$0xff]   ;;  %v19138_v24 = vld [vmem:[#allocation7 + $0x2ac] ss:$16 sps:$4 sm:$0xff]  }
 0x70e   :  { %12875 = vmatprep.subr.bf16.mxu0 %v19081_v25  ;;  %12957 = vmatprep.subr.bf16.mxu1 %v19084_v26  ;;  %v19133_v25 = vld [vmem:[#allocation7 + $0x2a0] ss:$16 sps:$4 sm:$0xff]   ;;  %v19136_v26 = vld [vmem:[#allocation7 + $0x2a8] ss:$16 sps:$4 sm:$0xff]  }
 0x711   :  { %12876 = vmatpush1.bf16.msra.mxu0 %v19079_v27  ;;  %12958 = vmatpush1.bf16.msra.mxu1 %v19082_v28  ;;  %v19141_v27 = vld [vmem:[#allocation7 + $0x2c4] ss:$16 sps:$4 sm:$0xff]   ;;  %v19144_v28 = vld [vmem:[#allocation7 + $0x2cc] ss:$16 sps:$4 sm:$0xff]  }
 0x712   :  { %12877 = vmatprep.subr.bf16.mxu0 %v19087_v29  ;;  %12959 = vmatprep.subr.bf16.mxu1 %v19090_v30  ;;  %v19139_v29 = vld [vmem:[#allocation7 + $0x2c0] ss:$16 sps:$4 sm:$0xff]   ;;  %v19142_v30 = vld [vmem:[#allocation7 + $0x2c8] ss:$16 sps:$4 sm:$0xff]  }
 0x715   :  { %12878 = vmatpush1.bf16.msra.mxu0 %v19085_v31  ;;  %12960 = vmatpush1.bf16.msra.mxu1 %v19088_v32  ;;  %v19147_v31 = vld [vmem:[#allocation7 + $0x2e4] ss:$16 sps:$4 sm:$0xff]   ;;  %v19150_v32 = vld [vmem:[#allocation7 + $0x2ec] ss:$16 sps:$4 sm:$0xff]  }
 0x716   :  { %12879 = vmatprep.subr.bf16.mxu0 %v19093_v33  ;;  %12961 = vmatprep.subr.bf16.mxu1 %v19096_v34  ;;  %v19145_v33 = vld [vmem:[#allocation7 + $0x2e0] ss:$16 sps:$4 sm:$0xff]   ;;  %v19148_v34 = vld [vmem:[#allocation7 + $0x2e8] ss:$16 sps:$4 sm:$0xff]  }
 0x719   :  { %12880 = vmatpush1.bf16.msra.mxu0 %v19091_v35  ;;  %12962 = vmatpush1.bf16.msra.mxu1 %v19094_v36  ;;  %v19153_v35 = vld [vmem:[#allocation7 + $0x304] ss:$16 sps:$4 sm:$0xff]   ;;  %v19156_v36 = vld [vmem:[#allocation7 + $0x30c] ss:$16 sps:$4 sm:$0xff]  }
 0x71a   :  { %12881 = vmatprep.subr.bf16.mxu0 %v19099_v37  ;;  %12963 = vmatprep.subr.bf16.mxu1 %v19102_v38  ;;  %v19151_v37 = vld [vmem:[#allocation7 + $0x300] ss:$16 sps:$4 sm:$0xff]   ;;  %v19154_v38 = vld [vmem:[#allocation7 + $0x308] ss:$16 sps:$4 sm:$0xff]  }
 0x71d   :  { %12882 = vmatpush1.bf16.msra.mxu0 %v19097_v39  ;;  %12964 = vmatpush1.bf16.msra.mxu1 %v19100_v40  ;;  %v19159_v39 = vld [vmem:[#allocation7 + $0x324] ss:$16 sps:$4 sm:$0xff]   ;;  %v19162_v40 = vld [vmem:[#allocation7 + $0x32c] ss:$16 sps:$4 sm:$0xff]  }
 0x71e   :  { %12892 = vmatprep.subr.bf16.mxu0 %v19105_v41  ;;  %12974 = vmatprep.subr.bf16.mxu1 %v19108_v42  ;;  %v19157_v41 = vld [vmem:[#allocation7 + $0x320] ss:$16 sps:$4 sm:$0xff]   ;;  %v19160_v42 = vld [vmem:[#allocation7 + $0x328] ss:$16 sps:$4 sm:$0xff]  }
 0x7b3   :  { %v11021_v52 = vpop.f32.mrb[0].mxu0  ;;  %v19857_v53 = vpop.f32.mrb[0].mxu1 }
 0x7b4   :  { %v16304_v54 = vadd.f32 %v11021_v52, %v1996_v49  ;;  %v11023_v55 = vpop.f32.mrb[1].mxu0  ;;  %v12048_v56 = vpop.f32.mrb[1].mxu1  ;;  %v19168_v49 = vld [vmem:[#allocation7 + $0x34c] ss:$16 sps:$4 sm:$0xff]   ;;  %v19166_v52 = vld [vmem:[#allocation7 + $0x348] ss:$16 sps:$4 sm:$0xff]  }
 0x7b5   :  { %v16305_v57 = vadd.f32 %v11023_v55, %v2000_v50  ;;  %v16307_v58 = vadd.f32 %v12048_v56, %v2008_v51  ;;  %v11025_v59 = vpop.f32.mrb[2].mxu0  ;;  %v12050_v60 = vpop.f32.mrb[2].mxu1  ;;  %v19860_v50 = vsub.s32 2, %v19838_v44  ;;  %v19163_v51 = vld [vmem:[#allocation7 + $0x340] ss:$16 sps:$4 sm:$0xff]  }
 0x7b6   :  { %v11026_v61 = vpop.f32.mrb[3].mxu0  ;;  %v12051_v62 = vpop.f32.mrb[3].mxu1  ;;  %19423 = vtanh.f32 %v16304_v54  ;;  %v19171_v54 = vld [vmem:[#allocation7 + $0x364] ss:$16 sps:$4 sm:$0xff]   ;;  %v19174_v55 = vld [vmem:[#allocation7 + $0x36c] ss:$16 sps:$4 sm:$0xff]  }
 0x7b7   :  { %19425 = vtanh.f32 %v16305_v57  ;;  %v2004_v56 = vrot.slane %v19843_v46, %v19860_v50  ;;  %v19169_v57 = vld [vmem:[#allocation7 + $0x360] ss:$16 sps:$4 sm:$0xff]   ;;  %v19177_v59 = vld [vmem:[#allocation7 + $0x384] ss:$16 sps:$4 sm:$0xff]   ;;  %v19180_v44 = vld [vmem:[#allocation7 + $0x38c] ss:$16 sps:$4 sm:$0xff]  }
 0x7b8   :  { %19427 = vtanh.f32 %v16307_v58  ;;  %v19172_v58 = vld [vmem:[#allocation7 + $0x368] ss:$16 sps:$4 sm:$0xff]   ;;  %v19175_v61 = vld [vmem:[#allocation7 + $0x380] ss:$16 sps:$4 sm:$0xff]  }
 0x7b9   :  { %v16306_v60 = vadd.f32 %v19857_v53, %v2004_v56  ;;  %v19178_v62 = vld [vmem:[#allocation7 + $0x388] ss:$16 sps:$4 sm:$0xff]   ;;  %v19181_v46 = vld [vmem:[#allocation7 + $0x3a0] ss:$16 sps:$4 sm:$0xff]   ;;  %v19253_v56 = vld [vmem:[#allocation10 + $0x120] ss:$16 sps:$4 sm:$0xff]  }
 0x7ba   :  { %v19187_v53 = vld [vmem:[#allocation7 + $0x3c0] ss:$16 sps:$4 sm:$0xff]  }
 0x7bb   :  { %19429 = vtanh.f32 %v16306_v60  ;;  %v19262_v60 = vld [vmem:[#allocation10 + $0x148] ss:$16 sps:$4 sm:$0xff]  }
 0x7c0   :  { %v19424_v63 = vpop.eup %19423 }
 0x7c1   :  { %v19426_v0 = vpop.eup %19425  ;;  %v12057_v5 = vpack.c.bf16 %v19424_v63, %v19424_v63  ;;  %v19183_v63 = vld [vmem:[#allocation7 + $0x3a4] ss:$16 sps:$4 sm:$0xff]  }
 0x7c2   :  { %v19428_v1 = vpop.eup %19427  ;;  %v12058_v2 = vpack.c.bf16 %v19426_v0, %v19426_v0  ;;  %v19186_v0 = vld [vmem:[#allocation7 + $0x3ac] ss:$16 sps:$4 sm:$0xff]  }
 0x7c3   :  { %v12060_v8 = vpack.c.bf16 %v19428_v1, %v19428_v1  ;;  %v19184_v1 = vld [vmem:[#allocation7 + $0x3a8] ss:$16 sps:$4 sm:$0xff]  }
 0x7c4   :  { %12883 = vmatprep.mubr.bf16.mxu0 %v12058_v2  ;;  %12965 = vmatprep.mubr.bf16.mxu1 %v12058_v2  ;;  %v19189_v2 = vld [vmem:[#allocation7 + $0x3c4] ss:$16 sps:$4 sm:$0xff]  }
 0x7c5   :  { %12884 = vmatmul.mubr.bf16.vlgmr.msra.gmra.mrb[4].mxu0 %v12057_v5  ;;  %12966 = vmatmul.mubr.bf16.vlgmr.msra.gmra.mrb[4].mxu1 %v12057_v5  ;;  %v19195_v5 = vld [vmem:[#allocation7 + $0x3e4] ss:$16 sps:$4 sm:$0xff]  }
 0x7c6   :  { %12893 = vmatpush1.bf16.msra.mxu0 %v19103_v3  ;;  %12975 = vmatpush1.bf16.msra.mxu1 %v19106_v4  ;;  %v19192_v3 = vld [vmem:[#allocation7 + $0x3cc] ss:$16 sps:$4 sm:$0xff]   ;;  %v19190_v4 = vld [vmem:[#allocation7 + $0x3c8] ss:$16 sps:$4 sm:$0xff]  }
 0x7c7   :  { %12924 = vmatprep.mubr.bf16.mxu0 %v12060_v8  ;;  %13006 = vmatprep.mubr.bf16.mxu1 %v12060_v8  ;;  %v19196_v8 = vld [vmem:[#allocation7 + $0x3e8] ss:$16 sps:$4 sm:$0xff]  }
 0x7c8   :  { %12894 = vmatprep.subr.bf16.mxu0 %v19111_v6  ;;  %12976 = vmatprep.subr.bf16.mxu1 %v19114_v7  ;;  %v19198_v6 = vld [vmem:[#allocation7 + $0x3ec] ss:$16 sps:$4 sm:$0xff]   ;;  %v19193_v7 = vld [vmem:[#allocation7 + $0x3e0] ss:$16 sps:$4 sm:$0xff]  }
 0x7ca   :  { %12895 = vmatpush1.bf16.msra.mxu0 %v19109_v9  ;;  %12977 = vmatpush1.bf16.msra.mxu1 %v19112_v10  ;;  %v19201_v9 = vld [vmem:[#allocation10 + $0x4] ss:$16 sps:$4 sm:$0xff]   ;;  %v19204_v10 = vld [vmem:[#allocation10 + $0xc] ss:$16 sps:$4 sm:$0xff]  }
 0x7cb   :  { %12896 = vmatprep.subr.bf16.mxu0 %v19117_v11  ;;  %12978 = vmatprep.subr.bf16.mxu1 %v19120_v12  ;;  %v19430_v11 = vpop.eup %19429  ;;  %v19199_v12 = vld [vmem:[#allocation10] ss:$16 sps:$4 sm:$0xff]  }
 0x7ce   :  { %12897 = vmatpush1.bf16.msra.mxu0 %v19115_v13  ;;  %12979 = vmatpush1.bf16.msra.mxu1 %v19118_v14  ;;  %v19202_v13 = vld [vmem:[#allocation10 + $0x8] ss:$16 sps:$4 sm:$0xff]   ;;  %v12059_v14 = vpack.c.bf16 %v19430_v11, %v19430_v11  ;;  %v19291_v11 = vld [vmem:[#allocation10 + $0x1e4] ss:$16 sps:$4 sm:$0xff]  }
 0x7cf   :  { %12898 = vmatprep.subr.bf16.mxu0 %v19123_v15  ;;  %12980 = vmatprep.subr.bf16.mxu1 %v19126_v16  ;;  %v19207_v15 = vld [vmem:[#allocation10 + $0x24] ss:$16 sps:$4 sm:$0xff]   ;;  %v19210_v16 = vld [vmem:[#allocation10 + $0x2c] ss:$16 sps:$4 sm:$0xff]  }
 0x7d2   :  { %12899 = vmatpush1.bf16.msra.mxu0 %v19121_v17  ;;  %12981 = vmatpush1.bf16.msra.mxu1 %v19124_v18  ;;  %v19205_v17 = vld [vmem:[#allocation10 + $0x20] ss:$16 sps:$4 sm:$0xff]   ;;  %v19208_v18 = vld [vmem:[#allocation10 + $0x28] ss:$16 sps:$4 sm:$0xff]  }
 0x7d3   :  { %12900 = vmatprep.subr.bf16.mxu0 %v19129_v19  ;;  %12982 = vmatprep.subr.bf16.mxu1 %v19132_v20  ;;  %v19213_v19 = vld [vmem:[#allocation10 + $0x44] ss:$16 sps:$4 sm:$0xff]   ;;  %v19216_v20 = vld [vmem:[#allocation10 + $0x4c] ss:$16 sps:$4 sm:$0xff]  }
 0x7d6   :  { %12901 = vmatpush1.bf16.msra.mxu0 %v19127_v21  ;;  %12983 = vmatpush1.bf16.msra.mxu1 %v19130_v22  ;;  %v19211_v21 = vld [vmem:[#allocation10 + $0x40] ss:$16 sps:$4 sm:$0xff]   ;;  %v19214_v22 = vld [vmem:[#allocation10 + $0x48] ss:$16 sps:$4 sm:$0xff]  }
 0x7d7   :  { %12902 = vmatprep.subr.bf16.mxu0 %v19135_v23  ;;  %12984 = vmatprep.subr.bf16.mxu1 %v19138_v24  ;;  %v19219_v23 = vld [vmem:[#allocation10 + $0x64] ss:$16 sps:$4 sm:$0xff]   ;;  %v19222_v24 = vld [vmem:[#allocation10 + $0x6c] ss:$16 sps:$4 sm:$0xff]  }
 0x7da   :  { %12903 = vmatpush1.bf16.msra.mxu0 %v19133_v25  ;;  %12985 = vmatpush1.bf16.msra.mxu1 %v19136_v26  ;;  %v19217_v25 = vld [vmem:[#allocation10 + $0x60] ss:$16 sps:$4 sm:$0xff]   ;;  %v19220_v26 = vld [vmem:[#allocation10 + $0x68] ss:$16 sps:$4 sm:$0xff]  }
 0x7db   :  { %12904 = vmatprep.subr.bf16.mxu0 %v19141_v27  ;;  %12986 = vmatprep.subr.bf16.mxu1 %v19144_v28  ;;  %v19225_v27 = vld [vmem:[#allocation10 + $0x84] ss:$16 sps:$4 sm:$0xff]   ;;  %v19228_v28 = vld [vmem:[#allocation10 + $0x8c] ss:$16 sps:$4 sm:$0xff]  }
 0x7de   :  { %12905 = vmatpush1.bf16.msra.mxu0 %v19139_v29  ;;  %12987 = vmatpush1.bf16.msra.mxu1 %v19142_v30  ;;  %v19223_v29 = vld [vmem:[#allocation10 + $0x80] ss:$16 sps:$4 sm:$0xff]   ;;  %v19226_v30 = vld [vmem:[#allocation10 + $0x88] ss:$16 sps:$4 sm:$0xff]  }
 0x7df   :  { %12906 = vmatprep.subr.bf16.mxu0 %v19147_v31  ;;  %12988 = vmatprep.subr.bf16.mxu1 %v19150_v32  ;;  %v19231_v31 = vld [vmem:[#allocation10 + $0xa4] ss:$16 sps:$4 sm:$0xff]   ;;  %v19234_v32 = vld [vmem:[#allocation10 + $0xac] ss:$16 sps:$4 sm:$0xff]  }
 0x7e2   :  { %12907 = vmatpush1.bf16.msra.mxu0 %v19145_v33  ;;  %12989 = vmatpush1.bf16.msra.mxu1 %v19148_v34  ;;  %v19229_v33 = vld [vmem:[#allocation10 + $0xa0] ss:$16 sps:$4 sm:$0xff]   ;;  %v19232_v34 = vld [vmem:[#allocation10 + $0xa8] ss:$16 sps:$4 sm:$0xff]  }
 0x7e3   :  { %12908 = vmatprep.subr.bf16.mxu0 %v19153_v35  ;;  %12990 = vmatprep.subr.bf16.mxu1 %v19156_v36  ;;  %v19237_v35 = vld [vmem:[#allocation10 + $0xc4] ss:$16 sps:$4 sm:$0xff]   ;;  %v19240_v36 = vld [vmem:[#allocation10 + $0xcc] ss:$16 sps:$4 sm:$0xff]  }
 0x7e6   :  { %12909 = vmatpush1.bf16.msra.mxu0 %v19151_v37  ;;  %12991 = vmatpush1.bf16.msra.mxu1 %v19154_v38  ;;  %v19235_v37 = vld [vmem:[#allocation10 + $0xc0] ss:$16 sps:$4 sm:$0xff]   ;;  %v19238_v38 = vld [vmem:[#allocation10 + $0xc8] ss:$16 sps:$4 sm:$0xff]  }
 0x7e7   :  { %12910 = vmatprep.subr.bf16.mxu0 %v19159_v39  ;;  %12992 = vmatprep.subr.bf16.mxu1 %v19162_v40  ;;  %v19243_v39 = vld [vmem:[#allocation10 + $0xe4] ss:$16 sps:$4 sm:$0xff]   ;;  %v19246_v40 = vld [vmem:[#allocation10 + $0xec] ss:$16 sps:$4 sm:$0xff]  }
 0x7ea   :  { %12911 = vmatpush1.bf16.msra.mxu0 %v19157_v41  ;;  %12993 = vmatpush1.bf16.msra.mxu1 %v19160_v42  ;;  %v19241_v41 = vld [vmem:[#allocation10 + $0xe0] ss:$16 sps:$4 sm:$0xff]   ;;  %v19244_v42 = vld [vmem:[#allocation10 + $0xe8] ss:$16 sps:$4 sm:$0xff]  }
 0x7eb   :  { %12912 = vmatprep.subr.bf16.mxu0 %v19165_v43  ;;  %12994 = vmatprep.subr.bf16.mxu1 %v19168_v49  ;;  %v19249_v43 = vld [vmem:[#allocation10 + $0x104] ss:$16 sps:$4 sm:$0xff]   ;;  %v19252_v49 = vld [vmem:[#allocation10 + $0x10c] ss:$16 sps:$4 sm:$0xff]  }
 0x7ee   :  { %12913 = vmatpush1.bf16.msra.mxu0 %v19163_v51  ;;  %12995 = vmatpush1.bf16.msra.mxu1 %v19166_v52  ;;  %v19247_v51 = vld [vmem:[#allocation10 + $0x100] ss:$16 sps:$4 sm:$0xff]   ;;  %v19250_v52 = vld [vmem:[#allocation10 + $0x108] ss:$16 sps:$4 sm:$0xff]  }
 0x7ef   :  { %12914 = vmatprep.subr.bf16.mxu0 %v19171_v54  ;;  %12996 = vmatprep.subr.bf16.mxu1 %v19174_v55  ;;  %v19255_v54 = vld [vmem:[#allocation10 + $0x124] ss:$16 sps:$4 sm:$0xff]   ;;  %v19258_v55 = vld [vmem:[#allocation10 + $0x12c] ss:$16 sps:$4 sm:$0xff]  }
 0x7f2   :  { %12915 = vmatpush1.bf16.msra.mxu0 %v19169_v57  ;;  %12997 = vmatpush1.bf16.msra.mxu1 %v19172_v58  ;;  %v19256_v57 = vld [vmem:[#allocation10 + $0x128] ss:$16 sps:$4 sm:$0xff]   ;;  %v19261_v58 = vld [vmem:[#allocation10 + $0x144] ss:$16 sps:$4 sm:$0xff]  }
 0x7f3   :  { %12916 = vmatprep.subr.bf16.mxu0 %v19177_v59  ;;  %12998 = vmatprep.subr.bf16.mxu1 %v19180_v44  ;;  %v19264_v59 = vld [vmem:[#allocation10 + $0x14c] ss:$16 sps:$4 sm:$0xff]   ;;  %v19259_v44 = vld [vmem:[#allocation10 + $0x140] ss:$16 sps:$4 sm:$0xff]  }
 0x7f6   :  { %12917 = vmatpush1.bf16.msra.mxu0 %v19175_v61  ;;  %12999 = vmatpush1.bf16.msra.mxu1 %v19178_v62  ;;  %v19267_v61 = vld [vmem:[#allocation10 + $0x164] ss:$16 sps:$4 sm:$0xff]   ;;  %v19270_v62 = vld [vmem:[#allocation10 + $0x16c] ss:$16 sps:$4 sm:$0xff]  }
 0x7f7   :  { %12918 = vmatprep.subr.bf16.mxu0 %v19183_v63  ;;  %13000 = vmatprep.subr.bf16.mxu1 %v19186_v0  ;;  %v19265_v63 = vld [vmem:[#allocation10 + $0x160] ss:$16 sps:$4 sm:$0xff]   ;;  %v19268_v0 = vld [vmem:[#allocation10 + $0x168] ss:$16 sps:$4 sm:$0xff]  }
 0x7fa   :  { %12919 = vmatpush1.bf16.msra.mxu0 %v19181_v46  ;;  %13001 = vmatpush1.bf16.msra.mxu1 %v19184_v1  ;;  %v19273_v46 = vld [vmem:[#allocation10 + $0x184] ss:$16 sps:$4 sm:$0xff]   ;;  %v19276_v1 = vld [vmem:[#allocation10 + $0x18c] ss:$16 sps:$4 sm:$0xff]  }
 0x7fb   :  { %12920 = vmatprep.subr.bf16.mxu0 %v19189_v2  ;;  %13002 = vmatprep.subr.bf16.mxu1 %v19192_v3  ;;  %v19271_v2 = vld [vmem:[#allocation10 + $0x180] ss:$16 sps:$4 sm:$0xff]   ;;  %v19274_v3 = vld [vmem:[#allocation10 + $0x188] ss:$16 sps:$4 sm:$0xff]  }
 0x7fe   :  { %12921 = vmatpush1.bf16.msra.mxu0 %v19187_v53  ;;  %13003 = vmatpush1.bf16.msra.mxu1 %v19190_v4  ;;  %v19279_v53 = vld [vmem:[#allocation10 + $0x1a4] ss:$16 sps:$4 sm:$0xff]   ;;  %v19282_v4 = vld [vmem:[#allocation10 + $0x1ac] ss:$16 sps:$4 sm:$0xff]  }
 0x7ff   :  { %12922 = vmatprep.subr.bf16.mxu0 %v19195_v5  ;;  %13004 = vmatprep.subr.bf16.mxu1 %v19198_v6  ;;  %v19277_v5 = vld [vmem:[#allocation10 + $0x1a0] ss:$16 sps:$4 sm:$0xff]   ;;  %v19280_v6 = vld [vmem:[#allocation10 + $0x1a8] ss:$16 sps:$4 sm:$0xff]  }
 0x802   :  { %12923 = vmatpush1.bf16.msra.mxu0 %v19193_v7  ;;  %13005 = vmatpush1.bf16.msra.mxu1 %v19196_v8  ;;  %v19285_v7 = vld [vmem:[#allocation10 + $0x1c4] ss:$16 sps:$4 sm:$0xff]   ;;  %v19288_v8 = vld [vmem:[#allocation10 + $0x1cc] ss:$16 sps:$4 sm:$0xff]  }
 0x803   :  { %13813 = vmatprep.subr.bf16.mxu0 %v19201_v9  ;;  %13895 = vmatprep.subr.bf16.mxu1 %v19204_v10  ;;  %v19283_v9 = vld [vmem:[#allocation10 + $0x1c0] ss:$16 sps:$4 sm:$0xff]   ;;  %v19286_v10 = vld [vmem:[#allocation10 + $0x1c8] ss:$16 sps:$4 sm:$0xff]  }
 0x805   :  { %12925 = vmatmul.mubr.bf16.vlgmr.msra.gmra.mrb[4].mxu0 %v12059_v14  ;;  %13007 = vmatmul.mubr.bf16.vlgmr.msra.gmra.mrb[4].mxu1 %v12059_v14  ;;  %v19292_v14 = vld [vmem:[#allocation10 + $0x1e8] ss:$16 sps:$4 sm:$0xff]  }
 0x806   :  { %13814 = vmatpush1.bf16.msra.mxu0 %v19199_v12  ;;  %13896 = vmatpush1.bf16.msra.mxu1 %v19202_v13  ;;  %v19294_v12 = vld [vmem:[#allocation10 + $0x1ec] ss:$16 sps:$4 sm:$0xff]   ;;  %v19289_v13 = vld [vmem:[#allocation10 + $0x1e0] ss:$16 sps:$4 sm:$0xff]  }
 0x807   :  { %13815 = vmatprep.subr.bf16.mxu0 %v19207_v15  ;;  %13897 = vmatprep.subr.bf16.mxu1 %v19210_v16  ;;  %v19297_v15 = vld [vmem:[#allocation10 + $0x204] ss:$16 sps:$4 sm:$0xff]   ;;  %v19300_v16 = vld [vmem:[#allocation10 + $0x20c] ss:$16 sps:$4 sm:$0xff]  }
 0x80a   :  { %13816 = vmatpush1.bf16.msra.mxu0 %v19205_v17  ;;  %13898 = vmatpush1.bf16.msra.mxu1 %v19208_v18  ;;  %v19865_v17 = vld [vmem:[#allocation9] sm:$0xf] }
 0x80b   :  { %13817 = vmatprep.subr.bf16.mxu0 %v19213_v19  ;;  %13899 = vmatprep.subr.bf16.mxu1 %v19216_v20  ;;  %v12194_v18 = vrot.slane %v19865_v17, %v19841_v45  ;;  %v12198_v19 = vrot.slane %v19865_v17, %v19846_v47  ;;  %v12206_v20 = vrot.slane %v19865_v17, %v19849_v48 }
 0x80e   :  { %13818 = vmatpush1.bf16.msra.mxu0 %v19211_v21  ;;  %13900 = vmatpush1.bf16.msra.mxu1 %v19214_v22 }
 0x80f   :  { %13819 = vmatprep.subr.bf16.mxu0 %v19219_v23  ;;  %13901 = vmatprep.subr.bf16.mxu1 %v19222_v24 }
 0x812   :  { %13820 = vmatpush1.bf16.msra.mxu0 %v19217_v25  ;;  %13902 = vmatpush1.bf16.msra.mxu1 %v19220_v26 }
 0x813   :  { %13821 = vmatprep.subr.bf16.mxu0 %v19225_v27  ;;  %13903 = vmatprep.subr.bf16.mxu1 %v19228_v28 }
 0x816   :  { %13822 = vmatpush1.bf16.msra.mxu0 %v19223_v29  ;;  %13904 = vmatpush1.bf16.msra.mxu1 %v19226_v30 }
 0x817   :  { %13823 = vmatprep.subr.bf16.mxu0 %v19231_v31  ;;  %13905 = vmatprep.subr.bf16.mxu1 %v19234_v32 }
 0x81a   :  { %13824 = vmatpush1.bf16.msra.mxu0 %v19229_v33  ;;  %13906 = vmatpush1.bf16.msra.mxu1 %v19232_v34 }
 0x81b   :  { %13825 = vmatprep.subr.bf16.mxu0 %v19237_v35  ;;  %13907 = vmatprep.subr.bf16.mxu1 %v19240_v36  ;;  %v19295_v36 = vld [vmem:[#allocation10 + $0x200] ss:$16 sps:$4 sm:$0xff]  }
 0x81e   :  { %13826 = vmatpush1.bf16.msra.mxu0 %v19235_v37  ;;  %13908 = vmatpush1.bf16.msra.mxu1 %v19238_v38  ;;  %v19298_v37 = vld [vmem:[#allocation10 + $0x208] ss:$16 sps:$4 sm:$0xff]  }
 0x81f   :  { %13827 = vmatprep.subr.bf16.mxu0 %v19243_v39  ;;  %13909 = vmatprep.subr.bf16.mxu1 %v19246_v40  ;;  %v19303_v39 = vld [vmem:[#allocation10 + $0x224] ss:$16 sps:$4 sm:$0xff]   ;;  %v19306_v40 = vld [vmem:[#allocation10 + $0x22c] ss:$16 sps:$4 sm:$0xff]  }
 0x822   :  { %13828 = vmatpush1.bf16.msra.mxu0 %v19241_v41  ;;  %13910 = vmatpush1.bf16.msra.mxu1 %v19244_v42  ;;  %v19301_v42 = vld [vmem:[#allocation10 + $0x220] ss:$16 sps:$4 sm:$0xff]  }
 0x823   :  { %13829 = vmatprep.subr.bf16.mxu0 %v19249_v43  ;;  %13911 = vmatprep.subr.bf16.mxu1 %v19252_v49  ;;  %v19304_v43 = vld [vmem:[#allocation10 + $0x228] ss:$16 sps:$4 sm:$0xff]   ;;  %v19309_v49 = vld [vmem:[#allocation10 + $0x244] ss:$16 sps:$4 sm:$0xff]  }
 0x826   :  { %13830 = vmatpush1.bf16.msra.mxu0 %v19247_v51  ;;  %13912 = vmatpush1.bf16.msra.mxu1 %v19250_v52  ;;  %v19312_v51 = vld [vmem:[#allocation10 + $0x24c] ss:$16 sps:$4 sm:$0xff]   ;;  %v19307_v52 = vld [vmem:[#allocation10 + $0x240] ss:$16 sps:$4 sm:$0xff]  }
 0x827   :  { %13831 = vmatprep.subr.bf16.mxu0 %v19255_v54  ;;  %13913 = vmatprep.subr.bf16.mxu1 %v19258_v55  ;;  %v19310_v54 = vld [vmem:[#allocation10 + $0x248] ss:$16 sps:$4 sm:$0xff]   ;;  %v19315_v55 = vld [vmem:[#allocation10 + $0x264] ss:$16 sps:$4 sm:$0xff]  }
 0x82a   :  { %13832 = vmatpush1.bf16.msra.mxu0 %v19253_v56  ;;  %13914 = vmatpush1.bf16.msra.mxu1 %v19256_v57  ;;  %v19318_v56 = vld [vmem:[#allocation10 + $0x26c] ss:$16 sps:$4 sm:$0xff]   ;;  %v19313_v57 = vld [vmem:[#allocation10 + $0x260] ss:$16 sps:$4 sm:$0xff]  }
 0x82b   :  { %13833 = vmatprep.subr.bf16.mxu0 %v19261_v58  ;;  %13915 = vmatprep.subr.bf16.mxu1 %v19264_v59  ;;  %v19316_v58 = vld [vmem:[#allocation10 + $0x268] ss:$16 sps:$4 sm:$0xff]   ;;  %v19321_v59 = vld [vmem:[#allocation10 + $0x284] ss:$16 sps:$4 sm:$0xff]  }
 0x82e   :  { %13834 = vmatpush1.bf16.msra.mxu0 %v19259_v44  ;;  %13916 = vmatpush1.bf16.msra.mxu1 %v19262_v60  ;;  %v19324_v44 = vld [vmem:[#allocation10 + $0x28c] ss:$16 sps:$4 sm:$0xff]   ;;  %v19319_v60 = vld [vmem:[#allocation10 + $0x280] ss:$16 sps:$4 sm:$0xff]  }
 0x82f   :  { %13835 = vmatprep.subr.bf16.mxu0 %v19267_v61  ;;  %13917 = vmatprep.subr.bf16.mxu1 %v19270_v62  ;;  %v19322_v61 = vld [vmem:[#allocation10 + $0x288] ss:$16 sps:$4 sm:$0xff]   ;;  %v19327_v62 = vld [vmem:[#allocation10 + $0x2a4] ss:$16 sps:$4 sm:$0xff]  }
 0x832   :  { %13836 = vmatpush1.bf16.msra.mxu0 %v19265_v63  ;;  %13918 = vmatpush1.bf16.msra.mxu1 %v19268_v0  ;;  %v19330_v63 = vld [vmem:[#allocation10 + $0x2ac] ss:$16 sps:$4 sm:$0xff]   ;;  %v19325_v0 = vld [vmem:[#allocation10 + $0x2a0] ss:$16 sps:$4 sm:$0xff]  }
 0x833   :  { %13837 = vmatprep.subr.bf16.mxu0 %v19273_v46  ;;  %13919 = vmatprep.subr.bf16.mxu1 %v19276_v1  ;;  %v19328_v46 = vld [vmem:[#allocation10 + $0x2a8] ss:$16 sps:$4 sm:$0xff]   ;;  %v19333_v1 = vld [vmem:[#allocation10 + $0x2c4] ss:$16 sps:$4 sm:$0xff]  }
 0x836   :  { %13838 = vmatpush1.bf16.msra.mxu0 %v19271_v2  ;;  %13920 = vmatpush1.bf16.msra.mxu1 %v19274_v3  ;;  %v19336_v2 = vld [vmem:[#allocation10 + $0x2cc] ss:$16 sps:$4 sm:$0xff]   ;;  %v19331_v3 = vld [vmem:[#allocation10 + $0x2c0] ss:$16 sps:$4 sm:$0xff]  }
 0x837   :  { %13839 = vmatprep.subr.bf16.mxu0 %v19279_v53  ;;  %13921 = vmatprep.subr.bf16.mxu1 %v19282_v4  ;;  %v19334_v53 = vld [vmem:[#allocation10 + $0x2c8] ss:$16 sps:$4 sm:$0xff]   ;;  %v19339_v4 = vld [vmem:[#allocation10 + $0x2e4] ss:$16 sps:$4 sm:$0xff]  }
 0x83a   :  { %13840 = vmatpush1.bf16.msra.mxu0 %v19277_v5  ;;  %13922 = vmatpush1.bf16.msra.mxu1 %v19280_v6  ;;  %v19342_v5 = vld [vmem:[#allocation10 + $0x2ec] ss:$16 sps:$4 sm:$0xff]   ;;  %v19337_v6 = vld [vmem:[#allocation10 + $0x2e0] ss:$16 sps:$4 sm:$0xff]  }
 0x83b   :  { %13841 = vmatprep.subr.bf16.mxu0 %v19285_v7  ;;  %13923 = vmatprep.subr.bf16.mxu1 %v19288_v8  ;;  %v19340_v7 = vld [vmem:[#allocation10 + $0x2e8] ss:$16 sps:$4 sm:$0xff]   ;;  %v19345_v8 = vld [vmem:[#allocation10 + $0x304] ss:$16 sps:$4 sm:$0xff]  }
 0x83e   :  { %13842 = vmatpush1.bf16.msra.mxu0 %v19283_v9  ;;  %13924 = vmatpush1.bf16.msra.mxu1 %v19286_v10  ;;  %v19348_v9 = vld [vmem:[#allocation10 + $0x30c] ss:$16 sps:$4 sm:$0xff]   ;;  %v19343_v10 = vld [vmem:[#allocation10 + $0x300] ss:$16 sps:$4 sm:$0xff]  }
 0x83f   :  { %13843 = vmatprep.subr.bf16.mxu0 %v19291_v11  ;;  %13925 = vmatprep.subr.bf16.mxu1 %v19294_v12  ;;  %v19346_v11 = vld [vmem:[#allocation10 + $0x308] ss:$16 sps:$4 sm:$0xff]   ;;  %v19351_v12 = vld [vmem:[#allocation10 + $0x324] ss:$16 sps:$4 sm:$0xff]  }
 0x842   :  { %13844 = vmatpush1.bf16.msra.mxu0 %v19289_v13  ;;  %13926 = vmatpush1.bf16.msra.mxu1 %v19292_v14  ;;  %v19354_v13 = vld [vmem:[#allocation10 + $0x32c] ss:$16 sps:$4 sm:$0xff]   ;;  %v19349_v14 = vld [vmem:[#allocation10 + $0x320] ss:$16 sps:$4 sm:$0xff]  }
 0x843   :  { %13854 = vmatprep.subr.bf16.mxu0 %v19297_v15  ;;  %13936 = vmatprep.subr.bf16.mxu1 %v19300_v16  ;;  %v19352_v15 = vld [vmem:[#allocation10 + $0x328] ss:$16 sps:$4 sm:$0xff]   ;;  %v19357_v16 = vld [vmem:[#allocation10 + $0x344] ss:$16 sps:$4 sm:$0xff]  }
 0x8d8   :  { %v12926_v21 = vpop.f32.mrb[4].mxu0  ;;  %v19873_v22 = vpop.f32.mrb[4].mxu1 }
 0x8d9   :  { %v16308_v23 = vadd.f32 %v12926_v21, %v12194_v18  ;;  %v12928_v24 = vpop.f32.mrb[5].mxu0  ;;  %v13010_v25 = vpop.f32.mrb[5].mxu1  ;;  %v19360_v18 = vld [vmem:[#allocation10 + $0x34c] ss:$16 sps:$4 sm:$0xff]   ;;  %v19363_v21 = vld [vmem:[#allocation10 + $0x364] ss:$16 sps:$4 sm:$0xff]  }
 0x8da   :  { %v16309_v26 = vadd.f32 %v12928_v24, %v12198_v19  ;;  %v16311_v27 = vadd.f32 %v13010_v25, %v12206_v20  ;;  %v12930_v28 = vpop.f32.mrb[6].mxu0  ;;  %v13012_v29 = vpop.f32.mrb[6].mxu1  ;;  %v19355_v19 = vld [vmem:[#allocation10 + $0x340] ss:$16 sps:$4 sm:$0xff]   ;;  %v19358_v20 = vld [vmem:[#allocation10 + $0x348] ss:$16 sps:$4 sm:$0xff]   ;;  %v12202_v24 = vrot.slane %v19865_v17, %v19860_v50 }
 0x8db   :  { %v12931_v30 = vpop.f32.mrb[7].mxu0  ;;  %v13013_v31 = vpop.f32.mrb[7].mxu1  ;;  %19431 = vtanh.f32 %v16308_v23  ;;  %v19366_v23 = vld [vmem:[#allocation10 + $0x36c] ss:$16 sps:$4 sm:$0xff]   ;;  %v19361_v25 = vld [vmem:[#allocation10 + $0x360] ss:$16 sps:$4 sm:$0xff]  }
 0x8dc   :  { %19433 = vtanh.f32 %v16309_v26  ;;  %v19364_v26 = vld [vmem:[#allocation10 + $0x368] ss:$16 sps:$4 sm:$0xff]   ;;  %v19372_v28 = vld [vmem:[#allocation10 + $0x38c] ss:$16 sps:$4 sm:$0xff]   ;;  %v16310_v29 = vadd.f32 %v19873_v22, %v12202_v24  ;;  %v19367_v30 = vld [vmem:[#allocation10 + $0x380] ss:$16 sps:$4 sm:$0xff]  }
 0x8dd   :  { %19435 = vtanh.f32 %v16311_v27  ;;  %v19369_v27 = vld [vmem:[#allocation10 + $0x384] ss:$16 sps:$4 sm:$0xff]   ;;  %v19370_v31 = vld [vmem:[#allocation10 + $0x388] ss:$16 sps:$4 sm:$0xff]   ;;  %v19373_v17 = vld [vmem:[#allocation10 + $0x3a0] ss:$16 sps:$4 sm:$0xff]  }
 0x8de   :  { %19437 = vtanh.f32 %v16310_v29  ;;  %v19379_v22 = vld [vmem:[#allocation10 + $0x3c0] ss:$16 sps:$4 sm:$0xff]  }
 0x8e5   :  { %v19432_v32 = vpop.eup %19431 }
 0x8e6   :  { %v19434_v33 = vpop.eup %19433  ;;  %v13019_v38 = vpack.c.bf16 %v19432_v32, %v19432_v32  ;;  %v19375_v32 = vld [vmem:[#allocation10 + $0x3a4] ss:$16 sps:$4 sm:$0xff]  }
 0x8e7   :  { %v19436_v34 = vpop.eup %19435  ;;  %v13020_v35 = vpack.c.bf16 %v19434_v33, %v19434_v33  ;;  %v19378_v33 = vld [vmem:[#allocation10 + $0x3ac] ss:$16 sps:$4 sm:$0xff]  }
 0x8e8   :  { %v13022_v41 = vpack.c.bf16 %v19436_v34, %v19436_v34  ;;  %v19376_v34 = vld [vmem:[#allocation10 + $0x3a8] ss:$16 sps:$4 sm:$0xff]  }
 0x8e9   :  { %13845 = vmatprep.mubr.bf16.mxu0 %v13020_v35  ;;  %13927 = vmatprep.mubr.bf16.mxu1 %v13020_v35  ;;  %v19381_v35 = vld [vmem:[#allocation10 + $0x3c4] ss:$16 sps:$4 sm:$0xff]  }
 0x8ea   :  { %13846 = vmatmul.mubr.bf16.vlgmr.msra.gmra.mrb[8].mxu0 %v13019_v38  ;;  %13928 = vmatmul.mubr.bf16.vlgmr.msra.gmra.mrb[8].mxu1 %v13019_v38  ;;  %v19387_v38 = vld [vmem:[#allocation10 + $0x3e4] ss:$16 sps:$4 sm:$0xff]  }
 0x8eb   :  { %13855 = vmatpush1.bf16.msra.mxu0 %v19295_v36  ;;  %13937 = vmatpush1.bf16.msra.mxu1 %v19298_v37  ;;  %v19384_v36 = vld [vmem:[#allocation10 + $0x3cc] ss:$16 sps:$4 sm:$0xff]   ;;  %v19382_v37 = vld [vmem:[#allocation10 + $0x3c8] ss:$16 sps:$4 sm:$0xff]  }
 0x8ec   :  { %13886 = vmatprep.mubr.bf16.mxu0 %v13022_v41  ;;  %13968 = vmatprep.mubr.bf16.mxu1 %v13022_v41  ;;  %v19388_v41 = vld [vmem:[#allocation10 + $0x3e8] ss:$16 sps:$4 sm:$0xff]  }
 0x8ed   :  { %13856 = vmatprep.subr.bf16.mxu0 %v19303_v39  ;;  %13938 = vmatprep.subr.bf16.mxu1 %v19306_v40  ;;  %v19390_v39 = vld [vmem:[#allocation10 + $0x3ec] ss:$16 sps:$4 sm:$0xff]   ;;  %v19385_v40 = vld [vmem:[#allocation10 + $0x3e0] ss:$16 sps:$4 sm:$0xff]  }
 0x8ef   :  { %13857 = vmatpush1.bf16.msra.mxu0 %v19301_v42  ;;  %13939 = vmatpush1.bf16.msra.mxu1 %v19304_v43  ;;  %v19391_v42 = vld [vmem:[#allocation13 + $0x40] sm:$0xff]  }
 0x8f0   :  { %13858 = vmatprep.subr.bf16.mxu0 %v19309_v49  ;;  %13940 = vmatprep.subr.bf16.mxu1 %v19312_v51  ;;  %v19392_v43 = vld [vmem:[#allocation13 + $0xc0] sm:$0xff]   ;;  %v19438_v49 = vpop.eup %19437 }
 0x8f1   :  { %v19393_v51 = vld [vmem:[#allocation13] sm:$0xff]  }
 0x8f3   :  { %13859 = vmatpush1.bf16.msra.mxu0 %v19307_v52  ;;  %13941 = vmatpush1.bf16.msra.mxu1 %v19310_v54  ;;  %v19394_v52 = vld [vmem:[#allocation13 + $0x80] sm:$0xff]   ;;  %v13021_v54 = vpack.c.bf16 %v19438_v49, %v19438_v49 }
 0x8f4   :  { %13860 = vmatprep.subr.bf16.mxu0 %v19315_v55  ;;  %13942 = vmatprep.subr.bf16.mxu1 %v19318_v56  ;;  %v19395_v55 = vld [vmem:[#allocation13 + $0x48] sm:$0xff]  }
 0x8f5   :  { %v19396_v56 = vld [vmem:[#allocation13 + $0xc8] sm:$0xff]  }
 0x8f7   :  { %13861 = vmatpush1.bf16.msra.mxu0 %v19313_v57  ;;  %13943 = vmatpush1.bf16.msra.mxu1 %v19316_v58  ;;  %v19397_v57 = vld [vmem:[#allocation13 + $0x8] sm:$0xff]  }
 0x8f8   :  { %13862 = vmatprep.subr.bf16.mxu0 %v19321_v59  ;;  %13944 = vmatprep.subr.bf16.mxu1 %v19324_v44  ;;  %v19398_v58 = vld [vmem:[#allocation13 + $0x88] sm:$0xff]   ;;  %v19399_v59 = vld [vmem:[#allocation13 + $0x50] sm:$0xff]  }
 0x8f9   :  { %v19400_v44 = vld [vmem:[#allocation13 + $0xd0] sm:$0xff]  }
 0x8fb   :  { %13863 = vmatpush1.bf16.msra.mxu0 %v19319_v60  ;;  %13945 = vmatpush1.bf16.msra.mxu1 %v19322_v61  ;;  %v19401_v60 = vld [vmem:[#allocation13 + $0x10] sm:$0xff]  }
 0x8fc   :  { %13864 = vmatprep.subr.bf16.mxu0 %v19327_v62  ;;  %13946 = vmatprep.subr.bf16.mxu1 %v19330_v63  ;;  %v19402_v61 = vld [vmem:[#allocation13 + $0x90] sm:$0xff]   ;;  %v19403_v62 = vld [vmem:[#allocation13 + $0x58] sm:$0xff]  }
 0x8fd   :  { %v19404_v63 = vld [vmem:[#allocation13 + $0xd8] sm:$0xff]  }
 0x8ff   :  { %13865 = vmatpush1.bf16.msra.mxu0 %v19325_v0  ;;  %13947 = vmatpush1.bf16.msra.mxu1 %v19328_v46  ;;  %v19405_v0 = vld [vmem:[#allocation13 + $0x18] sm:$0xff]  }
 0x900   :  { %13866 = vmatprep.subr.bf16.mxu0 %v19333_v1  ;;  %13948 = vmatprep.subr.bf16.mxu1 %v19336_v2  ;;  %v19406_v46 = vld [vmem:[#allocation13 + $0x98] sm:$0xff]   ;;  %v19407_v1 = vld [vmem:[#allocation13 + $0x60] sm:$0xff]  }
 0x901   :  { %v19408_v2 = vld [vmem:[#allocation13 + $0xe0] sm:$0xff]  }
 0x903   :  { %13867 = vmatpush1.bf16.msra.mxu0 %v19331_v3  ;;  %13949 = vmatpush1.bf16.msra.mxu1 %v19334_v53  ;;  %v19409_v3 = vld [vmem:[#allocation13 + $0x20] sm:$0xff]  }
 0x904   :  { %13868 = vmatprep.subr.bf16.mxu0 %v19339_v4  ;;  %13950 = vmatprep.subr.bf16.mxu1 %v19342_v5  ;;  %v19410_v53 = vld [vmem:[#allocation13 + $0xa0] sm:$0xff]   ;;  %v19411_v4 = vld [vmem:[#allocation13 + $0x68] sm:$0xff]  }
 0x905   :  { %v19412_v5 = vld [vmem:[#allocation13 + $0xe8] sm:$0xff]  }
 0x907   :  { %13869 = vmatpush1.bf16.msra.mxu0 %v19337_v6  ;;  %13951 = vmatpush1.bf16.msra.mxu1 %v19340_v7  ;;  %v19413_v6 = vld [vmem:[#allocation13 + $0x28] sm:$0xff]  }
 0x908   :  { %13870 = vmatprep.subr.bf16.mxu0 %v19345_v8  ;;  %13952 = vmatprep.subr.bf16.mxu1 %v19348_v9  ;;  %v19414_v7 = vld [vmem:[#allocation13 + $0xa8] sm:$0xff]   ;;  %v19415_v8 = vld [vmem:[#allocation13 + $0x70] sm:$0xff]  }
 0x909   :  { %v19416_v9 = vld [vmem:[#allocation13 + $0xf0] sm:$0xff]  }
 0x90b   :  { %13871 = vmatpush1.bf16.msra.mxu0 %v19343_v10  ;;  %13953 = vmatpush1.bf16.msra.mxu1 %v19346_v11  ;;  %v19417_v10 = vld [vmem:[#allocation13 + $0x30] sm:$0xff]  }
 0x90c   :  { %13872 = vmatprep.subr.bf16.mxu0 %v19351_v12  ;;  %13954 = vmatprep.subr.bf16.mxu1 %v19354_v13  ;;  %v19418_v11 = vld [vmem:[#allocation13 + $0xb0] sm:$0xff]   ;;  %v19419_v12 = vld [vmem:[#allocation13 + $0x78] sm:$0xff]  }
 0x90d   :  { %v19420_v13 = vld [vmem:[#allocation13 + $0xf8] sm:$0xff]  }
 0x90f   :  { %13873 = vmatpush1.bf16.msra.mxu0 %v19349_v14  ;;  %13955 = vmatpush1.bf16.msra.mxu1 %v19352_v15  ;;  %v19421_v14 = vld [vmem:[#allocation13 + $0x38] sm:$0xff]  }
 0x910   :  { %13874 = vmatprep.subr.bf16.mxu0 %v19357_v16  ;;  %13956 = vmatprep.subr.bf16.mxu1 %v19360_v18  ;;  %v19422_v15 = vld [vmem:[#allocation13 + $0xb8] sm:$0xff]  }
 0x911   :  { %v13151_v16 = vld [vmem:[#allocation12] sm:$0xf] }
 0x912   :  { %v13156_v18 = vrot.slane %v13151_v16, %v19841_v45 }
 0x913   :  { %13875 = vmatpush1.bf16.msra.mxu0 %v19355_v19  ;;  %13957 = vmatpush1.bf16.msra.mxu1 %v19358_v20  ;;  %v13164_v19 = vrot.slane %v13151_v16, %v19860_v50  ;;  %v13160_v20 = vrot.slane %v13151_v16, %v19846_v47 }
 0x914   :  { %13876 = vmatprep.subr.bf16.mxu0 %v19363_v21  ;;  %13958 = vmatprep.subr.bf16.mxu1 %v19366_v23  ;;  %v13168_v21 = vrot.slane %v13151_v16, %v19849_v48 }
 0x917   :  { %13877 = vmatpush1.bf16.msra.mxu0 %v19361_v25  ;;  %13959 = vmatpush1.bf16.msra.mxu1 %v19364_v26 }
 0x918   :  { %13878 = vmatprep.subr.bf16.mxu0 %v19369_v27  ;;  %13960 = vmatprep.subr.bf16.mxu1 %v19372_v28 }
 0x91b   :  { %13879 = vmatpush1.bf16.msra.mxu0 %v19367_v30  ;;  %13961 = vmatpush1.bf16.msra.mxu1 %v19370_v31 }
 0x91c   :  { %13880 = vmatprep.subr.bf16.mxu0 %v19375_v32  ;;  %13962 = vmatprep.subr.bf16.mxu1 %v19378_v33 }
 0x91f   :  { %13881 = vmatpush1.bf16.msra.mxu0 %v19373_v17  ;;  %13963 = vmatpush1.bf16.msra.mxu1 %v19376_v34 }
 0x920   :  { %13882 = vmatprep.subr.bf16.mxu0 %v19381_v35  ;;  %13964 = vmatprep.subr.bf16.mxu1 %v19384_v36 }
 0x923   :  { %13883 = vmatpush1.bf16.msra.mxu0 %v19379_v22  ;;  %13965 = vmatpush1.bf16.msra.mxu1 %v19382_v37 }
 0x924   :  { %13884 = vmatprep.subr.bf16.mxu0 %v19387_v38  ;;  %13966 = vmatprep.subr.bf16.mxu1 %v19390_v39  ;;  %v16227_v39 = vld [vmem:[#allocation15] ss:$0 sm:$0xff] }
 0x927   :  { %13885 = vmatpush1.bf16.msra.mxu0 %v19385_v40  ;;  %13967 = vmatpush1.bf16.msra.mxu1 %v19388_v41 }
 0x928   :  { %16260 = vmatprep.subr.bf16.mxu0 %v19391_v42  ;;  %16282 = vmatprep.subr.bf16.mxu1 %v19392_v43 }
 0x92a   :  { %13887 = vmatmul.mubr.bf16.vlgmr.msra.gmra.mrb[8].mxu0 %v13021_v54  ;;  %13969 = vmatmul.mubr.bf16.vlgmr.msra.gmra.mrb[8].mxu1 %v13021_v54 }
 0x92b   :  { %16261 = vmatpush3.bf16.msra.mxu0 %v19393_v51  ;;  %16283 = vmatpush3.bf16.msra.mxu1 %v19394_v52 }
 0x92c   :  { %16262 = vmatprep.subr.bf16.mxu0 %v19395_v55  ;;  %16284 = vmatprep.subr.bf16.mxu1 %v19396_v56 }
 0x92f   :  { %16263 = vmatpush3.bf16.msra.mxu0 %v19397_v57  ;;  %16285 = vmatpush3.bf16.msra.mxu1 %v19398_v58 }
 0x930   :  { %16264 = vmatprep.subr.bf16.mxu0 %v19399_v59  ;;  %16286 = vmatprep.subr.bf16.mxu1 %v19400_v44 }
 0x933   :  { %16265 = vmatpush3.bf16.msra.mxu0 %v19401_v60  ;;  %16287 = vmatpush3.bf16.msra.mxu1 %v19402_v61 }
 0x934   :  { %16266 = vmatprep.subr.bf16.mxu0 %v19403_v62  ;;  %16288 = vmatprep.subr.bf16.mxu1 %v19404_v63 }
 0x937   :  { %16267 = vmatpush3.bf16.msra.mxu0 %v19405_v0  ;;  %16289 = vmatpush3.bf16.msra.mxu1 %v19406_v46 }
 0x938   :  { %16268 = vmatprep.subr.bf16.mxu0 %v19407_v1  ;;  %16290 = vmatprep.subr.bf16.mxu1 %v19408_v2 }
 0x93b   :  { %16269 = vmatpush3.bf16.msra.mxu0 %v19409_v3  ;;  %16291 = vmatpush3.bf16.msra.mxu1 %v19410_v53 }
 0x93c   :  { %16270 = vmatprep.subr.bf16.mxu0 %v19411_v4  ;;  %16292 = vmatprep.subr.bf16.mxu1 %v19412_v5 }
 0x93f   :  { %16271 = vmatpush3.bf16.msra.mxu0 %v19413_v6  ;;  %16293 = vmatpush3.bf16.msra.mxu1 %v19414_v7 }
 0x940   :  { %16272 = vmatprep.subr.bf16.mxu0 %v19415_v8  ;;  %16294 = vmatprep.subr.bf16.mxu1 %v19416_v9 }
 0x943   :  { %16273 = vmatpush3.bf16.msra.mxu0 %v19417_v10  ;;  %16295 = vmatpush3.bf16.msra.mxu1 %v19418_v11 }
 0x944   :  { %16274 = vmatprep.subr.bf16.mxu0 %v19419_v12  ;;  %16296 = vmatprep.subr.bf16.mxu1 %v19420_v13 }
 0x947   :  { %16275 = vmatpush3.bf16.msra.mxu0 %v19421_v14  ;;  %16297 = vmatpush3.bf16.msra.mxu1 %v19422_v15 }
 0x9fd   :  { %v13888_v23 = vpop.f32.mrb[8].mxu0  ;;  %v13970_v24 = vpop.f32.mrb[8].mxu1 }
 0x9fe   :  { %v16312_v25 = vadd.f32 %v13888_v23, %v13156_v18  ;;  %v16314_v26 = vadd.f32 %v13970_v24, %v13164_v19  ;;  %v13890_v27 = vpop.f32.mrb[9].mxu0  ;;  %v13972_v28 = vpop.f32.mrb[9].mxu1 }
 0x9ff   :  { %v16313_v29 = vadd.f32 %v13890_v27, %v13160_v20  ;;  %v16315_v30 = vadd.f32 %v13972_v28, %v13168_v21  ;;  %v13892_v31 = vpop.f32.mrb[10].mxu0  ;;  %v13974_v32 = vpop.f32.mrb[10].mxu1 }
 0xa00   :  { %19439 = vtanh.f32 %v16312_v25  ;;  %v13893_v33 = vpop.f32.mrb[11].mxu0  ;;  %v13975_v17 = vpop.f32.mrb[11].mxu1 }
 0xa01   :  { %19441 = vtanh.f32 %v16314_v26 }
 0xa02   :  { %19443 = vtanh.f32 %v16313_v29 }
 0xa03   :  { %19445 = vtanh.f32 %v16315_v30 }
 0xa0a   :  { %v19440_v45 = vpop.eup %19439 }
 0xa0b   :  { %v19442_v47 = vpop.eup %19441  ;;  %v13981_v35 = vpack.c.bf16 %v19440_v45, %v19440_v45 }
 0xa0c   :  { %v19444_v50 = vpop.eup %19443  ;;  %v13983_v22 = vpack.c.bf16 %v19442_v47, %v19442_v47 }
 0xa0d   :  { %v19446_v48 = vpop.eup %19445  ;;  %v13982_v34 = vpack.c.bf16 %v19444_v50, %v19444_v50 }
 0xa0e   :  { %v13984_v36 = vpack.c.bf16 %v19446_v48, %v19446_v48 }
 0xa0f   :  { %14280 = vmatprep.mubr.bf16.mxu0 %v13982_v34 }
 0xa10   :  { %14320 = vmatprep.mubr.bf16.mxu1 %v13984_v36  ;;  %14281 = vmatmul.mubr.bf16.vlgmr.msra.gmra.mrb[12].mxu0 %v13981_v35 }
 0xa11   :  { %14321 = vmatmul.mubr.bf16.vlgmr.msra.gmra.mrb[12].mxu1 %v13983_v22 }
 0xae3   :  { %v16276_v37 = vpop.f32.mrb[12].mxu0 }
 0xae4   :  { %v16298_v38 = vpop.f32.mrb[12].mxu1  ;;  %v16277_v40 = vpop.f32.mrb[13].mxu0 }
 0xae5   :  { %v16278_v41 = vadd.f32 %v16277_v40, %v16276_v37  ;;  %v16299_v42 = vpop.f32.mrb[13].mxu1  ;;  %v16279_v43 = vpop.f32.mrb[14].mxu0 }
 0xae6   :  { %v16300_v49 = vadd.f32 %v16299_v42, %v16298_v38  ;;  %v16301_v51 = vpop.f32.mrb[14].mxu1  ;;  %v16280_v52 = vpop.f32.mrb[15].mxu0 }
 0xae7   :  { %v14283_v54 = vadd.f32 %v16278_v41, %v16227_v39  ;;  %v16302_v55 = vpop.f32.mrb[15].mxu1 }
 0xae9   :  { %v14323_v56 = vadd.f32 %v16300_v49, %v14283_v54 }
 0xaeb   :  { %14328 = vst [vmem:[#allocation16] sm:$0xff] %v14323_v56 }
 0xaf2   :  { %v14346_v57 = vld [vmem:[#allocation16] sm:$0xf] }
 0xaf3   :  { %14347 = vst [vmem:[%s19894_s9] sm:$0xf] %v14346_v57 }
 0xaf4   :  { %14364 = vsyncpa [#allocation3], 1 }
 0xaf5   :  { %14365 = vsyncpa [#allocation5], 1 }
 0xaf6   :  { %14366 = vsyncpa [#allocation8], 1 }
 0xaf7   :  { %14367 = vsyncpa [#allocation11], 1 }
 0xaf8   :  { %14368 = vsyncpa [#allocation14], 1 }

</bundles_post_ra>
